<compile_context>
chip_gen: v6e
topology: v6e:2x2x1
jax: 0.10.0
libtpu: 0.0.40
codegen_flags: <defaults>
</compile_context>

<pallas_src>
import functools

import jax
import jax.numpy as jnp
from jax.experimental import pallas as pl
from jax.experimental.pallas import tpu as pltpu


def _round_up(x, m):
    return (x + m - 1) // m * m


# ---------------------------------------------------------------------------
# Pallas kernel 1: single-K-tile matmul + bias + ReLU  (conv hot path)
# ---------------------------------------------------------------------------
def _matmul_bias_relu_kernel(a_ref, b_ref, bias_ref, o_ref, *, apply_relu):
    out = jnp.dot(a_ref[...], b_ref[...], preferred_element_type=jnp.float32)
    out = out + bias_ref[...]
    if apply_relu:
        out = jnp.maximum(out, 0.0)
    o_ref[...] = out.astype(o_ref.dtype)


def matmul_bias_relu(a, b, bias, *, apply_relu=True):
    """(M,K) @ (K,N) + bias[N] (+ReLU).

    Returns an (M, N_padded) float32 array (N padded up to a multiple of 128;
    padded columns are exactly 0 after bias+ReLU since their bias is 0).
    """
    m, k = a.shape
    k2, n = b.shape
    assert k == k2
    kp = _round_up(k, 128)
    np_ = _round_up(n, 128)
    tm = 256 if m > 256 else _round_up(m, 8)
    mp = _round_up(m, tm)

    a_p = jnp.pad(a, ((0, mp - m), (0, kp - k))).astype(jnp.bfloat16)
    b_p = jnp.pad(b, ((0, kp - k), (0, np_ - n))).astype(jnp.bfloat16)
    bias_p = jnp.pad(bias, ((0, np_ - n),)).reshape(1, np_).astype(jnp.float32)

    kernel = functools.partial(_matmul_bias_relu_kernel, apply_relu=apply_relu)
    out = pl.pallas_call(
        kernel,
        out_shape=jax.ShapeDtypeStruct((mp, np_), jnp.float32),
        grid=(mp // tm,),
        in_specs=[
            pl.BlockSpec((tm, kp), lambda i: (i, 0)),
            pl.BlockSpec((kp, np_), lambda i: (0, 0)),
            pl.BlockSpec((1, np_), lambda i: (0, 0)),
        ],
        out_specs=pl.BlockSpec((tm, np_), lambda i: (i, 0)),
        compiler_params=pltpu.CompilerParams(
            dimension_semantics=("parallel",)),
    )(a_p, b_p, bias_p)
    return out[:m, :]


# ---------------------------------------------------------------------------
# Pallas kernel 2: MaxPool2d(kernel_size=3, stride=2), NHWC
# ---------------------------------------------------------------------------
def _maxpool3x3s2_kernel(x_ref, o_ref):
    # x_ref: (1, H_in, W_in, C)   o_ref: (1, H_out, W_out, C)
    h_out = o_ref.shape[1]
    w_out = o_ref.shape[2]
    x = x_ref[...][0]  # (H_in, W_in, C), one dense load

    # Max over the 3 kh taps per output row first (whole rows, lane-dense).
    rows = [jnp.maximum(jnp.maximum(x[2 * h], x[2 * h + 1]), x[2 * h + 2])
            for h in range(h_out)]
    r = jnp.stack(rows, axis=0)  # (h_out, W_in, C)

    # Then max over the 3 kw taps with stride-2 column selection.
    cols = [jnp.maximum(jnp.maximum(r[:, 2 * w], r[:, 2 * w + 1]),
                        r[:, 2 * w + 2])
            for w in range(w_out)]  # each (h_out, C)
    out = jnp.stack(cols, axis=1)  # (h_out, w_out, C)

    # Single dense slab store.
    o_ref[...] = out[None].astype(o_ref.dtype)


def maxpool3x3s2(x):
    # x: (N, H, W, C)
    n, h, w, c = x.shape
    h_out = (h - 3) // 2 + 1
    w_out = (w - 3) // 2 + 1
    return pl.pallas_call(
        _maxpool3x3s2_kernel,
        out_shape=jax.ShapeDtypeStruct((n, h_out, w_out, c), x.dtype),
        grid=(n,),
        in_specs=[pl.BlockSpec((1, h, w, c), lambda i: (i, 0, 0, 0))],
        out_specs=pl.BlockSpec((1, h_out, w_out, c), lambda i: (i, 0, 0, 0)),
        compiler_params=pltpu.CompilerParams(dimension_semantics=("parallel",)),
    )(x)


# ---------------------------------------------------------------------------
# Conv2d(+ReLU) = im2col (JAX glue) + Pallas matmul kernel
# ---------------------------------------------------------------------------
def _im2col(x, k, stride, pad):
    # x: (N, H, W, C) -> patches (N*Hout*Wout, k*k*C), Hout, Wout
    x = jnp.pad(x, ((0, 0), (pad, pad), (pad, pad), (0, 0)))
    n, h, w, c = x.shape
    h_out = (h - k) // stride + 1
    w_out = (w - k) // stride + 1
    cols = []
    for kh in range(k):
        for kw in range(k):
            cols.append(x[:, kh:kh + stride * (h_out - 1) + 1:stride,
                           kw:kw + stride * (w_out - 1) + 1:stride, :])
    patches = jnp.stack(cols, axis=3)  # (N, Hout, Wout, k*k, C) in (kh,kw,cin) order
    return patches.reshape(n * h_out * w_out, k * k * c), h_out, w_out


def conv2d_relu(x, w, b, *, stride, pad):
    # x: (N,H,W,Cp) NHWC with Cp >= w.shape[1]; extra (padded) channels are 0.
    # w: (Cout,Cin,KH,KW) (PyTorch layout); b: (Cout,)
    cout, cin, kh, kw = w.shape
    assert kh == kw
    cp = x.shape[-1]
    if cp > cin:
        # Zero-pad the weight along Cin so padded activation channels are no-ops.
        w = jnp.pad(w, ((0, 0), (0, cp - cin), (0, 0), (0, 0)))
    patches, h_out, w_out = _im2col(x, kh, stride, pad)
    w_mat = jnp.transpose(w, (2, 3, 1, 0)).reshape(kh * kw * cp, cout)
    out = matmul_bias_relu(patches, w_mat, b, apply_relu=True)  # (M, N_padded)
    return out.reshape(x.shape[0], h_out, w_out, out.shape[-1])


# ---------------------------------------------------------------------------
# FeatureNet = AlexNet.features
# ---------------------------------------------------------------------------
_ALEXNET_FEATURE_CFG = [
    # (cout, cin, k, stride, pad, maxpool_after)
    (64, 3, 11, 4, 2, True),
    (192, 64, 5, 1, 2, True),
    (384, 192, 3, 1, 1, False),
    (256, 384, 3, 1, 1, False),
    (256, 256, 3, 1, 1, True),
]


def init_featurenet_params(key):
    params = []
    for cout, cin, k, _, _, _ in _ALEXNET_FEATURE_CFG:
        key, wk, bk = jax.random.split(key, 3)
        fan_in = cin * k * k
        w = jax.random.normal(wk, (cout, cin, k, k), jnp.float32) * jnp.sqrt(2.0 / fan_in)
        b = jax.random.normal(bk, (cout,), jnp.float32) * 0.01
        params.append((w, b))
    return params


def featurenet_forward(x_nchw, params):
    # x_nchw: (N, 3, H, W) like the PyTorch module input.
    x = jnp.transpose(x_nchw, (0, 2, 3, 1))  # NCHW -> NHWC
    for (w, b), (_, _, _, stride, pad, pool_after) in zip(params, _ALEXNET_FEATURE_CFG):
        x = conv2d_relu(x, w, b, stride=stride, pad=pad)
        if pool_after:
            x = maxpool3x3s2(x)
    # Drop the (zero) channel padding carried between layers, back to NCHW.
    cout_last = _ALEXNET_FEATURE_CFG[-1][0]
    x = x[..., :cout_last]
    return jnp.transpose(x, (0, 3, 1, 2))


if __name__ == "__main__":
    key = jax.random.PRNGKey(0)
    pkey, xkey = jax.random.split(key)
    params = init_featurenet_params(pkey)

    # Small input consistent with AlexNet features (needs >= ~63 spatial).
    x = jax.random.normal(xkey, (2, 3, 63, 63), jnp.float32)

    out = jax.jit(featurenet_forward)(x, params)
    out = jax.block_until_ready(out)

    # 63 -> conv11/s4 -> 15 -> pool -> 7 -> conv5 -> 7 -> pool -> 3
    #   -> conv3 x3 -> 3 -> pool -> 1, channels 256
    assert out.shape == (2, 256, 1, 1), out.shape
    assert bool(jnp.all(jnp.isfinite(out)))
    print("KERNEL_OK")
</pallas_src>

<mosaic_0001>
module attributes {stable_mosaic.version = 11 : i64} {
  func.func @_matmul_bias_relu_kernel(%arg0: i32, %arg1: memref<256x384xbf16, #tpu.memory_space<vmem>>, %arg2: memref<384x128xbf16, #tpu.memory_space<vmem>>, %arg3: memref<1x128xf32, #tpu.memory_space<vmem>>, %arg4: memref<256x128xf32, #tpu.memory_space<vmem>>) attributes {dimension_semantics = [#tpu.dimension_semantics<parallel>], iteration_bounds = array<i64: 2>, scalar_prefetch = 0 : i64, scratch_operands = 0 : i64, tpu.core_type = #tpu.core_type<tc>, window_params = [{transform_indices = @transform_0, window_bounds = array<i64: 256, 384>}, {pipeline_mode = #tpu.pipeline_mode<synchronous>, transform_indices = @transform_1, window_bounds = array<i64: 384, 128>}, {pipeline_mode = #tpu.pipeline_mode<synchronous>, transform_indices = @transform_2, window_bounds = array<i64: 1, 128>}, {transform_indices = @transform_3, window_bounds = array<i64: 256, 128>}]} {
    %c0 = arith.constant 0 : index
    %c0_0 = arith.constant 0 : index
    %0 = vector.load %arg1[%c0, %c0_0] : memref<256x384xbf16, #tpu.memory_space<vmem>>, vector<256x384xbf16>
    %c0_1 = arith.constant 0 : index
    %c0_2 = arith.constant 0 : index
    %1 = vector.load %arg2[%c0_1, %c0_2] : memref<384x128xbf16, #tpu.memory_space<vmem>>, vector<384x128xbf16>
    %cst = arith.constant dense<0.000000e+00> : vector<256x128xf32>
    %2 = tpu.matmul %0, %1, %cst {dimension_numbers = #tpu.dot_dimension_numbers<[1], [0], [0], [1], [0, 0, 1, 1], [], []>} : vector<256x384xbf16>, vector<384x128xbf16>, vector<256x128xf32> -> vector<256x128xf32>
    %c0_3 = arith.constant 0 : index
    %c0_4 = arith.constant 0 : index
    %3 = vector.load %arg3[%c0_3, %c0_4] : memref<1x128xf32, #tpu.memory_space<vmem>>, vector<1x128xf32>
    %4 = vector.broadcast %3 : vector<1x128xf32> to vector<256x128xf32>
    %5 = arith.addf %2, %4 : vector<256x128xf32>
    %cst_5 = arith.constant 0.000000e+00 : f32
    %6 = vector.broadcast %cst_5 : f32 to vector<256x128xf32>
    %7 = arith.maximumf %5, %6 : vector<256x128xf32>
    %c0_6 = arith.constant 0 : index
    %c0_7 = arith.constant 0 : index
    %8 = vector.load %arg4[%c0_6, %c0_7] : memref<256x128xf32, #tpu.memory_space<vmem>>, vector<256x128xf32>
    tpu.vector_store %arg4[%c0_6, %c0_7], %7 {strides = array<i32>} : memref<256x128xf32, #tpu.memory_space<vmem>>, vector<256x128xf32>,
    return
  }
  func.func @transform_0(%arg0: i32) -> (i32, i32) {
    %c0_i32 = arith.constant 0 : i32
    %c0_i32_0 = arith.constant 0 : i32
    return %arg0, %c0_i32 : i32, i32
  }
  func.func @transform_1(%arg0: i32) -> (i32, i32) {
    %c0_i32 = arith.constant 0 : i32
    %c0_i32_0 = arith.constant 0 : i32
    %c0_i32_1 = arith.constant 0 : i32
    return %c0_i32, %c0_i32_0 : i32, i32
  }
  func.func @transform_2(%arg0: i32) -> (i32, i32) {
    %c0_i32 = arith.constant 0 : i32
    %c0_i32_0 = arith.constant 0 : i32
    %c0_i32_1 = arith.constant 0 : i32
    return %c0_i32, %c0_i32_0 : i32, i32
  }
  func.func @transform_3(%arg0: i32) -> (i32, i32) {
    %c0_i32 = arith.constant 0 : i32
    %c0_i32_0 = arith.constant 0 : i32
    return %arg0, %c0_i32 : i32, i32
  }
}

module attributes {stable_mosaic.version = 11 : i64} {
  func.func @_maxpool3x3s2_kernel(%arg0: i32, %arg1: memref<1x15x15x128xf32, #tpu.memory_space<vmem>>, %arg2: memref<1x7x7x128xf32, #tpu.memory_space<vmem>>) attributes {dimension_semantics = [#tpu.dimension_semantics<parallel>], iteration_bounds = array<i64: 2>, scalar_prefetch = 0 : i64, scratch_operands = 0 : i64, tpu.core_type = #tpu.core_type<tc>, window_params = [{transform_indices = @transform_0, window_bounds = array<i64: 1, 15, 15, 128>}, {transform_indices = @transform_1, window_bounds = array<i64: 1, 7, 7, 128>}]} {
    %c0 = arith.constant 0 : index
    %c0_0 = arith.constant 0 : index
    %c0_1 = arith.constant 0 : index
    %c0_2 = arith.constant 0 : index
    %0 = vector.load %arg1[%c0, %c0_0, %c0_1, %c0_2] : memref<1x15x15x128xf32, #tpu.memory_space<vmem>>, vector<1x15x15x128xf32>
    %1 = vector.shape_cast %0 : vector<1x15x15x128xf32> to vector<15x15x128xf32>
    %2 = vector.extract_strided_slice %1 {offsets = [0, 0, 0], sizes = [1, 15, 128], strides = [1, 1, 1]} : vector<15x15x128xf32> to vector<1x15x128xf32>
    %3 = vector.shape_cast %2 : vector<1x15x128xf32> to vector<15x128xf32>
    %4 = vector.extract_strided_slice %1 {offsets = [1, 0, 0], sizes = [1, 15, 128], strides = [1, 1, 1]} : vector<15x15x128xf32> to vector<1x15x128xf32>
    %5 = vector.shape_cast %4 : vector<1x15x128xf32> to vector<15x128xf32>
    %6 = arith.maximumf %3, %5 : vector<15x128xf32>
    %7 = vector.extract_strided_slice %1 {offsets = [2, 0, 0], sizes = [1, 15, 128], strides = [1, 1, 1]} : vector<15x15x128xf32> to vector<1x15x128xf32>
    %8 = vector.shape_cast %7 : vector<1x15x128xf32> to vector<15x128xf32>
    %9 = arith.maximumf %6, %8 : vector<15x128xf32>
    %10 = vector.extract_strided_slice %1 {offsets = [2, 0, 0], sizes = [1, 15, 128], strides = [1, 1, 1]} : vector<15x15x128xf32> to vector<1x15x128xf32>
    %11 = vector.shape_cast %10 : vector<1x15x128xf32> to vector<15x128xf32>
    %12 = vector.extract_strided_slice %1 {offsets = [3, 0, 0], sizes = [1, 15, 128], strides = [1, 1, 1]} : vector<15x15x128xf32> to vector<1x15x128xf32>
    %13 = vector.shape_cast %12 : vector<1x15x128xf32> to vector<15x128xf32>
    %14 = arith.maximumf %11, %13 : vector<15x128xf32>
    %15 = vector.extract_strided_slice %1 {offsets = [4, 0, 0], sizes = [1, 15, 128], strides = [1, 1, 1]} : vector<15x15x128xf32> to vector<1x15x128xf32>
    %16 = vector.shape_cast %15 : vector<1x15x128xf32> to vector<15x128xf32>
    %17 = arith.maximumf %14, %16 : vector<15x128xf32>
    %18 = vector.extract_strided_slice %1 {offsets = [4, 0, 0], sizes = [1, 15, 128], strides = [1, 1, 1]} : vector<15x15x128xf32> to vector<1x15x128xf32>
    %19 = vector.shape_cast %18 : vector<1x15x128xf32> to vector<15x128xf32>
    %20 = vector.extract_strided_slice %1 {offsets = [5, 0, 0], sizes = [1, 15, 128], strides = [1, 1, 1]} : vector<15x15x128xf32> to vector<1x15x128xf32>
    %21 = vector.shape_cast %20 : vector<1x15x128xf32> to vector<15x128xf32>
    %22 = arith.maximumf %19, %21 : vector<15x128xf32>
    %23 = vector.extract_strided_slice %1 {offsets = [6, 0, 0], sizes = [1, 15, 128], strides = [1, 1, 1]} : vector<15x15x128xf32> to vector<1x15x128xf32>
    %24 = vector.shape_cast %23 : vector<1x15x128xf32> to vector<15x128xf32>
    %25 = arith.maximumf %22, %24 : vector<15x128xf32>
    %26 = vector.extract_strided_slice %1 {offsets = [6, 0, 0], sizes = [1, 15, 128], strides = [1, 1, 1]} : vector<15x15x128xf32> to vector<1x15x128xf32>
    %27 = vector.shape_cast %26 : vector<1x15x128xf32> to vector<15x128xf32>
    %28 = vector.extract_strided_slice %1 {offsets = [7, 0, 0], sizes = [1, 15, 128], strides = [1, 1, 1]} : vector<15x15x128xf32> to vector<1x15x128xf32>
    %29 = vector.shape_cast %28 : vector<1x15x128xf32> to vector<15x128xf32>
    %30 = arith.maximumf %27, %29 : vector<15x128xf32>
    %31 = vector.extract_strided_slice %1 {offsets = [8, 0, 0], sizes = [1, 15, 128], strides = [1, 1, 1]} : vector<15x15x128xf32> to vector<1x15x128xf32>
    %32 = vector.shape_cast %31 : vector<1x15x128xf32> to vector<15x128xf32>
    %33 = arith.maximumf %30, %32 : vector<15x128xf32>
    %34 = vector.extract_strided_slice %1 {offsets = [8, 0, 0], sizes = [1, 15, 128], strides = [1, 1, 1]} : vector<15x15x128xf32> to vector<1x15x128xf32>
    %35 = vector.shape_cast %34 : vector<1x15x128xf32> to vector<15x128xf32>
    %36 = vector.extract_strided_slice %1 {offsets = [9, 0, 0], sizes = [1, 15, 128], strides = [1, 1, 1]} : vector<15x15x128xf32> to vector<1x15x128xf32>
    %37 = vector.shape_cast %36 : vector<1x15x128xf32> to vector<15x128xf32>
    %38 = arith.maximumf %35, %37 : vector<15x128xf32>
    %39 = vector.extract_strided_slice %1 {offsets = [10, 0, 0], sizes = [1, 15, 128], strides = [1, 1, 1]} : vector<15x15x128xf32> to vector<1x15x128xf32>
    %40 = vector.shape_cast %39 : vector<1x15x128xf32> to vector<15x128xf32>
    %41 = arith.maximumf %38, %40 : vector<15x128xf32>
    %42 = vector.extract_strided_slice %1 {offsets = [10, 0, 0], sizes = [1, 15, 128], strides = [1, 1, 1]} : vector<15x15x128xf32> to vector<1x15x128xf32>
    %43 = vector.shape_cast %42 : vector<1x15x128xf32> to vector<15x128xf32>
    %44 = vector.extract_strided_slice %1 {offsets = [11, 0, 0], sizes = [1, 15, 128], strides = [1, 1, 1]} : vector<15x15x128xf32> to vector<1x15x128xf32>
    %45 = vector.shape_cast %44 : vector<1x15x128xf32> to vector<15x128xf32>
    %46 = arith.maximumf %43, %45 : vector<15x128xf32>
    %47 = vector.extract_strided_slice %1 {offsets = [12, 0, 0], sizes = [1, 15, 128], strides = [1, 1, 1]} : vector<15x15x128xf32> to vector<1x15x128xf32>
    %48 = vector.shape_cast %47 : vector<1x15x128xf32> to vector<15x128xf32>
    %49 = arith.maximumf %46, %48 : vector<15x128xf32>
    %50 = vector.extract_strided_slice %1 {offsets = [12, 0, 0], sizes = [1, 15, 128], strides = [1, 1, 1]} : vector<15x15x128xf32> to vector<1x15x128xf32>
    %51 = vector.shape_cast %50 : vector<1x15x128xf32> to vector<15x128xf32>
    %52 = vector.extract_strided_slice %1 {offsets = [13, 0, 0], sizes = [1, 15, 128], strides = [1, 1, 1]} : vector<15x15x128xf32> to vector<1x15x128xf32>
    %53 = vector.shape_cast %52 : vector<1x15x128xf32> to vector<15x128xf32>
    %54 = arith.maximumf %51, %53 : vector<15x128xf32>
    %55 = vector.extract_strided_slice %1 {offsets = [14, 0, 0], sizes = [1, 15, 128], strides = [1, 1, 1]} : vector<15x15x128xf32> to vector<1x15x128xf32>
    %56 = vector.shape_cast %55 : vector<1x15x128xf32> to vector<15x128xf32>
    %57 = arith.maximumf %54, %56 : vector<15x128xf32>
    %58 = vector.shape_cast %9 : vector<15x128xf32> to vector<1x15x128xf32>
    %59 = vector.shape_cast %17 : vector<15x128xf32> to vector<1x15x128xf32>
    %60 = vector.shape_cast %25 : vector<15x128xf32> to vector<1x15x128xf32>
    %61 = vector.shape_cast %33 : vector<15x128xf32> to vector<1x15x128xf32>
    %62 = vector.shape_cast %41 : vector<15x128xf32> to vector<1x15x128xf32>
    %63 = vector.shape_cast %49 : vector<15x128xf32> to vector<1x15x128xf32>
    %64 = vector.shape_cast %57 : vector<15x128xf32> to vector<1x15x128xf32>
    %65 = tpu.concatenate %58, %59, %60, %61, %62, %63, %64 in 0 : vector<1x15x128xf32>, vector<1x15x128xf32>, vector<1x15x128xf32>, vector<1x15x128xf32>, vector<1x15x128xf32>, vector<1x15x128xf32>, vector<1x15x128xf32> -> vector<7x15x128xf32>
    %66 = vector.extract_strided_slice %65 {offsets = [0, 0, 0], sizes = [7, 1, 128], strides = [1, 1, 1]} : vector<7x15x128xf32> to vector<7x1x128xf32>
    %67 = vector.shape_cast %66 : vector<7x1x128xf32> to vector<7x128xf32>
    %68 = vector.extract_strided_slice %65 {offsets = [0, 1, 0], sizes = [7, 1, 128], strides = [1, 1, 1]} : vector<7x15x128xf32> to vector<7x1x128xf32>
    %69 = vector.shape_cast %68 : vector<7x1x128xf32> to vector<7x128xf32>
    %70 = arith.maximumf %67, %69 : vector<7x128xf32>
    %71 = vector.extract_strided_slice %65 {offsets = [0, 2, 0], sizes = [7, 1, 128], strides = [1, 1, 1]} : vector<7x15x128xf32> to vector<7x1x128xf32>
    %72 = vector.shape_cast %71 : vector<7x1x128xf32> to vector<7x128xf32>
    %73 = arith.maximumf %70, %72 : vector<7x128xf32>
    %74 = vector.extract_strided_slice %65 {offsets = [0, 2, 0], sizes = [7, 1, 128], strides = [1, 1, 1]} : vector<7x15x128xf32> to vector<7x1x128xf32>
    %75 = vector.shape_cast %74 : vector<7x1x128xf32> to vector<7x128xf32>
    %76 = vector.extract_strided_slice %65 {offsets = [0, 3, 0], sizes = [7, 1, 128], strides = [1, 1, 1]} : vector<7x15x128xf32> to vector<7x1x128xf32>
    %77 = vector.shape_cast %76 : vector<7x1x128xf32> to vector<7x128xf32>
    %78 = arith.maximumf %75, %77 : vector<7x128xf32>
    %79 = vector.extract_strided_slice %65 {offsets = [0, 4, 0], sizes = [7, 1, 128], strides = [1, 1, 1]} : vector<7x15x128xf32> to vector<7x1x128xf32>
    %80 = vector.shape_cast %79 : vector<7x1x128xf32> to vector<7x128xf32>
    %81 = arith.maximumf %78, %80 : vector<7x128xf32>
    %82 = vector.extract_strided_slice %65 {offsets = [0, 4, 0], sizes = [7, 1, 128], strides = [1, 1, 1]} : vector<7x15x128xf32> to vector<7x1x128xf32>
    %83 = vector.shape_cast %82 : vector<7x1x128xf32> to vector<7x128xf32>
    %84 = vector.extract_strided_slice %65 {offsets = [0, 5, 0], sizes = [7, 1, 128], strides = [1, 1, 1]} : vector<7x15x128xf32> to vector<7x1x128xf32>
    %85 = vector.shape_cast %84 : vector<7x1x128xf32> to vector<7x128xf32>
    %86 = arith.maximumf %83, %85 : vector<7x128xf32>
    %87 = vector.extract_strided_slice %65 {offsets = [0, 6, 0], sizes = [7, 1, 128], strides = [1, 1, 1]} : vector<7x15x128xf32> to vector<7x1x128xf32>
    %88 = vector.shape_cast %87 : vector<7x1x128xf32> to vector<7x128xf32>
    %89 = arith.maximumf %86, %88 : vector<7x128xf32>
    %90 = vector.extract_strided_slice %65 {offsets = [0, 6, 0], sizes = [7, 1, 128], strides = [1, 1, 1]} : vector<7x15x128xf32> to vector<7x1x128xf32>
    %91 = vector.shape_cast %90 : vector<7x1x128xf32> to vector<7x128xf32>
    %92 = vector.extract_strided_slice %65 {offsets = [0, 7, 0], sizes = [7, 1, 128], strides = [1, 1, 1]} : vector<7x15x128xf32> to vector<7x1x128xf32>
    %93 = vector.shape_cast %92 : vector<7x1x128xf32> to vector<7x128xf32>
    %94 = arith.maximumf %91, %93 : vector<7x128xf32>
    %95 = vector.extract_strided_slice %65 {offsets = [0, 8, 0], sizes = [7, 1, 128], strides = [1, 1, 1]} : vector<7x15x128xf32> to vector<7x1x128xf32>
    %96 = vector.shape_cast %95 : vector<7x1x128xf32> to vector<7x128xf32>
    %97 = arith.maximumf %94, %96 : vector<7x128xf32>
    %98 = vector.extract_strided_slice %65 {offsets = [0, 8, 0], sizes = [7, 1, 128], strides = [1, 1, 1]} : vector<7x15x128xf32> to vector<7x1x128xf32>
    %99 = vector.shape_cast %98 : vector<7x1x128xf32> to vector<7x128xf32>
    %100 = vector.extract_strided_slice %65 {offsets = [0, 9, 0], sizes = [7, 1, 128], strides = [1, 1, 1]} : vector<7x15x128xf32> to vector<7x1x128xf32>
    %101 = vector.shape_cast %100 : vector<7x1x128xf32> to vector<7x128xf32>
    %102 = arith.maximumf %99, %101 : vector<7x128xf32>
    %103 = vector.extract_strided_slice %65 {offsets = [0, 10, 0], sizes = [7, 1, 128], strides = [1, 1, 1]} : vector<7x15x128xf32> to vector<7x1x128xf32>
    %104 = vector.shape_cast %103 : vector<7x1x128xf32> to vector<7x128xf32>
    %105 = arith.maximumf %102, %104 : vector<7x128xf32>
    %106 = vector.extract_strided_slice %65 {offsets = [0, 10, 0], sizes = [7, 1, 128], strides = [1, 1, 1]} : vector<7x15x128xf32> to vector<7x1x128xf32>
    %107 = vector.shape_cast %106 : vector<7x1x128xf32> to vector<7x128xf32>
    %108 = vector.extract_strided_slice %65 {offsets = [0, 11, 0], sizes = [7, 1, 128], strides = [1, 1, 1]} : vector<7x15x128xf32> to vector<7x1x128xf32>
    %109 = vector.shape_cast %108 : vector<7x1x128xf32> to vector<7x128xf32>
    %110 = arith.maximumf %107, %109 : vector<7x128xf32>
    %111 = vector.extract_strided_slice %65 {offsets = [0, 12, 0], sizes = [7, 1, 128], strides = [1, 1, 1]} : vector<7x15x128xf32> to vector<7x1x128xf32>
    %112 = vector.shape_cast %111 : vector<7x1x128xf32> to vector<7x128xf32>
    %113 = arith.maximumf %110, %112 : vector<7x128xf32>
    %114 = vector.extract_strided_slice %65 {offsets = [0, 12, 0], sizes = [7, 1, 128], strides = [1, 1, 1]} : vector<7x15x128xf32> to vector<7x1x128xf32>
    %115 = vector.shape_cast %114 : vector<7x1x128xf32> to vector<7x128xf32>
    %116 = vector.extract_strided_slice %65 {offsets = [0, 13, 0], sizes = [7, 1, 128], strides = [1, 1, 1]} : vector<7x15x128xf32> to vector<7x1x128xf32>
    %117 = vector.shape_cast %116 : vector<7x1x128xf32> to vector<7x128xf32>
    %118 = arith.maximumf %115, %117 : vector<7x128xf32>
    %119 = vector.extract_strided_slice %65 {offsets = [0, 14, 0], sizes = [7, 1, 128], strides = [1, 1, 1]} : vector<7x15x128xf32> to vector<7x1x128xf32>
    %120 = vector.shape_cast %119 : vector<7x1x128xf32> to vector<7x128xf32>
    %121 = arith.maximumf %118, %120 : vector<7x128xf32>
    %122 = vector.shape_cast %73 : vector<7x128xf32> to vector<7x1x128xf32>
    %123 = vector.shape_cast %81 : vector<7x128xf32> to vector<7x1x128xf32>
    %124 = vector.shape_cast %89 : vector<7x128xf32> to vector<7x1x128xf32>
    %125 = vector.shape_cast %97 : vector<7x128xf32> to vector<7x1x128xf32>
    %126 = vector.shape_cast %105 : vector<7x128xf32> to vector<7x1x128xf32>
    %127 = vector.shape_cast %113 : vector<7x128xf32> to vector<7x1x128xf32>
    %128 = vector.shape_cast %121 : vector<7x128xf32> to vector<7x1x128xf32>
    %129 = tpu.concatenate %122, %123, %124, %125, %126, %127, %128 in 1 : vector<7x1x128xf32>, vector<7x1x128xf32>, vector<7x1x128xf32>, vector<7x1x128xf32>, vector<7x1x128xf32>, vector<7x1x128xf32>, vector<7x1x128xf32> -> vector<7x7x128xf32>
    %130 = vector.shape_cast %129 : vector<7x7x128xf32> to vector<1x7x7x128xf32>
    %c0_3 = arith.constant 0 : index
    %c0_4 = arith.constant 0 : index
    %c0_5 = arith.constant 0 : index
    %c0_6 = arith.constant 0 : index
    %131 = vector.load %arg2[%c0_3, %c0_4, %c0_5, %c0_6] : memref<1x7x7x128xf32, #tpu.memory_space<vmem>>, vector<1x7x7x128xf32>
    tpu.vector_store %arg2[%c0_3, %c0_4, %c0_5, %c0_6], %130 {strides = array<i32>} : memref<1x7x7x128xf32, #tpu.memory_space<vmem>>, vector<1x7x7x128xf32>,
    return
  }
  func.func @transform_0(%arg0: i32) -> (i32, i32, i32, i32) {
    %c0_i32 = arith.constant 0 : i32
    %c0_i32_0 = arith.constant 0 : i32
    %c0_i32_1 = arith.constant 0 : i32
    %c0_i32_2 = arith.constant 0 : i32
    return %arg0, %c0_i32, %c0_i32_0, %c0_i32_1 : i32, i32, i32, i32
  }
  func.func @transform_1(%arg0: i32) -> (i32, i32, i32, i32) {
    %c0_i32 = arith.constant 0 : i32
    %c0_i32_0 = arith.constant 0 : i32
    %c0_i32_1 = arith.constant 0 : i32
    %c0_i32_2 = arith.constant 0 : i32
    return %arg0, %c0_i32, %c0_i32_0, %c0_i32_1 : i32, i32, i32, i32
  }
}

module attributes {stable_mosaic.version = 11 : i64} {
  func.func @_matmul_bias_relu_kernel(%arg0: i32, %arg1: memref<104x3200xbf16, #tpu.memory_space<vmem>>, %arg2: memref<3200x256xbf16, #tpu.memory_space<vmem>>, %arg3: memref<1x256xf32, #tpu.memory_space<vmem>>, %arg4: memref<104x256xf32, #tpu.memory_space<vmem>>) attributes {dimension_semantics = [#tpu.dimension_semantics<parallel>], iteration_bounds = array<i64: 1>, scalar_prefetch = 0 : i64, scratch_operands = 0 : i64, tpu.core_type = #tpu.core_type<tc>, window_params = [{transform_indices = @transform_0, window_bounds = array<i64: 104, 3200>}, {pipeline_mode = #tpu.pipeline_mode<synchronous>, transform_indices = @transform_1, window_bounds = array<i64: 3200, 256>}, {pipeline_mode = #tpu.pipeline_mode<synchronous>, transform_indices = @transform_2, window_bounds = array<i64: 1, 256>}, {transform_indices = @transform_3, window_bounds = array<i64: 104, 256>}]} {
    %c0 = arith.constant 0 : index
    %c0_0 = arith.constant 0 : index
    %0 = vector.load %arg1[%c0, %c0_0] : memref<104x3200xbf16, #tpu.memory_space<vmem>>, vector<104x3200xbf16>
    %c0_1 = arith.constant 0 : index
    %c0_2 = arith.constant 0 : index
    %1 = vector.load %arg2[%c0_1, %c0_2] : memref<3200x256xbf16, #tpu.memory_space<vmem>>, vector<3200x256xbf16>
    %cst = arith.constant dense<0.000000e+00> : vector<104x256xf32>
    %2 = tpu.matmul %0, %1, %cst {dimension_numbers = #tpu.dot_dimension_numbers<[1], [0], [0], [1], [0, 0, 1, 1], [], []>} : vector<104x3200xbf16>, vector<3200x256xbf16>, vector<104x256xf32> -> vector<104x256xf32>
    %c0_3 = arith.constant 0 : index
    %c0_4 = arith.constant 0 : index
    %3 = vector.load %arg3[%c0_3, %c0_4] : memref<1x256xf32, #tpu.memory_space<vmem>>, vector<1x256xf32>
    %4 = vector.broadcast %3 : vector<1x256xf32> to vector<104x256xf32>
    %5 = arith.addf %2, %4 : vector<104x256xf32>
    %cst_5 = arith.constant 0.000000e+00 : f32
    %6 = vector.broadcast %cst_5 : f32 to vector<104x256xf32>
    %7 = arith.maximumf %5, %6 : vector<104x256xf32>
    %c0_6 = arith.constant 0 : index
    %c0_7 = arith.constant 0 : index
    %8 = vector.load %arg4[%c0_6, %c0_7] : memref<104x256xf32, #tpu.memory_space<vmem>>, vector<104x256xf32>
    tpu.vector_store %arg4[%c0_6, %c0_7], %7 {strides = array<i32>} : memref<104x256xf32, #tpu.memory_space<vmem>>, vector<104x256xf32>,
    return
  }
  func.func @transform_0(%arg0: i32) -> (i32, i32) {
    %c0_i32 = arith.constant 0 : i32
    %c0_i32_0 = arith.constant 0 : i32
    return %arg0, %c0_i32 : i32, i32
  }
  func.func @transform_1(%arg0: i32) -> (i32, i32) {
    %c0_i32 = arith.constant 0 : i32
    %c0_i32_0 = arith.constant 0 : i32
    %c0_i32_1 = arith.constant 0 : i32
    return %c0_i32, %c0_i32_0 : i32, i32
  }
  func.func @transform_2(%arg0: i32) -> (i32, i32) {
    %c0_i32 = arith.constant 0 : i32
    %c0_i32_0 = arith.constant 0 : i32
    %c0_i32_1 = arith.constant 0 : i32
    return %c0_i32, %c0_i32_0 : i32, i32
  }
  func.func @transform_3(%arg0: i32) -> (i32, i32) {
    %c0_i32 = arith.constant 0 : i32
    %c0_i32_0 = arith.constant 0 : i32
    return %arg0, %c0_i32 : i32, i32
  }
}

module attributes {stable_mosaic.version = 11 : i64} {
  func.func @_maxpool3x3s2_kernel(%arg0: i32, %arg1: memref<1x7x7x256xf32, #tpu.memory_space<vmem>>, %arg2: memref<1x3x3x256xf32, #tpu.memory_space<vmem>>) attributes {dimension_semantics = [#tpu.dimension_semantics<parallel>], iteration_bounds = array<i64: 2>, scalar_prefetch = 0 : i64, scratch_operands = 0 : i64, tpu.core_type = #tpu.core_type<tc>, window_params = [{transform_indices = @transform_0, window_bounds = array<i64: 1, 7, 7, 256>}, {transform_indices = @transform_1, window_bounds = array<i64: 1, 3, 3, 256>}]} {
    %c0 = arith.constant 0 : index
    %c0_0 = arith.constant 0 : index
    %c0_1 = arith.constant 0 : index
    %c0_2 = arith.constant 0 : index
    %0 = vector.load %arg1[%c0, %c0_0, %c0_1, %c0_2] : memref<1x7x7x256xf32, #tpu.memory_space<vmem>>, vector<1x7x7x256xf32>
    %1 = vector.shape_cast %0 : vector<1x7x7x256xf32> to vector<7x7x256xf32>
    %2 = vector.extract_strided_slice %1 {offsets = [0, 0, 0], sizes = [1, 7, 256], strides = [1, 1, 1]} : vector<7x7x256xf32> to vector<1x7x256xf32>
    %3 = vector.shape_cast %2 : vector<1x7x256xf32> to vector<7x256xf32>
    %4 = vector.extract_strided_slice %1 {offsets = [1, 0, 0], sizes = [1, 7, 256], strides = [1, 1, 1]} : vector<7x7x256xf32> to vector<1x7x256xf32>
    %5 = vector.shape_cast %4 : vector<1x7x256xf32> to vector<7x256xf32>
    %6 = arith.maximumf %3, %5 : vector<7x256xf32>
    %7 = vector.extract_strided_slice %1 {offsets = [2, 0, 0], sizes = [1, 7, 256], strides = [1, 1, 1]} : vector<7x7x256xf32> to vector<1x7x256xf32>
    %8 = vector.shape_cast %7 : vector<1x7x256xf32> to vector<7x256xf32>
    %9 = arith.maximumf %6, %8 : vector<7x256xf32>
    %10 = vector.extract_strided_slice %1 {offsets = [2, 0, 0], sizes = [1, 7, 256], strides = [1, 1, 1]} : vector<7x7x256xf32> to vector<1x7x256xf32>
    %11 = vector.shape_cast %10 : vector<1x7x256xf32> to vector<7x256xf32>
    %12 = vector.extract_strided_slice %1 {offsets = [3, 0, 0], sizes = [1, 7, 256], strides = [1, 1, 1]} : vector<7x7x256xf32> to vector<1x7x256xf32>
    %13 = vector.shape_cast %12 : vector<1x7x256xf32> to vector<7x256xf32>
    %14 = arith.maximumf %11, %13 : vector<7x256xf32>
    %15 = vector.extract_strided_slice %1 {offsets = [4, 0, 0], sizes = [1, 7, 256], strides = [1, 1, 1]} : vector<7x7x256xf32> to vector<1x7x256xf32>
    %16 = vector.shape_cast %15 : vector<1x7x256xf32> to vector<7x256xf32>
    %17 = arith.maximumf %14, %16 : vector<7x256xf32>
    %18 = vector.extract_strided_slice %1 {offsets = [4, 0, 0], sizes = [1, 7, 256], strides = [1, 1, 1]} : vector<7x7x256xf32> to vector<1x7x256xf32>
    %19 = vector.shape_cast %18 : vector<1x7x256xf32> to vector<7x256xf32>
    %20 = vector.extract_strided_slice %1 {offsets = [5, 0, 0], sizes = [1, 7, 256], strides = [1, 1, 1]} : vector<7x7x256xf32> to vector<1x7x256xf32>
    %21 = vector.shape_cast %20 : vector<1x7x256xf32> to vector<7x256xf32>
    %22 = arith.maximumf %19, %21 : vector<7x256xf32>
    %23 = vector.extract_strided_slice %1 {offsets = [6, 0, 0], sizes = [1, 7, 256], strides = [1, 1, 1]} : vector<7x7x256xf32> to vector<1x7x256xf32>
    %24 = vector.shape_cast %23 : vector<1x7x256xf32> to vector<7x256xf32>
    %25 = arith.maximumf %22, %24 : vector<7x256xf32>
    %26 = vector.shape_cast %9 : vector<7x256xf32> to vector<1x7x256xf32>
    %27 = vector.shape_cast %17 : vector<7x256xf32> to vector<1x7x256xf32>
    %28 = vector.shape_cast %25 : vector<7x256xf32> to vector<1x7x256xf32>
    %29 = tpu.concatenate %26, %27, %28 in 0 : vector<1x7x256xf32>, vector<1x7x256xf32>, vector<1x7x256xf32> -> vector<3x7x256xf32>
    %30 = vector.extract_strided_slice %29 {offsets = [0, 0, 0], sizes = [3, 1, 256], strides = [1, 1, 1]} : vector<3x7x256xf32> to vector<3x1x256xf32>
    %31 = vector.shape_cast %30 : vector<3x1x256xf32> to vector<3x256xf32>
    %32 = vector.extract_strided_slice %29 {offsets = [0, 1, 0], sizes = [3, 1, 256], strides = [1, 1, 1]} : vector<3x7x256xf32> to vector<3x1x256xf32>
    %33 = vector.shape_cast %32 : vector<3x1x256xf32> to vector<3x256xf32>
    %34 = arith.maximumf %31, %33 : vector<3x256xf32>
    %35 = vector.extract_strided_slice %29 {offsets = [0, 2, 0], sizes = [3, 1, 256], strides = [1, 1, 1]} : vector<3x7x256xf32> to vector<3x1x256xf32>
    %36 = vector.shape_cast %35 : vector<3x1x256xf32> to vector<3x256xf32>
    %37 = arith.maximumf %34, %36 : vector<3x256xf32>
    %38 = vector.extract_strided_slice %29 {offsets = [0, 2, 0], sizes = [3, 1, 256], strides = [1, 1, 1]} : vector<3x7x256xf32> to vector<3x1x256xf32>
    %39 = vector.shape_cast %38 : vector<3x1x256xf32> to vector<3x256xf32>
    %40 = vector.extract_strided_slice %29 {offsets = [0, 3, 0], sizes = [3, 1, 256], strides = [1, 1, 1]} : vector<3x7x256xf32> to vector<3x1x256xf32>
    %41 = vector.shape_cast %40 : vector<3x1x256xf32> to vector<3x256xf32>
    %42 = arith.maximumf %39, %41 : vector<3x256xf32>
    %43 = vector.extract_strided_slice %29 {offsets = [0, 4, 0], sizes = [3, 1, 256], strides = [1, 1, 1]} : vector<3x7x256xf32> to vector<3x1x256xf32>
    %44 = vector.shape_cast %43 : vector<3x1x256xf32> to vector<3x256xf32>
    %45 = arith.maximumf %42, %44 : vector<3x256xf32>
    %46 = vector.extract_strided_slice %29 {offsets = [0, 4, 0], sizes = [3, 1, 256], strides = [1, 1, 1]} : vector<3x7x256xf32> to vector<3x1x256xf32>
    %47 = vector.shape_cast %46 : vector<3x1x256xf32> to vector<3x256xf32>
    %48 = vector.extract_strided_slice %29 {offsets = [0, 5, 0], sizes = [3, 1, 256], strides = [1, 1, 1]} : vector<3x7x256xf32> to vector<3x1x256xf32>
    %49 = vector.shape_cast %48 : vector<3x1x256xf32> to vector<3x256xf32>
    %50 = arith.maximumf %47, %49 : vector<3x256xf32>
    %51 = vector.extract_strided_slice %29 {offsets = [0, 6, 0], sizes = [3, 1, 256], strides = [1, 1, 1]} : vector<3x7x256xf32> to vector<3x1x256xf32>
    %52 = vector.shape_cast %51 : vector<3x1x256xf32> to vector<3x256xf32>
    %53 = arith.maximumf %50, %52 : vector<3x256xf32>
    %54 = vector.shape_cast %37 : vector<3x256xf32> to vector<3x1x256xf32>
    %55 = vector.shape_cast %45 : vector<3x256xf32> to vector<3x1x256xf32>
    %56 = vector.shape_cast %53 : vector<3x256xf32> to vector<3x1x256xf32>
    %57 = tpu.concatenate %54, %55, %56 in 1 : vector<3x1x256xf32>, vector<3x1x256xf32>, vector<3x1x256xf32> -> vector<3x3x256xf32>
    %58 = vector.shape_cast %57 : vector<3x3x256xf32> to vector<1x3x3x256xf32>
    %c0_3 = arith.constant 0 : index
    %c0_4 = arith.constant 0 : index
    %c0_5 = arith.constant 0 : index
    %c0_6 = arith.constant 0 : index
    %59 = vector.load %arg2[%c0_3, %c0_4, %c0_5, %c0_6] : memref<1x3x3x256xf32, #tpu.memory_space<vmem>>, vector<1x3x3x256xf32>
    tpu.vector_store %arg2[%c0_3, %c0_4, %c0_5, %c0_6], %58 {strides = array<i32>} : memref<1x3x3x256xf32, #tpu.memory_space<vmem>>, vector<1x3x3x256xf32>,
    return
  }
  func.func @transform_0(%arg0: i32) -> (i32, i32, i32, i32) {
    %c0_i32 = arith.constant 0 : i32
    %c0_i32_0 = arith.constant 0 : i32
    %c0_i32_1 = arith.constant 0 : i32
    %c0_i32_2 = arith.constant 0 : i32
    return %arg0, %c0_i32, %c0_i32_0, %c0_i32_1 : i32, i32, i32, i32
  }
  func.func @transform_1(%arg0: i32) -> (i32, i32, i32, i32) {
    %c0_i32 = arith.constant 0 : i32
    %c0_i32_0 = arith.constant 0 : i32
    %c0_i32_1 = arith.constant 0 : i32
    %c0_i32_2 = arith.constant 0 : i32
    return %arg0, %c0_i32, %c0_i32_0, %c0_i32_1 : i32, i32, i32, i32
  }
}

module attributes {stable_mosaic.version = 11 : i64} {
  func.func @_matmul_bias_relu_kernel(%arg0: i32, %arg1: memref<24x2304xbf16, #tpu.memory_space<vmem>>, %arg2: memref<2304x384xbf16, #tpu.memory_space<vmem>>, %arg3: memref<1x384xf32, #tpu.memory_space<vmem>>, %arg4: memref<24x384xf32, #tpu.memory_space<vmem>>) attributes {dimension_semantics = [#tpu.dimension_semantics<parallel>], iteration_bounds = array<i64: 1>, scalar_prefetch = 0 : i64, scratch_operands = 0 : i64, tpu.core_type = #tpu.core_type<tc>, window_params = [{transform_indices = @transform_0, window_bounds = array<i64: 24, 2304>}, {pipeline_mode = #tpu.pipeline_mode<synchronous>, transform_indices = @transform_1, window_bounds = array<i64: 2304, 384>}, {pipeline_mode = #tpu.pipeline_mode<synchronous>, transform_indices = @transform_2, window_bounds = array<i64: 1, 384>}, {transform_indices = @transform_3, window_bounds = array<i64: 24, 384>}]} {
    %c0 = arith.constant 0 : index
    %c0_0 = arith.constant 0 : index
    %0 = vector.load %arg1[%c0, %c0_0] : memref<24x2304xbf16, #tpu.memory_space<vmem>>, vector<24x2304xbf16>
    %c0_1 = arith.constant 0 : index
    %c0_2 = arith.constant 0 : index
    %1 = vector.load %arg2[%c0_1, %c0_2] : memref<2304x384xbf16, #tpu.memory_space<vmem>>, vector<2304x384xbf16>
    %cst = arith.constant dense<0.000000e+00> : vector<24x384xf32>
    %2 = tpu.matmul %0, %1, %cst {dimension_numbers = #tpu.dot_dimension_numbers<[1], [0], [0], [1], [0, 0, 1, 1], [], []>} : vector<24x2304xbf16>, vector<2304x384xbf16>, vector<24x384xf32> -> vector<24x384xf32>
    %c0_3 = arith.constant 0 : index
    %c0_4 = arith.constant 0 : index
    %3 = vector.load %arg3[%c0_3, %c0_4] : memref<1x384xf32, #tpu.memory_space<vmem>>, vector<1x384xf32>
    %4 = vector.broadcast %3 : vector<1x384xf32> to vector<24x384xf32>
    %5 = arith.addf %2, %4 : vector<24x384xf32>
    %cst_5 = arith.constant 0.000000e+00 : f32
    %6 = vector.broadcast %cst_5 : f32 to vector<24x384xf32>
    %7 = arith.maximumf %5, %6 : vector<24x384xf32>
    %c0_6 = arith.constant 0 : index
    %c0_7 = arith.constant 0 : index
    %8 = vector.load %arg4[%c0_6, %c0_7] : memref<24x384xf32, #tpu.memory_space<vmem>>, vector<24x384xf32>
    tpu.vector_store %arg4[%c0_6, %c0_7], %7 {strides = array<i32>} : memref<24x384xf32, #tpu.memory_space<vmem>>, vector<24x384xf32>,
    return
  }
  func.func @transform_0(%arg0: i32) -> (i32, i32) {
    %c0_i32 = arith.constant 0 : i32
    %c0_i32_0 = arith.constant 0 : i32
    return %arg0, %c0_i32 : i32, i32
  }
  func.func @transform_1(%arg0: i32) -> (i32, i32) {
    %c0_i32 = arith.constant 0 : i32
    %c0_i32_0 = arith.constant 0 : i32
    %c0_i32_1 = arith.constant 0 : i32
    return %c0_i32, %c0_i32_0 : i32, i32
  }
  func.func @transform_2(%arg0: i32) -> (i32, i32) {
    %c0_i32 = arith.constant 0 : i32
    %c0_i32_0 = arith.constant 0 : i32
    %c0_i32_1 = arith.constant 0 : i32
    return %c0_i32, %c0_i32_0 : i32, i32
  }
  func.func @transform_3(%arg0: i32) -> (i32, i32) {
    %c0_i32 = arith.constant 0 : i32
    %c0_i32_0 = arith.constant 0 : i32
    return %arg0, %c0_i32 : i32, i32
  }
}

module attributes {stable_mosaic.version = 11 : i64} {
  func.func @_matmul_bias_relu_kernel(%arg0: i32, %arg1: memref<24x3456xbf16, #tpu.memory_space<vmem>>, %arg2: memref<3456x256xbf16, #tpu.memory_space<vmem>>, %arg3: memref<1x256xf32, #tpu.memory_space<vmem>>, %arg4: memref<24x256xf32, #tpu.memory_space<vmem>>) attributes {dimension_semantics = [#tpu.dimension_semantics<parallel>], iteration_bounds = array<i64: 1>, scalar_prefetch = 0 : i64, scratch_operands = 0 : i64, tpu.core_type = #tpu.core_type<tc>, window_params = [{transform_indices = @transform_0, window_bounds = array<i64: 24, 3456>}, {pipeline_mode = #tpu.pipeline_mode<synchronous>, transform_indices = @transform_1, window_bounds = array<i64: 3456, 256>}, {pipeline_mode = #tpu.pipeline_mode<synchronous>, transform_indices = @transform_2, window_bounds = array<i64: 1, 256>}, {transform_indices = @transform_3, window_bounds = array<i64: 24, 256>}]} {
    %c0 = arith.constant 0 : index
    %c0_0 = arith.constant 0 : index
    %0 = vector.load %arg1[%c0, %c0_0] : memref<24x3456xbf16, #tpu.memory_space<vmem>>, vector<24x3456xbf16>
    %c0_1 = arith.constant 0 : index
    %c0_2 = arith.constant 0 : index
    %1 = vector.load %arg2[%c0_1, %c0_2] : memref<3456x256xbf16, #tpu.memory_space<vmem>>, vector<3456x256xbf16>
    %cst = arith.constant dense<0.000000e+00> : vector<24x256xf32>
    %2 = tpu.matmul %0, %1, %cst {dimension_numbers = #tpu.dot_dimension_numbers<[1], [0], [0], [1], [0, 0, 1, 1], [], []>} : vector<24x3456xbf16>, vector<3456x256xbf16>, vector<24x256xf32> -> vector<24x256xf32>
    %c0_3 = arith.constant 0 : index
    %c0_4 = arith.constant 0 : index
    %3 = vector.load %arg3[%c0_3, %c0_4] : memref<1x256xf32, #tpu.memory_space<vmem>>, vector<1x256xf32>
    %4 = vector.broadcast %3 : vector<1x256xf32> to vector<24x256xf32>
    %5 = arith.addf %2, %4 : vector<24x256xf32>
    %cst_5 = arith.constant 0.000000e+00 : f32
    %6 = vector.broadcast %cst_5 : f32 to vector<24x256xf32>
    %7 = arith.maximumf %5, %6 : vector<24x256xf32>
    %c0_6 = arith.constant 0 : index
    %c0_7 = arith.constant 0 : index
    %8 = vector.load %arg4[%c0_6, %c0_7] : memref<24x256xf32, #tpu.memory_space<vmem>>, vector<24x256xf32>
    tpu.vector_store %arg4[%c0_6, %c0_7], %7 {strides = array<i32>} : memref<24x256xf32, #tpu.memory_space<vmem>>, vector<24x256xf32>,
    return
  }
  func.func @transform_0(%arg0: i32) -> (i32, i32) {
    %c0_i32 = arith.constant 0 : i32
    %c0_i32_0 = arith.constant 0 : i32
    return %arg0, %c0_i32 : i32, i32
  }
  func.func @transform_1(%arg0: i32) -> (i32, i32) {
    %c0_i32 = arith.constant 0 : i32
    %c0_i32_0 = arith.constant 0 : i32
    %c0_i32_1 = arith.constant 0 : i32
    return %c0_i32, %c0_i32_0 : i32, i32
  }
  func.func @transform_2(%arg0: i32) -> (i32, i32) {
    %c0_i32 = arith.constant 0 : i32
    %c0_i32_0 = arith.constant 0 : i32
    %c0_i32_1 = arith.constant 0 : i32
    return %c0_i32, %c0_i32_0 : i32, i32
  }
  func.func @transform_3(%arg0: i32) -> (i32, i32) {
    %c0_i32 = arith.constant 0 : i32
    %c0_i32_0 = arith.constant 0 : i32
    return %arg0, %c0_i32 : i32, i32
  }
}

module attributes {stable_mosaic.version = 11 : i64} {
  func.func @_matmul_bias_relu_kernel(%arg0: i32, %arg1: memref<24x2304xbf16, #tpu.memory_space<vmem>>, %arg2: memref<2304x256xbf16, #tpu.memory_space<vmem>>, %arg3: memref<1x256xf32, #tpu.memory_space<vmem>>, %arg4: memref<24x256xf32, #tpu.memory_space<vmem>>) attributes {dimension_semantics = [#tpu.dimension_semantics<parallel>], iteration_bounds = array<i64: 1>, scalar_prefetch = 0 : i64, scratch_operands = 0 : i64, tpu.core_type = #tpu.core_type<tc>, window_params = [{transform_indices = @transform_0, window_bounds = array<i64: 24, 2304>}, {pipeline_mode = #tpu.pipeline_mode<synchronous>, transform_indices = @transform_1, window_bounds = array<i64: 2304, 256>}, {pipeline_mode = #tpu.pipeline_mode<synchronous>, transform_indices = @transform_2, window_bounds = array<i64: 1, 256>}, {transform_indices = @transform_3, window_bounds = array<i64: 24, 256>}]} {
    %c0 = arith.constant 0 : index
    %c0_0 = arith.constant 0 : index
    %0 = vector.load %arg1[%c0, %c0_0] : memref<24x2304xbf16, #tpu.memory_space<vmem>>, vector<24x2304xbf16>
    %c0_1 = arith.constant 0 : index
    %c0_2 = arith.constant 0 : index
    %1 = vector.load %arg2[%c0_1, %c0_2] : memref<2304x256xbf16, #tpu.memory_space<vmem>>, vector<2304x256xbf16>
    %cst = arith.constant dense<0.000000e+00> : vector<24x256xf32>
    %2 = tpu.matmul %0, %1, %cst {dimension_numbers = #tpu.dot_dimension_numbers<[1], [0], [0], [1], [0, 0, 1, 1], [], []>} : vector<24x2304xbf16>, vector<2304x256xbf16>, vector<24x256xf32> -> vector<24x256xf32>
    %c0_3 = arith.constant 0 : index
    %c0_4 = arith.constant 0 : index
    %3 = vector.load %arg3[%c0_3, %c0_4] : memref<1x256xf32, #tpu.memory_space<vmem>>, vector<1x256xf32>
    %4 = vector.broadcast %3 : vector<1x256xf32> to vector<24x256xf32>
    %5 = arith.addf %2, %4 : vector<24x256xf32>
    %cst_5 = arith.constant 0.000000e+00 : f32
    %6 = vector.broadcast %cst_5 : f32 to vector<24x256xf32>
    %7 = arith.maximumf %5, %6 : vector<24x256xf32>
    %c0_6 = arith.constant 0 : index
    %c0_7 = arith.constant 0 : index
    %8 = vector.load %arg4[%c0_6, %c0_7] : memref<24x256xf32, #tpu.memory_space<vmem>>, vector<24x256xf32>
    tpu.vector_store %arg4[%c0_6, %c0_7], %7 {strides = array<i32>} : memref<24x256xf32, #tpu.memory_space<vmem>>, vector<24x256xf32>,
    return
  }
  func.func @transform_0(%arg0: i32) -> (i32, i32) {
    %c0_i32 = arith.constant 0 : i32
    %c0_i32_0 = arith.constant 0 : i32
    return %arg0, %c0_i32 : i32, i32
  }
  func.func @transform_1(%arg0: i32) -> (i32, i32) {
    %c0_i32 = arith.constant 0 : i32
    %c0_i32_0 = arith.constant 0 : i32
    %c0_i32_1 = arith.constant 0 : i32
    return %c0_i32, %c0_i32_0 : i32, i32
  }
  func.func @transform_2(%arg0: i32) -> (i32, i32) {
    %c0_i32 = arith.constant 0 : i32
    %c0_i32_0 = arith.constant 0 : i32
    %c0_i32_1 = arith.constant 0 : i32
    return %c0_i32, %c0_i32_0 : i32, i32
  }
  func.func @transform_3(%arg0: i32) -> (i32, i32) {
    %c0_i32 = arith.constant 0 : i32
    %c0_i32_0 = arith.constant 0 : i32
    return %arg0, %c0_i32 : i32, i32
  }
}

module attributes {stable_mosaic.version = 11 : i64} {
  func.func @_maxpool3x3s2_kernel(%arg0: i32, %arg1: memref<1x3x3x256xf32, #tpu.memory_space<vmem>>, %arg2: memref<1x1x1x256xf32, #tpu.memory_space<vmem>>) attributes {dimension_semantics = [#tpu.dimension_semantics<parallel>], iteration_bounds = array<i64: 2>, scalar_prefetch = 0 : i64, scratch_operands = 0 : i64, tpu.core_type = #tpu.core_type<tc>, window_params = [{transform_indices = @transform_0, window_bounds = array<i64: 1, 3, 3, 256>}, {transform_indices = @transform_1, window_bounds = array<i64: 1, 1, 1, 256>}]} {
    %c0 = arith.constant 0 : index
    %c0_0 = arith.constant 0 : index
    %c0_1 = arith.constant 0 : index
    %c0_2 = arith.constant 0 : index
    %0 = vector.load %arg1[%c0, %c0_0, %c0_1, %c0_2] : memref<1x3x3x256xf32, #tpu.memory_space<vmem>>, vector<1x3x3x256xf32>
    %1 = vector.shape_cast %0 : vector<1x3x3x256xf32> to vector<3x3x256xf32>
    %2 = vector.extract_strided_slice %1 {offsets = [0, 0, 0], sizes = [1, 3, 256], strides = [1, 1, 1]} : vector<3x3x256xf32> to vector<1x3x256xf32>
    %3 = vector.shape_cast %2 : vector<1x3x256xf32> to vector<3x256xf32>
    %4 = vector.extract_strided_slice %1 {offsets = [1, 0, 0], sizes = [1, 3, 256], strides = [1, 1, 1]} : vector<3x3x256xf32> to vector<1x3x256xf32>
    %5 = vector.shape_cast %4 : vector<1x3x256xf32> to vector<3x256xf32>
    %6 = arith.maximumf %3, %5 : vector<3x256xf32>
    %7 = vector.extract_strided_slice %1 {offsets = [2, 0, 0], sizes = [1, 3, 256], strides = [1, 1, 1]} : vector<3x3x256xf32> to vector<1x3x256xf32>
    %8 = vector.shape_cast %7 : vector<1x3x256xf32> to vector<3x256xf32>
    %9 = arith.maximumf %6, %8 : vector<3x256xf32>
    %10 = vector.shape_cast %9 : vector<3x256xf32> to vector<1x3x256xf32>
    %11 = vector.extract_strided_slice %10 {offsets = [0, 0, 0], sizes = [1, 1, 256], strides = [1, 1, 1]} : vector<1x3x256xf32> to vector<1x1x256xf32>
    %12 = vector.shape_cast %11 : vector<1x1x256xf32> to vector<1x256xf32>
    %13 = vector.extract_strided_slice %10 {offsets = [0, 1, 0], sizes = [1, 1, 256], strides = [1, 1, 1]} : vector<1x3x256xf32> to vector<1x1x256xf32>
    %14 = vector.shape_cast %13 : vector<1x1x256xf32> to vector<1x256xf32>
    %15 = arith.maximumf %12, %14 : vector<1x256xf32>
    %16 = vector.extract_strided_slice %10 {offsets = [0, 2, 0], sizes = [1, 1, 256], strides = [1, 1, 1]} : vector<1x3x256xf32> to vector<1x1x256xf32>
    %17 = vector.shape_cast %16 : vector<1x1x256xf32> to vector<1x256xf32>
    %18 = arith.maximumf %15, %17 : vector<1x256xf32>
    %19 = vector.shape_cast %18 : vector<1x256xf32> to vector<1x1x256xf32>
    %20 = vector.shape_cast %19 : vector<1x1x256xf32> to vector<1x1x1x256xf32>
    %c0_3 = arith.constant 0 : index
    %c0_4 = arith.constant 0 : index
    %c0_5 = arith.constant 0 : index
    %c0_6 = arith.constant 0 : index
    %21 = vector.load %arg2[%c0_3, %c0_4, %c0_5, %c0_6] : memref<1x1x1x256xf32, #tpu.memory_space<vmem>>, vector<1x1x1x256xf32>
    tpu.vector_store %arg2[%c0_3, %c0_4, %c0_5, %c0_6], %20 {strides = array<i32>} : memref<1x1x1x256xf32, #tpu.memory_space<vmem>>, vector<1x1x1x256xf32>,
    return
  }
  func.func @transform_0(%arg0: i32) -> (i32, i32, i32, i32) {
    %c0_i32 = arith.constant 0 : i32
    %c0_i32_0 = arith.constant 0 : i32
    %c0_i32_1 = arith.constant 0 : i32
    %c0_i32_2 = arith.constant 0 : i32
    return %arg0, %c0_i32, %c0_i32_0, %c0_i32_1 : i32, i32, i32, i32
  }
  func.func @transform_1(%arg0: i32) -> (i32, i32, i32, i32) {
    %c0_i32 = arith.constant 0 : i32
    %c0_i32_0 = arith.constant 0 : i32
    %c0_i32_1 = arith.constant 0 : i32
    %c0_i32_2 = arith.constant 0 : i32
    return %arg0, %c0_i32, %c0_i32_0, %c0_i32_1 : i32, i32, i32, i32
  }
}

</mosaic_0001>

<bundles_post_ra>
// kernel: featurenet_forward.9
= control target key start
LH: loop header
LB: loop body
LE: loop exit
PB: predicated region body
PF: predicated region fallthrough
CT: control target
= control target key end

     0   :  { %s532_s6 = smov 0   ;;  %s651_s0 = inlined_call_operand.vmem [shape: f32[2,15,15,128], index: 0, kind: input, shape index: {}]   ;;  %s652_s1 = inlined_call_operand.vmem [shape: f32[2,7,7,128], index: 1, kind: output, shape index: {}]  }
   0x1 LB: > { %s495_s7 = sadd.s32 4294967295, %s520_s6   ;;  %p499_p0 = scmp.ge.s32.totalorder %s520_s6, 1  ;;  %s520_s6 = sphi %s532_s6, %s11_s6  }
   0x2   : > { %p87_p1 = scmp.lt.s32.totalorder %s520_s6, 3 }
   0x4   : > { %p88_p2 = pnand %p499_p0, %p87_p1 }
   0x5   : > { %p107_p3 = scmp.lt.s32.totalorder (!%p88_p2), %s495_s7, 1 }
   0x6   : > { %91 = sbr.rel (%p88_p2) target bundleno = 70 (0x46), region = 24 }
   0xb   : > { %s654_s7 = smov (!%p107_p3, %s495_s7), 1  ;;  %vm385_vm0 = vcmask 1040384   ;;  %vm393_vm1 = vcmask 1041408   ;;  %vm401_vm2 = vcmask 1042432   ;;  %vm409_vm3 = vcmask 1043456  }
   0xc   : > { %s504_s8 = smul.u32 240, %s654_s7  ;;  %vm417_vm4 = vcmask 1044480   ;;  %vm425_vm5 = vcmask 1045504  }
   0xd   : > { %s505_s12 = smul.u32 56, %s654_s7 }
   0xe   : > { %s546_s11 = scalar_lea.vmem %s651_s0, %s504_s8 }
   0xf   : > { %v117_v0 = vld [vmem:[%s546_s11] sm:$0xff]  ;;  %v118_v1 = vld [vmem:[%s546_s11 + $0x8] sm:$0x7f]  ;;  %v119_v2 = vld [vmem:[%s546_s11 + $0x10] sm:$0xff]  ;;  %s575_s15 = scalar_lea.vmem %s652_s1, %s505_s12 }
  0x10   : > { %v120_v3 = vld [vmem:[%s546_s11 + $0x18] sm:$0x7f]  ;;  %v121_v4 = vld [vmem:[%s546_s11 + $0x20] sm:$0xff]  ;;  %v122_v5 = vld [vmem:[%s546_s11 + $0x28] sm:$0x7f]  ;;  %v147_v6 = vmax.f32 %v117_v0, %v119_v2 }
  0x11   : > { %v148_v7 = vmax.f32 %v118_v1, %v120_v3  ;;  %v123_v8 = vld [vmem:[%s546_s11 + $0x30] sm:$0xff]  ;;  %v124_v9 = vld [vmem:[%s546_s11 + $0x38] sm:$0x7f]  ;;  %v125_v10 = vld [vmem:[%s546_s11 + $0x40] sm:$0xff] }
  0x12   : > { %v149_v11 = vmax.f32 %v147_v6, %v121_v4  ;;  %v126_v12 = vld [vmem:[%s546_s11 + $0x48] sm:$0x7f]  ;;  %v151_v13 = vmax.f32 %v121_v4, %v123_v8  ;;  %v152_v14 = vmax.f32 %v122_v5, %v124_v9  ;;  %v127_v15 = vld [vmem:[%s546_s11 + $0x50] sm:$0xff]  ;;  %v128_v16 = vld [vmem:[%s546_s11 + $0x58] sm:$0x7f] }
  0x13   : > { %v150_v17 = vmax.f32 %v148_v7, %v122_v5  ;;  %v155_v18 = vmax.f32 %v125_v10, %v127_v15  ;;  %v156_v19 = vmax.f32 %v126_v12, %v128_v16  ;;  %v561_v24 = vld [vmem:[%s546_s11 + $0x60] sm:$0xff]  ;;  %v564_v25 = vld [vmem:[%s546_s11 + $0x68] sm:$0x7f]  ;;  %v131_v6 = vld [vmem:[%s546_s11 + $0x70] sm:$0xff] }
  0x14   : > { %v182_v20 = vrot.slane %v149_v11, 1  ;;  %v203_v21 = vrot.slane %v149_v11, 2  ;;  %v153_v22 = vmax.f32 %v151_v13, %v125_v10  ;;  %v154_v23 = vmax.f32 %v152_v14, %v126_v12  ;;  %v132_v7 = vld [vmem:[%s546_s11 + $0x78] sm:$0x7f]  ;;  %v133_v16 = vld [vmem:[%s546_s11 + $0x80] sm:$0xff] }
  0x15   : > { %v231_v26 = vrot.slane %v150_v17, 2  ;;  %v252_v27 = vrot.slane %v150_v17, 1  ;;  %v157_v28 = vmax.f32 %v155_v18, %v561_v24  ;;  %v158_v29 = vmax.f32 %v156_v19, %v564_v25  ;;  %v135_v18 = vld [vmem:[%s546_s11 + $0x90] sm:$0xff] }
  0x16   : > { %v196_v30 = vmax.f32 %v149_v11, %v182_v20  ;;  %v183_v31 = vrot.slane %v153_v22, 1  ;;  %v204_v32 = vrot.slane %v153_v22, 2  ;;  %v232_v33 = vrot.slane %v154_v23, 2 }
  0x17   : > { %v266_v34 = vmax.f32 %v150_v17, %v252_v27  ;;  %v253_v35 = vrot.slane %v154_v23, 1  ;;  %v184_v36 = vrot.slane %v157_v28, 1  ;;  %v205_v37 = vrot.slane %v157_v28, 2  ;;  %v134_v17 = vld [vmem:[%s546_s11 + $0x88] sm:$0x7f]  ;;  %v139_v27 = vld [vmem:[%s546_s11 + $0xb0] sm:$0xff] }
  0x18   : > { %v217_v38 = vmax.f32 %v196_v30, %v203_v21  ;;  %v245_v39 = vmax.f32 %v196_v30, %v231_v26  ;;  %v197_v40 = vmax.f32 %v153_v22, %v183_v31  ;;  %v233_v41 = vrot.slane %v158_v29, 2 }
  0x19   : > { %v273_v42 = vmax.f32 %v266_v34, %v231_v26  ;;  %v267_v43 = vmax.f32 %v154_v23, %v253_v35  ;;  %v198_v44 = vmax.f32 %v157_v28, %v184_v36  ;;  %v254_v45 = vrot.slane %v158_v29, 1  ;;  %v136_v23 = vld [vmem:[%s546_s11 + $0x98] sm:$0x7f]  ;;  %v137_v26 = vld [vmem:[%s546_s11 + $0xa0] sm:$0xff] }
  0x1a   : > { %v287_v46 = vrot.slane %v217_v38, 1  ;;  %v301_v47 = vrot.slane %v217_v38, 2  ;;  %v322_v48 = vrot.slane %v245_v39, 3  ;;  %v218_v49 = vmax.f32 %v197_v40, %v204_v32  ;;  %v605_v39 = vld [vmem:[%s546_s11 + $0xc0] sm:$0xff] }
  0x1b   : > { %v343_v50 = vrot.slane %v273_v42, 4  ;;  %v357_v51 = vrot.slane %v273_v42, 5  ;;  %v371_v52 = vrot.slane %v273_v42, 6  ;;  %v246_v53 = vmax.f32 %v197_v40, %v232_v33 }
  0x1c   : > { %v386_v54 = vsel %vm385_vm0, %v217_v38, %v287_v46  ;;  %v274_v55 = vmax.f32 %v267_v43, %v232_v33  ;;  %v288_v56 = vrot.slane %v218_v49, 1  ;;  %v302_v57 = vrot.slane %v218_v49, 2  ;;  %v140_v38 = vld [vmem:[%s546_s11 + $0xb8] sm:$0x7f] }
  0x1d   : > { %v394_v58 = vsel %vm393_vm1, %v386_v54, %v301_v47  ;;  %v323_v59 = vrot.slane %v246_v53, 3  ;;  %v219_v60 = vmax.f32 %v198_v44, %v205_v37  ;;  %v247_v61 = vmax.f32 %v198_v44, %v233_v41 }
  0x1e   : > { %v402_v62 = vsel %vm401_vm2, %v394_v58, %v322_v48  ;;  %v344_v63 = vrot.slane %v274_v55, 4  ;;  %v358_v0 = vrot.slane %v274_v55, 5  ;;  %v372_v1 = vrot.slane %v274_v55, 6  ;;  %v142_v58 = vld [vmem:[%s546_s11 + $0xc8] sm:$0x7f] }
  0x1f   : > { %v410_v2 = vsel %vm409_vm3, %v402_v62, %v343_v50  ;;  %v387_v3 = vsel %vm385_vm0, %v218_v49, %v288_v56  ;;  %v268_v4 = vmax.f32 %v158_v29, %v254_v45  ;;  %v289_v5 = vrot.slane %v219_v60, 1 }
  0x20   : > { %v418_v8 = vsel %vm417_vm4, %v410_v2, %v357_v51  ;;  %v395_v9 = vsel %vm393_vm1, %v387_v3, %v302_v57  ;;  %v303_v10 = vrot.slane %v219_v60, 2  ;;  %v324_v11 = vrot.slane %v247_v61, 3 }
  0x21   : > { %v426_v12 = vsel %vm425_vm5, %v418_v8, %v371_v52  ;;  %v403_v13 = vsel %vm401_vm2, %v395_v9, %v323_v59  ;;  %v275_v14 = vmax.f32 %v268_v4, %v233_v41  ;;  %v388_v15 = vsel %vm385_vm0, %v219_v60, %v289_v5  ;;  %v608_v41 = vld [vmem:[%s546_s11 + $0xd0] sm:$0xff] }
  0x22   : > { %433 = vst [vmem:[%s575_s15] sm:$0x7f] %v426_v12  ;;  %v411_v19 = vsel %vm409_vm3, %v403_v13, %v344_v63  ;;  %v396_v20 = vsel %vm393_vm1, %v388_v15, %v303_v10  ;;  %v159_v21 = vmax.f32 %v561_v24, %v131_v6  ;;  %v160_v22 = vmax.f32 %v564_v25, %v132_v7  ;;  %v138_v24 = vld [vmem:[%s546_s11 + $0xa8] sm:$0x7f] }
  0x23   : > { %v419_v28 = vsel %vm417_vm4, %v411_v19, %v358_v0  ;;  %v345_v29 = vrot.slane %v275_v14, 4  ;;  %v359_v30 = vrot.slane %v275_v14, 5  ;;  %v373_v31 = vrot.slane %v275_v14, 6 }
  0x24   : > { %v427_v32 = vsel %vm425_vm5, %v419_v28, %v372_v1  ;;  %v404_v33 = vsel %vm401_vm2, %v396_v20, %v324_v11  ;;  %v161_v34 = vmax.f32 %v159_v21, %v133_v16  ;;  %v162_v35 = vmax.f32 %v160_v22, %v134_v17 }
  0x25   : > { %434 = vst [vmem:[%s575_s15 + $0x8] sm:$0x7f] %v427_v32  ;;  %v412_v25 = vsel %vm409_vm3, %v404_v33, %v345_v29  ;;  %v163_v36 = vmax.f32 %v133_v16, %v135_v18  ;;  %v164_v37 = vmax.f32 %v134_v17, %v136_v23  ;;  %v167_v40 = vmax.f32 %v137_v26, %v139_v27  ;;  %v144_v29 = vld [vmem:[%s546_s11 + $0xd8] sm:$0x7f] }
  0x26   : > { %v420_v42 = vsel %vm417_vm4, %v412_v25, %v359_v30  ;;  %v185_v43 = vrot.slane %v161_v34, 1  ;;  %v206_v44 = vrot.slane %v161_v34, 2  ;;  %v234_v45 = vrot.slane %v162_v35, 2 }
  0x27   : > { %v428_v46 = vsel %vm425_vm5, %v420_v42, %v373_v31  ;;  %v255_v47 = vrot.slane %v162_v35, 1  ;;  %v165_v48 = vmax.f32 %v163_v36, %v137_v26  ;;  %v166_v49 = vmax.f32 %v164_v37, %v138_v24  ;;  %v146_v37 = vld [vmem:[%s546_s11 + $0xe8] sm:$0x7f] }
  0x28   : > { %435 = vst [vmem:[%s575_s15 + $0x10] sm:$0x7f] %v428_v46  ;;  %v199_v50 = vmax.f32 %v161_v34, %v185_v43  ;;  %v168_v51 = vmax.f32 %v138_v24, %v140_v38  ;;  %v169_v52 = vmax.f32 %v167_v40, %v605_v39  ;;  %v171_v53 = vmax.f32 %v605_v39, %v608_v41  ;;  %v145_v34 = vld [vmem:[%s546_s11 + $0xe0] sm:$0xff] }
  0x29   : > { %v269_v54 = vmax.f32 %v162_v35, %v255_v47  ;;  %v186_v55 = vrot.slane %v165_v48, 1  ;;  %v207_v56 = vrot.slane %v165_v48, 2  ;;  %v235_v57 = vrot.slane %v166_v49, 2 }
  0x2a   : > { %v220_v59 = vmax.f32 %v199_v50, %v206_v44  ;;  %v248_v60 = vmax.f32 %v199_v50, %v234_v45  ;;  %v256_v61 = vrot.slane %v166_v49, 1  ;;  %v170_v62 = vmax.f32 %v168_v51, %v142_v58 }
  0x2b   : > { %v276_v63 = vmax.f32 %v269_v54, %v234_v45  ;;  %v200_v0 = vmax.f32 %v165_v48, %v186_v55  ;;  %v187_v1 = vrot.slane %v169_v52, 1  ;;  %v208_v2 = vrot.slane %v169_v52, 2 }
  0x2c   : > { %v290_v3 = vrot.slane %v220_v59, 1  ;;  %v304_v4 = vrot.slane %v220_v59, 2  ;;  %v325_v5 = vrot.slane %v248_v60, 3  ;;  %v270_v6 = vmax.f32 %v166_v49, %v256_v61 }
  0x2d   : > { %v346_v7 = vrot.slane %v276_v63, 4  ;;  %v360_v8 = vrot.slane %v276_v63, 5  ;;  %v374_v9 = vrot.slane %v276_v63, 6  ;;  %v221_v10 = vmax.f32 %v200_v0, %v207_v56 }
  0x2e   : > { %v389_v11 = vsel %vm385_vm0, %v220_v59, %v290_v3  ;;  %v249_v12 = vmax.f32 %v200_v0, %v235_v57  ;;  %v277_v13 = vmax.f32 %v270_v6, %v235_v57  ;;  %v201_v14 = vmax.f32 %v169_v52, %v187_v1 }
  0x2f   : > { %v397_v15 = vsel %vm393_vm1, %v389_v11, %v304_v4  ;;  %v291_v16 = vrot.slane %v221_v10, 1  ;;  %v305_v17 = vrot.slane %v221_v10, 2  ;;  %v236_v18 = vrot.slane %v170_v62, 2 }
  0x30   : > { %v405_v19 = vsel %vm401_vm2, %v397_v15, %v325_v5  ;;  %v326_v20 = vrot.slane %v249_v12, 3  ;;  %v347_v21 = vrot.slane %v277_v13, 4  ;;  %v361_v22 = vrot.slane %v277_v13, 5 }
  0x31   : > { %v413_v23 = vsel %vm409_vm3, %v405_v19, %v346_v7  ;;  %v375_v26 = vrot.slane %v277_v13, 6  ;;  %v390_v27 = vsel %vm385_vm0, %v221_v10, %v291_v16  ;;  %v222_v28 = vmax.f32 %v201_v14, %v208_v2 }
  0x32   : > { %v421_v30 = vsel %vm417_vm4, %v413_v23, %v360_v8  ;;  %v398_v31 = vsel %vm393_vm1, %v390_v27, %v305_v17  ;;  %v250_v32 = vmax.f32 %v201_v14, %v236_v18  ;;  %v257_v33 = vrot.slane %v170_v62, 1 }
  0x33   : > { %v429_v35 = vsel %vm425_vm5, %v421_v30, %v374_v9  ;;  %v406_v24 = vsel %vm401_vm2, %v398_v31, %v326_v20  ;;  %v292_v25 = vrot.slane %v222_v28, 1  ;;  %v306_v36 = vrot.slane %v222_v28, 2 }
  0x34   : > { %436 = vst [vmem:[%s575_s15 + $0x18] sm:$0x7f] %v429_v35  ;;  %v414_v38 = vsel %vm409_vm3, %v406_v24, %v347_v21  ;;  %v271_v39 = vmax.f32 %v170_v62, %v257_v33  ;;  %v327_v40 = vrot.slane %v250_v32, 3  ;;  %v172_v41 = vmax.f32 %v142_v58, %v144_v29 }
  0x35   : > { %v422_v42 = vsel %vm417_vm4, %v414_v38, %v361_v22  ;;  %v391_v43 = vsel %vm385_vm0, %v222_v28, %v292_v25  ;;  %v173_v44 = vmax.f32 %v171_v53, %v145_v34 }
  0x36   : > { %v430_v45 = vsel %vm425_vm5, %v422_v42, %v375_v26  ;;  %v278_v46 = vmax.f32 %v271_v39, %v236_v18  ;;  %v399_v47 = vsel %vm393_vm1, %v391_v43, %v306_v36  ;;  %v174_v48 = vmax.f32 %v172_v41, %v146_v37 }
  0x37   : > { %437 = vst [vmem:[%s575_s15 + $0x20] sm:$0x7f] %v430_v45  ;;  %v407_v49 = vsel %vm401_vm2, %v399_v47, %v327_v40  ;;  %v188_v50 = vrot.slane %v173_v44, 1  ;;  %v209_v51 = vrot.slane %v173_v44, 2 }
  0x38   : > { %v348_v52 = vrot.slane %v278_v46, 4  ;;  %v362_v54 = vrot.slane %v278_v46, 5  ;;  %v376_v55 = vrot.slane %v278_v46, 6  ;;  %v237_v56 = vrot.slane %v174_v48, 2 }
  0x39   : > { %v202_v57 = vmax.f32 %v173_v44, %v188_v50  ;;  %v258_v58 = vrot.slane %v174_v48, 1 }
  0x3a   : > { %v415_v53 = vsel %vm409_vm3, %v407_v49, %v348_v52 }
  0x3b   : > { %v423_v59 = vsel %vm417_vm4, %v415_v53, %v362_v54  ;;  %v223_v60 = vmax.f32 %v202_v57, %v209_v51  ;;  %v251_v61 = vmax.f32 %v202_v57, %v237_v56  ;;  %v272_v62 = vmax.f32 %v174_v48, %v258_v58 }
  0x3c   : > { %v431_v63 = vsel %vm425_vm5, %v423_v59, %v376_v55 }
  0x3d   : > { %438 = vst [vmem:[%s575_s15 + $0x28] sm:$0x7f] %v431_v63  ;;  %v279_v0 = vmax.f32 %v272_v62, %v237_v56  ;;  %v293_v1 = vrot.slane %v223_v60, 1  ;;  %v307_v2 = vrot.slane %v223_v60, 2  ;;  %v328_v3 = vrot.slane %v251_v61, 3 }
  0x3f   : > { %v349_v4 = vrot.slane %v279_v0, 4  ;;  %v363_v5 = vrot.slane %v279_v0, 5  ;;  %v392_v6 = vsel %vm385_vm0, %v223_v60, %v293_v1  ;;  %v377_v7 = vrot.slane %v279_v0, 6 }
  0x40   : > { %v400_v8 = vsel %vm393_vm1, %v392_v6, %v307_v2 }
  0x41   : > { %v408_v9 = vsel %vm401_vm2, %v400_v8, %v328_v3 }
  0x42   : > { %v416_v10 = vsel %vm409_vm3, %v408_v9, %v349_v4 }
  0x43   : > { %v424_v11 = vsel %vm417_vm4, %v416_v10, %v363_v5 }
  0x44   : > { %v432_v12 = vsel %vm425_vm5, %v424_v11, %v377_v7 }
  0x45   : > { %439 = vst [vmem:[%s575_s15 + $0x30] sm:$0x7f] %v432_v12 }
  0x46 PF: > { %s11_s6 = sadd.s32 1, %s520_s6  }
  0x47   : > { %p8_p4 = scmp.ge.s32.totalorder %s11_s6, 4  }
  0x49   :  { %10 = sbr.rel (!%p8_p4) target bundleno = 1 (0x1), region = 54 }

// kernel: featurenet_forward.8
= control target key start
LH: loop header
LB: loop body
LE: loop exit
PB: predicated region body
PF: predicated region fallthrough
CT: control target
= control target key end

     0   :  { %s1548_s12 = smov 0   ;;  %s1798_s0 = inlined_call_operand.vmem [shape: bf16[512,384], index: 0, kind: input, shape index: {}]   ;;  %s1799_s1 = inlined_call_operand.vmem [shape: bf16[384,128], index: 1, kind: input, shape index: {}]   ;;  %s1800_s2 = inlined_call_operand.vmem [shape: f32[1,128], index: 2, kind: input, shape index: {}]   ;;  %s1801_s3 = inlined_call_operand.vmem [shape: f32[512,128], index: 3, kind: output, shape index: {}]  }
   0x1 LB: > { %s1139_s13 = sadd.s32 4294967295, %s1526_s12   ;;  %p1143_p0 = scmp.ge.s32.totalorder %s1526_s12, 1  ;;  %s1526_s12 = sphi %s1548_s12, %s13_s12  }
   0x2   : > { %p139_p1 = scmp.lt.s32.totalorder %s1526_s12, 3 }
   0x4   : > { %p140_p2 = pnand %p1143_p0, %p139_p1 }
   0x5   : > { %s1144_s16 = sshll.u32 (!%p140_p2), %s1139_s13, 5 }
   0x6   : > { %143 = sbr.rel (%p140_p2) target bundleno = 340 (0x154), region = 32  ;;  %p165_p3 = scmp.lt.s32.totalorder (!%p140_p2), %s1144_s16, 63 }
   0xb   : > { %v1432_v0 = vld [vmem:[%s1799_s1 + $0x78] sm:$0xff]   ;;  %v1434_v2 = vld [vmem:[%s1799_s1 + $0x70] sm:$0xff]   ;;  %v1436_v4 = vld [vmem:[%s1799_s1 + $0x68] sm:$0xff]   ;;  %s1803_s16 = smov (!%p165_p3, %s1144_s16), 63 }
   0xc   : > { %v1433_v1 = vld [vmem:[%s1799_s1 + $0x38] sm:$0xff]   ;;  %1223 = vmatprep.subr.bf16.mxu0 %v1432_v0  ;;  %1407 = vmatprep.subr.bf16.mxu1 %v1432_v0  ;;  %v1435_v3 = vld [vmem:[%s1799_s1 + $0x30] sm:$0xff]   ;;  %v1437_v5 = vld [vmem:[%s1799_s1 + $0x28] sm:$0xff]   ;;  %s1423_s29 = smul.u32 12, %s1803_s16  ;;  %s1147_s19 = sshll.u32 %s1803_s16, 3 }
   0xd   : > { %1224 = vmatpush3.bf16.msra.mxu0 %v1433_v1  ;;  %1415 = vmatpush3.bf16.msra.mxu1 %v1433_v1  ;;  %v1438_v6 = vld [vmem:[%s1799_s1 + $0x60] sm:$0xff]   ;;  %v1440_v8 = vld [vmem:[%s1799_s1 + $0x58] sm:$0xff]   ;;  %v1442_v10 = vld [vmem:[%s1799_s1 + $0x50] sm:$0xff]   ;;  %s1715_s22 = scalar_lea.vmem %s1801_s3, %s1147_s19 }
   0xe   : > { %1225 = vmatprep.subr.bf16.mxu0 %v1434_v2  ;;  %1408 = vmatprep.subr.bf16.mxu1 %v1434_v2  ;;  %v1439_v7 = vld [vmem:[%s1799_s1 + $0x20] sm:$0xff]   ;;  %s1589_s9 = scalar_lea.vmem %s1798_s0, %s1423_s29  ;;  %v1441_v9 = vld [vmem:[%s1799_s1 + $0x18] sm:$0xff]   ;;  %v1443_v13 = vld [vmem:[%s1799_s1 + $0x10] sm:$0xff]  }
   0xf   : > { %v1450_v11 = vld [vmem:[%s1589_s9 + $0x4] ss:$12 sps:$4 sm:$0xff]   ;;  %v1444_v14 = vld [vmem:[%s1799_s1 + $0x48] sm:$0xff]   ;;  %v1454_v18 = vld [vmem:[%s1799_s1 + $0xb8] sm:$0xff]  }
  0x10   : > { %v1453_v12 = vld [vmem:[%s1589_s9 + $0x124] ss:$12 sps:$4 sm:$0xff]   ;;  %729 = vmatprep.mubr.bf16.mxu0 %v1450_v11  ;;  %v1445_v15 = vld [vmem:[%s1799_s1 + $0x8] sm:$0xff]   ;;  %v1464_v28 = vld [vmem:[%s1589_s9 + $0x34] ss:$12 sps:$4 sm:$0xff]  }
  0x11   : > { %1226 = vmatpush3.bf16.msra.mxu0 %v1435_v3  ;;  %1416 = vmatpush3.bf16.msra.mxu1 %v1435_v3  ;;  %v1446_v16 = vld [vmem:[%s1799_s1 + $0x40] sm:$0xff]   ;;  %v1456_v21 = vld [vmem:[%s1589_s9 + $0x1c] ss:$12 sps:$4 sm:$0xff]   ;;  %v1455_v22 = vld [vmem:[%s1799_s1 + $0xb0] sm:$0xff]  }
  0x12   : > { %1227 = vmatprep.subr.bf16.mxu0 %v1436_v4  ;;  %1409 = vmatprep.subr.bf16.mxu1 %v1436_v4  ;;  %v1447_v17 = vld [vmem:[%s1799_s1] sm:$0xff]   ;;  %v1458_v23 = vld [vmem:[%s1589_s9 + $0x13c] ss:$12 sps:$4 sm:$0xff]   ;;  %v1471_v33 = vld [vmem:[%s1799_s1 + $0x90] sm:$0xff]  }
  0x13   : > { %825 = vmatprep.mubr.bf16.mxu1 %v1453_v12  ;;  %v1448_v19 = vld [vmem:[%s1589_s9] ss:$12 sps:$4 sm:$0xff]   ;;  %v1460_v24 = vld [vmem:[%s1589_s9 + $0x18] ss:$12 sps:$4 sm:$0xff]   ;;  %v1468_v31 = vld [vmem:[%s1589_s9 + $0x30] ss:$12 sps:$4 sm:$0xff]  }
  0x14   : > { %v1451_v20 = vld [vmem:[%s1589_s9 + $0x120] ss:$12 sps:$4 sm:$0xff]   ;;  %v1461_v26 = vld [vmem:[%s1589_s9 + $0x138] ss:$12 sps:$4 sm:$0xff]   ;;  %v1469_v32 = vld [vmem:[%s1589_s9 + $0x150] ss:$12 sps:$4 sm:$0xff]  }
  0x15   : > { %1228 = vmatpush3.bf16.msra.mxu0 %v1437_v5  ;;  %1417 = vmatpush3.bf16.msra.mxu1 %v1437_v5  ;;  %v1462_v25 = vld [vmem:[%s1799_s1 + $0xa8] sm:$0xff]   ;;  %v1463_v27 = vld [vmem:[%s1799_s1 + $0xa0] sm:$0xff]   ;;  %v1470_v30 = vld [vmem:[%s1799_s1 + $0x98] sm:$0xff]  }
  0x16   : > { %1229 = vmatprep.subr.bf16.mxu0 %v1438_v6  ;;  %1410 = vmatprep.subr.bf16.mxu1 %v1438_v6  ;;  %v1466_v29 = vld [vmem:[%s1589_s9 + $0x154] ss:$12 sps:$4 sm:$0xff]   ;;  %v1472_v34 = vld [vmem:[%s1589_s9 + $0x4c] ss:$12 sps:$4 sm:$0xff]   ;;  %v1480_v39 = vld [vmem:[%s1589_s9 + $0x64] ss:$12 sps:$4 sm:$0xff]  }
  0x17   : > { %v1474_v35 = vld [vmem:[%s1589_s9 + $0x16c] ss:$12 sps:$4 sm:$0xff]   ;;  %v1476_v37 = vld [vmem:[%s1589_s9 + $0x48] ss:$12 sps:$4 sm:$0xff]   ;;  %v1479_v40 = vld [vmem:[%s1799_s1 + $0x80] sm:$0xff]  }
  0x18   : > { %v1478_v36 = vld [vmem:[%s1799_s1 + $0x88] sm:$0xff]   ;;  %v1487_v45 = vld [vmem:[%s1589_s9 + $0x38] ss:$12 sps:$4 sm:$0xff]   ;;  %v1489_v47 = vld [vmem:[%s1589_s9 + $0x50] ss:$12 sps:$4 sm:$0xff]  }
  0x19   : > { %1230 = vmatpush3.bf16.msra.mxu0 %v1439_v7  ;;  %1418 = vmatpush3.bf16.msra.mxu1 %v1439_v7  ;;  %v1477_v38 = vld [vmem:[%s1589_s9 + $0x168] ss:$12 sps:$4 sm:$0xff]   ;;  %v1483_v42 = vld [vmem:[%s1589_s9 + $0x60] ss:$12 sps:$4 sm:$0xff]   ;;  %v1488_v46 = vld [vmem:[%s1589_s9 + $0x78] ss:$12 sps:$4 sm:$0xff]  }
  0x1a   : > { %1231 = vmatprep.subr.bf16.mxu0 %v1440_v8  ;;  %1411 = vmatprep.subr.bf16.mxu1 %v1440_v8  ;;  %v1482_v41 = vld [vmem:[%s1589_s9 + $0x8] ss:$12 sps:$4 sm:$0xff]   ;;  %v1484_v43 = vld [vmem:[%s1589_s9 + $0x20] ss:$12 sps:$4 sm:$0xff]   ;;  %v1493_v50 = vld [vmem:[%s1589_s9 + $0x90] ss:$12 sps:$4 sm:$0xff]  }
  0x1b   : > { %v1485_v44 = vld [vmem:[%s1589_s9 + $0x7c] ss:$12 sps:$4 sm:$0xff]   ;;  %v1490_v48 = vld [vmem:[%s1589_s9 + $0x94] ss:$12 sps:$4 sm:$0xff]   ;;  %v1495_v52 = vld [vmem:[%s1589_s9 + $0xac] ss:$12 sps:$4 sm:$0xff]  }
  0x1c   : > { %v1492_v49 = vld [vmem:[%s1589_s9 + $0x68] ss:$12 sps:$4 sm:$0xff]   ;;  %v1494_v51 = vld [vmem:[%s1589_s9 + $0x80] ss:$12 sps:$4 sm:$0xff]   ;;  %v1497_v53 = vld [vmem:[%s1589_s9 + $0x98] ss:$12 sps:$4 sm:$0xff]  }
  0x1d   : > { %1232 = vmatpush3.bf16.msra.mxu0 %v1441_v9  ;;  %1419 = vmatpush3.bf16.msra.mxu1 %v1441_v9  ;;  %v1498_v54 = vld [vmem:[%s1589_s9 + $0xa8] ss:$12 sps:$4 sm:$0xff]   ;;  %v1499_v55 = vld [vmem:[%s1589_s9 + $0xb0] ss:$12 sps:$4 sm:$0xff]   ;;  %v1503_v58 = vld [vmem:[%s1589_s9 + $0xc0] ss:$12 sps:$4 sm:$0xff]  }
  0x1e   : > { %1233 = vmatprep.subr.bf16.mxu0 %v1442_v10  ;;  %1412 = vmatprep.subr.bf16.mxu1 %v1442_v10  ;;  %v1500_v56 = vld [vmem:[%s1589_s9 + $0xc4] ss:$12 sps:$4 sm:$0xff]   ;;  %v1502_v57 = vld [vmem:[%s1589_s9 + $0xc8] ss:$12 sps:$4 sm:$0xff]   ;;  %v1504_v59 = vld [vmem:[%s1589_s9 + $0xe0] ss:$12 sps:$4 sm:$0xff]  }
  0x1f   : > { %v1505_v60 = vld [vmem:[%s1589_s9 + $0xdc] ss:$12 sps:$4 sm:$0xff]   ;;  %v1507_v61 = vld [vmem:[%s1589_s9 + $0xf8] ss:$12 sps:$4 sm:$0xff]   ;;  %v1510_v0 = vld [vmem:[%s1589_s9 + $0xf4] ss:$12 sps:$4 sm:$0xff]  }
  0x20   : > { %v1508_v62 = vld [vmem:[%s1589_s9 + $0xd8] ss:$12 sps:$4 sm:$0xff]   ;;  %v1509_v63 = vld [vmem:[%s1589_s9 + $0x110] ss:$12 sps:$4 sm:$0xff]   ;;  %v1512_v1 = vld [vmem:[%s1589_s9 + $0x128] ss:$12 sps:$4 sm:$0xff]  }
  0x21   : > { %1234 = vmatpush3.bf16.msra.mxu0 %v1443_v13  ;;  %1420 = vmatpush3.bf16.msra.mxu1 %v1443_v13  ;;  %v1513_v2 = vld [vmem:[%s1589_s9 + $0xf0] ss:$12 sps:$4 sm:$0xff]   ;;  %v1514_v3 = vld [vmem:[%s1589_s9 + $0x140] ss:$12 sps:$4 sm:$0xff]   ;;  %v1517_v5 = vld [vmem:[%s1589_s9 + $0x158] ss:$12 sps:$4 sm:$0xff]  }
  0x22   : > { %1235 = vmatprep.subr.bf16.mxu0 %v1444_v14  ;;  %1413 = vmatprep.subr.bf16.mxu1 %v1444_v14  ;;  %v1515_v4 = vld [vmem:[%s1589_s9 + $0x10c] ss:$12 sps:$4 sm:$0xff]   ;;  %v1518_v6 = vld [vmem:[%s1589_s9 + $0x108] ss:$12 sps:$4 sm:$0xff]   ;;  %v1519_v7 = vld [vmem:[%s1589_s9 + $0x170] ss:$12 sps:$4 sm:$0xff]  }
  0x25   : > { %1236 = vmatpush3.bf16.msra.mxu0 %v1445_v15  ;;  %1421 = vmatpush3.bf16.msra.mxu1 %v1445_v15 }
  0x26   : > { %1237 = vmatprep.subr.bf16.mxu0 %v1446_v16  ;;  %1414 = vmatprep.subr.bf16.mxu1 %v1446_v16 }
  0x29   : > { %1238 = vmatpush3.bf16.msra.mxu0 %v1447_v17  ;;  %1422 = vmatpush3.bf16.msra.mxu1 %v1447_v17 }
  0x2a   : > { %1359 = vmatprep.subr.bf16.mxu1 %v1454_v18 }
  0x2c   : > { %730 = vmatmul.mubr.bf16.vlgmr.msra.gmra.mxu0 %v1448_v19  ;;  %826 = vmatmul.mubr.bf16.vlgmr.msra.gmra.mxu1 %v1451_v20 }
  0x2d   : > { %1360 = vmatpush3.bf16.msra.mxu1 %v1454_v18  ;;  %737 = vmatprep.mubr.bf16.mxu0 %v1456_v21 }
  0x2e   : > { %1361 = vmatprep.subr.bf16.mxu1 %v1455_v22  ;;  %833 = vmatprep.mubr.bf16.mxu1 %v1458_v23 }
  0x31   : > { %1362 = vmatpush3.bf16.msra.mxu1 %v1455_v22 }
  0x32   : > { %1363 = vmatprep.subr.bf16.mxu1 %v1462_v25 }
  0x34   : > { %738 = vmatmul.mubr.bf16.gmra.mxu0 %v1460_v24  ;;  %834 = vmatmul.mubr.bf16.gmra.mxu1 %v1461_v26 }
  0x35   : > { %1364 = vmatpush3.bf16.msra.mxu1 %v1462_v25  ;;  %745 = vmatprep.mubr.bf16.mxu0 %v1464_v28 }
  0x36   : > { %1365 = vmatprep.subr.bf16.mxu1 %v1463_v27  ;;  %841 = vmatprep.mubr.bf16.mxu1 %v1466_v29 }
  0x39   : > { %1366 = vmatpush3.bf16.msra.mxu1 %v1463_v27 }
  0x3a   : > { %1367 = vmatprep.subr.bf16.mxu1 %v1470_v30 }
  0x3c   : > { %746 = vmatmul.mubr.bf16.gmra.mxu0 %v1468_v31  ;;  %842 = vmatmul.mubr.bf16.gmra.mxu1 %v1469_v32 }
  0x3d   : > { %1368 = vmatpush3.bf16.msra.mxu1 %v1470_v30  ;;  %753 = vmatprep.mubr.bf16.mxu0 %v1472_v34 }
  0x3e   : > { %1369 = vmatprep.subr.bf16.mxu1 %v1471_v33  ;;  %849 = vmatprep.mubr.bf16.mxu1 %v1474_v35 }
  0x41   : > { %1370 = vmatpush3.bf16.msra.mxu1 %v1471_v33 }
  0x42   : > { %1371 = vmatprep.subr.bf16.mxu1 %v1478_v36 }
  0x44   : > { %754 = vmatmul.mubr.bf16.gmra.mxu0 %v1476_v37  ;;  %850 = vmatmul.mubr.bf16.gmra.mxu1 %v1477_v38 }
  0x45   : > { %1372 = vmatpush3.bf16.msra.mxu1 %v1478_v36  ;;  %761 = vmatprep.mubr.bf16.mxu0 %v1480_v39 }
  0x46   : > { %1373 = vmatprep.subr.bf16.mxu1 %v1479_v40  ;;  %1375 = vmatprep.mubr.bf16.mxu1 %v1482_v41 }
  0x49   : > { %1374 = vmatpush3.bf16.msra.mxu1 %v1479_v40 }
  0x4c   : > { %762 = vmatmul.mubr.bf16.gmra.mxu0 %v1483_v42  ;;  %1376 = vmatmul.mubr.bf16.vlgmr.msra.gmra.mxu1 %v1484_v43 }
  0x4d   : > { %769 = vmatprep.mubr.bf16.mxu0 %v1485_v44  ;;  %1379 = vmatprep.mubr.bf16.mxu1 %v1487_v45 }
  0x54   : > { %770 = vmatmul.mubr.bf16.gmra.mxu0 %v1488_v46  ;;  %1380 = vmatmul.mubr.bf16.gmra.mxu1 %v1489_v47 }
  0x55   : > { %777 = vmatprep.mubr.bf16.mxu0 %v1490_v48  ;;  %1383 = vmatprep.mubr.bf16.mxu1 %v1492_v49  ;;  %v1707_v48 = vld [vmem:[%s1800_s2] ss:$0 sm:$0xff] }
  0x5c   : > { %778 = vmatmul.mubr.bf16.gmra.mxu0 %v1493_v50  ;;  %1384 = vmatmul.mubr.bf16.gmra.mxu1 %v1494_v51 }
  0x5d   : > { %785 = vmatprep.mubr.bf16.mxu0 %v1495_v52  ;;  %1387 = vmatprep.mubr.bf16.mxu1 %v1497_v53 }
  0x64   : > { %786 = vmatmul.mubr.bf16.gmra.mxu0 %v1498_v54  ;;  %1388 = vmatmul.mubr.bf16.gmra.mxu1 %v1499_v55 }
  0x65   : > { %793 = vmatprep.mubr.bf16.mxu0 %v1500_v56  ;;  %1391 = vmatprep.mubr.bf16.mxu1 %v1502_v57 }
  0x6c   : > { %794 = vmatmul.mubr.bf16.gmra.mxu0 %v1503_v58  ;;  %1392 = vmatmul.mubr.bf16.gmra.mxu1 %v1504_v59 }
  0x6d   : > { %801 = vmatprep.mubr.bf16.mxu0 %v1505_v60  ;;  %1395 = vmatprep.mubr.bf16.mxu1 %v1507_v61 }
  0x74   : > { %802 = vmatmul.mubr.bf16.gmra.mxu0 %v1508_v62  ;;  %1396 = vmatmul.mubr.bf16.gmra.mxu1 %v1509_v63 }
  0x75   : > { %809 = vmatprep.mubr.bf16.mxu0 %v1510_v0  ;;  %1399 = vmatprep.mubr.bf16.mxu1 %v1512_v1 }
  0x7c   : > { %810 = vmatmul.mubr.bf16.gmra.mxu0 %v1513_v2  ;;  %1400 = vmatmul.mubr.bf16.gmra.mxu1 %v1514_v3 }
  0x7d   : > { %817 = vmatprep.mubr.bf16.mxu0 %v1515_v4  ;;  %1403 = vmatprep.mubr.bf16.mxu1 %v1517_v5 }
  0x84   : > { %818 = vmatmul.mubr.bf16.gmra.mxu0 %v1518_v6  ;;  %1404 = vmatmul.mubr.bf16.gmra.mxu1 %v1519_v7 }
  0xec   : > { %v1239_v8 = vpop.f32.mrf.mxu0  ;;  %v1311_v9 = vpop.f32.mrf.mxu1 }
  0xee   : > { %v1240_v10 = vpop.f32.mrf.mxu0  ;;  %v1312_v11 = vpop.f32.mrf.mxu1 }
  0xef   : > { %v1684_v12 = vadd.f32 %v1312_v11, %v1311_v9  ;;  %v1241_v45 = vadd.f32 %v1240_v10, %v1239_v8 }
  0xf0   : > { %v1242_v13 = vpop.f32.mrf.mxu0  ;;  %v1314_v14 = vpop.f32.mrf.mxu1 }
  0xf1   : > { %v732_v55 = vadd.f32 %v1241_v45, %v1707_v48 }
  0xf2   : > { %v1243_v15 = vpop.f32.mrf.mxu0  ;;  %v1315_v16 = vpop.f32.mrf.mxu1 }
  0xf3   : > { %v1686_v17 = vadd.f32 %v1315_v16, %v1314_v14  ;;  %v1244_v53 = vadd.f32 %v1243_v15, %v1242_v13 }
  0xf4   : > { %v1245_v18 = vpop.f32.mrf.mxu0  ;;  %v1317_v19 = vpop.f32.mrf.mxu1 }
  0xf5   : > { %v735_v3 = vadd.f32 %v1244_v53, %v1707_v48 }
  0xf6   : > { %v1246_v20 = vpop.f32.mrf.mxu0  ;;  %v1318_v21 = vpop.f32.mrf.mxu1 }
  0xf7   : > { %v1688_v22 = vadd.f32 %v1318_v21, %v1317_v19  ;;  %v1247_v42 = vadd.f32 %v1246_v20, %v1245_v18 }
  0xf8   : > { %v1248_v23 = vpop.f32.mrf.mxu0  ;;  %v1320_v24 = vpop.f32.mrf.mxu1 }
  0xf9   : > { %v740_v50 = vadd.f32 %v1247_v42, %v1707_v48 }
  0xfa   : > { %v1249_v25 = vpop.f32.mrf.mxu0  ;;  %v1321_v26 = vpop.f32.mrf.mxu1 }
  0xfb   : > { %v1690_v27 = vadd.f32 %v1321_v26, %v1320_v24  ;;  %v1250_v49 = vadd.f32 %v1249_v25, %v1248_v23 }
  0xfc   : > { %v1251_v28 = vpop.f32.mrf.mxu0  ;;  %v1323_v29 = vpop.f32.mrf.mxu1 }
  0xfd   : > { %v743_v61 = vadd.f32 %v1250_v49, %v1707_v48 }
  0xfe   : > { %v1252_v30 = vpop.f32.mrf.mxu0  ;;  %v1324_v31 = vpop.f32.mrf.mxu1 }
  0xff   : > { %v1692_v32 = vadd.f32 %v1324_v31, %v1323_v29  ;;  %v1253_v0 = vadd.f32 %v1252_v30, %v1251_v28 }
 0x100   : > { %v1254_v33 = vpop.f32.mrf.mxu0  ;;  %v1326_v34 = vpop.f32.mrf.mxu1 }
 0x101   : > { %v748_v16 = vadd.f32 %v1253_v0, %v1707_v48 }
 0x102   : > { %v1255_v35 = vpop.f32.mrf.mxu0  ;;  %v1327_v36 = vpop.f32.mrf.mxu1 }
 0x103   : > { %v1694_v37 = vadd.f32 %v1327_v36, %v1326_v34  ;;  %v1256_v13 = vadd.f32 %v1255_v35, %v1254_v33 }
 0x104   : > { %v1257_v38 = vpop.f32.mrf.mxu0  ;;  %v1696_v39 = vpop.f32.mrf.mxu1 }
 0x105   : > { %v751_v31 = vadd.f32 %v1256_v13, %v1707_v48 }
 0x106   : > { %v1258_v40 = vpop.f32.mrf.mxu0  ;;  %v1698_v41 = vpop.f32.mrf.mxu1 }
 0x107   : > { %v1259_v58 = vadd.f32 %v1258_v40, %v1257_v38 }
 0x108   : > { %v1260_v43 = vpop.f32.mrf.mxu0  ;;  %v1700_v44 = vpop.f32.mrf.mxu1 }
 0x109   : > { %v756_v9 = vadd.f32 %v1259_v58, %v1707_v48 }
 0x10a   : > { %v1261_v46 = vpop.f32.mrf.mxu0  ;;  %v1702_v47 = vpop.f32.mrf.mxu1 }
 0x10b   : > { %v1262_v6 = vadd.f32 %v1261_v46, %v1260_v43 }
 0x10c   : > { %v1263_v51 = vpop.f32.mrf.mxu0  ;;  %v1377_v52 = vpop.f32.mrf.mxu1 }
 0x10d   : > { %v901_v54 = vadd.f32 %v1377_v52, %v740_v50  ;;  %v759_v24 = vadd.f32 %v1262_v6, %v1707_v48 }
 0x10e   : > { %v1264_v56 = vpop.f32.mrf.mxu0  ;;  %v892_v57 = vpop.f32.mrf.mxu1 }
 0x10f   : > { %v1021_v59 = vmax.f32 %v901_v54, 0.0  ;;  %v893_v60 = vadd.f32 %v892_v57, %v732_v55  ;;  %v1265_v28 = vadd.f32 %v1264_v56, %v1263_v51 }
 0x110   : > { %v1266_v62 = vpop.f32.mrf.mxu0  ;;  %v1378_v63 = vpop.f32.mrf.mxu1 }
 0x111   : > { %1053 = vst [vmem:[%s1715_s22 + $0x10] sm:$0xff] %v1021_v59  ;;  %v1019_v1 = vmax.f32 %v893_v60, 0.0  ;;  %v904_v2 = vadd.f32 %v1378_v63, %v743_v61  ;;  %v764_v50 = vadd.f32 %v1265_v28, %v1707_v48 }
 0x112   : > { %v1267_v4 = vpop.f32.mrf.mxu0  ;;  %v895_v5 = vpop.f32.mrf.mxu1 }
 0x113   : > { %1051 = vst [vmem:[%s1715_s22] sm:$0xff] %v1019_v1  ;;  %v1022_v7 = vmax.f32 %v904_v2, 0.0  ;;  %v896_v8 = vadd.f32 %v895_v5, %v735_v3  ;;  %v1268_v45 = vadd.f32 %v1267_v4, %v1266_v62 }
 0x114   : > { %v1269_v10 = vpop.f32.mrf.mxu0  ;;  %v1381_v11 = vpop.f32.mrf.mxu1 }
 0x115   : > { %1054 = vst [vmem:[%s1715_s22 + $0x18] sm:$0xff] %v1022_v7  ;;  %v1020_v14 = vmax.f32 %v896_v8, 0.0  ;;  %v917_v15 = vadd.f32 %v1381_v11, %v756_v9  ;;  %v767_v61 = vadd.f32 %v1268_v45, %v1707_v48 }
 0x116   : > { %v1270_v18 = vpop.f32.mrf.mxu0  ;;  %v908_v19 = vpop.f32.mrf.mxu1 }
 0x117   : > { %1052 = vst [vmem:[%s1715_s22 + $0x8] sm:$0xff] %v1020_v14  ;;  %v1025_v20 = vmax.f32 %v917_v15, 0.0  ;;  %v1271_v21 = vadd.f32 %v1270_v18, %v1269_v10  ;;  %v909_v23 = vadd.f32 %v908_v19, %v748_v16 }
 0x118   : > { %v1272_v25 = vpop.f32.mrf.mxu0  ;;  %v1382_v26 = vpop.f32.mrf.mxu1 }
 0x119   : > { %1057 = vst [vmem:[%s1715_s22 + $0x30] sm:$0xff] %v1025_v20  ;;  %v1023_v29 = vmax.f32 %v909_v23, 0.0  ;;  %v920_v30 = vadd.f32 %v1382_v26, %v759_v24  ;;  %v772_v40 = vadd.f32 %v1271_v21, %v1707_v48 }
 0x11a   : > { %v1273_v33 = vpop.f32.mrf.mxu0  ;;  %v911_v34 = vpop.f32.mrf.mxu1 }
 0x11b   : > { %1055 = vst [vmem:[%s1715_s22 + $0x20] sm:$0xff] %v1023_v29  ;;  %v1026_v35 = vmax.f32 %v920_v30, 0.0  ;;  %v1274_v36 = vadd.f32 %v1273_v33, %v1272_v25  ;;  %v912_v38 = vadd.f32 %v911_v34, %v751_v31 }
 0x11c   : > { %v1275_v42 = vpop.f32.mrf.mxu0  ;;  %v1385_v43 = vpop.f32.mrf.mxu1 }
 0x11d   : > { %1058 = vst [vmem:[%s1715_s22 + $0x38] sm:$0xff] %v1026_v35  ;;  %v1024_v46 = vmax.f32 %v912_v38, 0.0  ;;  %v933_v49 = vadd.f32 %v1385_v43, %v772_v40  ;;  %v775_v55 = vadd.f32 %v1274_v36, %v1707_v48 }
 0x11e   : > { %v1276_v51 = vpop.f32.mrf.mxu0  ;;  %v924_v52 = vpop.f32.mrf.mxu1 }
 0x11f   : > { %1056 = vst [vmem:[%s1715_s22 + $0x28] sm:$0xff] %v1024_v46  ;;  %v1029_v53 = vmax.f32 %v933_v49, 0.0  ;;  %v925_v54 = vadd.f32 %v924_v52, %v764_v50  ;;  %v1277_v58 = vadd.f32 %v1276_v51, %v1275_v42 }
 0x120   : > { %v1278_v56 = vpop.f32.mrf.mxu0  ;;  %v1386_v57 = vpop.f32.mrf.mxu1 }
 0x121   : > { %1061 = vst [vmem:[%s1715_s22 + $0x50] sm:$0xff] %v1029_v53  ;;  %v1027_v59 = vmax.f32 %v925_v54, 0.0  ;;  %v936_v60 = vadd.f32 %v1386_v57, %v775_v55  ;;  %v780_v6 = vadd.f32 %v1277_v58, %v1707_v48 }
 0x122   : > { %v1279_v62 = vpop.f32.mrf.mxu0  ;;  %v927_v63 = vpop.f32.mrf.mxu1 }
 0x123   : > { %1059 = vst [vmem:[%s1715_s22 + $0x40] sm:$0xff] %v1027_v59  ;;  %v1030_v0 = vmax.f32 %v936_v60, 0.0  ;;  %v928_v1 = vadd.f32 %v927_v63, %v767_v61  ;;  %v1280_v4 = vadd.f32 %v1279_v62, %v1278_v56 }
 0x124   : > { %v1281_v2 = vpop.f32.mrf.mxu0  ;;  %v1389_v3 = vpop.f32.mrf.mxu1 }
 0x125   : > { %1062 = vst [vmem:[%s1715_s22 + $0x58] sm:$0xff] %v1030_v0  ;;  %v1028_v5 = vmax.f32 %v928_v1, 0.0  ;;  %v783_v16 = vadd.f32 %v1280_v4, %v1707_v48  ;;  %v836_v1 = vadd.f32 %v1688_v22, %v1707_v48 }
 0x126   : > { %v1282_v7 = vpop.f32.mrf.mxu0  ;;  %v940_v8 = vpop.f32.mrf.mxu1 }
 0x127   : > { %1060 = vst [vmem:[%s1715_s22 + $0x48] sm:$0xff] %v1028_v5  ;;  %v1283_v9 = vadd.f32 %v1282_v7, %v1281_v2  ;;  %v941_v10 = vadd.f32 %v940_v8, %v780_v6  ;;  %v828_v7 = vadd.f32 %v1684_v12, %v1707_v48  ;;  %v1331_v8 = vadd.f32 %v1698_v41, %v1696_v39 }
 0x128   : > { %v1284_v11 = vpop.f32.mrf.mxu0  ;;  %v1390_v13 = vpop.f32.mrf.mxu1  ;;  %v831_v12 = vadd.f32 %v1686_v17, %v1707_v48 }
 0x129   : > { %v788_v14 = vadd.f32 %v1283_v9, %v1707_v48  ;;  %v1031_v15 = vmax.f32 %v941_v10, 0.0 }
 0x12a   : > { %v1285_v18 = vpop.f32.mrf.mxu0  ;;  %v943_v19 = vpop.f32.mrf.mxu1 }
 0x12b   : > { %v949_v20 = vadd.f32 %v1389_v3, %v788_v14  ;;  %1063 = vst [vmem:[%s1715_s22 + $0x60] sm:$0xff] %v1031_v15  ;;  %v1286_v21 = vadd.f32 %v1285_v18, %v1284_v11  ;;  %v944_v23 = vadd.f32 %v943_v19, %v783_v16  ;;  %v839_v11 = vadd.f32 %v1690_v27, %v1707_v48 }
 0x12c   : > { %v1287_v24 = vpop.f32.mrf.mxu0  ;;  %v1393_v25 = vpop.f32.mrf.mxu1  ;;  %v1334_v27 = vadd.f32 %v1702_v47, %v1700_v44 }
 0x12d   : > { %v1033_v26 = vmax.f32 %v949_v20, 0.0  ;;  %v791_v28 = vadd.f32 %v1286_v21, %v1707_v48  ;;  %v1032_v29 = vmax.f32 %v944_v23, 0.0 }
 0x12e   : > { %v1288_v30 = vpop.f32.mrf.mxu0  ;;  %v956_v31 = vpop.f32.mrf.mxu1 }
 0x12f   : > { %1065 = vst [vmem:[%s1715_s22 + $0x70] sm:$0xff] %v1033_v26  ;;  %v952_v33 = vadd.f32 %v1390_v13, %v791_v28  ;;  %1064 = vst [vmem:[%s1715_s22 + $0x68] sm:$0xff] %v1032_v29  ;;  %v1289_v34 = vadd.f32 %v1288_v30, %v1287_v24  ;;  %v852_v24 = vadd.f32 %v1331_v8, %v1707_v48 }
 0x130   : > { %v1290_v35 = vpop.f32.mrf.mxu0  ;;  %v1394_v36 = vpop.f32.mrf.mxu1 }
 0x131   : > { %v1034_v38 = vmax.f32 %v952_v33, 0.0  ;;  %v796_v40 = vadd.f32 %v1289_v34, %v1707_v48 }
 0x132   : > { %v1291_v42 = vpop.f32.mrf.mxu0  ;;  %v959_v43 = vpop.f32.mrf.mxu1 }
 0x133   : > { %1066 = vst [vmem:[%s1715_s22 + $0x78] sm:$0xff] %v1034_v38  ;;  %v957_v45 = vadd.f32 %v956_v31, %v796_v40  ;;  %v1292_v46 = vadd.f32 %v1291_v42, %v1290_v35  ;;  %v844_v31 = vadd.f32 %v1692_v32, %v1707_v48  ;;  %v855_v38 = vadd.f32 %v1334_v27, %v1707_v48 }
 0x134   : > { %v1293_v49 = vpop.f32.mrf.mxu0  ;;  %v1748_v50 = vpop.f32.mrf.mxu1 }
 0x135   : > { %v1035_v51 = vmax.f32 %v957_v45, 0.0  ;;  %v799_v52 = vadd.f32 %v1292_v46, %v1707_v48 }
 0x136   : > { %v1294_v53 = vpop.f32.mrf.mxu0  ;;  %v972_v54 = vpop.f32.mrf.mxu1 }
 0x137   : > { %1067 = vst [vmem:[%s1715_s22 + $0x80] sm:$0xff] %v1035_v51  ;;  %v960_v55 = vadd.f32 %v959_v43, %v799_v52  ;;  %v1295_v56 = vadd.f32 %v1294_v53, %v1293_v49  ;;  %v847_v49 = vadd.f32 %v1694_v37, %v1707_v48 }
 0x138   : > { %v1296_v57 = vpop.f32.mrf.mxu0  ;;  %v1752_v58 = vpop.f32.mrf.mxu1 }
 0x139   : > { %v1036_v59 = vmax.f32 %v960_v55, 0.0  ;;  %v804_v60 = vadd.f32 %v1295_v56, %v1707_v48 }
 0x13a   : > { %v1297_v61 = vpop.f32.mrf.mxu0  ;;  %v975_v62 = vpop.f32.mrf.mxu1 }
 0x13b   : > { %1068 = vst [vmem:[%s1715_s22 + $0x88] sm:$0xff] %v1036_v59  ;;  %v965_v63 = vadd.f32 %v1393_v25, %v804_v60  ;;  %v1298_v0 = vadd.f32 %v1297_v61, %v1296_v57 }
 0x13c   : > { %v1299_v2 = vpop.f32.mrf.mxu0  ;;  %v1401_v3 = vpop.f32.mrf.mxu1 }
 0x13d   : > { %v1037_v4 = vmax.f32 %v965_v63, 0.0  ;;  %v807_v5 = vadd.f32 %v1298_v0, %v1707_v48  ;;  %v997_v6 = vadd.f32 %v1401_v3, %v836_v1 }
 0x13e   : > { %v1300_v9 = vpop.f32.mrf.mxu0  ;;  %v988_v10 = vpop.f32.mrf.mxu1 }
 0x13f   : > { %1069 = vst [vmem:[%s1715_s22 + $0x90] sm:$0xff] %v1037_v4  ;;  %v968_v22 = vadd.f32 %v1394_v36, %v807_v5  ;;  %v1045_v13 = vmax.f32 %v997_v6, 0.0  ;;  %v1301_v14 = vadd.f32 %v1300_v9, %v1299_v2  ;;  %v989_v15 = vadd.f32 %v988_v10, %v828_v7 }
 0x140   : > { %v1302_v16 = vpop.f32.mrf.mxu0  ;;  %v1402_v18 = vpop.f32.mrf.mxu1 }
 0x141   : > { %v1038_v19 = vmax.f32 %v968_v22, 0.0  ;;  %1077 = vst [vmem:[%s1715_s22 + $0xd0] sm:$0xff] %v1045_v13  ;;  %v812_v39 = vadd.f32 %v1301_v14, %v1707_v48  ;;  %v1043_v41 = vmax.f32 %v989_v15, 0.0  ;;  %v1000_v20 = vadd.f32 %v1402_v18, %v839_v11 }
 0x142   : > { %v1303_v21 = vpop.f32.mrf.mxu0  ;;  %v991_v23 = vpop.f32.mrf.mxu1 }
 0x143   : > { %1070 = vst [vmem:[%s1715_s22 + $0x98] sm:$0xff] %v1038_v19  ;;  %v973_v25 = vadd.f32 %v972_v54, %v812_v39  ;;  %1075 = vst [vmem:[%s1715_s22 + $0xc0] sm:$0xff] %v1043_v41  ;;  %v1046_v26 = vmax.f32 %v1000_v20, 0.0  ;;  %v1304_v17 = vadd.f32 %v1303_v21, %v1302_v16  ;;  %v992_v28 = vadd.f32 %v991_v23, %v831_v12 }
 0x144   : > { %v1305_v29 = vpop.f32.mrf.mxu0  ;;  %v1405_v30 = vpop.f32.mrf.mxu1 }
 0x145   : > { %v1039_v33 = vmax.f32 %v973_v25, 0.0  ;;  %1078 = vst [vmem:[%s1715_s22 + $0xd8] sm:$0xff] %v1046_v26  ;;  %v815_v44 = vadd.f32 %v1304_v17, %v1707_v48  ;;  %v1044_v47 = vmax.f32 %v992_v28, 0.0  ;;  %v1013_v34 = vadd.f32 %v1405_v30, %v852_v24 }
 0x146   : > { %v1306_v35 = vpop.f32.mrf.mxu0  ;;  %v1004_v36 = vpop.f32.mrf.mxu1 }
 0x147   : > { %1071 = vst [vmem:[%s1715_s22 + $0xa0] sm:$0xff] %v1039_v33  ;;  %v976_v40 = vadd.f32 %v975_v62, %v815_v44  ;;  %1076 = vst [vmem:[%s1715_s22 + $0xc8] sm:$0xff] %v1044_v47  ;;  %v1049_v42 = vmax.f32 %v1013_v34, 0.0  ;;  %v1307_v43 = vadd.f32 %v1306_v35, %v1305_v29  ;;  %v1005_v45 = vadd.f32 %v1004_v36, %v844_v31 }
 0x148   : > { %v1308_v32 = vpop.f32.mrf.mxu0  ;;  %v1406_v46 = vpop.f32.mrf.mxu1 }
 0x149   : > { %v1040_v51 = vmax.f32 %v976_v40, 0.0  ;;  %1081 = vst [vmem:[%s1715_s22 + $0xf0] sm:$0xff] %v1049_v42  ;;  %v820_v52 = vadd.f32 %v1307_v43, %v1707_v48  ;;  %v1047_v53 = vmax.f32 %v1005_v45, 0.0  ;;  %v1016_v54 = vadd.f32 %v1406_v46, %v855_v38 }
 0x14a   : > { %v1309_v55 = vpop.f32.mrf.mxu0  ;;  %v1007_v56 = vpop.f32.mrf.mxu1 }
 0x14b   : > { %1072 = vst [vmem:[%s1715_s22 + $0xa8] sm:$0xff] %v1040_v51  ;;  %v981_v57 = vadd.f32 %v1748_v50, %v820_v52  ;;  %1079 = vst [vmem:[%s1715_s22 + $0xe0] sm:$0xff] %v1047_v53  ;;  %v1050_v59 = vmax.f32 %v1016_v54, 0.0  ;;  %v1310_v60 = vadd.f32 %v1309_v55, %v1308_v32  ;;  %v1008_v61 = vadd.f32 %v1007_v56, %v847_v49 }
 0x14d   : > { %v1041_v62 = vmax.f32 %v981_v57, 0.0  ;;  %1082 = vst [vmem:[%s1715_s22 + $0xf8] sm:$0xff] %v1050_v59  ;;  %v823_v37 = vadd.f32 %v1310_v60, %v1707_v48  ;;  %v1048_v63 = vmax.f32 %v1008_v61, 0.0 }
 0x14f   : > { %1073 = vst [vmem:[%s1715_s22 + $0xb0] sm:$0xff] %v1041_v62  ;;  %v984_v0 = vadd.f32 %v1752_v58, %v823_v37  ;;  %1080 = vst [vmem:[%s1715_s22 + $0xe8] sm:$0xff] %v1048_v63 }
 0x151   : > { %v1042_v1 = vmax.f32 %v984_v0, 0.0 }
 0x153   : > { %1074 = vst [vmem:[%s1715_s22 + $0xb8] sm:$0xff] %v1042_v1 }
 0x154 PF: > { %s13_s12 = sadd.s32 1, %s1526_s12  }
 0x155   : > { %p10_p4 = scmp.ge.s32.totalorder %s13_s12, 4  }
 0x157   :  { %12 = sbr.rel (!%p10_p4) target bundleno = 1 (0x1), region = 62 }

// kernel: featurenet_forward.11
= control target key start
LH: loop header
LB: loop body
LE: loop exit
PB: predicated region body
PF: predicated region fallthrough
CT: control target
= control target key end

     0   :  { %s336_s6 = smov 0   ;;  %s369_s0 = inlined_call_operand.vmem [shape: f32[2,7,7,256], index: 0, kind: input, shape index: {}]   ;;  %s370_s1 = inlined_call_operand.vmem [shape: f32[2,3,3,256], index: 1, kind: output, shape index: {}]  }
   0x1 LB: > { %s299_s7 = sadd.s32 4294967295, %s324_s6   ;;  %p303_p0 = scmp.ge.s32.totalorder %s324_s6, 1  ;;  %s324_s6 = sphi %s336_s6, %s11_s6  }
   0x2   : > { %p87_p1 = scmp.lt.s32.totalorder %s324_s6, 3 }
   0x4   : > { %p88_p2 = pnand %p303_p0, %p87_p1 }
   0x5   : > { %p107_p3 = scmp.lt.s32.totalorder (!%p88_p2), %s299_s7, 1 }
   0x6   : > { %91 = sbr.rel (%p88_p2) target bundleno = 38 (0x26), region = 24 }
   0xb   : > { %s372_s7 = smov (!%p107_p3, %s299_s7), 1  ;;  %vm215_vm0 = vcmask 1040384   ;;  %vm222_vm1 = vcmask 1041408  }
   0xc   : > { %s308_s8 = smul.u32 112, %s372_s7 }
   0xd   : > { %s309_s12 = smul.u32 24, %s372_s7 }
   0xe   : > { %s111_s11 = scalar_lea.vmem %s369_s0, %s308_s8 }
   0xf   : > { %v117_v0 = vld [vmem:[%s111_s11] sm:$0x7f]  ;;  %v118_v1 = vld [vmem:[%s111_s11 + $0x8] sm:$0x7f]  ;;  %v119_v2 = vld [vmem:[%s111_s11 + $0x10] sm:$0x7f]  ;;  %s116_s15 = scalar_lea.vmem %s370_s1, %s309_s12 }
  0x10   : > { %v120_v3 = vld [vmem:[%s111_s11 + $0x18] sm:$0x7f]  ;;  %v121_v4 = vld [vmem:[%s111_s11 + $0x20] sm:$0x7f]  ;;  %v122_v5 = vld [vmem:[%s111_s11 + $0x28] sm:$0x7f]  ;;  %v131_v6 = vmax.f32 %v117_v0, %v119_v2 }
  0x11   : > { %v132_v7 = vmax.f32 %v118_v1, %v120_v3  ;;  %v123_v8 = vld [vmem:[%s111_s11 + $0x30] sm:$0x7f]  ;;  %v124_v9 = vld [vmem:[%s111_s11 + $0x38] sm:$0x7f]  ;;  %v125_v10 = vld [vmem:[%s111_s11 + $0x40] sm:$0x7f] }
  0x12   : > { %v133_v11 = vmax.f32 %v131_v6, %v121_v4  ;;  %v126_v12 = vld [vmem:[%s111_s11 + $0x48] sm:$0x7f]  ;;  %v135_v13 = vmax.f32 %v121_v4, %v123_v8  ;;  %v136_v14 = vmax.f32 %v122_v5, %v124_v9  ;;  %v127_v15 = vld [vmem:[%s111_s11 + $0x50] sm:$0x7f]  ;;  %v128_v16 = vld [vmem:[%s111_s11 + $0x58] sm:$0x7f] }
  0x13   : > { %v134_v17 = vmax.f32 %v132_v7, %v122_v5  ;;  %v129_v18 = vld [vmem:[%s111_s11 + $0x60] sm:$0x7f]  ;;  %v130_v19 = vld [vmem:[%s111_s11 + $0x68] sm:$0x7f]  ;;  %v139_v20 = vmax.f32 %v125_v10, %v127_v15  ;;  %v140_v21 = vmax.f32 %v126_v12, %v128_v16 }
  0x14   : > { %v149_v22 = vrot.slane %v133_v11, 1  ;;  %v167_v23 = vrot.slane %v133_v11, 2  ;;  %v137_v24 = vmax.f32 %v135_v13, %v125_v10  ;;  %v138_v25 = vmax.f32 %v136_v14, %v126_v12 }
  0x15   : > { %v150_v26 = vrot.slane %v134_v17, 1  ;;  %v168_v27 = vrot.slane %v134_v17, 2  ;;  %v141_v28 = vmax.f32 %v139_v20, %v129_v18  ;;  %v142_v29 = vmax.f32 %v140_v21, %v130_v19 }
  0x16   : > { %v161_v30 = vmax.f32 %v133_v11, %v149_v22  ;;  %v151_v31 = vrot.slane %v137_v24, 1  ;;  %v152_v32 = vrot.slane %v138_v25, 1  ;;  %v169_v33 = vrot.slane %v137_v24, 2 }
  0x17   : > { %v162_v34 = vmax.f32 %v134_v17, %v150_v26  ;;  %v170_v35 = vrot.slane %v138_v25, 2  ;;  %v153_v36 = vrot.slane %v141_v28, 1  ;;  %v154_v37 = vrot.slane %v142_v29, 1 }
  0x18   : > { %v179_v38 = vmax.f32 %v161_v30, %v167_v23  ;;  %v163_v39 = vmax.f32 %v137_v24, %v151_v31  ;;  %v164_v40 = vmax.f32 %v138_v25, %v152_v32  ;;  %v171_v41 = vrot.slane %v141_v28, 2 }
  0x19   : > { %v180_v42 = vmax.f32 %v162_v34, %v168_v27  ;;  %v165_v43 = vmax.f32 %v141_v28, %v153_v36  ;;  %v166_v44 = vmax.f32 %v142_v29, %v154_v37  ;;  %v172_v45 = vrot.slane %v142_v29, 2 }
  0x1a   : > { %v191_v46 = vrot.slane %v179_v38, 1  ;;  %v203_v47 = vrot.slane %v179_v38, 2  ;;  %v181_v48 = vmax.f32 %v163_v39, %v169_v33  ;;  %v182_v49 = vmax.f32 %v164_v40, %v170_v35 }
  0x1b   : > { %v192_v50 = vrot.slane %v180_v42, 1  ;;  %v204_v51 = vrot.slane %v180_v42, 2  ;;  %v183_v52 = vmax.f32 %v165_v43, %v171_v41  ;;  %v184_v53 = vmax.f32 %v166_v44, %v172_v45 }
  0x1c   : > { %v216_v54 = vsel %vm215_vm0, %v179_v38, %v191_v46  ;;  %v193_v55 = vrot.slane %v181_v48, 1  ;;  %v194_v56 = vrot.slane %v182_v49, 1  ;;  %v205_v57 = vrot.slane %v181_v48, 2 }
  0x1d   : > { %v217_v58 = vsel %vm215_vm0, %v180_v42, %v192_v50  ;;  %v223_v59 = vsel %vm222_vm1, %v216_v54, %v203_v47  ;;  %v206_v60 = vrot.slane %v182_v49, 2  ;;  %v195_v61 = vrot.slane %v183_v52, 1 }
  0x1e   : > { %v224_v62 = vsel %vm222_vm1, %v217_v58, %v204_v51  ;;  %v218_v63 = vsel %vm215_vm0, %v181_v48, %v193_v55  ;;  %v219_v0 = vsel %vm215_vm0, %v182_v49, %v194_v56  ;;  %v196_v1 = vrot.slane %v184_v53, 1 }
  0x1f   : > { %v235_v2 = vcombine.low %v223_v59, %v224_v62  ;;  %v225_v3 = vsel %vm222_vm1, %v218_v63, %v205_v57  ;;  %v226_v4 = vsel %vm222_vm1, %v219_v0, %v206_v60  ;;  %v207_v5 = vrot.slane %v183_v52, 2 }
  0x20   : > { %v236_v6 = vcombine.low %v225_v3, %v226_v4  ;;  %v208_v7 = vrot.slane %v184_v53, 2  ;;  %v220_v8 = vsel %vm215_vm0, %v183_v52, %v195_v61  ;;  %v221_v9 = vsel %vm215_vm0, %v184_v53, %v196_v1 }
  0x21   : > { %241 = vst [vmem:[%s116_s15] sm:$0x77] %v235_v2  ;;  %v227_v10 = vsel %vm222_vm1, %v220_v8, %v207_v5 }
  0x22   : > { %242 = vst [vmem:[%s116_s15 + $0x8] sm:$0x77] %v236_v6  ;;  %v228_v11 = vsel %vm222_vm1, %v221_v9, %v208_v7 }
  0x23   : > { %v237_v12 = vcombine.low %v227_v10, %v228_v11 }
  0x25   : > { %243 = vst [vmem:[%s116_s15 + $0x10] sm:$0x77] %v237_v12 }
  0x26 PF: > { %s11_s6 = sadd.s32 1, %s324_s6  }
  0x27   : > { %p8_p4 = scmp.ge.s32.totalorder %s11_s6, 4  }
  0x29   :  { %10 = sbr.rel (!%p8_p4) target bundleno = 1 (0x1), region = 54 }

// kernel: featurenet_forward.10
= control target key start
LH: loop header
LB: loop body
LE: loop exit
PB: predicated region body
PF: predicated region fallthrough
CT: control target
= control target key end

     0   :  { %s8564_s1 = inlined_call_operand.vmem [shape: bf16[3200,256], index: 1, kind: input, shape index: {}]   ;;  %s8565_s0 = inlined_call_operand.vmem [shape: bf16[104,3200], index: 0, kind: input, shape index: {}]   ;;  %s8566_s2 = inlined_call_operand.vmem [shape: f32[1,256], index: 2, kind: input, shape index: {}]   ;;  %s8567_s3 = inlined_call_operand.vmem [shape: f32[104,256], index: 3, kind: output, shape index: {}]  }
   0x1   :  { %v5401_v0 = vld [vmem:[%s8564_s1 + $0x74] ss:$8 sps:$4 sm:$0xff]   ;;  %v5405_v2 = vld [vmem:[%s8564_s1 + $0x70] ss:$8 sps:$4 sm:$0xff]   ;;  %v5407_v4 = vld [vmem:[%s8564_s1 + $0x64] ss:$8 sps:$4 sm:$0xff]  }
   0x2   :  { %v5403_v1 = vld [vmem:[%s8564_s1 + $0x174] ss:$8 sps:$4 sm:$0xff]   ;;  %3440 = vmatprep.subr.bf16.mxu0 %v5401_v0  ;;  %v5406_v3 = vld [vmem:[%s8564_s1 + $0x170] ss:$8 sps:$4 sm:$0xff]   ;;  %v5409_v5 = vld [vmem:[%s8564_s1 + $0x164] ss:$8 sps:$4 sm:$0xff]  }
   0x3   :  { %3541 = vmatprep.subr.bf16.mxu1 %v5403_v1  ;;  %3441 = vmatpush1.bf16.msra.mxu0 %v5405_v2  ;;  %v5411_v6 = vld [vmem:[%s8564_s1 + $0x60] ss:$8 sps:$4 sm:$0xff]   ;;  %v5413_v8 = vld [vmem:[%s8564_s1 + $0x54] ss:$8 sps:$4 sm:$0xff]   ;;  %v5417_v10 = vld [vmem:[%s8564_s1 + $0x50] ss:$8 sps:$4 sm:$0xff]  }
   0x4   :  { %3542 = vmatpush1.bf16.msra.mxu1 %v5406_v3  ;;  %3442 = vmatprep.subr.bf16.mxu0 %v5407_v4  ;;  %v5412_v7 = vld [vmem:[%s8564_s1 + $0x160] ss:$8 sps:$4 sm:$0xff]   ;;  %v5415_v9 = vld [vmem:[%s8564_s1 + $0x154] ss:$8 sps:$4 sm:$0xff]   ;;  %v5418_v11 = vld [vmem:[%s8564_s1 + $0x150] ss:$8 sps:$4 sm:$0xff]  }
   0x5   :  { %3543 = vmatprep.subr.bf16.mxu1 %v5409_v5  ;;  %v5419_v12 = vld [vmem:[%s8564_s1 + $0x44] ss:$8 sps:$4 sm:$0xff]   ;;  %v5423_v14 = vld [vmem:[%s8564_s1 + $0x40] ss:$8 sps:$4 sm:$0xff]   ;;  %v5425_v16 = vld [vmem:[%s8564_s1 + $0x34] ss:$8 sps:$4 sm:$0xff]  }
   0x6   :  { %v5421_v13 = vld [vmem:[%s8564_s1 + $0x144] ss:$8 sps:$4 sm:$0xff]   ;;  %v5424_v15 = vld [vmem:[%s8564_s1 + $0x140] ss:$8 sps:$4 sm:$0xff]   ;;  %v5427_v17 = vld [vmem:[%s8564_s1 + $0x134] ss:$8 sps:$4 sm:$0xff]  }
   0x7   :  { %3443 = vmatpush1.bf16.msra.mxu0 %v5411_v6  ;;  %v5429_v18 = vld [vmem:[%s8564_s1 + $0x30] ss:$8 sps:$4 sm:$0xff]   ;;  %v5431_v20 = vld [vmem:[%s8564_s1 + $0x24] ss:$8 sps:$4 sm:$0xff]   ;;  %v5435_v22 = vld [vmem:[%s8564_s1 + $0x20] ss:$8 sps:$4 sm:$0xff]  }
   0x8   :  { %3544 = vmatpush1.bf16.msra.mxu1 %v5412_v7  ;;  %3444 = vmatprep.subr.bf16.mxu0 %v5413_v8  ;;  %v5430_v19 = vld [vmem:[%s8564_s1 + $0x130] ss:$8 sps:$4 sm:$0xff]   ;;  %v5433_v21 = vld [vmem:[%s8564_s1 + $0x124] ss:$8 sps:$4 sm:$0xff]   ;;  %v5436_v23 = vld [vmem:[%s8564_s1 + $0x120] ss:$8 sps:$4 sm:$0xff]  }
   0x9   :  { %3545 = vmatprep.subr.bf16.mxu1 %v5415_v9  ;;  %v5437_v24 = vld [vmem:[%s8564_s1 + $0x14] ss:$8 sps:$4 sm:$0xff]   ;;  %v5441_v26 = vld [vmem:[%s8564_s1 + $0x10] ss:$8 sps:$4 sm:$0xff]   ;;  %v5443_v28 = vld [vmem:[%s8564_s1 + $0x4] ss:$8 sps:$4 sm:$0xff]  }
   0xa   :  { %v5439_v25 = vld [vmem:[%s8564_s1 + $0x114] ss:$8 sps:$4 sm:$0xff]   ;;  %v5442_v27 = vld [vmem:[%s8564_s1 + $0x110] ss:$8 sps:$4 sm:$0xff]   ;;  %v5445_v29 = vld [vmem:[%s8564_s1 + $0x104] ss:$8 sps:$4 sm:$0xff]  }
   0xb   :  { %3445 = vmatpush1.bf16.msra.mxu0 %v5417_v10  ;;  %v5447_v30 = vld [vmem:[%s8564_s1] ss:$8 sps:$4 sm:$0xff]   ;;  %v5449_v32 = vld [vmem:[%s8564_s1 + $0xf4] ss:$8 sps:$4 sm:$0xff]   ;;  %v5453_v34 = vld [vmem:[%s8564_s1 + $0xf0] ss:$8 sps:$4 sm:$0xff]  }
   0xc   :  { %3546 = vmatpush1.bf16.msra.mxu1 %v5418_v11  ;;  %3446 = vmatprep.subr.bf16.mxu0 %v5419_v12  ;;  %v5448_v31 = vld [vmem:[%s8564_s1 + $0x100] ss:$8 sps:$4 sm:$0xff]   ;;  %v5451_v33 = vld [vmem:[%s8564_s1 + $0x1f4] ss:$8 sps:$4 sm:$0xff]   ;;  %v5454_v35 = vld [vmem:[%s8564_s1 + $0x1f0] ss:$8 sps:$4 sm:$0xff]  }
   0xd   :  { %3547 = vmatprep.subr.bf16.mxu1 %v5421_v13  ;;  %v5455_v36 = vld [vmem:[%s8564_s1 + $0xe4] ss:$8 sps:$4 sm:$0xff]   ;;  %v5459_v38 = vld [vmem:[%s8564_s1 + $0xe0] ss:$8 sps:$4 sm:$0xff]   ;;  %v5461_v40 = vld [vmem:[%s8564_s1 + $0xd4] ss:$8 sps:$4 sm:$0xff]  }
   0xe   :  { %v5457_v37 = vld [vmem:[%s8564_s1 + $0x1e4] ss:$8 sps:$4 sm:$0xff]   ;;  %v5460_v39 = vld [vmem:[%s8564_s1 + $0x1e0] ss:$8 sps:$4 sm:$0xff]   ;;  %v5463_v41 = vld [vmem:[%s8564_s1 + $0x1d4] ss:$8 sps:$4 sm:$0xff]  }
   0xf   :  { %3447 = vmatpush1.bf16.msra.mxu0 %v5423_v14  ;;  %v5465_v42 = vld [vmem:[%s8564_s1 + $0xd0] ss:$8 sps:$4 sm:$0xff]   ;;  %v5467_v44 = vld [vmem:[%s8564_s1 + $0xc4] ss:$8 sps:$4 sm:$0xff]   ;;  %v5471_v46 = vld [vmem:[%s8564_s1 + $0xc0] ss:$8 sps:$4 sm:$0xff]  }
  0x10   :  { %3548 = vmatpush1.bf16.msra.mxu1 %v5424_v15  ;;  %3448 = vmatprep.subr.bf16.mxu0 %v5425_v16  ;;  %v5466_v43 = vld [vmem:[%s8564_s1 + $0x1d0] ss:$8 sps:$4 sm:$0xff]   ;;  %v5469_v45 = vld [vmem:[%s8564_s1 + $0x1c4] ss:$8 sps:$4 sm:$0xff]   ;;  %v5472_v47 = vld [vmem:[%s8564_s1 + $0x1c0] ss:$8 sps:$4 sm:$0xff]  }
  0x11   :  { %3549 = vmatprep.subr.bf16.mxu1 %v5427_v17  ;;  %v5473_v48 = vld [vmem:[%s8564_s1 + $0xb4] ss:$8 sps:$4 sm:$0xff]   ;;  %v5499_v49 = vld [vmem:[%s8565_s0 + $0x4] ss:$100 sps:$4 sm:$0xff]   ;;  %v5502_v51 = vld [vmem:[%s8565_s0 + $0xc] ss:$100 sps:$4 sm:$0xff]  }
  0x12   :  { %v5475_v50 = vld [vmem:[%s8564_s1 + $0x1b4] ss:$8 sps:$4 sm:$0xff]   ;;  %3472 = vmatprep.mubr.bf16.mxu0 %v5499_v49  ;;  %v5477_v52 = vld [vmem:[%s8564_s1 + $0xb0] ss:$8 sps:$4 sm:$0xff]   ;;  %3573 = vmatprep.mubr.bf16.mxu1 %v5502_v51  ;;  %v5479_v54 = vld [vmem:[%s8564_s1 + $0xa4] ss:$8 sps:$4 sm:$0xff]  }
  0x13   :  { %3449 = vmatpush1.bf16.msra.mxu0 %v5429_v18  ;;  %v5478_v53 = vld [vmem:[%s8564_s1 + $0x1b0] ss:$8 sps:$4 sm:$0xff]   ;;  %v5481_v55 = vld [vmem:[%s8564_s1 + $0x1a4] ss:$8 sps:$4 sm:$0xff]   ;;  %v5483_v56 = vld [vmem:[%s8564_s1 + $0xa0] ss:$8 sps:$4 sm:$0xff]  }
  0x14   :  { %3550 = vmatpush1.bf16.msra.mxu1 %v5430_v19  ;;  %3450 = vmatprep.subr.bf16.mxu0 %v5431_v20  ;;  %v5484_v57 = vld [vmem:[%s8564_s1 + $0x1a0] ss:$8 sps:$4 sm:$0xff]   ;;  %v5485_v58 = vld [vmem:[%s8564_s1 + $0x94] ss:$8 sps:$4 sm:$0xff]   ;;  %v5489_v60 = vld [vmem:[%s8564_s1 + $0x90] ss:$8 sps:$4 sm:$0xff]  }
  0x15   :  { %3551 = vmatprep.subr.bf16.mxu1 %v5433_v21  ;;  %v5487_v59 = vld [vmem:[%s8564_s1 + $0x194] ss:$8 sps:$4 sm:$0xff]   ;;  %v5490_v61 = vld [vmem:[%s8564_s1 + $0x190] ss:$8 sps:$4 sm:$0xff]   ;;  %v5491_v62 = vld [vmem:[%s8564_s1 + $0x84] ss:$8 sps:$4 sm:$0xff]  }
  0x16   :  { %v5493_v63 = vld [vmem:[%s8564_s1 + $0x184] ss:$8 sps:$4 sm:$0xff]   ;;  %v5495_v0 = vld [vmem:[%s8564_s1 + $0x80] ss:$8 sps:$4 sm:$0xff]   ;;  %v5505_v2 = vld [vmem:[%s8564_s1 + $0x274] ss:$8 sps:$4 sm:$0xff]  }
  0x17   :  { %3451 = vmatpush1.bf16.msra.mxu0 %v5435_v22  ;;  %v5496_v1 = vld [vmem:[%s8564_s1 + $0x180] ss:$8 sps:$4 sm:$0xff]   ;;  %v5508_v3 = vld [vmem:[%s8564_s1 + $0x374] ss:$8 sps:$4 sm:$0xff]   ;;  %v5503_v6 = vld [vmem:[%s8564_s1 + $0x270] ss:$8 sps:$4 sm:$0xff]  }
  0x18   :  { %3552 = vmatpush1.bf16.msra.mxu1 %v5436_v23  ;;  %3452 = vmatprep.subr.bf16.mxu0 %v5437_v24  ;;  %v5497_v4 = vld [vmem:[%s8565_s0] ss:$100 sps:$4 sm:$0xff]   ;;  %v5500_v5 = vld [vmem:[%s8565_s0 + $0x8] ss:$100 sps:$4 sm:$0xff]   ;;  %v5506_v7 = vld [vmem:[%s8564_s1 + $0x370] ss:$8 sps:$4 sm:$0xff]  }
  0x19   :  { %3553 = vmatprep.subr.bf16.mxu1 %v5439_v25  ;;  %v5511_v8 = vld [vmem:[%s8564_s1 + $0x264] ss:$8 sps:$4 sm:$0xff]   ;;  %v5524_v11 = vld [vmem:[%s8565_s0 + $0xd4] ss:$100 sps:$4 sm:$0xff]   ;;  %v5509_v12 = vld [vmem:[%s8564_s1 + $0x260] ss:$8 sps:$4 sm:$0xff]  }
  0x1a   :  { %v5514_v9 = vld [vmem:[%s8564_s1 + $0x364] ss:$8 sps:$4 sm:$0xff]   ;;  %v5512_v13 = vld [vmem:[%s8564_s1 + $0x360] ss:$8 sps:$4 sm:$0xff]   ;;  %v5517_v14 = vld [vmem:[%s8564_s1 + $0x254] ss:$8 sps:$4 sm:$0xff]  }
  0x1b   :  { %3453 = vmatpush1.bf16.msra.mxu0 %v5441_v26  ;;  %v5521_v10 = vld [vmem:[%s8565_s0 + $0xcc] ss:$100 sps:$4 sm:$0xff]   ;;  %v5520_v15 = vld [vmem:[%s8564_s1 + $0x354] ss:$8 sps:$4 sm:$0xff]   ;;  %v5526_v24 = vld [vmem:[%s8564_s1 + $0x240] ss:$8 sps:$4 sm:$0xff]  }
  0x1c   :  { %3554 = vmatpush1.bf16.msra.mxu1 %v5442_v27  ;;  %3454 = vmatprep.subr.bf16.mxu0 %v5443_v28  ;;  %v5515_v16 = vld [vmem:[%s8564_s1 + $0x250] ss:$8 sps:$4 sm:$0xff]   ;;  %v5523_v17 = vld [vmem:[%s8565_s0 + $0xc8] ss:$100 sps:$4 sm:$0xff]   ;;  %v5542_v23 = vld [vmem:[%s8565_s0 + $0x19c] ss:$100 sps:$4 sm:$0xff]  }
  0x1d   :  { %3555 = vmatprep.subr.bf16.mxu1 %v5445_v29  ;;  %v5532_v18 = vld [vmem:[%s8565_s0 + $0xd0] ss:$100 sps:$4 sm:$0xff]   ;;  %v5528_v20 = vld [vmem:[%s8564_s1 + $0x244] ss:$8 sps:$4 sm:$0xff]   ;;  %v5529_v25 = vld [vmem:[%s8564_s1 + $0x340] ss:$8 sps:$4 sm:$0xff]  }
  0x1e   :  { %v5518_v19 = vld [vmem:[%s8564_s1 + $0x350] ss:$8 sps:$4 sm:$0xff]   ;;  %v5531_v21 = vld [vmem:[%s8564_s1 + $0x344] ss:$8 sps:$4 sm:$0xff]   ;;  %v5535_v26 = vld [vmem:[%s8564_s1 + $0x234] ss:$8 sps:$4 sm:$0xff]  }
  0x1f   :  { %3455 = vmatpush1.bf16.msra.mxu0 %v5447_v30  ;;  %v5539_v22 = vld [vmem:[%s8565_s0 + $0x194] ss:$100 sps:$4 sm:$0xff]   ;;  %v5565_v49 = vld [vmem:[%s8564_s1 + $0x300] ss:$8 sps:$4 sm:$0xff]  }
  0x20   :  { %3556 = vmatpush1.bf16.msra.mxu1 %v5448_v31  ;;  %3456 = vmatprep.subr.bf16.mxu0 %v5449_v32  ;;  %v5538_v27 = vld [vmem:[%s8564_s1 + $0x334] ss:$8 sps:$4 sm:$0xff]   ;;  %v5533_v28 = vld [vmem:[%s8564_s1 + $0x230] ss:$8 sps:$4 sm:$0xff]   ;;  %v5546_v32 = vld [vmem:[%s8564_s1 + $0x224] ss:$8 sps:$4 sm:$0xff]  }
  0x21   :  { %3557 = vmatprep.subr.bf16.mxu1 %v5451_v33  ;;  %v5541_v29 = vld [vmem:[%s8565_s0 + $0x190] ss:$100 sps:$4 sm:$0xff]   ;;  %v5550_v30 = vld [vmem:[%s8565_s0 + $0x198] ss:$100 sps:$4 sm:$0xff]   ;;  %v5549_v33 = vld [vmem:[%s8564_s1 + $0x324] ss:$8 sps:$4 sm:$0xff]  }
  0x22   :  { %v5536_v31 = vld [vmem:[%s8564_s1 + $0x330] ss:$8 sps:$4 sm:$0xff]   ;;  %v5574_v51 = vld [vmem:[%s8564_s1 + $0x3f4] ss:$8 sps:$4 sm:$0xff]  }
  0x23   :  { %3457 = vmatpush2.bf16.msra.mxu0 %v5453_v34  ;;  %v5557_v34 = vld [vmem:[%s8565_s0 + $0x25c] ss:$100 sps:$4 sm:$0xff]  }
  0x24   :  { %3558 = vmatpush2.bf16.msra.mxu1 %v5454_v35  ;;  %3458 = vmatprep.subr.bf16.mxu0 %v5455_v36  ;;  %v5560_v35 = vld [vmem:[%s8565_s0 + $0x264] ss:$100 sps:$4 sm:$0xff]  }
  0x25   :  { %3559 = vmatprep.subr.bf16.mxu1 %v5457_v37  ;;  %v5544_v36 = vld [vmem:[%s8564_s1 + $0x220] ss:$8 sps:$4 sm:$0xff]  }
  0x26   :  { %v5547_v37 = vld [vmem:[%s8564_s1 + $0x320] ss:$8 sps:$4 sm:$0xff]  }
  0x27   :  { %3459 = vmatpush2.bf16.msra.mxu0 %v5459_v38  ;;  %v5553_v38 = vld [vmem:[%s8564_s1 + $0x214] ss:$8 sps:$4 sm:$0xff]  }
  0x28   :  { %3560 = vmatpush2.bf16.msra.mxu1 %v5460_v39  ;;  %3460 = vmatprep.subr.bf16.mxu0 %v5461_v40  ;;  %v5556_v39 = vld [vmem:[%s8564_s1 + $0x314] ss:$8 sps:$4 sm:$0xff]   ;;  %v5551_v40 = vld [vmem:[%s8564_s1 + $0x210] ss:$8 sps:$4 sm:$0xff]  }
  0x29   :  { %3561 = vmatprep.subr.bf16.mxu1 %v5463_v41  ;;  %v5559_v41 = vld [vmem:[%s8565_s0 + $0x258] ss:$100 sps:$4 sm:$0xff]  }
  0x2b   :  { %3461 = vmatpush2.bf16.msra.mxu0 %v5465_v42  ;;  %v5568_v42 = vld [vmem:[%s8565_s0 + $0x260] ss:$100 sps:$4 sm:$0xff]  }
  0x2c   :  { %3562 = vmatpush2.bf16.msra.mxu1 %v5466_v43  ;;  %3462 = vmatprep.subr.bf16.mxu0 %v5467_v44  ;;  %v5554_v43 = vld [vmem:[%s8564_s1 + $0x310] ss:$8 sps:$4 sm:$0xff]   ;;  %v5564_v44 = vld [vmem:[%s8564_s1 + $0x204] ss:$8 sps:$4 sm:$0xff]  }
  0x2d   :  { %3563 = vmatprep.subr.bf16.mxu1 %v5469_v45  ;;  %v5567_v45 = vld [vmem:[%s8564_s1 + $0x304] ss:$8 sps:$4 sm:$0xff]  }
  0x2f   :  { %3463 = vmatpush2.bf16.msra.mxu0 %v5471_v46  ;;  %v5575_v46 = vld [vmem:[%s8565_s0 + $0x324] ss:$100 sps:$4 sm:$0xff]  }
  0x30   :  { %3564 = vmatpush2.bf16.msra.mxu1 %v5472_v47  ;;  %3464 = vmatprep.subr.bf16.mxu0 %v5473_v48  ;;  %v5578_v47 = vld [vmem:[%s8565_s0 + $0x32c] ss:$100 sps:$4 sm:$0xff]   ;;  %v5562_v48 = vld [vmem:[%s8564_s1 + $0x200] ss:$8 sps:$4 sm:$0xff]  }
  0x31   :  { %3565 = vmatprep.subr.bf16.mxu1 %v5475_v50  ;;  %v5571_v50 = vld [vmem:[%s8564_s1 + $0x2f4] ss:$8 sps:$4 sm:$0xff]  }
  0x33   :  { %3465 = vmatpush2.bf16.msra.mxu0 %v5477_v52  ;;  %v5569_v52 = vld [vmem:[%s8564_s1 + $0x2f0] ss:$8 sps:$4 sm:$0xff]  }
  0x34   :  { %3566 = vmatpush2.bf16.msra.mxu1 %v5478_v53  ;;  %3466 = vmatprep.subr.bf16.mxu0 %v5479_v54  ;;  %v5577_v53 = vld [vmem:[%s8565_s0 + $0x320] ss:$100 sps:$4 sm:$0xff]   ;;  %v5586_v54 = vld [vmem:[%s8565_s0 + $0x328] ss:$100 sps:$4 sm:$0xff]  }
  0x35   :  { %3567 = vmatprep.subr.bf16.mxu1 %v5481_v55  ;;  %v5572_v55 = vld [vmem:[%s8564_s1 + $0x3f0] ss:$8 sps:$4 sm:$0xff]  }
  0x37   :  { %3467 = vmatpush2.bf16.msra.mxu0 %v5483_v56  ;;  %v5582_v56 = vld [vmem:[%s8564_s1 + $0x2e4] ss:$8 sps:$4 sm:$0xff]  }
  0x38   :  { %3568 = vmatpush2.bf16.msra.mxu1 %v5484_v57  ;;  %3468 = vmatprep.subr.bf16.mxu0 %v5485_v58  ;;  %v5585_v57 = vld [vmem:[%s8564_s1 + $0x3e4] ss:$8 sps:$4 sm:$0xff]  }
  0x39   :  { %3569 = vmatprep.subr.bf16.mxu1 %v5487_v59  ;;  %v5593_v58 = vld [vmem:[%s8565_s0 + $0x3ec] ss:$100 sps:$4 sm:$0xff]   ;;  %v5580_v59 = vld [vmem:[%s8564_s1 + $0x2e0] ss:$8 sps:$4 sm:$0xff]  }
  0x3b   :  { %3469 = vmatpush2.bf16.msra.mxu0 %v5489_v60  ;;  %v5596_v60 = vld [vmem:[%s8565_s0 + $0x3f4] ss:$100 sps:$4 sm:$0xff]  }
  0x3c   :  { %3570 = vmatpush2.bf16.msra.mxu1 %v5490_v61  ;;  %3470 = vmatprep.subr.bf16.mxu0 %v5491_v62  ;;  %v5583_v61 = vld [vmem:[%s8564_s1 + $0x3e0] ss:$8 sps:$4 sm:$0xff]   ;;  %v5589_v62 = vld [vmem:[%s8564_s1 + $0x2d4] ss:$8 sps:$4 sm:$0xff]  }
  0x3d   :  { %3571 = vmatprep.subr.bf16.mxu1 %v5493_v63  ;;  %v5592_v63 = vld [vmem:[%s8564_s1 + $0x3d4] ss:$8 sps:$4 sm:$0xff]  }
  0x3f   :  { %3471 = vmatpush2.bf16.msra.mxu0 %v5495_v0  ;;  %v5595_v0 = vld [vmem:[%s8565_s0 + $0x3e8] ss:$100 sps:$4 sm:$0xff]  }
  0x40   :  { %3572 = vmatpush2.bf16.msra.mxu1 %v5496_v1  ;;  %3642 = vmatprep.subr.bf16.mxu0 %v5505_v2  ;;  %v5604_v1 = vld [vmem:[%s8565_s0 + $0x3f0] ss:$100 sps:$4 sm:$0xff]  }
  0x41   :  { %3743 = vmatprep.subr.bf16.mxu1 %v5508_v3  ;;  %v171_v2 = vld [vmem:[%s8565_s0 + $0x4b0] sm:$0xff]  ;;  %v172_v3 = vld [vmem:[%s8565_s0 + $0x4b8] sm:$0xff] }
  0x42   :  { %3473 = vmatmul.mubr.bf16.vlgmr.msra.gmra.mxu0 %v5497_v4  ;;  %v5587_v4 = vld [vmem:[%s8564_s1 + $0x2d0] ss:$8 sps:$4 sm:$0xff]  }
  0x43   :  { %3574 = vmatmul.mubr.bf16.vlgmr.msra.gmra.mxu1 %v5500_v5  ;;  %3643 = vmatpush1.bf16.msra.mxu0 %v5503_v6  ;;  %v5590_v5 = vld [vmem:[%s8564_s1 + $0x3d0] ss:$8 sps:$4 sm:$0xff]   ;;  %v5600_v6 = vld [vmem:[%s8564_s1 + $0x2c4] ss:$8 sps:$4 sm:$0xff]  }
  0x44   :  { %3744 = vmatpush1.bf16.msra.mxu1 %v5506_v7  ;;  %3644 = vmatprep.subr.bf16.mxu0 %v5511_v8  ;;  %v5603_v7 = vld [vmem:[%s8564_s1 + $0x3c4] ss:$8 sps:$4 sm:$0xff]   ;;  %v4960_v8 = vcombine.high %v171_v2, %v171_v2 }
  0x45   :  { %3745 = vmatprep.subr.bf16.mxu1 %v5514_v9  ;;  %3482 = vmatprep.mubr.bf16.mxu0 %v5521_v10  ;;  %v4962_v9 = vcombine.high %v172_v3, %v172_v3  ;;  %v5598_v10 = vld [vmem:[%s8564_s1 + $0x2c0] ss:$8 sps:$4 sm:$0xff]  }
  0x46   :  { %3583 = vmatprep.mubr.bf16.mxu1 %v5524_v11  ;;  %v5601_v11 = vld [vmem:[%s8564_s1 + $0x3c0] ss:$8 sps:$4 sm:$0xff]  }
  0x47   :  { %3645 = vmatpush1.bf16.msra.mxu0 %v5509_v12  ;;  %v5607_v12 = vld [vmem:[%s8564_s1 + $0x2b4] ss:$8 sps:$4 sm:$0xff]  }
  0x48   :  { %3746 = vmatpush1.bf16.msra.mxu1 %v5512_v13  ;;  %3646 = vmatprep.subr.bf16.mxu0 %v5517_v14  ;;  %v5610_v13 = vld [vmem:[%s8564_s1 + $0x3b4] ss:$8 sps:$4 sm:$0xff]   ;;  %v5605_v14 = vld [vmem:[%s8564_s1 + $0x2b0] ss:$8 sps:$4 sm:$0xff]  }
  0x49   :  { %3747 = vmatprep.subr.bf16.mxu1 %v5520_v15  ;;  %v4959_v15 = vcombine.low %v171_v2, %v171_v2  ;;  %v5681_v2 = vld [vmem:[%s8564_s1 + $0x420] ss:$8 sps:$4 sm:$0xff]  }
  0x4a   :  { %3483 = vmatmul.mubr.bf16.gmra.mxu0 %v5523_v17  ;;  %v5608_v17 = vld [vmem:[%s8564_s1 + $0x3b0] ss:$8 sps:$4 sm:$0xff]  }
  0x4b   :  { %3584 = vmatmul.mubr.bf16.gmra.mxu1 %v5532_v18  ;;  %3647 = vmatpush1.bf16.msra.mxu0 %v5515_v16  ;;  %v4961_v16 = vcombine.low %v172_v3, %v172_v3  ;;  %v5615_v18 = vld [vmem:[%s8564_s1 + $0x2a4] ss:$8 sps:$4 sm:$0xff]   ;;  %v5684_v3 = vld [vmem:[%s8564_s1 + $0x520] ss:$8 sps:$4 sm:$0xff]  }
  0x4c   :  { %3748 = vmatpush1.bf16.msra.mxu1 %v5518_v19  ;;  %3648 = vmatprep.subr.bf16.mxu0 %v5528_v20  ;;  %v5618_v19 = vld [vmem:[%s8564_s1 + $0x3a4] ss:$8 sps:$4 sm:$0xff]   ;;  %v5635_v20 = vld [vmem:[%s8565_s0 + $0x14] ss:$100 sps:$4 sm:$0xff]  }
  0x4d   :  { %3749 = vmatprep.subr.bf16.mxu1 %v5531_v21  ;;  %3492 = vmatprep.mubr.bf16.mxu0 %v5539_v22  ;;  %v5638_v21 = vld [vmem:[%s8565_s0 + $0x1c] ss:$100 sps:$4 sm:$0xff]  }
  0x4e   :  { %3593 = vmatprep.mubr.bf16.mxu1 %v5542_v23  ;;  %v5613_v22 = vld [vmem:[%s8564_s1 + $0x2a0] ss:$8 sps:$4 sm:$0xff]  }
  0x4f   :  { %3649 = vmatpush1.bf16.msra.mxu0 %v5526_v24  ;;  %v5616_v23 = vld [vmem:[%s8564_s1 + $0x3a0] ss:$8 sps:$4 sm:$0xff]   ;;  %v5622_v24 = vld [vmem:[%s8564_s1 + $0x294] ss:$8 sps:$4 sm:$0xff]  }
  0x50   :  { %3750 = vmatpush1.bf16.msra.mxu1 %v5529_v25  ;;  %3650 = vmatprep.subr.bf16.mxu0 %v5535_v26  ;;  %v5625_v25 = vld [vmem:[%s8564_s1 + $0x394] ss:$8 sps:$4 sm:$0xff]   ;;  %v5620_v26 = vld [vmem:[%s8564_s1 + $0x290] ss:$8 sps:$4 sm:$0xff]  }
  0x51   :  { %3751 = vmatprep.subr.bf16.mxu1 %v5538_v27  ;;  %v5623_v27 = vld [vmem:[%s8564_s1 + $0x390] ss:$8 sps:$4 sm:$0xff]  }
  0x52   :  { %3493 = vmatmul.mubr.bf16.gmra.mxu0 %v5541_v29  ;;  %v5632_v29 = vld [vmem:[%s8564_s1 + $0x384] ss:$8 sps:$4 sm:$0xff]  }
  0x53   :  { %3594 = vmatmul.mubr.bf16.gmra.mxu1 %v5550_v30  ;;  %3651 = vmatpush1.bf16.msra.mxu0 %v5533_v28  ;;  %v5629_v28 = vld [vmem:[%s8564_s1 + $0x284] ss:$8 sps:$4 sm:$0xff]   ;;  %v5627_v30 = vld [vmem:[%s8564_s1 + $0x280] ss:$8 sps:$4 sm:$0xff]  }
  0x54   :  { %3752 = vmatpush1.bf16.msra.mxu1 %v5536_v31  ;;  %3652 = vmatprep.subr.bf16.mxu0 %v5546_v32  ;;  %v5630_v31 = vld [vmem:[%s8564_s1 + $0x380] ss:$8 sps:$4 sm:$0xff]   ;;  %v5633_v32 = vld [vmem:[%s8565_s0 + $0x10] ss:$100 sps:$4 sm:$0xff]  }
  0x55   :  { %3753 = vmatprep.subr.bf16.mxu1 %v5549_v33  ;;  %3502 = vmatprep.mubr.bf16.mxu0 %v5557_v34  ;;  %v5641_v33 = vld [vmem:[%s8564_s1 + $0x474] ss:$8 sps:$4 sm:$0xff]  }
  0x56   :  { %3603 = vmatprep.mubr.bf16.mxu1 %v5560_v35  ;;  %v5644_v34 = vld [vmem:[%s8564_s1 + $0x574] ss:$8 sps:$4 sm:$0xff]  }
  0x57   :  { %3653 = vmatpush1.bf16.msra.mxu0 %v5544_v36  ;;  %v5636_v35 = vld [vmem:[%s8565_s0 + $0x18] ss:$100 sps:$4 sm:$0xff]  }
  0x58   :  { %3754 = vmatpush1.bf16.msra.mxu1 %v5547_v37  ;;  %3654 = vmatprep.subr.bf16.mxu0 %v5553_v38  ;;  %v5639_v36 = vld [vmem:[%s8564_s1 + $0x470] ss:$8 sps:$4 sm:$0xff]   ;;  %v5647_v38 = vld [vmem:[%s8564_s1 + $0x464] ss:$8 sps:$4 sm:$0xff]  }
  0x59   :  { %3755 = vmatprep.subr.bf16.mxu1 %v5556_v39  ;;  %v5642_v37 = vld [vmem:[%s8564_s1 + $0x570] ss:$8 sps:$4 sm:$0xff]   ;;  %v5650_v39 = vld [vmem:[%s8564_s1 + $0x564] ss:$8 sps:$4 sm:$0xff]  }
  0x5a   :  { %3503 = vmatmul.mubr.bf16.gmra.mxu0 %v5559_v41  ;;  %v5660_v41 = vld [vmem:[%s8565_s0 + $0xe4] ss:$100 sps:$4 sm:$0xff]  }
  0x5b   :  { %3604 = vmatmul.mubr.bf16.gmra.mxu1 %v5568_v42  ;;  %3655 = vmatpush1.bf16.msra.mxu0 %v5551_v40  ;;  %v5651_v40 = vld [vmem:[%s8565_s0 + $0xdc] ss:$100 sps:$4 sm:$0xff]  }
  0x5c   :  { %3756 = vmatpush1.bf16.msra.mxu1 %v5554_v43  ;;  %3656 = vmatprep.subr.bf16.mxu0 %v5564_v44  ;;  %v5645_v42 = vld [vmem:[%s8564_s1 + $0x460] ss:$8 sps:$4 sm:$0xff]   ;;  %v5653_v44 = vld [vmem:[%s8565_s0 + $0xd8] ss:$100 sps:$4 sm:$0xff]  }
  0x5d   :  { %3757 = vmatprep.subr.bf16.mxu1 %v5567_v45  ;;  %3512 = vmatprep.mubr.bf16.mxu0 %v5575_v46  ;;  %v5648_v43 = vld [vmem:[%s8564_s1 + $0x560] ss:$8 sps:$4 sm:$0xff]   ;;  %v5656_v45 = vld [vmem:[%s8564_s1 + $0x454] ss:$8 sps:$4 sm:$0xff]  }
  0x5e   :  { %3613 = vmatprep.mubr.bf16.mxu1 %v5578_v47  ;;  %v5659_v46 = vld [vmem:[%s8564_s1 + $0x554] ss:$8 sps:$4 sm:$0xff]   ;;  %v5654_v47 = vld [vmem:[%s8564_s1 + $0x450] ss:$8 sps:$4 sm:$0xff]  }
  0x5f   :  { %3657 = vmatpush1.bf16.msra.mxu0 %v5562_v48  ;;  %v5662_v48 = vld [vmem:[%s8565_s0 + $0xe0] ss:$100 sps:$4 sm:$0xff]  }
  0x60   :  { %3758 = vmatpush1.bf16.msra.mxu1 %v5565_v49  ;;  %3658 = vmatprep.subr.bf16.mxu0 %v5571_v50  ;;  %v5657_v49 = vld [vmem:[%s8564_s1 + $0x550] ss:$8 sps:$4 sm:$0xff]   ;;  %v5665_v50 = vld [vmem:[%s8564_s1 + $0x444] ss:$8 sps:$4 sm:$0xff]  }
  0x61   :  { %3759 = vmatprep.subr.bf16.mxu1 %v5574_v51  ;;  %v5668_v51 = vld [vmem:[%s8564_s1 + $0x544] ss:$8 sps:$4 sm:$0xff]  }
  0x62   :  { %3513 = vmatmul.mubr.bf16.gmra.mxu0 %v5577_v53  ;;  %v5678_v53 = vld [vmem:[%s8565_s0 + $0x1ac] ss:$100 sps:$4 sm:$0xff]  }
  0x63   :  { %3614 = vmatmul.mubr.bf16.gmra.mxu1 %v5586_v54  ;;  %3659 = vmatpush2.bf16.msra.mxu0 %v5569_v52  ;;  %v5669_v52 = vld [vmem:[%s8565_s0 + $0x1a4] ss:$100 sps:$4 sm:$0xff]  }
  0x64   :  { %3760 = vmatpush2.bf16.msra.mxu1 %v5572_v55  ;;  %3660 = vmatprep.subr.bf16.mxu0 %v5582_v56  ;;  %v5663_v54 = vld [vmem:[%s8564_s1 + $0x440] ss:$8 sps:$4 sm:$0xff]  }
  0x65   :  { %3761 = vmatprep.subr.bf16.mxu1 %v5585_v57  ;;  %3522 = vmatprep.mubr.bf16.mxu0 %v5593_v58  ;;  %v5666_v55 = vld [vmem:[%s8564_s1 + $0x540] ss:$8 sps:$4 sm:$0xff]   ;;  %v5674_v57 = vld [vmem:[%s8564_s1 + $0x434] ss:$8 sps:$4 sm:$0xff]  }
  0x66   :  { %3623 = vmatprep.mubr.bf16.mxu1 %v5596_v60  ;;  %v5671_v56 = vld [vmem:[%s8565_s0 + $0x1a0] ss:$100 sps:$4 sm:$0xff]   ;;  %v5677_v58 = vld [vmem:[%s8564_s1 + $0x534] ss:$8 sps:$4 sm:$0xff]   ;;  %v5680_v60 = vld [vmem:[%s8565_s0 + $0x1a8] ss:$100 sps:$4 sm:$0xff]  }
  0x67   :  { %3661 = vmatpush2.bf16.msra.mxu0 %v5580_v59  ;;  %v5672_v59 = vld [vmem:[%s8564_s1 + $0x430] ss:$8 sps:$4 sm:$0xff]  }
  0x68   :  { %3762 = vmatpush2.bf16.msra.mxu1 %v5583_v61  ;;  %3662 = vmatprep.subr.bf16.mxu0 %v5589_v62  ;;  %v5675_v61 = vld [vmem:[%s8564_s1 + $0x530] ss:$8 sps:$4 sm:$0xff]   ;;  %v5683_v62 = vld [vmem:[%s8564_s1 + $0x424] ss:$8 sps:$4 sm:$0xff]  }
  0x69   :  { %3763 = vmatprep.subr.bf16.mxu1 %v5592_v63  ;;  %v5686_v63 = vld [vmem:[%s8564_s1 + $0x524] ss:$8 sps:$4 sm:$0xff]  }
  0x6a   :  { %3523 = vmatmul.mubr.bf16.gmra.mxu0 %v5595_v0  ;;  %v5687_v0 = vld [vmem:[%s8565_s0 + $0x26c] ss:$100 sps:$4 sm:$0xff]  }
  0x6b   :  { %3624 = vmatmul.mubr.bf16.gmra.mxu1 %v5604_v1  ;;  %3663 = vmatpush2.bf16.msra.mxu0 %v5587_v4  ;;  %v5696_v1 = vld [vmem:[%s8565_s0 + $0x274] ss:$100 sps:$4 sm:$0xff]  }
  0x6c   :  { %3764 = vmatpush2.bf16.msra.mxu1 %v5590_v5  ;;  %3664 = vmatprep.subr.bf16.mxu0 %v5600_v6  ;;  %v5692_v4 = vld [vmem:[%s8564_s1 + $0x414] ss:$8 sps:$4 sm:$0xff]   ;;  %v5689_v6 = vld [vmem:[%s8565_s0 + $0x268] ss:$100 sps:$4 sm:$0xff]  }
  0x6d   :  { %3765 = vmatprep.subr.bf16.mxu1 %v5603_v7  ;;  %3532 = vmatprep.mubr.bf16.mxu0 %v4960_v8  ;;  %v5695_v5 = vld [vmem:[%s8564_s1 + $0x514] ss:$8 sps:$4 sm:$0xff]   ;;  %v5690_v7 = vld [vmem:[%s8564_s1 + $0x410] ss:$8 sps:$4 sm:$0xff]  }
  0x6e   :  { %3633 = vmatprep.mubr.bf16.mxu1 %v4962_v9  ;;  %v5698_v8 = vld [vmem:[%s8565_s0 + $0x270] ss:$100 sps:$4 sm:$0xff]  }
  0x6f   :  { %3665 = vmatpush2.bf16.msra.mxu0 %v5598_v10  ;;  %v5693_v9 = vld [vmem:[%s8564_s1 + $0x510] ss:$8 sps:$4 sm:$0xff]   ;;  %v5701_v10 = vld [vmem:[%s8564_s1 + $0x404] ss:$8 sps:$4 sm:$0xff]  }
  0x70   :  { %3766 = vmatpush2.bf16.msra.mxu1 %v5601_v11  ;;  %3666 = vmatprep.subr.bf16.mxu0 %v5607_v12  ;;  %v5704_v11 = vld [vmem:[%s8564_s1 + $0x504] ss:$8 sps:$4 sm:$0xff]   ;;  %v5705_v12 = vld [vmem:[%s8565_s0 + $0x334] ss:$100 sps:$4 sm:$0xff]  }
  0x71   :  { %3767 = vmatprep.subr.bf16.mxu1 %v5610_v13  ;;  %v5714_v13 = vld [vmem:[%s8565_s0 + $0x33c] ss:$100 sps:$4 sm:$0xff]  }
  0x72   :  { %3533 = vmatmul.mubr.bf16.gmra.mxu0 %v4959_v15  ;;  %v5702_v15 = vld [vmem:[%s8564_s1 + $0x500] ss:$8 sps:$4 sm:$0xff]  }
  0x73   :  { %3634 = vmatmul.mubr.bf16.gmra.mxu1 %v4961_v16  ;;  %3667 = vmatpush2.bf16.msra.mxu0 %v5605_v14  ;;  %v5699_v14 = vld [vmem:[%s8564_s1 + $0x400] ss:$8 sps:$4 sm:$0xff]   ;;  %v5710_v16 = vld [vmem:[%s8564_s1 + $0x4f4] ss:$8 sps:$4 sm:$0xff]  }
  0x74   :  { %3768 = vmatpush2.bf16.msra.mxu1 %v5608_v17  ;;  %3668 = vmatprep.subr.bf16.mxu0 %v5615_v18  ;;  %v5713_v17 = vld [vmem:[%s8564_s1 + $0x5f4] ss:$8 sps:$4 sm:$0xff]  }
  0x75   :  { %3769 = vmatprep.subr.bf16.mxu1 %v5618_v19  ;;  %3674 = vmatprep.mubr.bf16.mxu0 %v5635_v20  ;;  %v5707_v18 = vld [vmem:[%s8565_s0 + $0x330] ss:$100 sps:$4 sm:$0xff]  }
  0x76   :  { %3775 = vmatprep.mubr.bf16.mxu1 %v5638_v21  ;;  %v5708_v19 = vld [vmem:[%s8564_s1 + $0x4f0] ss:$8 sps:$4 sm:$0xff]  }
  0x77   :  { %3669 = vmatpush2.bf16.msra.mxu0 %v5613_v22  ;;  %v5711_v20 = vld [vmem:[%s8564_s1 + $0x5f0] ss:$8 sps:$4 sm:$0xff]   ;;  %v5719_v22 = vld [vmem:[%s8564_s1 + $0x4e4] ss:$8 sps:$4 sm:$0xff]  }
  0x78   :  { %3770 = vmatpush2.bf16.msra.mxu1 %v5616_v23  ;;  %3670 = vmatprep.subr.bf16.mxu0 %v5622_v24  ;;  %v5716_v21 = vld [vmem:[%s8565_s0 + $0x338] ss:$100 sps:$4 sm:$0xff]   ;;  %v5722_v23 = vld [vmem:[%s8564_s1 + $0x5e4] ss:$8 sps:$4 sm:$0xff]  }
  0x79   :  { %3771 = vmatprep.subr.bf16.mxu1 %v5625_v25  ;;  %v5723_v24 = vld [vmem:[%s8565_s0 + $0x3fc] ss:$100 sps:$4 sm:$0xff]   ;;  %v5732_v25 = vld [vmem:[%s8565_s0 + $0x404] ss:$100 sps:$4 sm:$0xff]  }
  0x7b   :  { %3671 = vmatpush2.bf16.msra.mxu0 %v5620_v26  ;;  %v5717_v26 = vld [vmem:[%s8564_s1 + $0x4e0] ss:$8 sps:$4 sm:$0xff]  }
  0x7c   :  { %3772 = vmatpush2.bf16.msra.mxu1 %v5623_v27  ;;  %3672 = vmatprep.subr.bf16.mxu0 %v5629_v28  ;;  %v5720_v27 = vld [vmem:[%s8564_s1 + $0x5e0] ss:$8 sps:$4 sm:$0xff]   ;;  %v5728_v28 = vld [vmem:[%s8564_s1 + $0x4d4] ss:$8 sps:$4 sm:$0xff]  }
  0x7d   :  { %3773 = vmatprep.subr.bf16.mxu1 %v5632_v29  ;;  %v5725_v29 = vld [vmem:[%s8565_s0 + $0x3f8] ss:$100 sps:$4 sm:$0xff]  }
  0x7f   :  { %3673 = vmatpush2.bf16.msra.mxu0 %v5627_v30  ;;  %v5731_v30 = vld [vmem:[%s8564_s1 + $0x5d4] ss:$8 sps:$4 sm:$0xff]  }
  0x80   :  { %3774 = vmatpush2.bf16.msra.mxu1 %v5630_v31  ;;  %3844 = vmatprep.subr.bf16.mxu0 %v5641_v33  ;;  %v5726_v31 = vld [vmem:[%s8564_s1 + $0x4d0] ss:$8 sps:$4 sm:$0xff]   ;;  %v5734_v33 = vld [vmem:[%s8565_s0 + $0x400] ss:$100 sps:$4 sm:$0xff]  }
  0x81   :  { %3945 = vmatprep.subr.bf16.mxu1 %v5644_v34  ;;  %v173_v34 = vld [vmem:[%s8565_s0 + $0x4c0] sm:$0xff] }
  0x82   :  { %3675 = vmatmul.mubr.bf16.vlgmr.msra.gmra.mxu0 %v5633_v32  ;;  %v5729_v32 = vld [vmem:[%s8564_s1 + $0x5d0] ss:$8 sps:$4 sm:$0xff]  }
  0x83   :  { %3776 = vmatmul.mubr.bf16.vlgmr.msra.gmra.mxu1 %v5636_v35  ;;  %3845 = vmatpush1.bf16.msra.mxu0 %v5639_v36  ;;  %v174_v35 = vld [vmem:[%s8565_s0 + $0x4c8] sm:$0xff] }
  0x84   :  { %3946 = vmatpush1.bf16.msra.mxu1 %v5642_v37  ;;  %3846 = vmatprep.subr.bf16.mxu0 %v5647_v38  ;;  %v5737_v36 = vld [vmem:[%s8564_s1 + $0x4c4] ss:$8 sps:$4 sm:$0xff]   ;;  %v4964_v38 = vcombine.high %v173_v34, %v173_v34 }
  0x85   :  { %3947 = vmatprep.subr.bf16.mxu1 %v5650_v39  ;;  %3684 = vmatprep.mubr.bf16.mxu0 %v5651_v40  ;;  %v5740_v37 = vld [vmem:[%s8564_s1 + $0x5c4] ss:$8 sps:$4 sm:$0xff]   ;;  %v4966_v39 = vcombine.high %v174_v35, %v174_v35  ;;  %v5735_v40 = vld [vmem:[%s8564_s1 + $0x4c0] ss:$8 sps:$4 sm:$0xff]  }
  0x86   :  { %3785 = vmatprep.mubr.bf16.mxu1 %v5660_v41  ;;  %v5738_v41 = vld [vmem:[%s8564_s1 + $0x5c0] ss:$8 sps:$4 sm:$0xff]  }
  0x87   :  { %3847 = vmatpush1.bf16.msra.mxu0 %v5645_v42  ;;  %v5745_v42 = vld [vmem:[%s8564_s1 + $0x4b4] ss:$8 sps:$4 sm:$0xff]  }
  0x88   :  { %3948 = vmatpush1.bf16.msra.mxu1 %v5648_v43  ;;  %3848 = vmatprep.subr.bf16.mxu0 %v5656_v45  ;;  %v5748_v43 = vld [vmem:[%s8564_s1 + $0x5b4] ss:$8 sps:$4 sm:$0xff]   ;;  %v5743_v45 = vld [vmem:[%s8564_s1 + $0x4b0] ss:$8 sps:$4 sm:$0xff]  }
  0x89   :  { %3949 = vmatprep.subr.bf16.mxu1 %v5659_v46  ;;  %v5746_v46 = vld [vmem:[%s8564_s1 + $0x5b0] ss:$8 sps:$4 sm:$0xff]  }
  0x8a   :  { %3685 = vmatmul.mubr.bf16.gmra.mxu0 %v5653_v44  ;;  %v4963_v44 = vcombine.low %v173_v34, %v173_v34  ;;  %v5825_v34 = vld [vmem:[%s8565_s0 + $0x278] ss:$100 sps:$4 sm:$0xff]  }
  0x8b   :  { %3786 = vmatmul.mubr.bf16.gmra.mxu1 %v5662_v48  ;;  %3849 = vmatpush1.bf16.msra.mxu0 %v5654_v47  ;;  %v4965_v47 = vcombine.low %v174_v35, %v174_v35  ;;  %v5753_v48 = vld [vmem:[%s8564_s1 + $0x4a4] ss:$8 sps:$4 sm:$0xff]   ;;  %v5828_v35 = vld [vmem:[%s8564_s1 + $0x614] ss:$8 sps:$4 sm:$0xff]  }
  0x8c   :  { %3950 = vmatpush1.bf16.msra.mxu1 %v5657_v49  ;;  %3850 = vmatprep.subr.bf16.mxu0 %v5665_v50  ;;  %v5756_v49 = vld [vmem:[%s8564_s1 + $0x5a4] ss:$8 sps:$4 sm:$0xff]  }
  0x8d   :  { %3951 = vmatprep.subr.bf16.mxu1 %v5668_v51  ;;  %3694 = vmatprep.mubr.bf16.mxu0 %v5669_v52  ;;  %v5771_v50 = vld [vmem:[%s8565_s0 + $0x24] ss:$100 sps:$4 sm:$0xff]   ;;  %v5774_v51 = vld [vmem:[%s8565_s0 + $0x2c] ss:$100 sps:$4 sm:$0xff]  }
  0x8e   :  { %3795 = vmatprep.mubr.bf16.mxu1 %v5678_v53  ;;  %v5751_v52 = vld [vmem:[%s8564_s1 + $0x4a0] ss:$8 sps:$4 sm:$0xff]  }
  0x8f   :  { %3851 = vmatpush1.bf16.msra.mxu0 %v5663_v54  ;;  %v5754_v53 = vld [vmem:[%s8564_s1 + $0x5a0] ss:$8 sps:$4 sm:$0xff]   ;;  %v5759_v54 = vld [vmem:[%s8564_s1 + $0x494] ss:$8 sps:$4 sm:$0xff]  }
  0x90   :  { %3952 = vmatpush1.bf16.msra.mxu1 %v5666_v55  ;;  %3852 = vmatprep.subr.bf16.mxu0 %v5674_v57  ;;  %v5762_v55 = vld [vmem:[%s8564_s1 + $0x594] ss:$8 sps:$4 sm:$0xff]   ;;  %v5760_v57 = vld [vmem:[%s8564_s1 + $0x590] ss:$8 sps:$4 sm:$0xff]  }
  0x91   :  { %3953 = vmatprep.subr.bf16.mxu1 %v5677_v58  ;;  %v5765_v58 = vld [vmem:[%s8564_s1 + $0x484] ss:$8 sps:$4 sm:$0xff]  }
  0x92   :  { %3695 = vmatmul.mubr.bf16.gmra.mxu0 %v5671_v56  ;;  %v5757_v56 = vld [vmem:[%s8564_s1 + $0x490] ss:$8 sps:$4 sm:$0xff]  }
  0x93   :  { %3796 = vmatmul.mubr.bf16.gmra.mxu1 %v5680_v60  ;;  %3853 = vmatpush1.bf16.msra.mxu0 %v5672_v59  ;;  %v5768_v59 = vld [vmem:[%s8564_s1 + $0x584] ss:$8 sps:$4 sm:$0xff]   ;;  %v5763_v60 = vld [vmem:[%s8564_s1 + $0x480] ss:$8 sps:$4 sm:$0xff]  }
  0x94   :  { %3954 = vmatpush1.bf16.msra.mxu1 %v5675_v61  ;;  %3854 = vmatprep.subr.bf16.mxu0 %v5683_v62  ;;  %v5766_v61 = vld [vmem:[%s8564_s1 + $0x580] ss:$8 sps:$4 sm:$0xff]   ;;  %v5777_v62 = vld [vmem:[%s8564_s1 + $0x674] ss:$8 sps:$4 sm:$0xff]  }
  0x95   :  { %3955 = vmatprep.subr.bf16.mxu1 %v5686_v63  ;;  %3704 = vmatprep.mubr.bf16.mxu0 %v5687_v0  ;;  %v5780_v63 = vld [vmem:[%s8564_s1 + $0x774] ss:$8 sps:$4 sm:$0xff]   ;;  %v5769_v0 = vld [vmem:[%s8565_s0 + $0x20] ss:$100 sps:$4 sm:$0xff]  }
  0x96   :  { %3805 = vmatprep.mubr.bf16.mxu1 %v5696_v1  ;;  %v5772_v1 = vld [vmem:[%s8565_s0 + $0x28] ss:$100 sps:$4 sm:$0xff]  }
  0x97   :  { %3855 = vmatpush1.bf16.msra.mxu0 %v5681_v2  ;;  %v5775_v2 = vld [vmem:[%s8564_s1 + $0x670] ss:$8 sps:$4 sm:$0xff]  }
  0x98   :  { %3956 = vmatpush1.bf16.msra.mxu1 %v5684_v3  ;;  %3856 = vmatprep.subr.bf16.mxu0 %v5692_v4  ;;  %v5778_v3 = vld [vmem:[%s8564_s1 + $0x770] ss:$8 sps:$4 sm:$0xff]   ;;  %v5783_v4 = vld [vmem:[%s8564_s1 + $0x664] ss:$8 sps:$4 sm:$0xff]  }
  0x99   :  { %3957 = vmatprep.subr.bf16.mxu1 %v5695_v5  ;;  %v5786_v5 = vld [vmem:[%s8564_s1 + $0x764] ss:$8 sps:$4 sm:$0xff]  }
  0x9a   :  { %3705 = vmatmul.mubr.bf16.gmra.mxu0 %v5689_v6  ;;  %v5787_v6 = vld [vmem:[%s8565_s0 + $0xec] ss:$100 sps:$4 sm:$0xff]  }
  0x9b   :  { %3806 = vmatmul.mubr.bf16.gmra.mxu1 %v5698_v8  ;;  %3857 = vmatpush1.bf16.msra.mxu0 %v5690_v7  ;;  %v5796_v7 = vld [vmem:[%s8565_s0 + $0xf4] ss:$100 sps:$4 sm:$0xff]   ;;  %v5781_v8 = vld [vmem:[%s8564_s1 + $0x660] ss:$8 sps:$4 sm:$0xff]  }
  0x9c   :  { %3958 = vmatpush1.bf16.msra.mxu1 %v5693_v9  ;;  %3858 = vmatprep.subr.bf16.mxu0 %v5701_v10  ;;  %v5784_v9 = vld [vmem:[%s8564_s1 + $0x760] ss:$8 sps:$4 sm:$0xff]   ;;  %v5792_v10 = vld [vmem:[%s8564_s1 + $0x654] ss:$8 sps:$4 sm:$0xff]  }
  0x9d   :  { %3959 = vmatprep.subr.bf16.mxu1 %v5704_v11  ;;  %3714 = vmatprep.mubr.bf16.mxu0 %v5705_v12  ;;  %v5795_v11 = vld [vmem:[%s8564_s1 + $0x754] ss:$8 sps:$4 sm:$0xff]   ;;  %v5789_v12 = vld [vmem:[%s8565_s0 + $0xe8] ss:$100 sps:$4 sm:$0xff]  }
  0x9e   :  { %3815 = vmatprep.mubr.bf16.mxu1 %v5714_v13  ;;  %v5790_v13 = vld [vmem:[%s8564_s1 + $0x650] ss:$8 sps:$4 sm:$0xff]  }
  0x9f   :  { %3859 = vmatpush1.bf16.msra.mxu0 %v5699_v14  ;;  %v5793_v14 = vld [vmem:[%s8564_s1 + $0x750] ss:$8 sps:$4 sm:$0xff]  }
  0xa0   :  { %3960 = vmatpush1.bf16.msra.mxu1 %v5702_v15  ;;  %3860 = vmatprep.subr.bf16.mxu0 %v5710_v16  ;;  %v5798_v15 = vld [vmem:[%s8565_s0 + $0xf0] ss:$100 sps:$4 sm:$0xff]   ;;  %v5801_v16 = vld [vmem:[%s8564_s1 + $0x644] ss:$8 sps:$4 sm:$0xff]  }
  0xa1   :  { %3961 = vmatprep.subr.bf16.mxu1 %v5713_v17  ;;  %v5804_v17 = vld [vmem:[%s8564_s1 + $0x744] ss:$8 sps:$4 sm:$0xff]  }
  0xa2   :  { %3715 = vmatmul.mubr.bf16.gmra.mxu0 %v5707_v18  ;;  %v5805_v18 = vld [vmem:[%s8565_s0 + $0x1b4] ss:$100 sps:$4 sm:$0xff]  }
  0xa3   :  { %3816 = vmatmul.mubr.bf16.gmra.mxu1 %v5716_v21  ;;  %3861 = vmatpush2.bf16.msra.mxu0 %v5708_v19  ;;  %v5814_v19 = vld [vmem:[%s8565_s0 + $0x1bc] ss:$100 sps:$4 sm:$0xff]  }
  0xa4   :  { %3962 = vmatpush2.bf16.msra.mxu1 %v5711_v20  ;;  %3862 = vmatprep.subr.bf16.mxu0 %v5719_v22  ;;  %v5799_v20 = vld [vmem:[%s8564_s1 + $0x640] ss:$8 sps:$4 sm:$0xff]   ;;  %v5810_v22 = vld [vmem:[%s8564_s1 + $0x634] ss:$8 sps:$4 sm:$0xff]  }
  0xa5   :  { %3963 = vmatprep.subr.bf16.mxu1 %v5722_v23  ;;  %3724 = vmatprep.mubr.bf16.mxu0 %v5723_v24  ;;  %v5802_v21 = vld [vmem:[%s8564_s1 + $0x740] ss:$8 sps:$4 sm:$0xff]   ;;  %v5813_v23 = vld [vmem:[%s8564_s1 + $0x734] ss:$8 sps:$4 sm:$0xff]  }
  0xa6   :  { %3825 = vmatprep.mubr.bf16.mxu1 %v5732_v25  ;;  %v5807_v24 = vld [vmem:[%s8565_s0 + $0x1b0] ss:$100 sps:$4 sm:$0xff]  }
  0xa7   :  { %3863 = vmatpush2.bf16.msra.mxu0 %v5717_v26  ;;  %v5808_v25 = vld [vmem:[%s8564_s1 + $0x630] ss:$8 sps:$4 sm:$0xff]  }
  0xa8   :  { %3964 = vmatpush2.bf16.msra.mxu1 %v5720_v27  ;;  %3864 = vmatprep.subr.bf16.mxu0 %v5728_v28  ;;  %v5816_v26 = vld [vmem:[%s8565_s0 + $0x1b8] ss:$100 sps:$4 sm:$0xff]   ;;  %v5819_v28 = vld [vmem:[%s8564_s1 + $0x624] ss:$8 sps:$4 sm:$0xff]  }
  0xa9   :  { %3965 = vmatprep.subr.bf16.mxu1 %v5731_v30  ;;  %v5811_v27 = vld [vmem:[%s8564_s1 + $0x730] ss:$8 sps:$4 sm:$0xff]   ;;  %v5823_v30 = vld [vmem:[%s8565_s0 + $0x27c] ss:$100 sps:$4 sm:$0xff]  }
  0xaa   :  { %3725 = vmatmul.mubr.bf16.gmra.mxu0 %v5725_v29  ;;  %v5822_v29 = vld [vmem:[%s8564_s1 + $0x724] ss:$8 sps:$4 sm:$0xff]  }
  0xab   :  { %3826 = vmatmul.mubr.bf16.gmra.mxu1 %v5734_v33  ;;  %3865 = vmatpush2.bf16.msra.mxu0 %v5726_v31  ;;  %v5832_v31 = vld [vmem:[%s8565_s0 + $0x284] ss:$100 sps:$4 sm:$0xff]  }
  0xac   :  { %3966 = vmatpush2.bf16.msra.mxu1 %v5729_v32  ;;  %3866 = vmatprep.subr.bf16.mxu0 %v5737_v36  ;;  %v5817_v32 = vld [vmem:[%s8564_s1 + $0x620] ss:$8 sps:$4 sm:$0xff]   ;;  %v5831_v36 = vld [vmem:[%s8564_s1 + $0x714] ss:$8 sps:$4 sm:$0xff]  }
  0xad   :  { %3967 = vmatprep.subr.bf16.mxu1 %v5740_v37  ;;  %3734 = vmatprep.mubr.bf16.mxu0 %v4964_v38  ;;  %v5820_v33 = vld [vmem:[%s8564_s1 + $0x720] ss:$8 sps:$4 sm:$0xff]   ;;  %v5826_v37 = vld [vmem:[%s8564_s1 + $0x610] ss:$8 sps:$4 sm:$0xff]  }
  0xae   :  { %3835 = vmatprep.mubr.bf16.mxu1 %v4966_v39  ;;  %v5834_v38 = vld [vmem:[%s8565_s0 + $0x280] ss:$100 sps:$4 sm:$0xff]   ;;  %v5829_v39 = vld [vmem:[%s8564_s1 + $0x710] ss:$8 sps:$4 sm:$0xff]  }
  0xaf   :  { %3867 = vmatpush2.bf16.msra.mxu0 %v5735_v40  ;;  %v5837_v40 = vld [vmem:[%s8564_s1 + $0x604] ss:$8 sps:$4 sm:$0xff]  }
  0xb0   :  { %3968 = vmatpush2.bf16.msra.mxu1 %v5738_v41  ;;  %3868 = vmatprep.subr.bf16.mxu0 %v5745_v42  ;;  %v5840_v41 = vld [vmem:[%s8564_s1 + $0x704] ss:$8 sps:$4 sm:$0xff]  }
  0xb1   :  { %3969 = vmatprep.subr.bf16.mxu1 %v5748_v43  ;;  %v5841_v42 = vld [vmem:[%s8565_s0 + $0x344] ss:$100 sps:$4 sm:$0xff]   ;;  %v5850_v43 = vld [vmem:[%s8565_s0 + $0x34c] ss:$100 sps:$4 sm:$0xff]  }
  0xb2   :  { %3735 = vmatmul.mubr.bf16.gmra.mxu0 %v4963_v44  ;;  %v5835_v44 = vld [vmem:[%s8564_s1 + $0x600] ss:$8 sps:$4 sm:$0xff]  }
  0xb3   :  { %3836 = vmatmul.mubr.bf16.gmra.mxu1 %v4965_v47  ;;  %3869 = vmatpush2.bf16.msra.mxu0 %v5743_v45  ;;  %v5838_v45 = vld [vmem:[%s8564_s1 + $0x700] ss:$8 sps:$4 sm:$0xff]   ;;  %v5846_v47 = vld [vmem:[%s8564_s1 + $0x6f4] ss:$8 sps:$4 sm:$0xff]  }
  0xb4   :  { %3970 = vmatpush2.bf16.msra.mxu1 %v5746_v46  ;;  %3870 = vmatprep.subr.bf16.mxu0 %v5753_v48  ;;  %v5843_v46 = vld [vmem:[%s8565_s0 + $0x340] ss:$100 sps:$4 sm:$0xff]   ;;  %v5849_v48 = vld [vmem:[%s8564_s1 + $0x7f4] ss:$8 sps:$4 sm:$0xff]  }
  0xb5   :  { %3971 = vmatprep.subr.bf16.mxu1 %v5756_v49  ;;  %3876 = vmatprep.mubr.bf16.mxu0 %v5771_v50  ;;  %v5844_v49 = vld [vmem:[%s8564_s1 + $0x6f0] ss:$8 sps:$4 sm:$0xff]  }
  0xb6   :  { %3977 = vmatprep.mubr.bf16.mxu1 %v5774_v51  ;;  %v5847_v50 = vld [vmem:[%s8564_s1 + $0x7f0] ss:$8 sps:$4 sm:$0xff]   ;;  %v5852_v51 = vld [vmem:[%s8565_s0 + $0x348] ss:$100 sps:$4 sm:$0xff]  }
  0xb7   :  { %3871 = vmatpush2.bf16.msra.mxu0 %v5751_v52  ;;  %v5855_v52 = vld [vmem:[%s8564_s1 + $0x6e4] ss:$8 sps:$4 sm:$0xff]  }
  0xb8   :  { %3972 = vmatpush2.bf16.msra.mxu1 %v5754_v53  ;;  %3872 = vmatprep.subr.bf16.mxu0 %v5759_v54  ;;  %v5858_v53 = vld [vmem:[%s8564_s1 + $0x7e4] ss:$8 sps:$4 sm:$0xff]  }
  0xb9   :  { %3973 = vmatprep.subr.bf16.mxu1 %v5762_v55  ;;  %v5859_v54 = vld [vmem:[%s8565_s0 + $0x40c] ss:$100 sps:$4 sm:$0xff]   ;;  %v5868_v55 = vld [vmem:[%s8565_s0 + $0x414] ss:$100 sps:$4 sm:$0xff]  }
  0xbb   :  { %3873 = vmatpush2.bf16.msra.mxu0 %v5757_v56  ;;  %v5853_v56 = vld [vmem:[%s8564_s1 + $0x6e0] ss:$8 sps:$4 sm:$0xff]  }
  0xbc   :  { %3974 = vmatpush2.bf16.msra.mxu1 %v5760_v57  ;;  %3874 = vmatprep.subr.bf16.mxu0 %v5765_v58  ;;  %v5856_v57 = vld [vmem:[%s8564_s1 + $0x7e0] ss:$8 sps:$4 sm:$0xff]   ;;  %v5864_v58 = vld [vmem:[%s8564_s1 + $0x6d4] ss:$8 sps:$4 sm:$0xff]  }
  0xbd   :  { %3975 = vmatprep.subr.bf16.mxu1 %v5768_v59  ;;  %v5861_v59 = vld [vmem:[%s8565_s0 + $0x408] ss:$100 sps:$4 sm:$0xff]  }
  0xbf   :  { %3875 = vmatpush2.bf16.msra.mxu0 %v5763_v60  ;;  %v5867_v60 = vld [vmem:[%s8564_s1 + $0x7d4] ss:$8 sps:$4 sm:$0xff]  }
  0xc0   :  { %3976 = vmatpush2.bf16.msra.mxu1 %v5766_v61  ;;  %4046 = vmatprep.subr.bf16.mxu0 %v5777_v62  ;;  %v5862_v61 = vld [vmem:[%s8564_s1 + $0x6d0] ss:$8 sps:$4 sm:$0xff]  }
  0xc1   :  { %4147 = vmatprep.subr.bf16.mxu1 %v5780_v63  ;;  %v5870_v62 = vld [vmem:[%s8565_s0 + $0x410] ss:$100 sps:$4 sm:$0xff]  }
  0xc2   :  { %3877 = vmatmul.mubr.bf16.vlgmr.msra.gmra.mxu0 %v5769_v0  ;;  %v175_v63 = vld [vmem:[%s8565_s0 + $0x4d0] sm:$0xff]  ;;  %v176_v0 = vld [vmem:[%s8565_s0 + $0x4d8] sm:$0xff] }
  0xc3   :  { %3978 = vmatmul.mubr.bf16.vlgmr.msra.gmra.mxu1 %v5772_v1  ;;  %4047 = vmatpush1.bf16.msra.mxu0 %v5775_v2  ;;  %v5865_v1 = vld [vmem:[%s8564_s1 + $0x7d0] ss:$8 sps:$4 sm:$0xff]   ;;  %v5873_v2 = vld [vmem:[%s8564_s1 + $0x6c4] ss:$8 sps:$4 sm:$0xff]  }
  0xc4   :  { %4148 = vmatpush1.bf16.msra.mxu1 %v5778_v3  ;;  %4048 = vmatprep.subr.bf16.mxu0 %v5783_v4  ;;  %v5876_v3 = vld [vmem:[%s8564_s1 + $0x7c4] ss:$8 sps:$4 sm:$0xff]   ;;  %v4968_v4 = vcombine.high %v175_v63, %v175_v63 }
  0xc5   :  { %4149 = vmatprep.subr.bf16.mxu1 %v5786_v5  ;;  %3886 = vmatprep.mubr.bf16.mxu0 %v5787_v6  ;;  %v4970_v5 = vcombine.high %v176_v0, %v176_v0  ;;  %v5871_v6 = vld [vmem:[%s8564_s1 + $0x6c0] ss:$8 sps:$4 sm:$0xff]  }
  0xc6   :  { %3987 = vmatprep.mubr.bf16.mxu1 %v5796_v7  ;;  %v5874_v7 = vld [vmem:[%s8564_s1 + $0x7c0] ss:$8 sps:$4 sm:$0xff]  }
  0xc7   :  { %4049 = vmatpush1.bf16.msra.mxu0 %v5781_v8  ;;  %v5881_v8 = vld [vmem:[%s8564_s1 + $0x6b4] ss:$8 sps:$4 sm:$0xff]  }
  0xc8   :  { %4150 = vmatpush1.bf16.msra.mxu1 %v5784_v9  ;;  %4050 = vmatprep.subr.bf16.mxu0 %v5792_v10  ;;  %v5884_v9 = vld [vmem:[%s8564_s1 + $0x7b4] ss:$8 sps:$4 sm:$0xff]   ;;  %v4967_v10 = vcombine.low %v175_v63, %v175_v63 }
  0xc9   :  { %4151 = vmatprep.subr.bf16.mxu1 %v5795_v11  ;;  %v5879_v11 = vld [vmem:[%s8564_s1 + $0x6b0] ss:$8 sps:$4 sm:$0xff]  }
  0xca   :  { %3887 = vmatmul.mubr.bf16.gmra.mxu0 %v5789_v12  ;;  %v5882_v12 = vld [vmem:[%s8564_s1 + $0x7b0] ss:$8 sps:$4 sm:$0xff]  }
  0xcb   :  { %3988 = vmatmul.mubr.bf16.gmra.mxu1 %v5798_v15  ;;  %4051 = vmatpush1.bf16.msra.mxu0 %v5790_v13  ;;  %v4969_v13 = vcombine.low %v176_v0, %v176_v0  ;;  %v5892_v15 = vld [vmem:[%s8564_s1 + $0x7a4] ss:$8 sps:$4 sm:$0xff]  }
  0xcc   :  { %4152 = vmatpush1.bf16.msra.mxu1 %v5793_v14  ;;  %4052 = vmatprep.subr.bf16.mxu0 %v5801_v16  ;;  %v5889_v14 = vld [vmem:[%s8564_s1 + $0x6a4] ss:$8 sps:$4 sm:$0xff]   ;;  %v5907_v16 = vld [vmem:[%s8565_s0 + $0x34] ss:$100 sps:$4 sm:$0xff]  }
  0xcd   :  { %4153 = vmatprep.subr.bf16.mxu1 %v5804_v17  ;;  %3896 = vmatprep.mubr.bf16.mxu0 %v5805_v18  ;;  %v5910_v17 = vld [vmem:[%s8565_s0 + $0x3c] ss:$100 sps:$4 sm:$0xff]   ;;  %v5937_v0 = vld [vmem:[%s8564_s1 + $0x844] ss:$8 sps:$4 sm:$0xff]  }
  0xce   :  { %3997 = vmatprep.mubr.bf16.mxu1 %v5814_v19  ;;  %v5887_v18 = vld [vmem:[%s8564_s1 + $0x6a0] ss:$8 sps:$4 sm:$0xff]  }
  0xcf   :  { %4053 = vmatpush1.bf16.msra.mxu0 %v5799_v20  ;;  %v5890_v19 = vld [vmem:[%s8564_s1 + $0x7a0] ss:$8 sps:$4 sm:$0xff]   ;;  %v5895_v20 = vld [vmem:[%s8564_s1 + $0x694] ss:$8 sps:$4 sm:$0xff]  }
  0xd0   :  { %4154 = vmatpush1.bf16.msra.mxu1 %v5802_v21  ;;  %4054 = vmatprep.subr.bf16.mxu0 %v5810_v22  ;;  %v586_v21 = vlaneseq  ;;  %v5898_v22 = vld [vmem:[%s8564_s1 + $0x794] ss:$8 sps:$4 sm:$0xff]  }
  0xd1   :  { %4155 = vmatprep.subr.bf16.mxu1 %v5813_v23  ;;  %v5893_v23 = vld [vmem:[%s8564_s1 + $0x690] ss:$8 sps:$4 sm:$0xff]  }
  0xd2   :  { %3897 = vmatmul.mubr.bf16.gmra.mxu0 %v5807_v24  ;;  %v5896_v24 = vld [vmem:[%s8564_s1 + $0x790] ss:$8 sps:$4 sm:$0xff]  }
  0xd3   :  { %3998 = vmatmul.mubr.bf16.gmra.mxu1 %v5816_v26  ;;  %4055 = vmatpush1.bf16.msra.mxu0 %v5808_v25  ;;  %v5901_v25 = vld [vmem:[%s8564_s1 + $0x684] ss:$8 sps:$4 sm:$0xff]   ;;  %v587_v26 = vshrl.u32 %v586_v21, 7 }
  0xd4   :  { %4156 = vmatpush1.bf16.msra.mxu1 %v5811_v27  ;;  %4056 = vmatprep.subr.bf16.mxu0 %v5819_v28  ;;  %v5904_v27 = vld [vmem:[%s8564_s1 + $0x784] ss:$8 sps:$4 sm:$0xff]   ;;  %v5899_v28 = vld [vmem:[%s8564_s1 + $0x680] ss:$8 sps:$4 sm:$0xff]  }
  0xd5   :  { %4157 = vmatprep.subr.bf16.mxu1 %v5822_v29  ;;  %3906 = vmatprep.mubr.bf16.mxu0 %v5823_v30  ;;  %v5902_v29 = vld [vmem:[%s8564_s1 + $0x780] ss:$8 sps:$4 sm:$0xff]  }
  0xd6   :  { %4007 = vmatprep.mubr.bf16.mxu1 %v5832_v31  ;;  %v584_v30 = vld [vmem:[%s8566_s2] sm:$0x3]  ;;  %v588_v31 = vsub.s32 0, %v587_v26 }
  0xd7   :  { %4057 = vmatpush1.bf16.msra.mxu0 %v5817_v32  ;;  %v5913_v32 = vld [vmem:[%s8564_s1 + $0x874] ss:$8 sps:$4 sm:$0xff]  }
  0xd8   :  { %4158 = vmatpush1.bf16.msra.mxu1 %v5820_v33  ;;  %4058 = vmatprep.subr.bf16.mxu0 %v5828_v35  ;;  %v5905_v33 = vld [vmem:[%s8565_s0 + $0x30] ss:$100 sps:$4 sm:$0xff]   ;;  %v5908_v35 = vld [vmem:[%s8565_s0 + $0x38] ss:$100 sps:$4 sm:$0xff]  }
  0xd9   :  { %4159 = vmatprep.subr.bf16.mxu1 %v5831_v36  ;;  %v592_v36 = vsub.s32 1, %v587_v26 }
  0xda   :  { %3907 = vmatmul.mubr.bf16.gmra.mxu0 %v5825_v34  ;;  %v5916_v34 = vld [vmem:[%s8564_s1 + $0x974] ss:$8 sps:$4 sm:$0xff]  }
  0xdb   :  { %4008 = vmatmul.mubr.bf16.gmra.mxu1 %v5834_v38  ;;  %4059 = vmatpush1.bf16.msra.mxu0 %v5826_v37  ;;  %v5911_v37 = vld [vmem:[%s8564_s1 + $0x870] ss:$8 sps:$4 sm:$0xff]  }
  0xdc   :  { %4160 = vmatpush1.bf16.msra.mxu1 %v5829_v39  ;;  %4060 = vmatprep.subr.bf16.mxu0 %v5837_v40  ;;  %v5914_v38 = vld [vmem:[%s8564_s1 + $0x970] ss:$8 sps:$4 sm:$0xff]   ;;  %v7298_v39 = vrot.slane %v584_v30, %v588_v31  ;;  %v5919_v40 = vld [vmem:[%s8564_s1 + $0x864] ss:$8 sps:$4 sm:$0xff]  }
  0xdd   :  { %4161 = vmatprep.subr.bf16.mxu1 %v5840_v41  ;;  %3916 = vmatprep.mubr.bf16.mxu0 %v5841_v42  ;;  %v5922_v41 = vld [vmem:[%s8564_s1 + $0x964] ss:$8 sps:$4 sm:$0xff]   ;;  %v5923_v42 = vld [vmem:[%s8565_s0 + $0xfc] ss:$100 sps:$4 sm:$0xff]  }
  0xde   :  { %4017 = vmatprep.mubr.bf16.mxu1 %v5850_v43  ;;  %v7309_v43 = vrot.slane %v584_v30, %v592_v36  ;;  %v5955_v30 = vld [vmem:[%s8564_s1 + $0x824] ss:$8 sps:$4 sm:$0xff]  }
  0xdf   :  { %4061 = vmatpush1.bf16.msra.mxu0 %v5835_v44  ;;  %v5932_v44 = vld [vmem:[%s8565_s0 + $0x104] ss:$100 sps:$4 sm:$0xff]  }
  0xe0   :  { %4162 = vmatpush1.bf16.msra.mxu1 %v5838_v45  ;;  %4062 = vmatprep.subr.bf16.mxu0 %v5846_v47  ;;  %v5917_v47 = vld [vmem:[%s8564_s1 + $0x860] ss:$8 sps:$4 sm:$0xff]   ;;  %v5958_v31 = vld [vmem:[%s8564_s1 + $0x924] ss:$8 sps:$4 sm:$0xff]  }
  0xe1   :  { %4163 = vmatprep.subr.bf16.mxu1 %v5849_v48 }
  0xe2   :  { %3917 = vmatmul.mubr.bf16.gmra.mxu0 %v5843_v46 }
  0xe3   :  { %4018 = vmatmul.mubr.bf16.gmra.mxu1 %v5852_v51  ;;  %4063 = vmatpush2.bf16.msra.mxu0 %v5844_v49  ;;  %v5920_v49 = vld [vmem:[%s8564_s1 + $0x960] ss:$8 sps:$4 sm:$0xff]  }
  0xe4   :  { %4164 = vmatpush2.bf16.msra.mxu1 %v5847_v50  ;;  %4064 = vmatprep.subr.bf16.mxu0 %v5855_v52  ;;  %v5928_v50 = vld [vmem:[%s8564_s1 + $0x854] ss:$8 sps:$4 sm:$0xff]  }
  0xe5   :  { %4165 = vmatprep.subr.bf16.mxu1 %v5858_v53  ;;  %3926 = vmatprep.mubr.bf16.mxu0 %v5859_v54  ;;  %v5925_v53 = vld [vmem:[%s8565_s0 + $0xf8] ss:$100 sps:$4 sm:$0xff]  }
  0xe6   :  { %4027 = vmatprep.mubr.bf16.mxu1 %v5868_v55  ;;  %v5931_v54 = vld [vmem:[%s8564_s1 + $0x954] ss:$8 sps:$4 sm:$0xff]  }
  0xe7   :  { %4065 = vmatpush2.bf16.msra.mxu0 %v5853_v56 }
  0xe8   :  { %4166 = vmatpush2.bf16.msra.mxu1 %v5856_v57  ;;  %4066 = vmatprep.subr.bf16.mxu0 %v5864_v58  ;;  %v5926_v57 = vld [vmem:[%s8564_s1 + $0x850] ss:$8 sps:$4 sm:$0xff]  }
  0xe9   :  { %4167 = vmatprep.subr.bf16.mxu1 %v5867_v60  ;;  %v5929_v60 = vld [vmem:[%s8564_s1 + $0x950] ss:$8 sps:$4 sm:$0xff]  }
  0xea   :  { %3927 = vmatmul.mubr.bf16.gmra.mxu0 %v5861_v59 }
  0xeb   :  { %4028 = vmatmul.mubr.bf16.gmra.mxu1 %v5870_v62  ;;  %4067 = vmatpush2.bf16.msra.mxu0 %v5862_v61  ;;  %v5934_v61 = vld [vmem:[%s8565_s0 + $0x100] ss:$100 sps:$4 sm:$0xff]  }
  0xec   :  { %4168 = vmatpush2.bf16.msra.mxu1 %v5865_v1  ;;  %4068 = vmatprep.subr.bf16.mxu0 %v5873_v2  ;;  %v5940_v1 = vld [vmem:[%s8564_s1 + $0x944] ss:$8 sps:$4 sm:$0xff]  }
  0xed   :  { %4169 = vmatprep.subr.bf16.mxu1 %v5876_v3  ;;  %3936 = vmatprep.mubr.bf16.mxu0 %v4968_v4  ;;  %v5941_v4 = vld [vmem:[%s8565_s0 + $0x1c4] ss:$100 sps:$4 sm:$0xff]  }
  0xee   :  { %4037 = vmatprep.mubr.bf16.mxu1 %v4970_v5 }
  0xef   :  { %4069 = vmatpush2.bf16.msra.mxu0 %v5871_v6 }
  0xf0   :  { %4170 = vmatpush2.bf16.msra.mxu1 %v5874_v7  ;;  %4070 = vmatprep.subr.bf16.mxu0 %v5881_v8  ;;  %v5950_v7 = vld [vmem:[%s8565_s0 + $0x1cc] ss:$100 sps:$4 sm:$0xff]  }
  0xf1   :  { %4171 = vmatprep.subr.bf16.mxu1 %v5884_v9  ;;  %v5935_v9 = vld [vmem:[%s8564_s1 + $0x840] ss:$8 sps:$4 sm:$0xff]  }
  0xf2   :  { %3937 = vmatmul.mubr.bf16.gmra.mxu0 %v4967_v10 }
  0xf3   :  { %4038 = vmatmul.mubr.bf16.gmra.mxu1 %v4969_v13  ;;  %4071 = vmatpush2.bf16.msra.mxu0 %v5879_v11  ;;  %v5938_v13 = vld [vmem:[%s8564_s1 + $0x940] ss:$8 sps:$4 sm:$0xff]  }
  0xf4   :  { %4172 = vmatpush2.bf16.msra.mxu1 %v5882_v12  ;;  %4072 = vmatprep.subr.bf16.mxu0 %v5889_v14  ;;  %v5946_v14 = vld [vmem:[%s8564_s1 + $0x834] ss:$8 sps:$4 sm:$0xff]  }
  0xf5   :  { %4173 = vmatprep.subr.bf16.mxu1 %v5892_v15  ;;  %4078 = vmatprep.mubr.bf16.mxu0 %v5907_v16 }
  0xf6   :  { %4179 = vmatprep.mubr.bf16.mxu1 %v5910_v17  ;;  %v5949_v17 = vld [vmem:[%s8564_s1 + $0x934] ss:$8 sps:$4 sm:$0xff]  }
  0xf7   :  { %4073 = vmatpush2.bf16.msra.mxu0 %v5887_v18 }
  0xf8   :  { %4174 = vmatpush2.bf16.msra.mxu1 %v5890_v19  ;;  %4074 = vmatprep.subr.bf16.mxu0 %v5895_v20  ;;  %v5943_v20 = vld [vmem:[%s8565_s0 + $0x1c0] ss:$100 sps:$4 sm:$0xff]  }
  0xf9   :  { %4175 = vmatprep.subr.bf16.mxu1 %v5898_v22  ;;  %v5944_v22 = vld [vmem:[%s8564_s1 + $0x830] ss:$8 sps:$4 sm:$0xff]  }
  0xfb   :  { %4075 = vmatpush2.bf16.msra.mxu0 %v5893_v23 }
  0xfc   :  { %4176 = vmatpush2.bf16.msra.mxu1 %v5896_v24  ;;  %4076 = vmatprep.subr.bf16.mxu0 %v5901_v25  ;;  %v5952_v24 = vld [vmem:[%s8565_s0 + $0x1c8] ss:$100 sps:$4 sm:$0xff]  }
  0xfd   :  { %4177 = vmatprep.subr.bf16.mxu1 %v5904_v27  ;;  %v5947_v27 = vld [vmem:[%s8564_s1 + $0x930] ss:$8 sps:$4 sm:$0xff]  }
  0xff   :  { %4077 = vmatpush2.bf16.msra.mxu0 %v5899_v28 }
 0x100   :  { %4178 = vmatpush2.bf16.msra.mxu1 %v5902_v29  ;;  %4248 = vmatprep.subr.bf16.mxu0 %v5913_v32 }
 0x101   :  { %4349 = vmatprep.subr.bf16.mxu1 %v5916_v34  ;;  %v5959_v34 = vld [vmem:[%s8565_s0 + $0x28c] ss:$100 sps:$4 sm:$0xff]  }
 0x102   :  { %v3474_v45 = vpop.f32.mrf.mxu0  ;;  %4079 = vmatmul.mubr.bf16.vlgmr.msra.gmra.mxu0 %v5905_v33 }
 0x103   :  { %4180 = vmatmul.mubr.bf16.vlgmr.msra.gmra.mxu1 %v5908_v35  ;;  %v3575_v46 = vpop.f32.mrf.mxu1  ;;  %v3475_v48 = vadd.f32 %v3474_v45, %v7298_v39  ;;  %4249 = vmatpush1.bf16.msra.mxu0 %v5911_v37  ;;  %v5968_v35 = vld [vmem:[%s8565_s0 + $0x294] ss:$100 sps:$4 sm:$0xff]   ;;  %v5953_v37 = vld [vmem:[%s8564_s1 + $0x820] ss:$8 sps:$4 sm:$0xff]  }
 0x104   :  { %4350 = vmatpush1.bf16.msra.mxu1 %v5914_v38  ;;  %v3476_v51 = vpop.f32.mrf.mxu0  ;;  %4250 = vmatprep.subr.bf16.mxu0 %v5919_v40 }
 0x105   :  { %v3577_v52 = vpop.f32.mrf.mxu1  ;;  %4351 = vmatprep.subr.bf16.mxu1 %v5922_v41  ;;  %v3477_v55 = vadd.f32 %v3476_v51, %v7309_v43  ;;  %v7331_v56 = vadd.f32 %v3575_v46, %v3475_v48  ;;  %4088 = vmatprep.mubr.bf16.mxu0 %v5923_v42  ;;  %v5956_v42 = vld [vmem:[%s8564_s1 + $0x920] ss:$8 sps:$4 sm:$0xff]   ;;  %v5964_v46 = vld [vmem:[%s8564_s1 + $0x814] ss:$8 sps:$4 sm:$0xff]   ;;  %v5962_v51 = vld [vmem:[%s8564_s1 + $0x810] ss:$8 sps:$4 sm:$0xff]  }
 0x106   :  { %4189 = vmatprep.mubr.bf16.mxu1 %v5932_v44  ;;  %v3478_v58 = vpop.f32.mrf.mxu0 }
 0x107   :  { %v3579_v59 = vpop.f32.mrf.mxu1  ;;  %v3479_v62 = vadd.f32 %v3478_v58, %v7298_v39  ;;  %v7343_v63 = vadd.f32 %v3577_v52, %v3477_v55  ;;  %4251 = vmatpush1.bf16.msra.mxu0 %v5917_v47  ;;  %v5967_v47 = vld [vmem:[%s8564_s1 + $0x914] ss:$8 sps:$4 sm:$0xff]   ;;  %v5965_v58 = vld [vmem:[%s8564_s1 + $0x910] ss:$8 sps:$4 sm:$0xff]  }
 0x108   :  { %4352 = vmatpush1.bf16.msra.mxu1 %v5920_v49  ;;  %v3480_v2 = vpop.f32.mrf.mxu0  ;;  %4252 = vmatprep.subr.bf16.mxu0 %v5928_v50  ;;  %v5961_v50 = vld [vmem:[%s8565_s0 + $0x288] ss:$100 sps:$4 sm:$0xff]  }
 0x109   :  { %v3581_v3 = vpop.f32.mrf.mxu1  ;;  %4353 = vmatprep.subr.bf16.mxu1 %v5931_v54  ;;  %v3481_v5 = vadd.f32 %v3480_v2, %v7309_v43  ;;  %v7355_v6 = vadd.f32 %v3579_v59, %v3479_v62  ;;  %v5970_v54 = vld [vmem:[%s8565_s0 + $0x290] ss:$100 sps:$4 sm:$0xff]   ;;  %v5976_v62 = vld [vmem:[%s8564_s1 + $0x904] ss:$8 sps:$4 sm:$0xff]  }
 0x10a   :  { %4089 = vmatmul.mubr.bf16.gmra.mxu0 %v5925_v53  ;;  %v3484_v8 = vpop.f32.mrf.mxu0  ;;  %v5977_v2 = vld [vmem:[%s8565_s0 + $0x354] ss:$100 sps:$4 sm:$0xff]  }
 0x10b   :  { %4190 = vmatmul.mubr.bf16.gmra.mxu1 %v5934_v61  ;;  %v3585_v10 = vpop.f32.mrf.mxu1  ;;  %v7363_v11 = vadd.f32 %v3581_v3, %v3481_v5  ;;  %4253 = vmatpush1.bf16.msra.mxu0 %v5926_v57  ;;  %v3485_v12 = vadd.f32 %v3484_v8, %v7298_v39  ;;  %v5973_v61 = vld [vmem:[%s8564_s1 + $0x804] ss:$8 sps:$4 sm:$0xff]   ;;  %v5986_v3 = vld [vmem:[%s8565_s0 + $0x35c] ss:$100 sps:$4 sm:$0xff]  }
 0x10c   :  { %4354 = vmatpush1.bf16.msra.mxu1 %v5929_v60  ;;  %4254 = vmatprep.subr.bf16.mxu0 %v5937_v0  ;;  %v3486_v15 = vpop.f32.mrf.mxu0  ;;  %v5971_v5 = vld [vmem:[%s8564_s1 + $0x800] ss:$8 sps:$4 sm:$0xff]  }
 0x10d   :  { %4355 = vmatprep.subr.bf16.mxu1 %v5940_v1  ;;  %v3587_v16 = vpop.f32.mrf.mxu1  ;;  %v3487_v18 = vadd.f32 %v3486_v15, %v7309_v43  ;;  %v7376_v19 = vadd.f32 %v3585_v10, %v3485_v12  ;;  %4098 = vmatprep.mubr.bf16.mxu0 %v5941_v4  ;;  %v5974_v10 = vld [vmem:[%s8564_s1 + $0x900] ss:$8 sps:$4 sm:$0xff]   ;;  %v5985_v15 = vld [vmem:[%s8564_s1 + $0x9f4] ss:$8 sps:$4 sm:$0xff]  }
 0x10e   :  { %4199 = vmatprep.mubr.bf16.mxu1 %v5950_v7  ;;  %v3488_v21 = vpop.f32.mrf.mxu0 }
 0x10f   :  { %v3589_v23 = vpop.f32.mrf.mxu1  ;;  %4255 = vmatpush1.bf16.msra.mxu0 %v5935_v9  ;;  %v3489_v25 = vadd.f32 %v3488_v21, %v7298_v39  ;;  %v7388_v26 = vadd.f32 %v3587_v16, %v3487_v18  ;;  %v5979_v18 = vld [vmem:[%s8565_s0 + $0x350] ss:$100 sps:$4 sm:$0xff]  }
 0x110   :  { %4356 = vmatpush1.bf16.msra.mxu1 %v5938_v13  ;;  %4256 = vmatprep.subr.bf16.mxu0 %v5946_v14  ;;  %v3490_v28 = vpop.f32.mrf.mxu0  ;;  %v5982_v14 = vld [vmem:[%s8564_s1 + $0x8f4] ss:$8 sps:$4 sm:$0xff]  }
 0x111   :  { %4357 = vmatprep.subr.bf16.mxu1 %v5949_v17  ;;  %v3591_v29 = vpop.f32.mrf.mxu1  ;;  %v3491_v32 = vadd.f32 %v3490_v28, %v7309_v43  ;;  %v7400_v33 = vadd.f32 %v3589_v23, %v3489_v25  ;;  %v5988_v23 = vld [vmem:[%s8565_s0 + $0x358] ss:$100 sps:$4 sm:$0xff]  }
 0x112   :  { %4099 = vmatmul.mubr.bf16.gmra.mxu0 %v5943_v20  ;;  %v3494_v36 = vpop.f32.mrf.mxu0  ;;  %v5980_v20 = vld [vmem:[%s8564_s1 + $0x8f0] ss:$8 sps:$4 sm:$0xff]  }
 0x113   :  { %4200 = vmatmul.mubr.bf16.gmra.mxu1 %v5952_v24  ;;  %v3595_v38 = vpop.f32.mrf.mxu1  ;;  %4257 = vmatpush1.bf16.msra.mxu0 %v5944_v22  ;;  %v3495_v40 = vadd.f32 %v3494_v36, %v7298_v39  ;;  %v7412_v41 = vadd.f32 %v3591_v29, %v3491_v32  ;;  %v6004_v36 = vld [vmem:[%s8565_s0 + $0x424] ss:$100 sps:$4 sm:$0xff]  }
 0x114   :  { %4358 = vmatpush1.bf16.msra.mxu1 %v5947_v27  ;;  %4258 = vmatprep.subr.bf16.mxu0 %v5955_v30  ;;  %v3496_v44 = vpop.f32.mrf.mxu0  ;;  %v5983_v27 = vld [vmem:[%s8564_s1 + $0x9f0] ss:$8 sps:$4 sm:$0xff]   ;;  %v5991_v30 = vld [vmem:[%s8564_s1 + $0x8e4] ss:$8 sps:$4 sm:$0xff]  }
 0x115   :  { %4359 = vmatprep.subr.bf16.mxu1 %v5958_v31  ;;  %v3597_v45 = vpop.f32.mrf.mxu1  ;;  %v3497_v48 = vadd.f32 %v3496_v44, %v7309_v43  ;;  %v7424_v49 = vadd.f32 %v3595_v38, %v3495_v40  ;;  %4108 = vmatprep.mubr.bf16.mxu0 %v5959_v34  ;;  %v5994_v31 = vld [vmem:[%s8564_s1 + $0x9e4] ss:$8 sps:$4 sm:$0xff]   ;;  %v5989_v38 = vld [vmem:[%s8564_s1 + $0x8e0] ss:$8 sps:$4 sm:$0xff]  }
 0x116   :  { %4209 = vmatprep.mubr.bf16.mxu1 %v5968_v35  ;;  %v3498_v52 = vpop.f32.mrf.mxu0  ;;  %v5995_v35 = vld [vmem:[%s8565_s0 + $0x41c] ss:$100 sps:$4 sm:$0xff]  }
 0x117   :  { %v3599_v53 = vpop.f32.mrf.mxu1  ;;  %4259 = vmatpush1.bf16.msra.mxu0 %v5953_v37  ;;  %v3499_v55 = vadd.f32 %v3498_v52, %v7298_v39  ;;  %v7436_v57 = vadd.f32 %v3597_v45, %v3497_v48  ;;  %v5992_v45 = vld [vmem:[%s8564_s1 + $0x9e0] ss:$8 sps:$4 sm:$0xff]   ;;  %v5997_v48 = vld [vmem:[%s8565_s0 + $0x418] ss:$100 sps:$4 sm:$0xff]  }
 0x118   :  { %4360 = vmatpush1.bf16.msra.mxu1 %v5956_v42  ;;  %4260 = vmatprep.subr.bf16.mxu0 %v5964_v46  ;;  %v3500_v59 = vpop.f32.mrf.mxu0 }
 0x119   :  { %4361 = vmatprep.subr.bf16.mxu1 %v5967_v47  ;;  %v3601_v60 = vpop.f32.mrf.mxu1  ;;  %v3501_v0 = vadd.f32 %v3500_v59, %v7309_v43  ;;  %v7448_v1 = vadd.f32 %v3599_v53, %v3499_v55  ;;  %v6006_v55 = vld [vmem:[%s8565_s0 + $0x420] ss:$100 sps:$4 sm:$0xff]  }
 0x11a   :  { %4109 = vmatmul.mubr.bf16.gmra.mxu0 %v5961_v50  ;;  %v3504_v4 = vpop.f32.mrf.mxu0  ;;  %v6000_v50 = vld [vmem:[%s8564_s1 + $0x8d4] ss:$8 sps:$4 sm:$0xff]  }
 0x11b   :  { %4210 = vmatmul.mubr.bf16.gmra.mxu1 %v5970_v54  ;;  %v3605_v7 = vpop.f32.mrf.mxu1  ;;  %4261 = vmatpush1.bf16.msra.mxu0 %v5962_v51  ;;  %v3505_v8 = vadd.f32 %v3504_v4, %v7298_v39  ;;  %v7460_v9 = vadd.f32 %v3601_v60, %v3501_v0  ;;  %v6003_v51 = vld [vmem:[%s8564_s1 + $0x9d4] ss:$8 sps:$4 sm:$0xff]   ;;  %v5998_v54 = vld [vmem:[%s8564_s1 + $0x8d0] ss:$8 sps:$4 sm:$0xff]  }
 0x11c   :  { %4362 = vmatpush1.bf16.msra.mxu1 %v5965_v58  ;;  %4262 = vmatprep.subr.bf16.mxu0 %v5973_v61  ;;  %v3506_v12 = vpop.f32.mrf.mxu0  ;;  %v177_v58 = vld [vmem:[%s8565_s0 + $0x4e0] sm:$0xff]  ;;  %v178_v61 = vld [vmem:[%s8565_s0 + $0x4e8] sm:$0xff] }
 0x11d   :  { %4363 = vmatprep.subr.bf16.mxu1 %v5976_v62  ;;  %v3607_v13 = vpop.f32.mrf.mxu1  ;;  %v3507_v16 = vadd.f32 %v3506_v12, %v7309_v43  ;;  %v7472_v17 = vadd.f32 %v3605_v7, %v3505_v8  ;;  %4118 = vmatprep.mubr.bf16.mxu0 %v5977_v2  ;;  %v6001_v2 = vld [vmem:[%s8564_s1 + $0x9d0] ss:$8 sps:$4 sm:$0xff]   ;;  %v6012_v7 = vld [vmem:[%s8564_s1 + $0x9c4] ss:$8 sps:$4 sm:$0xff]   ;;  %v4972_v12 = vcombine.high %v177_v58, %v177_v58 }
 0x11e   :  { %4219 = vmatprep.mubr.bf16.mxu1 %v5986_v3  ;;  %v3508_v21 = vpop.f32.mrf.mxu0 }
 0x11f   :  { %v3609_v22 = vpop.f32.mrf.mxu1  ;;  %4263 = vmatpush1.bf16.msra.mxu0 %v5971_v5  ;;  %v3509_v24 = vadd.f32 %v3508_v21, %v7298_v39  ;;  %v7484_v25 = vadd.f32 %v3607_v13, %v3507_v16  ;;  %v6009_v5 = vld [vmem:[%s8564_s1 + $0x8c4] ss:$8 sps:$4 sm:$0xff]   ;;  %v4974_v13 = vcombine.high %v178_v61, %v178_v61  ;;  %v6010_v21 = vld [vmem:[%s8564_s1 + $0x9c0] ss:$8 sps:$4 sm:$0xff]  }
 0x120   :  { %4364 = vmatpush1.bf16.msra.mxu1 %v5974_v10  ;;  %4264 = vmatprep.subr.bf16.mxu0 %v5982_v14  ;;  %v3510_v28 = vpop.f32.mrf.mxu0 }
 0x121   :  { %4365 = vmatprep.subr.bf16.mxu1 %v5985_v15  ;;  %v3611_v29 = vpop.f32.mrf.mxu1  ;;  %v3511_v32 = vadd.f32 %v3510_v28, %v7309_v43  ;;  %v7496_v34 = vadd.f32 %v3609_v22, %v3509_v24  ;;  %v6007_v15 = vld [vmem:[%s8564_s1 + $0x8c0] ss:$8 sps:$4 sm:$0xff]   ;;  %v6017_v24 = vld [vmem:[%s8564_s1 + $0x8b4] ss:$8 sps:$4 sm:$0xff]  }
 0x122   :  { %4119 = vmatmul.mubr.bf16.gmra.mxu0 %v5979_v18  ;;  %v3514_v37 = vpop.f32.mrf.mxu0 }
 0x123   :  { %4220 = vmatmul.mubr.bf16.gmra.mxu1 %v5988_v23  ;;  %v3615_v40 = vpop.f32.mrf.mxu1  ;;  %4265 = vmatpush2.bf16.msra.mxu0 %v5980_v20  ;;  %v3515_v42 = vadd.f32 %v3514_v37, %v7298_v39  ;;  %v7508_v44 = vadd.f32 %v3611_v29, %v3511_v32  ;;  %v6015_v32 = vld [vmem:[%s8564_s1 + $0x8b0] ss:$8 sps:$4 sm:$0xff]  }
 0x124   :  { %4366 = vmatpush2.bf16.msra.mxu1 %v5983_v27  ;;  %4266 = vmatprep.subr.bf16.mxu0 %v5991_v30  ;;  %v3516_v46 = vpop.f32.mrf.mxu0  ;;  %v6020_v27 = vld [vmem:[%s8564_s1 + $0x9b4] ss:$8 sps:$4 sm:$0xff]  }
 0x125   :  { %4367 = vmatprep.subr.bf16.mxu1 %v5994_v31  ;;  %v3617_v47 = vpop.f32.mrf.mxu1  ;;  %v3517_v52 = vadd.f32 %v3516_v46, %v7309_v43  ;;  %v7523_v53 = vadd.f32 %v3615_v40, %v3515_v42  ;;  %4128 = vmatprep.mubr.bf16.mxu0 %v5995_v35  ;;  %v4971_v31 = vcombine.low %v177_v58, %v177_v58  ;;  %v6018_v40 = vld [vmem:[%s8564_s1 + $0x9b0] ss:$8 sps:$4 sm:$0xff]   ;;  %v6025_v46 = vld [vmem:[%s8564_s1 + $0x8a4] ss:$8 sps:$4 sm:$0xff]  }
 0x126   :  { %4229 = vmatprep.mubr.bf16.mxu1 %v6004_v36  ;;  %v3518_v59 = vpop.f32.mrf.mxu0  ;;  %v4973_v36 = vcombine.low %v178_v61, %v178_v61  ;;  %v6026_v61 = vld [vmem:[%s8564_s1 + $0x9a0] ss:$8 sps:$4 sm:$0xff]  }
 0x127   :  { %v3619_v60 = vpop.f32.mrf.mxu1  ;;  %4267 = vmatpush2.bf16.msra.mxu0 %v5989_v38  ;;  %v3519_v62 = vadd.f32 %v3518_v59, %v7298_v39  ;;  %v7538_v0 = vadd.f32 %v3617_v47, %v3517_v52  ;;  %v6028_v47 = vld [vmem:[%s8564_s1 + $0x9a4] ss:$8 sps:$4 sm:$0xff]  }
 0x128   :  { %4368 = vmatpush2.bf16.msra.mxu1 %v5992_v45  ;;  %4268 = vmatprep.subr.bf16.mxu0 %v6000_v50  ;;  %v3520_v3 = vpop.f32.mrf.mxu0  ;;  %v6046_v52 = vld [vmem:[%s8565_s0 + $0x4c] ss:$100 sps:$4 sm:$0xff]  }
 0x129   :  { %4369 = vmatprep.subr.bf16.mxu1 %v6003_v51  ;;  %v3621_v4 = vpop.f32.mrf.mxu1  ;;  %v3521_v8 = vadd.f32 %v3520_v3, %v7309_v43  ;;  %v7550_v10 = vadd.f32 %v3619_v60, %v3519_v62  ;;  %v6043_v51 = vld [vmem:[%s8565_s0 + $0x44] ss:$100 sps:$4 sm:$0xff]   ;;  %v6034_v3 = vld [vmem:[%s8564_s1 + $0x994] ss:$8 sps:$4 sm:$0xff]  }
 0x12a   :  { %4129 = vmatmul.mubr.bf16.gmra.mxu0 %v5997_v48  ;;  %v3524_v14 = vpop.f32.mrf.mxu0 }
 0x12b   :  { %4230 = vmatmul.mubr.bf16.gmra.mxu1 %v6006_v55  ;;  %v3625_v16 = vpop.f32.mrf.mxu1  ;;  %4269 = vmatpush2.bf16.msra.mxu0 %v5998_v54  ;;  %v3525_v18 = vadd.f32 %v3524_v14, %v7298_v39  ;;  %v7556_v20 = vadd.f32 %v3621_v4, %v3521_v8  ;;  %v6023_v55 = vld [vmem:[%s8564_s1 + $0x8a0] ss:$8 sps:$4 sm:$0xff]   ;;  %v6029_v8 = vld [vmem:[%s8564_s1 + $0x890] ss:$8 sps:$4 sm:$0xff]  }
 0x12c   :  { %4370 = vmatpush2.bf16.msra.mxu1 %v6001_v2  ;;  %4270 = vmatprep.subr.bf16.mxu0 %v6009_v5  ;;  %v3526_v22 = vpop.f32.mrf.mxu0  ;;  %v6031_v2 = vld [vmem:[%s8564_s1 + $0x894] ss:$8 sps:$4 sm:$0xff]  }
 0x12d   :  { %4371 = vmatprep.subr.bf16.mxu1 %v6012_v7  ;;  %v3627_v23 = vpop.f32.mrf.mxu1  ;;  %v3527_v28 = vadd.f32 %v3526_v22, %v7309_v43  ;;  %v7568_v29 = vadd.f32 %v3625_v16, %v3525_v18  ;;  %4138 = vmatprep.mubr.bf16.mxu0 %v4972_v12  ;;  %v6040_v16 = vld [vmem:[%s8564_s1 + $0x984] ss:$8 sps:$4 sm:$0xff]   ;;  %v6038_v22 = vld [vmem:[%s8564_s1 + $0x980] ss:$8 sps:$4 sm:$0xff]  }
 0x12e   :  { %4239 = vmatprep.mubr.bf16.mxu1 %v4974_v13  ;;  %v3528_v30 = vpop.f32.mrf.mxu0  ;;  %v6032_v13 = vld [vmem:[%s8564_s1 + $0x990] ss:$8 sps:$4 sm:$0xff]  }
 0x12f   :  { %v3629_v35 = vpop.f32.mrf.mxu1  ;;  %4271 = vmatpush2.bf16.msra.mxu0 %v6007_v15  ;;  %v3529_v37 = vadd.f32 %v3528_v30, %v7298_v39  ;;  %v7574_v38 = vadd.f32 %v3627_v23, %v3527_v28  ;;  %v6037_v15 = vld [vmem:[%s8564_s1 + $0x884] ss:$8 sps:$4 sm:$0xff]   ;;  %v6049_v23 = vld [vmem:[%s8564_s1 + $0xa74] ss:$8 sps:$4 sm:$0xff]   ;;  %v6047_v30 = vld [vmem:[%s8564_s1 + $0xa70] ss:$8 sps:$4 sm:$0xff]  }
 0x130   :  { %4372 = vmatpush2.bf16.msra.mxu1 %v6010_v21  ;;  %4272 = vmatprep.subr.bf16.mxu0 %v6017_v24  ;;  %v3530_v42 = vpop.f32.mrf.mxu0  ;;  %v6035_v21 = vld [vmem:[%s8564_s1 + $0x880] ss:$8 sps:$4 sm:$0xff]   ;;  %v6052_v24 = vld [vmem:[%s8564_s1 + $0xb74] ss:$8 sps:$4 sm:$0xff]  }
 0x131   :  { %4373 = vmatprep.subr.bf16.mxu1 %v6020_v27  ;;  %v3631_v45 = vpop.f32.mrf.mxu1  ;;  %v3531_v48 = vadd.f32 %v3530_v42, %v7309_v43  ;;  %v7586_v50 = vadd.f32 %v3629_v35, %v3529_v37  ;;  %v6041_v27 = vld [vmem:[%s8565_s0 + $0x40] ss:$100 sps:$4 sm:$0xff]   ;;  %v6044_v28 = vld [vmem:[%s8565_s0 + $0x48] ss:$100 sps:$4 sm:$0xff]   ;;  %v6070_v37 = vld [vmem:[%s8565_s0 + $0x114] ss:$100 sps:$4 sm:$0xff]  }
 0x132   :  { %4139 = vmatmul.mubr.bf16.gmra.mxu0 %v4971_v31  ;;  %v3534_v54 = vpop.f32.mrf.mxu0  ;;  %v6050_v31 = vld [vmem:[%s8564_s1 + $0xb70] ss:$8 sps:$4 sm:$0xff]   ;;  %v6058_v35 = vld [vmem:[%s8564_s1 + $0xb64] ss:$8 sps:$4 sm:$0xff]  }
 0x133   :  { %4240 = vmatmul.mubr.bf16.gmra.mxu1 %v4973_v36  ;;  %v3635_v58 = vpop.f32.mrf.mxu1  ;;  %4273 = vmatpush2.bf16.msra.mxu0 %v6015_v32  ;;  %v3535_v59 = vadd.f32 %v3534_v54, %v7298_v39  ;;  %v7598_v60 = vadd.f32 %v3631_v45, %v3531_v48  ;;  %v6055_v32 = vld [vmem:[%s8564_s1 + $0xa64] ss:$8 sps:$4 sm:$0xff]   ;;  %v6053_v45 = vld [vmem:[%s8564_s1 + $0xa60] ss:$8 sps:$4 sm:$0xff]   ;;  %v6067_v54 = vld [vmem:[%s8564_s1 + $0xb54] ss:$8 sps:$4 sm:$0xff]  }
 0x134   :  { %4374 = vmatpush2.bf16.msra.mxu1 %v6018_v40  ;;  %4274 = vmatprep.subr.bf16.mxu0 %v6025_v46  ;;  %v3536_v62 = vpop.f32.mrf.mxu0  ;;  %v6061_v36 = vld [vmem:[%s8565_s0 + $0x10c] ss:$100 sps:$4 sm:$0xff]  }
 0x135   :  { %4375 = vmatprep.subr.bf16.mxu1 %v6028_v47  ;;  %v3637_v4 = vpop.f32.mrf.mxu1  ;;  %v3537_v39 = vadd.f32 %v3536_v62, %v7309_v43  ;;  %v7610_v5 = vadd.f32 %v3635_v58, %v3535_v59  ;;  %4280 = vmatprep.mubr.bf16.mxu0 %v6043_v51  ;;  %v6056_v47 = vld [vmem:[%s8564_s1 + $0xb60] ss:$8 sps:$4 sm:$0xff]   ;;  %v6062_v59 = vld [vmem:[%s8564_s1 + $0xa50] ss:$8 sps:$4 sm:$0xff]  }
 0x136   :  { %4381 = vmatprep.mubr.bf16.mxu1 %v6046_v52  ;;  %v3538_v7 = vpop.f32.mrf.mxu0  ;;  %v6064_v52 = vld [vmem:[%s8564_s1 + $0xa54] ss:$8 sps:$4 sm:$0xff]   ;;  %v6059_v58 = vld [vmem:[%s8565_s0 + $0x108] ss:$100 sps:$4 sm:$0xff]  }
 0x137   :  { %v3639_v12 = vpop.f32.mrf.mxu1  ;;  %4275 = vmatpush2.bf16.msra.mxu0 %v6023_v55  ;;  %v7618_v14 = vadd.f32 %v3637_v4, %v3537_v39  ;;  %v6065_v4 = vld [vmem:[%s8564_s1 + $0xb50] ss:$8 sps:$4 sm:$0xff]   ;;  %v6073_v39 = vld [vmem:[%s8564_s1 + $0xa44] ss:$8 sps:$4 sm:$0xff]  }
 0x138   :  { %4376 = vmatpush2.bf16.msra.mxu1 %v6026_v61  ;;  %4276 = vmatprep.subr.bf16.mxu0 %v6031_v2  ;;  %v3539_v43 = vpop.f32.mrf.mxu0  ;;  %v6068_v2 = vld [vmem:[%s8565_s0 + $0x110] ss:$100 sps:$4 sm:$0xff]  }
 0x139   :  { %4377 = vmatprep.subr.bf16.mxu1 %v6034_v3  ;;  %v3640_v18 = vpop.f32.mrf.mxu1  ;;  %v6079_v12 = vld [vmem:[%s8565_s0 + $0x1d4] ss:$100 sps:$4 sm:$0xff]  }
 0x13b   :  { %4277 = vmatpush2.bf16.msra.mxu0 %v6029_v8 }
 0x13c   :  { %4378 = vmatpush2.bf16.msra.mxu1 %v6032_v13  ;;  %4278 = vmatprep.subr.bf16.mxu0 %v6037_v15  ;;  %v6088_v15 = vld [vmem:[%s8565_s0 + $0x1dc] ss:$100 sps:$4 sm:$0xff]  }
 0x13d   :  { %4379 = vmatprep.subr.bf16.mxu1 %v6040_v16 }
 0x13f   :  { %4279 = vmatpush2.bf16.msra.mxu0 %v6035_v21  ;;  %v6071_v21 = vld [vmem:[%s8564_s1 + $0xa40] ss:$8 sps:$4 sm:$0xff]  }
 0x140   :  { %4380 = vmatpush2.bf16.msra.mxu1 %v6038_v22  ;;  %4450 = vmatprep.subr.bf16.mxu0 %v6049_v23 }
 0x141   :  { %4551 = vmatprep.subr.bf16.mxu1 %v6052_v24  ;;  %v6082_v24 = vld [vmem:[%s8564_s1 + $0xa34] ss:$8 sps:$4 sm:$0xff]  }
 0x142   :  { %v3676_v40 = vpop.f32.mrf.mxu0  ;;  %4281 = vmatmul.mubr.bf16.vlgmr.msra.gmra.mxu0 %v6041_v27 }
 0x143   :  { %4382 = vmatmul.mubr.bf16.vlgmr.msra.gmra.mxu1 %v6044_v28  ;;  %v3777_v42 = vpop.f32.mrf.mxu1  ;;  %v3677_v46 = vadd.f32 %v3676_v40, %v7331_v56  ;;  %4451 = vmatpush1.bf16.msra.mxu0 %v6047_v30  ;;  %v6085_v30 = vld [vmem:[%s8564_s1 + $0xb34] ss:$8 sps:$4 sm:$0xff]   ;;  %v6083_v40 = vld [vmem:[%s8564_s1 + $0xb30] ss:$8 sps:$4 sm:$0xff]  }
 0x144   :  { %4552 = vmatpush1.bf16.msra.mxu1 %v6050_v31  ;;  %v3678_v48 = vpop.f32.mrf.mxu0  ;;  %4452 = vmatprep.subr.bf16.mxu0 %v6055_v32 }
 0x145   :  { %v3779_v51 = vpop.f32.mrf.mxu1  ;;  %4553 = vmatprep.subr.bf16.mxu1 %v6058_v35  ;;  %v3679_v56 = vadd.f32 %v3678_v48, %v7343_v63  ;;  %v7676_v55 = vadd.f32 %v3777_v42, %v3677_v46  ;;  %4290 = vmatprep.mubr.bf16.mxu0 %v6061_v36  ;;  %v6080_v35 = vld [vmem:[%s8564_s1 + $0xa30] ss:$8 sps:$4 sm:$0xff]   ;;  %v6091_v46 = vld [vmem:[%s8564_s1 + $0xa24] ss:$8 sps:$4 sm:$0xff]  }
 0x146   :  { %4391 = vmatprep.mubr.bf16.mxu1 %v6070_v37  ;;  %v3680_v61 = vpop.f32.mrf.mxu0  ;;  %v6086_v42 = vld [vmem:[%s8565_s0 + $0x1d8] ss:$100 sps:$4 sm:$0xff]  }
 0x147   :  { %v3781_v62 = vpop.f32.mrf.mxu1  ;;  %v3681_v63 = vadd.f32 %v3680_v61, %v7355_v6  ;;  %v7688_v3 = vadd.f32 %v3779_v51, %v3679_v56  ;;  %4453 = vmatpush1.bf16.msra.mxu0 %v6053_v45  ;;  %v6076_v6 = vld [vmem:[%s8564_s1 + $0xb44] ss:$8 sps:$4 sm:$0xff]   ;;  %v6089_v61 = vld [vmem:[%s8564_s1 + $0xa20] ss:$8 sps:$4 sm:$0xff]  }
 0x148   :  { %4554 = vmatpush1.bf16.msra.mxu1 %v6056_v47  ;;  %v3682_v7 = vpop.f32.mrf.mxu0  ;;  %4454 = vmatprep.subr.bf16.mxu0 %v6064_v52  ;;  %v6094_v47 = vld [vmem:[%s8564_s1 + $0xb24] ss:$8 sps:$4 sm:$0xff]  }
 0x149   :  { %v3783_v8 = vpop.f32.mrf.mxu1  ;;  %4555 = vmatprep.subr.bf16.mxu1 %v6067_v54  ;;  %v3683_v13 = vadd.f32 %v3682_v7, %v7363_v11  ;;  %v7703_v43 = vadd.f32 %v3781_v62, %v3681_v63  ;;  %v6074_v11 = vld [vmem:[%s8564_s1 + $0xb40] ss:$8 sps:$4 sm:$0xff]   ;;  %v6100_v63 = vld [vmem:[%s8564_s1 + $0xa14] ss:$8 sps:$4 sm:$0xff]  }
 0x14a   :  { %v3686_v16 = vpop.f32.mrf.mxu0  ;;  %4291 = vmatmul.mubr.bf16.gmra.mxu0 %v6059_v58  ;;  %v6106_v56 = vld [vmem:[%s8565_s0 + $0x2a4] ss:$100 sps:$4 sm:$0xff]   ;;  %v6103_v7 = vld [vmem:[%s8564_s1 + $0xb14] ss:$8 sps:$4 sm:$0xff]  }
 0x14b   :  { %v3787_v18 = vpop.f32.mrf.mxu1  ;;  %4392 = vmatmul.mubr.bf16.gmra.mxu1 %v6068_v2  ;;  %v3687_v22 = vadd.f32 %v3686_v16, %v7376_v19  ;;  %v7712_v23 = vadd.f32 %v3783_v8, %v3683_v13  ;;  %4455 = vmatpush1.bf16.msra.mxu0 %v6062_v59  ;;  %v6077_v19 = vld [vmem:[%s8565_s0 + $0x1d0] ss:$100 sps:$4 sm:$0xff]  }
 0x14c   :  { %4556 = vmatpush1.bf16.msra.mxu1 %v6065_v4  ;;  %v3688_v27 = vpop.f32.mrf.mxu0  ;;  %4456 = vmatprep.subr.bf16.mxu0 %v6073_v39  ;;  %v6101_v16 = vld [vmem:[%s8564_s1 + $0xb10] ss:$8 sps:$4 sm:$0xff]  }
 0x14d   :  { %v3789_v28 = vpop.f32.mrf.mxu1  ;;  %4557 = vmatprep.subr.bf16.mxu1 %v6076_v6  ;;  %v3689_v31 = vadd.f32 %v3688_v27, %v7388_v26  ;;  %v7727_v32 = vadd.f32 %v3787_v18, %v3687_v22  ;;  %4300 = vmatprep.mubr.bf16.mxu0 %v6079_v12  ;;  %v6098_v12 = vld [vmem:[%s8564_s1 + $0xa10] ss:$8 sps:$4 sm:$0xff]   ;;  %v6104_v18 = vld [vmem:[%s8565_s0 + $0x2a0] ss:$100 sps:$4 sm:$0xff]  }
 0x14e   :  { %4401 = vmatprep.mubr.bf16.mxu1 %v6088_v15  ;;  %v3690_v36 = vpop.f32.mrf.mxu0  ;;  %v6109_v22 = vld [vmem:[%s8564_s1 + $0xa04] ss:$8 sps:$4 sm:$0xff]  }
 0x14f   :  { %v3791_v37 = vpop.f32.mrf.mxu1  ;;  %v3691_v26 = vadd.f32 %v3690_v36, %v7400_v33  ;;  %v7739_v45 = vadd.f32 %v3789_v28, %v3689_v31  ;;  %4457 = vmatpush1.bf16.msra.mxu0 %v6071_v21  ;;  %v6097_v33 = vld [vmem:[%s8565_s0 + $0x29c] ss:$100 sps:$4 sm:$0xff]  }
 0x150   :  { %4558 = vmatpush1.bf16.msra.mxu1 %v6074_v11  ;;  %v3692_v48 = vpop.f32.mrf.mxu0  ;;  %4458 = vmatprep.subr.bf16.mxu0 %v6082_v24  ;;  %v6112_v11 = vld [vmem:[%s8564_s1 + $0xb04] ss:$8 sps:$4 sm:$0xff]   ;;  %v6107_v36 = vld [vmem:[%s8564_s1 + $0xa00] ss:$8 sps:$4 sm:$0xff]  }
 0x151   :  { %v3793_v51 = vpop.f32.mrf.mxu1  ;;  %4559 = vmatprep.subr.bf16.mxu1 %v6085_v30  ;;  %v3693_v52 = vadd.f32 %v3692_v48, %v7412_v41  ;;  %v7751_v54 = vadd.f32 %v3791_v37, %v3691_v26  ;;  %v6092_v41 = vld [vmem:[%s8564_s1 + $0xb20] ss:$8 sps:$4 sm:$0xff]   ;;  %v6124_v30 = vld [vmem:[%s8565_s0 + $0x36c] ss:$100 sps:$4 sm:$0xff]  }
 0x152   :  { %v3696_v58 = vpop.f32.mrf.mxu0  ;;  %4301 = vmatmul.mubr.bf16.gmra.mxu0 %v6077_v19 }
 0x153   :  { %v3797_v59 = vpop.f32.mrf.mxu1  ;;  %4402 = vmatmul.mubr.bf16.gmra.mxu1 %v6086_v42  ;;  %v3697_v62 = vadd.f32 %v3696_v58, %v7424_v49  ;;  %v7760_v2 = vadd.f32 %v3793_v51, %v3693_v52  ;;  %4459 = vmatpush1.bf16.msra.mxu0 %v6080_v35  ;;  %v6095_v49 = vld [vmem:[%s8565_s0 + $0x298] ss:$100 sps:$4 sm:$0xff]  }
 0x154   :  { %4560 = vmatpush1.bf16.msra.mxu1 %v6083_v40  ;;  %v3698_v4 = vpop.f32.mrf.mxu0  ;;  %4460 = vmatprep.subr.bf16.mxu0 %v6091_v46  ;;  %v6118_v42 = vld [vmem:[%s8564_s1 + $0xaf4] ss:$8 sps:$4 sm:$0xff]   ;;  %v6119_v58 = vld [vmem:[%s8564_s1 + $0xbf0] ss:$8 sps:$4 sm:$0xff]  }
 0x155   :  { %v3799_v39 = vpop.f32.mrf.mxu1  ;;  %4561 = vmatprep.subr.bf16.mxu1 %v6094_v47  ;;  %v3699_v8 = vadd.f32 %v3698_v4, %v7436_v57  ;;  %v7775_v6 = vadd.f32 %v3797_v59, %v3697_v62  ;;  %4310 = vmatprep.mubr.bf16.mxu0 %v6097_v33  ;;  %v6121_v47 = vld [vmem:[%s8564_s1 + $0xbf4] ss:$8 sps:$4 sm:$0xff]   ;;  %v6116_v33 = vld [vmem:[%s8564_s1 + $0xaf0] ss:$8 sps:$4 sm:$0xff]   ;;  %v6122_v59 = vld [vmem:[%s8565_s0 + $0x368] ss:$100 sps:$4 sm:$0xff]  }
 0x156   :  { %4411 = vmatprep.mubr.bf16.mxu1 %v6106_v56  ;;  %v3700_v13 = vpop.f32.mrf.mxu0  ;;  %v6127_v62 = vld [vmem:[%s8564_s1 + $0xae4] ss:$8 sps:$4 sm:$0xff]  }
 0x157   :  { %v3801_v15 = vpop.f32.mrf.mxu1  ;;  %v3701_v57 = vadd.f32 %v3700_v13, %v7448_v1  ;;  %v7787_v21 = vadd.f32 %v3799_v39, %v3699_v8  ;;  %4461 = vmatpush1.bf16.msra.mxu0 %v6089_v61  ;;  %v6115_v1 = vld [vmem:[%s8565_s0 + $0x364] ss:$100 sps:$4 sm:$0xff]  }
 0x158   :  { %4562 = vmatpush1.bf16.msra.mxu1 %v6092_v41  ;;  %v3702_v24 = vpop.f32.mrf.mxu0  ;;  %4462 = vmatprep.subr.bf16.mxu0 %v6100_v63  ;;  %v6130_v41 = vld [vmem:[%s8564_s1 + $0xbe4] ss:$8 sps:$4 sm:$0xff]   ;;  %v6125_v13 = vld [vmem:[%s8564_s1 + $0xae0] ss:$8 sps:$4 sm:$0xff]  }
 0x159   :  { %v3803_v27 = vpop.f32.mrf.mxu1  ;;  %4563 = vmatprep.subr.bf16.mxu1 %v6103_v7  ;;  %v3703_v28 = vadd.f32 %v3702_v24, %v7460_v9  ;;  %v7799_v19 = vadd.f32 %v3801_v15, %v3701_v57  ;;  %v6110_v9 = vld [vmem:[%s8564_s1 + $0xb00] ss:$8 sps:$4 sm:$0xff]   ;;  %v6142_v7 = vld [vmem:[%s8565_s0 + $0x434] ss:$100 sps:$4 sm:$0xff]  }
 0x15a   :  { %v3706_v31 = vpop.f32.mrf.mxu0  ;;  %4311 = vmatmul.mubr.bf16.gmra.mxu0 %v6095_v49 }
 0x15b   :  { %v3807_v35 = vpop.f32.mrf.mxu1  ;;  %4412 = vmatmul.mubr.bf16.gmra.mxu1 %v6104_v18  ;;  %v3707_v37 = vadd.f32 %v3706_v31, %v7472_v17  ;;  %v7808_v40 = vadd.f32 %v3803_v27, %v3703_v28  ;;  %4463 = vmatpush1.bf16.msra.mxu0 %v6098_v12  ;;  %v6113_v17 = vld [vmem:[%s8565_s0 + $0x360] ss:$100 sps:$4 sm:$0xff]   ;;  %v6136_v18 = vld [vmem:[%s8564_s1 + $0xad4] ss:$8 sps:$4 sm:$0xff]  }
 0x15c   :  { %4564 = vmatpush1.bf16.msra.mxu1 %v6101_v16  ;;  %v3708_v26 = vpop.f32.mrf.mxu0  ;;  %4464 = vmatprep.subr.bf16.mxu0 %v6109_v22  ;;  %v6140_v28 = vld [vmem:[%s8565_s0 + $0x430] ss:$100 sps:$4 sm:$0xff]  }
 0x15d   :  { %v3809_v46 = vpop.f32.mrf.mxu1  ;;  %4565 = vmatprep.subr.bf16.mxu1 %v6112_v11  ;;  %v3709_v48 = vadd.f32 %v3708_v26, %v7484_v25  ;;  %v7823_v51 = vadd.f32 %v3807_v35, %v3707_v37  ;;  %4320 = vmatprep.mubr.bf16.mxu0 %v6115_v1  ;;  %v6139_v11 = vld [vmem:[%s8564_s1 + $0xbd4] ss:$8 sps:$4 sm:$0xff]   ;;  %v6134_v1 = vld [vmem:[%s8564_s1 + $0xad0] ss:$8 sps:$4 sm:$0xff]  }
 0x15e   :  { %4421 = vmatprep.mubr.bf16.mxu1 %v6124_v30  ;;  %v3710_v52 = vpop.f32.mrf.mxu0  ;;  %v179_v35 = vld [vmem:[%s8565_s0 + $0x4f0] sm:$0xff] }
 0x15f   :  { %v3811_v56 = vpop.f32.mrf.mxu1  ;;  %v3711_v25 = vadd.f32 %v3710_v52, %v7496_v34  ;;  %v7835_v61 = vadd.f32 %v3809_v46, %v3709_v48  ;;  %4465 = vmatpush1.bf16.msra.mxu0 %v6107_v36  ;;  %v6133_v34 = vld [vmem:[%s8565_s0 + $0x42c] ss:$100 sps:$4 sm:$0xff]   ;;  %v4976_v48 = vcombine.high %v179_v35, %v179_v35 }
 0x160   :  { %4566 = vmatpush1.bf16.msra.mxu1 %v6110_v9  ;;  %v3712_v63 = vpop.f32.mrf.mxu0  ;;  %4466 = vmatprep.subr.bf16.mxu0 %v6118_v42  ;;  %v6137_v9 = vld [vmem:[%s8564_s1 + $0xbd0] ss:$8 sps:$4 sm:$0xff]   ;;  %v6145_v42 = vld [vmem:[%s8564_s1 + $0xac4] ss:$8 sps:$4 sm:$0xff]  }
 0x161   :  { %v3813_v4 = vpop.f32.mrf.mxu1  ;;  %4567 = vmatprep.subr.bf16.mxu1 %v6121_v47  ;;  %v3713_v39 = vadd.f32 %v3712_v63, %v7508_v44  ;;  %v7847_v49 = vadd.f32 %v3811_v56, %v3711_v25  ;;  %v6128_v44 = vld [vmem:[%s8564_s1 + $0xbe0] ss:$8 sps:$4 sm:$0xff]   ;;  %v6156_v63 = vld [vmem:[%s8564_s1 + $0xbb4] ss:$8 sps:$4 sm:$0xff]  }
 0x162   :  { %v3716_v8 = vpop.f32.mrf.mxu0  ;;  %4321 = vmatmul.mubr.bf16.gmra.mxu0 %v6113_v17  ;;  %v6143_v25 = vld [vmem:[%s8564_s1 + $0xac0] ss:$8 sps:$4 sm:$0xff]  }
 0x163   :  { %v3817_v12 = vpop.f32.mrf.mxu1  ;;  %4422 = vmatmul.mubr.bf16.gmra.mxu1 %v6122_v59  ;;  %v3717_v15 = vadd.f32 %v3716_v8, %v7523_v53  ;;  %v7856_v16 = vadd.f32 %v3813_v4, %v3713_v39  ;;  %4467 = vmatpush2.bf16.msra.mxu0 %v6116_v33  ;;  %v6131_v53 = vld [vmem:[%s8565_s0 + $0x428] ss:$100 sps:$4 sm:$0xff]   ;;  %v6151_v39 = vld [vmem:[%s8564_s1 + $0xab0] ss:$8 sps:$4 sm:$0xff]  }
 0x164   :  { %4568 = vmatpush2.bf16.msra.mxu1 %v6119_v58  ;;  %v3718_v57 = vpop.f32.mrf.mxu0  ;;  %4468 = vmatprep.subr.bf16.mxu0 %v6127_v62 }
 0x165   :  { %v3819_v22 = vpop.f32.mrf.mxu1  ;;  %4569 = vmatprep.subr.bf16.mxu1 %v6130_v41  ;;  %v3719_v24 = vadd.f32 %v3718_v57, %v7538_v0  ;;  %v7871_v27 = vadd.f32 %v3817_v12, %v3717_v15  ;;  %4330 = vmatprep.mubr.bf16.mxu0 %v6133_v34  ;;  %v180_v0 = vld [vmem:[%s8565_s0 + $0x4f8] sm:$0xff]  ;;  %v6164_v57 = vld [vmem:[%s8564_s1 + $0xba4] ss:$8 sps:$4 sm:$0xff]  }
 0x166   :  { %4431 = vmatprep.mubr.bf16.mxu1 %v6142_v7  ;;  %v3720_v30 = vpop.f32.mrf.mxu0  ;;  %v4978_v33 = vcombine.high %v180_v0, %v180_v0  ;;  %v6154_v7 = vld [vmem:[%s8564_s1 + $0xbb0] ss:$8 sps:$4 sm:$0xff]   ;;  %v4977_v15 = vcombine.low %v180_v0, %v180_v0 }
 0x167   :  { %v3821_v31 = vpop.f32.mrf.mxu1  ;;  %v3721_v36 = vadd.f32 %v3720_v30, %v7550_v10  ;;  %v7886_v37 = vadd.f32 %v3819_v22, %v3719_v24  ;;  %4469 = vmatpush2.bf16.msra.mxu0 %v6125_v13  ;;  %v6148_v10 = vld [vmem:[%s8564_s1 + $0xbc4] ss:$8 sps:$4 sm:$0xff]   ;;  %v4975_v13 = vcombine.low %v179_v35, %v179_v35 }
 0x168   :  { %4570 = vmatpush2.bf16.msra.mxu1 %v6128_v44  ;;  %v3722_v26 = vpop.f32.mrf.mxu0  ;;  %4470 = vmatprep.subr.bf16.mxu0 %v6136_v18 }
 0x169   :  { %v3823_v46 = vpop.f32.mrf.mxu1  ;;  %4571 = vmatprep.subr.bf16.mxu1 %v6139_v11  ;;  %v3723_v17 = vadd.f32 %v3722_v26, %v7556_v20  ;;  %v7898_v47 = vadd.f32 %v3821_v31, %v3721_v36  ;;  %v6146_v20 = vld [vmem:[%s8564_s1 + $0xbc0] ss:$8 sps:$4 sm:$0xff]   ;;  %v6179_v11 = vld [vmem:[%s8565_s0 + $0x54] ss:$100 sps:$4 sm:$0xff]  }
 0x16a   :  { %v3726_v52 = vpop.f32.mrf.mxu0  ;;  %4331 = vmatmul.mubr.bf16.gmra.mxu0 %v6131_v53  ;;  %v6159_v31 = vld [vmem:[%s8564_s1 + $0xaa0] ss:$8 sps:$4 sm:$0xff]  }
 0x16b   :  { %v3827_v56 = vpop.f32.mrf.mxu1  ;;  %4432 = vmatmul.mubr.bf16.gmra.mxu1 %v6140_v28  ;;  %v3727_v58 = vadd.f32 %v3726_v52, %v7568_v29  ;;  %v7901_v59 = vadd.f32 %v3823_v46, %v3723_v17  ;;  %4471 = vmatpush2.bf16.msra.mxu0 %v6134_v1  ;;  %v6153_v29 = vld [vmem:[%s8564_s1 + $0xab4] ss:$8 sps:$4 sm:$0xff]   ;;  %v6168_v52 = vld [vmem:[%s8564_s1 + $0xb90] ss:$8 sps:$4 sm:$0xff]  }
 0x16c   :  { %4572 = vmatpush2.bf16.msra.mxu1 %v6137_v9  ;;  %v3728_v62 = vpop.f32.mrf.mxu0  ;;  %4472 = vmatprep.subr.bf16.mxu0 %v6145_v42  ;;  %v6167_v42 = vld [vmem:[%s8564_s1 + $0xa94] ss:$8 sps:$4 sm:$0xff]  }
 0x16d   :  { %v3829_v41 = vpop.f32.mrf.mxu1  ;;  %4573 = vmatprep.subr.bf16.mxu1 %v6148_v10  ;;  %v3729_v4 = vadd.f32 %v3728_v62, %v7574_v38  ;;  %v7916_v34 = vadd.f32 %v3827_v56, %v3727_v58  ;;  %4340 = vmatprep.mubr.bf16.mxu0 %v4976_v48  ;;  %v6161_v38 = vld [vmem:[%s8564_s1 + $0xaa4] ss:$8 sps:$4 sm:$0xff]   ;;  %v6174_v62 = vld [vmem:[%s8564_s1 + $0xb80] ss:$8 sps:$4 sm:$0xff]  }
 0x16e   :  { %4441 = vmatprep.mubr.bf16.mxu1 %v4978_v33  ;;  %v3730_v8 = vpop.f32.mrf.mxu0  ;;  %v6165_v33 = vld [vmem:[%s8564_s1 + $0xa90] ss:$8 sps:$4 sm:$0xff]   ;;  %v6173_v56 = vld [vmem:[%s8564_s1 + $0xa84] ss:$8 sps:$4 sm:$0xff]  }
 0x16f   :  { %v3831_v12 = vpop.f32.mrf.mxu1  ;;  %v3731_v44 = vadd.f32 %v3730_v8, %v7586_v50  ;;  %v7928_v18 = vadd.f32 %v3829_v41, %v3729_v4  ;;  %4473 = vmatpush2.bf16.msra.mxu0 %v6143_v25  ;;  %v6182_v50 = vld [vmem:[%s8565_s0 + $0x5c] ss:$100 sps:$4 sm:$0xff]   ;;  %v6176_v58 = vld [vmem:[%s8564_s1 + $0xb84] ss:$8 sps:$4 sm:$0xff]   ;;  %v6183_v4 = vld [vmem:[%s8564_s1 + $0xc70] ss:$8 sps:$4 sm:$0xff]  }
 0x170   :  { %4574 = vmatpush2.bf16.msra.mxu1 %v6146_v20  ;;  %v3732_v22 = vpop.f32.mrf.mxu0  ;;  %4474 = vmatprep.subr.bf16.mxu0 %v6153_v29  ;;  %v6171_v20 = vld [vmem:[%s8564_s1 + $0xa80] ss:$8 sps:$4 sm:$0xff]   ;;  %v6185_v41 = vld [vmem:[%s8564_s1 + $0xc74] ss:$8 sps:$4 sm:$0xff]   ;;  %v6194_v8 = vld [vmem:[%s8564_s1 + $0xc64] ss:$8 sps:$4 sm:$0xff]  }
 0x171   :  { %v3833_v53 = vpop.f32.mrf.mxu1  ;;  %4575 = vmatprep.subr.bf16.mxu1 %v6156_v63  ;;  %v3733_v24 = vadd.f32 %v3732_v22, %v7598_v60  ;;  %v7937_v1 = vadd.f32 %v3831_v12, %v3731_v44  ;;  %v6162_v60 = vld [vmem:[%s8564_s1 + $0xba0] ss:$8 sps:$4 sm:$0xff]   ;;  %v6177_v29 = vld [vmem:[%s8565_s0 + $0x50] ss:$100 sps:$4 sm:$0xff]   ;;  %v6180_v63 = vld [vmem:[%s8565_s0 + $0x58] ss:$100 sps:$4 sm:$0xff]  }
 0x172   :  { %v3736_v28 = vpop.f32.mrf.mxu0  ;;  %4341 = vmatmul.mubr.bf16.gmra.mxu0 %v4975_v13  ;;  %v6197_v22 = vld [vmem:[%s8564_s1 + $0xc54] ss:$8 sps:$4 sm:$0xff]  }
 0x173   :  { %v3837_v30 = vpop.f32.mrf.mxu1  ;;  %4442 = vmatmul.mubr.bf16.gmra.mxu1 %v4977_v15  ;;  %v3737_v35 = vadd.f32 %v3736_v28, %v7610_v5  ;;  %v7946_v0 = vadd.f32 %v3833_v53, %v3733_v24  ;;  %4475 = vmatpush2.bf16.msra.mxu0 %v6151_v39  ;;  %v6170_v5 = vld [vmem:[%s8564_s1 + $0xb94] ss:$8 sps:$4 sm:$0xff]   ;;  %v6189_v28 = vld [vmem:[%s8565_s0 + $0x120] ss:$100 sps:$4 sm:$0xff]  }
 0x174   :  { %4576 = vmatpush2.bf16.msra.mxu1 %v6154_v7  ;;  %v3738_v36 = vpop.f32.mrf.mxu0  ;;  %4476 = vmatprep.subr.bf16.mxu0 %v6161_v38  ;;  %v6188_v39 = vld [vmem:[%s8565_s0 + $0x11c] ss:$100 sps:$4 sm:$0xff]   ;;  %v6191_v7 = vld [vmem:[%s8565_s0 + $0x124] ss:$100 sps:$4 sm:$0xff]  }
 0x175   :  { %v3839_v9 = vpop.f32.mrf.mxu1  ;;  %4577 = vmatprep.subr.bf16.mxu1 %v6164_v57  ;;  %v3739_v26 = vadd.f32 %v3738_v36, %v7618_v14  ;;  %v7958_v46 = vadd.f32 %v3837_v30, %v3737_v35  ;;  %4482 = vmatprep.mubr.bf16.mxu0 %v6179_v11  ;;  %v6192_v38 = vld [vmem:[%s8564_s1 + $0xc60] ss:$8 sps:$4 sm:$0xff]   ;;  %v6203_v35 = vld [vmem:[%s8565_s0 + $0x1ec] ss:$100 sps:$4 sm:$0xff]  }
 0x176   :  { %4583 = vmatprep.mubr.bf16.mxu1 %v6182_v50  ;;  %v3740_v10 = vpop.f32.mrf.mxu0  ;;  %v6186_v50 = vld [vmem:[%s8565_s0 + $0x118] ss:$100 sps:$4 sm:$0xff]  }
 0x177   :  { %v3841_v17 = vpop.f32.mrf.mxu1  ;;  %v7960_v48 = vadd.f32 %v3839_v9, %v3739_v26  ;;  %4477 = vmatpush2.bf16.msra.mxu0 %v6159_v31  ;;  %v6195_v9 = vld [vmem:[%s8564_s1 + $0xc50] ss:$8 sps:$4 sm:$0xff]  }
 0x178   :  { %4578 = vmatpush2.bf16.msra.mxu1 %v6162_v60  ;;  %4478 = vmatprep.subr.bf16.mxu0 %v6167_v42  ;;  %v3741_v14 = vpop.f32.mrf.mxu0 }
 0x179   :  { %4579 = vmatprep.subr.bf16.mxu1 %v6170_v5  ;;  %v3842_v25 = vpop.f32.mrf.mxu1  ;;  %v6206_v5 = vld [vmem:[%s8564_s1 + $0xc44] ss:$8 sps:$4 sm:$0xff]  }
 0x17b   :  { %4479 = vmatpush2.bf16.msra.mxu0 %v6165_v33 }
 0x17c   :  { %4580 = vmatpush2.bf16.msra.mxu1 %v6168_v52  ;;  %4480 = vmatprep.subr.bf16.mxu0 %v6173_v56 }
 0x17d   :  { %4581 = vmatprep.subr.bf16.mxu1 %v6176_v58 }
 0x17f   :  { %4481 = vmatpush2.bf16.msra.mxu0 %v6171_v20 }
 0x180   :  { %4582 = vmatpush2.bf16.msra.mxu1 %v6174_v62  ;;  %4652 = vmatprep.subr.bf16.mxu0 %v6185_v41  ;;  %v6198_v62 = vld [vmem:[%s8565_s0 + $0x1e0] ss:$100 sps:$4 sm:$0xff]  }
 0x181   :  { %5384 = vmatprep.subr.bf16.mxu1 %v6185_v41  ;;  %v6201_v41 = vld [vmem:[%s8565_s0 + $0x1e8] ss:$100 sps:$4 sm:$0xff]  }
 0x182   :  { %v3878_v12 = vpop.f32.mrf.mxu0  ;;  %4483 = vmatmul.mubr.bf16.vlgmr.msra.gmra.mxu0 %v6177_v29 }
 0x183   :  { %4584 = vmatmul.mubr.bf16.vlgmr.msra.gmra.mxu1 %v6180_v63  ;;  %v3979_v13 = vpop.f32.mrf.mxu1  ;;  %v3879_v15 = vadd.f32 %v3878_v12, %v7676_v55  ;;  %4653 = vmatpush1.bf16.msra.mxu0 %v6183_v4  ;;  %v6209_v63 = vld [vmem:[%s8565_s0 + $0x2ac] ss:$100 sps:$4 sm:$0xff]  }
 0x184   :  { %4492 = vmatprep.mubr.bf16.mxu0 %v6188_v39  ;;  %v3880_v44 = vpop.f32.mrf.mxu0  ;;  %4593 = vmatprep.mubr.bf16.mxu1 %v6191_v7 }
 0x185   :  { %v3981_v57 = vpop.f32.mrf.mxu1  ;;  %4654 = vmatprep.subr.bf16.mxu0 %v6194_v8  ;;  %v3881_v53 = vadd.f32 %v3880_v44, %v7688_v3  ;;  %v8009_v11 = vadd.f32 %v3979_v13, %v3879_v15  ;;  %5392 = vmatpush1.bf16.msra.mxu1 %v6183_v4  ;;  %v6200_v3 = vld [vmem:[%s8565_s0 + $0x1e4] ss:$100 sps:$4 sm:$0xff]   ;;  %v6212_v4 = vld [vmem:[%s8565_s0 + $0x2b4] ss:$100 sps:$4 sm:$0xff]  }
 0x186   :  { %v3882_v55 = vpop.f32.mrf.mxu0  ;;  %5385 = vmatprep.subr.bf16.mxu1 %v6194_v8  ;;  %v6213_v8 = vld [vmem:[%s8564_s1 + $0xc30] ss:$8 sps:$4 sm:$0xff]   ;;  %v6224_v13 = vld [vmem:[%s8564_s1 + $0xc24] ss:$8 sps:$4 sm:$0xff]  }
 0x187   :  { %v3983_v24 = vpop.f32.mrf.mxu1  ;;  %v3883_v30 = vadd.f32 %v3882_v55, %v7703_v43  ;;  %v8018_v31 = vadd.f32 %v3981_v57, %v3881_v53  ;;  %4655 = vmatpush1.bf16.msra.mxu0 %v6192_v38  ;;  %v6222_v53 = vld [vmem:[%s8564_s1 + $0xc20] ss:$8 sps:$4 sm:$0xff]  }
 0x188   :  { %v3884_v60 = vpop.f32.mrf.mxu0  ;;  %4656 = vmatprep.subr.bf16.mxu0 %v6197_v22 }
 0x189   :  { %v3985_v36 = vpop.f32.mrf.mxu1  ;;  %v3885_v43 = vadd.f32 %v3884_v60, %v7712_v23  ;;  %v8030_v42 = vadd.f32 %v3983_v24, %v3883_v30  ;;  %5393 = vmatpush1.bf16.msra.mxu1 %v6192_v38  ;;  %v6204_v23 = vld [vmem:[%s8564_s1 + $0xc40] ss:$8 sps:$4 sm:$0xff]   ;;  %v6218_v60 = vld [vmem:[%s8565_s0 + $0x374] ss:$100 sps:$4 sm:$0xff]  }
 0x18a   :  { %v3888_v26 = vpop.f32.mrf.mxu0  ;;  %4493 = vmatmul.mubr.bf16.gmra.mxu0 %v6186_v50  ;;  %5386 = vmatprep.subr.bf16.mxu1 %v6197_v22  ;;  %v6207_v30 = vld [vmem:[%s8565_s0 + $0x2a8] ss:$100 sps:$4 sm:$0xff]  }
 0x18b   :  { %4594 = vmatmul.mubr.bf16.gmra.mxu1 %v6189_v28  ;;  %v3989_v10 = vpop.f32.mrf.mxu1  ;;  %v3889_v17 = vadd.f32 %v3888_v26, %v7727_v32  ;;  %v8036_v33 = vadd.f32 %v3985_v36, %v3885_v43  ;;  %4502 = vmatprep.mubr.bf16.mxu0 %v6200_v3  ;;  %v6215_v32 = vld [vmem:[%s8564_s1 + $0xc34] ss:$8 sps:$4 sm:$0xff]  }
 0x18c   :  { %4603 = vmatprep.mubr.bf16.mxu1 %v6203_v35  ;;  %v3890_v52 = vpop.f32.mrf.mxu0  ;;  %4657 = vmatpush1.bf16.msra.mxu0 %v6195_v9  ;;  %v6210_v3 = vld [vmem:[%s8565_s0 + $0x2b0] ss:$100 sps:$4 sm:$0xff]   ;;  %v6221_v36 = vld [vmem:[%s8565_s0 + $0x37c] ss:$100 sps:$4 sm:$0xff]  }
 0x18d   :  { %v3991_v14 = vpop.f32.mrf.mxu1  ;;  %v3891_v56 = vadd.f32 %v3890_v52, %v7739_v45  ;;  %v8042_v58 = vadd.f32 %v3989_v10, %v3889_v17  ;;  %4658 = vmatprep.subr.bf16.mxu0 %v6206_v5  ;;  %5394 = vmatpush1.bf16.msra.mxu1 %v6195_v9  ;;  %v6240_v10 = vld [vmem:[%s8564_s1 + $0xc04] ss:$8 sps:$4 sm:$0xff]  }
 0x18e   :  { %v3892_v25 = vpop.f32.mrf.mxu0  ;;  %5387 = vmatprep.subr.bf16.mxu1 %v6206_v5  ;;  %v6231_v5 = vld [vmem:[%s8564_s1 + $0xc10] ss:$8 sps:$4 sm:$0xff]  }
 0x18f   :  { %v3993_v20 = vpop.f32.mrf.mxu1  ;;  %v3893_v45 = vadd.f32 %v3892_v25, %v7751_v54  ;;  %v8054_v29 = vadd.f32 %v3991_v14, %v3891_v56 }
 0x190   :  { %v3894_v39 = vpop.f32.mrf.mxu0  ;;  %4659 = vmatpush1.bf16.msra.mxu0 %v6204_v23 }
 0x191   :  { %v3995_v7 = vpop.f32.mrf.mxu1  ;;  %v3895_v12 = vadd.f32 %v3894_v39, %v7760_v2  ;;  %v8066_v54 = vadd.f32 %v3993_v20, %v3893_v45  ;;  %4660 = vmatprep.subr.bf16.mxu0 %v6215_v32  ;;  %5395 = vmatpush1.bf16.msra.mxu1 %v6204_v23  ;;  %v6219_v45 = vld [vmem:[%s8565_s0 + $0x378] ss:$100 sps:$4 sm:$0xff]   ;;  %v6230_v39 = vld [vmem:[%s8565_s0 + $0x444] ss:$100 sps:$4 sm:$0xff]  }
 0x192   :  { %v3898_v15 = vpop.f32.mrf.mxu0  ;;  %4503 = vmatmul.mubr.bf16.gmra.mxu0 %v6198_v62  ;;  %5388 = vmatprep.subr.bf16.mxu1 %v6215_v32  ;;  %v6238_v32 = vld [vmem:[%s8564_s1 + $0xc00] ss:$8 sps:$4 sm:$0xff]  }
 0x193   :  { %4604 = vmatmul.mubr.bf16.gmra.mxu1 %v6201_v41  ;;  %v3999_v38 = vpop.f32.mrf.mxu1  ;;  %v3899_v44 = vadd.f32 %v3898_v15, %v7775_v6  ;;  %v8072_v57 = vadd.f32 %v3995_v7, %v3895_v12  ;;  %4512 = vmatprep.mubr.bf16.mxu0 %v6209_v63  ;;  %v6233_v6 = vld [vmem:[%s8564_s1 + $0xc14] ss:$8 sps:$4 sm:$0xff]  }
 0x194   :  { %4613 = vmatprep.mubr.bf16.mxu1 %v6212_v4  ;;  %v3900_v22 = vpop.f32.mrf.mxu0  ;;  %4661 = vmatpush1.bf16.msra.mxu0 %v6213_v8  ;;  %v6216_v41 = vld [vmem:[%s8565_s0 + $0x370] ss:$100 sps:$4 sm:$0xff]  }
 0x195   :  { %v4001_v2 = vpop.f32.mrf.mxu1  ;;  %v3901_v55 = vadd.f32 %v3900_v22, %v7787_v21  ;;  %v8078_v24 = vadd.f32 %v3999_v38, %v3899_v44  ;;  %4662 = vmatprep.subr.bf16.mxu0 %v6224_v13  ;;  %5396 = vmatpush1.bf16.msra.mxu1 %v6213_v8 }
 0x196   :  { %v3902_v50 = vpop.f32.mrf.mxu0  ;;  %5389 = vmatprep.subr.bf16.mxu1 %v6224_v13 }
 0x197   :  { %v4003_v28 = vpop.f32.mrf.mxu1  ;;  %v3903_v21 = vadd.f32 %v3902_v50, %v7799_v19  ;;  %v8090_v35 = vadd.f32 %v4001_v2, %v3901_v55 }
 0x198   :  { %v3904_v9 = vpop.f32.mrf.mxu0  ;;  %4663 = vmatpush1.bf16.msra.mxu0 %v6222_v53 }
 0x199   :  { %v4005_v43 = vpop.f32.mrf.mxu1  ;;  %v3905_v26 = vadd.f32 %v3904_v9, %v7808_v40  ;;  %v8102_v19 = vadd.f32 %v4003_v28, %v3903_v21  ;;  %4664 = vmatprep.subr.bf16.mxu0 %v6233_v6  ;;  %5397 = vmatpush1.bf16.msra.mxu1 %v6222_v53  ;;  %v181_v53 = vld [vmem:[%s8565_s0 + $0x500] sm:$0xff]  ;;  %v6225_v28 = vld [vmem:[%s8565_s0 + $0x438] ss:$100 sps:$4 sm:$0xff]  }
 0x19a   :  { %v3908_v17 = vpop.f32.mrf.mxu0  ;;  %4513 = vmatmul.mubr.bf16.gmra.mxu0 %v6207_v30  ;;  %5390 = vmatprep.subr.bf16.mxu1 %v6233_v6  ;;  %v6228_v30 = vld [vmem:[%s8565_s0 + $0x440] ss:$100 sps:$4 sm:$0xff]  }
 0x19b   :  { %4614 = vmatmul.mubr.bf16.gmra.mxu1 %v6210_v3  ;;  %v4009_v52 = vpop.f32.mrf.mxu1  ;;  %v3909_v14 = vadd.f32 %v3908_v17, %v7823_v51  ;;  %v8108_v23 = vadd.f32 %v4005_v43, %v3905_v26  ;;  %4522 = vmatprep.mubr.bf16.mxu0 %v6218_v60  ;;  %v4980_v60 = vcombine.high %v181_v53, %v181_v53 }
 0x19c   :  { %4623 = vmatprep.mubr.bf16.mxu1 %v6221_v36  ;;  %v3910_v56 = vpop.f32.mrf.mxu0  ;;  %4665 = vmatpush1.bf16.msra.mxu0 %v6231_v5 }
 0x19d   :  { %v4011_v40 = vpop.f32.mrf.mxu1  ;;  %v3911_v25 = vadd.f32 %v3910_v56, %v7835_v61  ;;  %v8114_v20 = vadd.f32 %v4009_v52, %v3909_v14  ;;  %5398 = vmatpush1.bf16.msra.mxu1 %v6231_v5  ;;  %4666 = vmatprep.subr.bf16.mxu0 %v6240_v10  ;;  %v6227_v61 = vld [vmem:[%s8565_s0 + $0x43c] ss:$100 sps:$4 sm:$0xff]  }
 0x19e   :  { %v3912_v62 = vpop.f32.mrf.mxu0  ;;  %5391 = vmatprep.subr.bf16.mxu1 %v6240_v10 }
 0x19f   :  { %v4013_v51 = vpop.f32.mrf.mxu1  ;;  %v3913_v63 = vadd.f32 %v3912_v62, %v7847_v49  ;;  %v8123_v4 = vadd.f32 %v4011_v40, %v3911_v25  ;;  %v4979_v25 = vcombine.low %v181_v53, %v181_v53 }
 0x1a0   :  { %v3914_v7 = vpop.f32.mrf.mxu0  ;;  %4667 = vmatpush1.bf16.msra.mxu0 %v6238_v32 }
 0x1a1   :  { %v4015_v8 = vpop.f32.mrf.mxu1  ;;  %v3915_v12 = vadd.f32 %v3914_v7, %v7856_v16  ;;  %v8132_v13 = vadd.f32 %v4013_v51, %v3913_v63  ;;  %5399 = vmatpush1.bf16.msra.mxu1 %v6238_v32  ;;  %v182_v16 = vld [vmem:[%s8565_s0 + $0x508] sm:$0xff] }
 0x1a2   :  { %v3918_v15 = vpop.f32.mrf.mxu0  ;;  %4523 = vmatmul.mubr.bf16.gmra.mxu0 %v6216_v41  ;;  %v4982_v36 = vcombine.high %v182_v16, %v182_v16  ;;  %v4981_v62 = vcombine.low %v182_v16, %v182_v16 }
 0x1a3   :  { %4624 = vmatmul.mubr.bf16.gmra.mxu1 %v6219_v45  ;;  %v4019_v49 = vpop.f32.mrf.mxu1  ;;  %v3919_v38 = vadd.f32 %v3918_v15, %v7871_v27  ;;  %v8135_v44 = vadd.f32 %v4015_v8, %v3915_v12  ;;  %4532 = vmatprep.mubr.bf16.mxu0 %v6227_v61  ;;  %v6248_v12 = vmov 0  }
 0x1a4   :  { %4633 = vmatprep.mubr.bf16.mxu1 %v6230_v39  ;;  %v3920_v22 = vpop.f32.mrf.mxu0 }
 0x1a5   :  { %v4021_v2 = vpop.f32.mrf.mxu1  ;;  %v3921_v55 = vadd.f32 %v3920_v22, %v7886_v37  ;;  %v8144_v6 = vadd.f32 %v4019_v49, %v3919_v38  ;;  %v6241_v22 = vld [vmem:[%s8565_s0 + $0x60] ss:$100 sps:$4 sm:$0xff]  }
 0x1a6   :  { %v3922_v50 = vpop.f32.mrf.mxu0 }
 0x1a7   :  { %v4023_v27 = vpop.f32.mrf.mxu1  ;;  %v3923_v3 = vadd.f32 %v3922_v50, %v7898_v47  ;;  %v8153_v21 = vadd.f32 %v4021_v2, %v3921_v55  ;;  %v6244_v50 = vld [vmem:[%s8565_s0 + $0x448] ss:$100 sps:$4 sm:$0xff]  }
 0x1a8   :  { %v3924_v9 = vpop.f32.mrf.mxu0 }
 0x1a9   :  { %v4025_v37 = vpop.f32.mrf.mxu1  ;;  %v3925_v43 = vadd.f32 %v3924_v9, %v7901_v59  ;;  %v8156_v5 = vadd.f32 %v4023_v27, %v3923_v3 }
 0x1aa   :  { %v3928_v26 = vpop.f32.mrf.mxu0  ;;  %4533 = vmatmul.mubr.bf16.gmra.mxu0 %v6225_v28 }
 0x1ab   :  { %4634 = vmatmul.mubr.bf16.gmra.mxu1 %v6228_v30  ;;  %v4029_v10 = vpop.f32.mrf.mxu1  ;;  %v3929_v17 = vadd.f32 %v3928_v26, %v7916_v34  ;;  %v8159_v52 = vadd.f32 %v4025_v37, %v3925_v43  ;;  %4542 = vmatprep.mubr.bf16.mxu0 %v4980_v60  ;;  %v6245_v26 = vld [vmem:[%s8565_s0 + $0x1f0] ss:$100 sps:$4 sm:$0xff]  }
 0x1ac   :  { %4643 = vmatprep.mubr.bf16.mxu1 %v4982_v36  ;;  %v3930_v47 = vpop.f32.mrf.mxu0 }
 0x1ad   :  { %v4031_v14 = vpop.f32.mrf.mxu1  ;;  %v3931_v56 = vadd.f32 %v3930_v47, %v7928_v18  ;;  %v8162_v40 = vadd.f32 %v4029_v10, %v3929_v17  ;;  %v6246_v10 = vld [vmem:[%s8565_s0 + $0x510] ss:$0 sps:$4 sm:$0xff]  }
 0x1ae   :  { %v3932_v32 = vpop.f32.mrf.mxu0 }
 0x1af   :  { %v4033_v59 = vpop.f32.mrf.mxu1  ;;  %v3933_v51 = vadd.f32 %v3932_v32, %v7937_v1  ;;  %v8165_v41 = vadd.f32 %v4031_v14, %v3931_v56 }
 0x1b0   :  { %v3934_v45 = vpop.f32.mrf.mxu0 }
 0x1b1   :  { %v4035_v34 = vpop.f32.mrf.mxu1  ;;  %v3935_v63 = vadd.f32 %v3934_v45, %v7946_v0  ;;  %v8168_v61 = vadd.f32 %v4033_v59, %v3933_v51 }
 0x1b2   :  { %v3938_v39 = vpop.f32.mrf.mxu0  ;;  %4543 = vmatmul.mubr.bf16.gmra.mxu0 %v4979_v25 }
 0x1b3   :  { %4644 = vmatmul.mubr.bf16.gmra.mxu1 %v4981_v62  ;;  %v4039_v18 = vpop.f32.mrf.mxu1  ;;  %v3939_v7 = vadd.f32 %v3938_v39, %v7958_v46  ;;  %v8171_v8 = vadd.f32 %v4035_v34, %v3935_v63  ;;  %4684 = vmatprep.mubr.bf16.mxu0 %v6248_v12  ;;  %v6242_v46 = vld [vmem:[%s8565_s0 + $0x380] ss:$100 sps:$4 sm:$0xff]  }
 0x1b4   :  { %4724 = vmatprep.mubr.bf16.mxu1 %v6248_v12  ;;  %v3940_v1 = vpop.f32.mrf.mxu0 }
 0x1b5   :  { %v4041_v15 = vpop.f32.mrf.mxu1  ;;  %v3941_v49 = vadd.f32 %v3940_v1, %v7960_v48  ;;  %v8174_v38 = vadd.f32 %v4039_v18, %v3939_v7  ;;  %v6243_v48 = vld [vmem:[%s8565_s0 + $0x128] ss:$100 sps:$4 sm:$0xff]  }
 0x1b6   :  { %v3942_v0 = vpop.f32.mrf.mxu0 }
 0x1b7   :  { %v4043_v2 = vpop.f32.mrf.mxu1  ;;  %v8182_v53 = vadd.f32 %v4041_v15, %v3941_v49 }
 0x1b8   :  { %v3943_v16 = vpop.f32.mrf.mxu0 }
 0x1b9   :  { %v4044_v55 = vpop.f32.mrf.mxu1 }
 0x1ba   :  { %4685 = vmatmul.mubr.bf16.vlgmr.msra.gmra.mxu0 %v6241_v22 }
 0x1bb   :  { %4725 = vmatmul.mubr.bf16.vlgmr.msra.gmra.mxu1 %v6242_v46  ;;  %4694 = vmatprep.mubr.bf16.mxu0 %v6248_v12 }
 0x1bc   :  { %4734 = vmatprep.mubr.bf16.mxu1 %v6248_v12 }
 0x1c2   :  { %v4080_v27 = vpop.f32.mrf.mxu0  ;;  %4695 = vmatmul.mubr.bf16.gmra.mxu0 %v6243_v48 }
 0x1c3   :  { %4735 = vmatmul.mubr.bf16.gmra.mxu1 %v6244_v50  ;;  %v4181_v28 = vpop.f32.mrf.mxu1  ;;  %v4081_v30 = vadd.f32 %v4080_v27, %v8009_v11  ;;  %4704 = vmatprep.mubr.bf16.mxu0 %v6248_v12 }
 0x1c4   :  { %4744 = vmatprep.mubr.bf16.mxu1 %v6248_v12  ;;  %v4082_v3 = vpop.f32.mrf.mxu0 }
 0x1c5   :  { %v4183_v60 = vpop.f32.mrf.mxu1  ;;  %v4083_v36 = vadd.f32 %v4082_v3, %v8018_v31  ;;  %v8192_v9 = vadd.f32 %v4181_v28, %v4081_v30 }
 0x1c6   :  { %v4084_v37 = vpop.f32.mrf.mxu0 }
 0x1c7   :  { %v4185_v43 = vpop.f32.mrf.mxu1  ;;  %v4085_v11 = vadd.f32 %v4084_v37, %v8030_v42  ;;  %v8201_v17 = vadd.f32 %v4183_v60, %v4083_v36 }
 0x1c8   :  { %v4086_v47 = vpop.f32.mrf.mxu0 }
 0x1c9   :  { %v4187_v14 = vpop.f32.mrf.mxu1  ;;  %v4087_v31 = vadd.f32 %v4086_v47, %v8036_v33  ;;  %v8204_v56 = vadd.f32 %v4185_v43, %v4085_v11  ;;  %v6247_v33 = vld [vmem:[%s8565_s0 + $0x2b8] ss:$100 sps:$4 sm:$0xff]  }
 0x1ca   :  { %v4090_v32 = vpop.f32.mrf.mxu0  ;;  %4705 = vmatmul.mubr.bf16.gmra.mxu0 %v6245_v26 }
 0x1cb   :  { %4745 = vmatmul.mubr.bf16.gmra.mxu1 %v6246_v10  ;;  %v4191_v59 = vpop.f32.mrf.mxu1  ;;  %v4091_v25 = vadd.f32 %v4090_v32, %v8042_v58  ;;  %v8207_v62 = vadd.f32 %v4187_v14, %v4087_v31  ;;  %4714 = vmatprep.mubr.bf16.mxu0 %v6248_v12 }
 0x1cc   :  { %v4092_v51 = vpop.f32.mrf.mxu0 }
 0x1cd   :  { %v4193_v45 = vpop.f32.mrf.mxu1  ;;  %v4093_v42 = vadd.f32 %v4092_v51, %v8054_v29  ;;  %v8210_v34 = vadd.f32 %v4191_v59, %v4091_v25 }
 0x1ce   :  { %v4094_v63 = vpop.f32.mrf.mxu0 }
 0x1cf   :  { %v4195_v39 = vpop.f32.mrf.mxu1  ;;  %v4095_v18 = vadd.f32 %v4094_v63, %v8066_v54  ;;  %v8216_v7 = vadd.f32 %v4193_v45, %v4093_v42 }
 0x1d0   :  { %v4096_v58 = vpop.f32.mrf.mxu0 }
 0x1d1   :  { %v4197_v1 = vpop.f32.mrf.mxu1  ;;  %v4097_v12 = vadd.f32 %v4096_v58, %v8072_v57  ;;  %v8219_v15 = vadd.f32 %v4195_v39, %v4095_v18 }
 0x1d2   :  { %v4100_v49 = vpop.f32.mrf.mxu0  ;;  %4715 = vmatmul.mubr.bf16.gmra.mxu0 %v6247_v33 }
 0x1d3   :  { %v4201_v29 = vpop.f32.mrf.mxu1  ;;  %v4101_v0 = vadd.f32 %v4100_v49, %v8078_v24  ;;  %v8222_v22 = vadd.f32 %v4197_v1, %v4097_v12 }
 0x1d4   :  { %v4102_v46 = vpop.f32.mrf.mxu0 }
 0x1d5   :  { %v4203_v2 = vpop.f32.mrf.mxu1  ;;  %v4103_v16 = vadd.f32 %v4102_v46, %v8090_v35  ;;  %v8225_v54 = vadd.f32 %v4201_v29, %v4101_v0 }
 0x1d6   :  { %v4104_v55 = vpop.f32.mrf.mxu0 }
 0x1d7   :  { %v4205_v48 = vpop.f32.mrf.mxu1  ;;  %v4105_v50 = vadd.f32 %v4104_v55, %v8102_v19  ;;  %v8228_v57 = vadd.f32 %v4203_v2, %v4103_v16 }
 0x1d8   :  { %v4106_v27 = vpop.f32.mrf.mxu0 }
 0x1d9   :  { %v4207_v28 = vpop.f32.mrf.mxu1  ;;  %v4107_v30 = vadd.f32 %v4106_v27, %v8108_v23  ;;  %v8231_v3 = vadd.f32 %v4205_v48, %v4105_v50 }
 0x1da   :  { %v4110_v24 = vpop.f32.mrf.mxu0 }
 0x1db   :  { %v4211_v60 = vpop.f32.mrf.mxu1  ;;  %v4111_v36 = vadd.f32 %v4110_v24, %v8114_v20  ;;  %v8234_v37 = vadd.f32 %v4207_v28, %v4107_v30 }
 0x1dc   :  { %v4112_v35 = vpop.f32.mrf.mxu0 }
 0x1dd   :  { %v4213_v43 = vpop.f32.mrf.mxu1  ;;  %v4113_v26 = vadd.f32 %v4112_v35, %v8123_v4  ;;  %v8237_v10 = vadd.f32 %v4211_v60, %v4111_v36 }
 0x1de   :  { %v4114_v19 = vpop.f32.mrf.mxu0 }
 0x1df   :  { %v4215_v11 = vpop.f32.mrf.mxu1  ;;  %v4115_v47 = vadd.f32 %v4114_v19, %v8132_v13  ;;  %v8240_v14 = vadd.f32 %v4213_v43, %v4113_v26 }
 0x1e0   :  { %v4116_v23 = vpop.f32.mrf.mxu0 }
 0x1e1   :  { %v4217_v31 = vpop.f32.mrf.mxu1  ;;  %v4117_v32 = vadd.f32 %v4116_v23, %v8135_v44  ;;  %v8243_v59 = vadd.f32 %v4215_v11, %v4115_v47 }
 0x1e2   :  { %v4120_v20 = vpop.f32.mrf.mxu0 }
 0x1e3   :  { %v4221_v25 = vpop.f32.mrf.mxu1  ;;  %v4121_v51 = vadd.f32 %v4120_v20, %v8144_v6  ;;  %v8246_v45 = vadd.f32 %v4217_v31, %v4117_v32 }
 0x1e4   :  { %v4122_v4 = vpop.f32.mrf.mxu0 }
 0x1e5   :  { %v4223_v42 = vpop.f32.mrf.mxu1  ;;  %v4123_v63 = vadd.f32 %v4122_v4, %v8153_v21  ;;  %v8249_v39 = vadd.f32 %v4221_v25, %v4121_v51 }
 0x1e6   :  { %v4124_v13 = vpop.f32.mrf.mxu0 }
 0x1e7   :  { %v4225_v33 = vpop.f32.mrf.mxu1  ;;  %v4125_v18 = vadd.f32 %v4124_v13, %v8156_v5  ;;  %v8252_v58 = vadd.f32 %v4223_v42, %v4123_v63 }
 0x1e8   :  { %v4126_v44 = vpop.f32.mrf.mxu0 }
 0x1e9   :  { %v4227_v1 = vpop.f32.mrf.mxu1  ;;  %v4127_v12 = vadd.f32 %v4126_v44, %v8159_v52  ;;  %v8255_v49 = vadd.f32 %v4225_v33, %v4125_v18 }
 0x1ea   :  { %v4130_v6 = vpop.f32.mrf.mxu0 }
 0x1eb   :  { %v4231_v29 = vpop.f32.mrf.mxu1  ;;  %v4131_v0 = vadd.f32 %v4130_v6, %v8162_v40  ;;  %v8258_v46 = vadd.f32 %v4227_v1, %v4127_v12 }
 0x1ec   :  { %v4132_v21 = vpop.f32.mrf.mxu0 }
 0x1ed   :  { %v4233_v2 = vpop.f32.mrf.mxu1  ;;  %v4133_v16 = vadd.f32 %v4132_v21, %v8165_v41  ;;  %v8261_v55 = vadd.f32 %v4231_v29, %v4131_v0 }
 0x1ee   :  { %v4134_v5 = vpop.f32.mrf.mxu0 }
 0x1ef   :  { %v4235_v48 = vpop.f32.mrf.mxu1  ;;  %v4135_v50 = vadd.f32 %v4134_v5, %v8168_v61  ;;  %v8264_v27 = vadd.f32 %v4233_v2, %v4133_v16 }
 0x1f0   :  { %v4136_v52 = vpop.f32.mrf.mxu0 }
 0x1f1   :  { %v4237_v28 = vpop.f32.mrf.mxu1  ;;  %v4137_v30 = vadd.f32 %v4136_v52, %v8171_v8  ;;  %v8267_v24 = vadd.f32 %v4235_v48, %v4135_v50 }
 0x1f2   :  { %v4140_v40 = vpop.f32.mrf.mxu0 }
 0x1f3   :  { %v4241_v60 = vpop.f32.mrf.mxu1  ;;  %v4141_v36 = vadd.f32 %v4140_v40, %v8174_v38  ;;  %v8270_v35 = vadd.f32 %v4237_v28, %v4137_v30 }
 0x1f4   :  { %v4142_v41 = vpop.f32.mrf.mxu0 }
 0x1f5   :  { %v4243_v43 = vpop.f32.mrf.mxu1  ;;  %v4143_v26 = vadd.f32 %v4142_v41, %v8182_v53  ;;  %v8273_v19 = vadd.f32 %v4241_v60, %v4141_v36 }
 0x1f6   :  { %v4144_v61 = vpop.f32.mrf.mxu0 }
 0x1f7   :  { %v4245_v11 = vpop.f32.mrf.mxu1  ;;  %v8275_v47 = vadd.f32 %v4243_v43, %v4143_v26 }
 0x1f8   :  { %v4145_v23 = vpop.f32.mrf.mxu0 }
 0x1f9   :  { %v4246_v8 = vpop.f32.mrf.mxu1 }
 0x202   :  { %v4282_v31 = vpop.f32.mrf.mxu0 }
 0x203   :  { %v4383_v32 = vpop.f32.mrf.mxu1  ;;  %v4283_v20 = vadd.f32 %v4282_v31, %v8192_v9 }
 0x204   :  { %v4284_v25 = vpop.f32.mrf.mxu0 }
 0x205   :  { %v4385_v38 = vpop.f32.mrf.mxu1  ;;  %v4285_v51 = vadd.f32 %v4284_v25, %v8201_v17  ;;  %v8279_v4 = vadd.f32 %v4383_v32, %v4283_v20 }
 0x206   :  { %v4286_v42 = vpop.f32.mrf.mxu0 }
 0x207   :  { %v4387_v53 = vpop.f32.mrf.mxu1  ;;  %v4287_v63 = vadd.f32 %v4286_v42, %v8204_v56  ;;  %v8282_v13 = vadd.f32 %v4385_v38, %v4285_v51 }
 0x208   :  { %v4288_v33 = vpop.f32.mrf.mxu0 }
 0x209   :  { %v4389_v18 = vpop.f32.mrf.mxu1  ;;  %v4289_v44 = vadd.f32 %v4288_v33, %v8207_v62  ;;  %v8285_v1 = vadd.f32 %v4387_v53, %v4287_v63 }
 0x20a   :  { %v4292_v12 = vpop.f32.mrf.mxu0 }
 0x20b   :  { %v4393_v9 = vpop.f32.mrf.mxu1  ;;  %v4293_v6 = vadd.f32 %v4292_v12, %v8210_v34  ;;  %v8288_v29 = vadd.f32 %v4389_v18, %v4289_v44 }
 0x20c   :  { %v4294_v17 = vpop.f32.mrf.mxu0 }
 0x20d   :  { %v4395_v0 = vpop.f32.mrf.mxu1  ;;  %v4295_v21 = vadd.f32 %v4294_v17, %v8216_v7  ;;  %v8291_v2 = vadd.f32 %v4393_v9, %v4293_v6 }
 0x20e   :  { %v4296_v56 = vpop.f32.mrf.mxu0 }
 0x20f   :  { %v4397_v16 = vpop.f32.mrf.mxu1  ;;  %v4297_v5 = vadd.f32 %v4296_v56, %v8219_v15  ;;  %v8294_v48 = vadd.f32 %v4395_v0, %v4295_v21 }
 0x210   :  { %v4298_v62 = vpop.f32.mrf.mxu0 }
 0x211   :  { %v4399_v50 = vpop.f32.mrf.mxu1  ;;  %v4299_v52 = vadd.f32 %v4298_v62, %v8222_v22  ;;  %v8297_v28 = vadd.f32 %v4397_v16, %v4297_v5 }
 0x212   :  { %v4302_v34 = vpop.f32.mrf.mxu0 }
 0x213   :  { %v4403_v30 = vpop.f32.mrf.mxu1  ;;  %v4303_v40 = vadd.f32 %v4302_v34, %v8225_v54  ;;  %v8300_v60 = vadd.f32 %v4399_v50, %v4299_v52 }
 0x214   :  { %v4304_v7 = vpop.f32.mrf.mxu0 }
 0x215   :  { %v4405_v36 = vpop.f32.mrf.mxu1  ;;  %v4305_v41 = vadd.f32 %v4304_v7, %v8228_v57  ;;  %v8303_v43 = vadd.f32 %v4403_v30, %v4303_v40 }
 0x216   :  { %v4306_v15 = vpop.f32.mrf.mxu0 }
 0x217   :  { %v4407_v26 = vpop.f32.mrf.mxu1  ;;  %v4307_v61 = vadd.f32 %v4306_v15, %v8231_v3  ;;  %v8306_v11 = vadd.f32 %v4405_v36, %v4305_v41 }
 0x218   :  { %v4308_v22 = vpop.f32.mrf.mxu0 }
 0x219   :  { %8568 = vst [vmem:[#allocation2_spill] sm:$0xff] %v8306_v11  ;;  %v4409_v23 = vpop.f32.mrf.mxu1  ;;  %v4309_v8 = vadd.f32 %v4308_v22, %v8234_v37  ;;  %v8309_v31 = vadd.f32 %v4407_v26, %v4307_v61 }
 0x21a   :  { %v4312_v54 = vpop.f32.mrf.mxu0 }
 0x21b   :  { %8569 = vst [vmem:[#allocation3_spill] sm:$0xff] %v8309_v31  ;;  %v4413_v32 = vpop.f32.mrf.mxu1  ;;  %v4313_v20 = vadd.f32 %v4312_v54, %v8237_v10  ;;  %v8312_v25 = vadd.f32 %v4409_v23, %v4309_v8 }
 0x21c   :  { %v4314_v57 = vpop.f32.mrf.mxu0 }
 0x21d   :  { %8570 = vst [vmem:[#allocation4_spill] sm:$0xff] %v8312_v25  ;;  %v4415_v38 = vpop.f32.mrf.mxu1  ;;  %v4315_v51 = vadd.f32 %v4314_v57, %v8240_v14  ;;  %v8315_v42 = vadd.f32 %v4413_v32, %v4313_v20 }
 0x21e   :  { %v4316_v3 = vpop.f32.mrf.mxu0 }
 0x21f   :  { %8571 = vst [vmem:[#allocation5_spill] sm:$0xff] %v8315_v42  ;;  %v4417_v53 = vpop.f32.mrf.mxu1  ;;  %v4317_v63 = vadd.f32 %v4316_v3, %v8243_v59  ;;  %v8318_v33 = vadd.f32 %v4415_v38, %v4315_v51 }
 0x220   :  { %v4318_v37 = vpop.f32.mrf.mxu0 }
 0x221   :  { %8572 = vst [vmem:[#allocation6_spill] sm:$0xff] %v8318_v33  ;;  %v4419_v18 = vpop.f32.mrf.mxu1  ;;  %v4319_v44 = vadd.f32 %v4318_v37, %v8246_v45  ;;  %v8321_v12 = vadd.f32 %v4417_v53, %v4317_v63 }
 0x222   :  { %v4322_v10 = vpop.f32.mrf.mxu0 }
 0x223   :  { %8573 = vst [vmem:[#allocation7_spill] sm:$0xff] %v8321_v12  ;;  %v4423_v9 = vpop.f32.mrf.mxu1  ;;  %v4323_v6 = vadd.f32 %v4322_v10, %v8249_v39  ;;  %v8324_v17 = vadd.f32 %v4419_v18, %v4319_v44 }
 0x224   :  { %v4324_v14 = vpop.f32.mrf.mxu0 }
 0x225   :  { %8574 = vst [vmem:[#allocation8_spill] sm:$0xff] %v8324_v17  ;;  %v4425_v0 = vpop.f32.mrf.mxu1  ;;  %v4325_v21 = vadd.f32 %v4324_v14, %v8252_v58  ;;  %v8327_v56 = vadd.f32 %v4423_v9, %v4323_v6 }
 0x226   :  { %v4326_v59 = vpop.f32.mrf.mxu0 }
 0x227   :  { %v4427_v16 = vpop.f32.mrf.mxu1  ;;  %v4327_v5 = vadd.f32 %v4326_v59, %v8255_v49  ;;  %v8330_v62 = vadd.f32 %v4425_v0, %v4325_v21 }
 0x228   :  { %v4328_v45 = vpop.f32.mrf.mxu0 }
 0x229   :  { %v4429_v50 = vpop.f32.mrf.mxu1  ;;  %v4329_v52 = vadd.f32 %v4328_v45, %v8258_v46  ;;  %v8333_v34 = vadd.f32 %v4427_v16, %v4327_v5 }
 0x22a   :  { %v4332_v39 = vpop.f32.mrf.mxu0 }
 0x22b   :  { %v4433_v30 = vpop.f32.mrf.mxu1  ;;  %v4333_v40 = vadd.f32 %v4332_v39, %v8261_v55  ;;  %v8336_v7 = vadd.f32 %v4429_v50, %v4329_v52 }
 0x22c   :  { %v4334_v58 = vpop.f32.mrf.mxu0 }
 0x22d   :  { %v4435_v36 = vpop.f32.mrf.mxu1  ;;  %v4335_v41 = vadd.f32 %v4334_v58, %v8264_v27  ;;  %v8339_v15 = vadd.f32 %v4433_v30, %v4333_v40 }
 0x22e   :  { %v4336_v49 = vpop.f32.mrf.mxu0 }
 0x22f   :  { %v4437_v26 = vpop.f32.mrf.mxu1  ;;  %v4337_v61 = vadd.f32 %v4336_v49, %v8267_v24  ;;  %v8342_v22 = vadd.f32 %v4435_v36, %v4335_v41 }
 0x230   :  { %v4338_v46 = vpop.f32.mrf.mxu0 }
 0x231   :  { %v4439_v23 = vpop.f32.mrf.mxu1  ;;  %v4339_v8 = vadd.f32 %v4338_v46, %v8270_v35  ;;  %v8345_v54 = vadd.f32 %v4437_v26, %v4337_v61 }
 0x232   :  { %v4342_v55 = vpop.f32.mrf.mxu0 }
 0x233   :  { %v4443_v32 = vpop.f32.mrf.mxu1  ;;  %v4343_v20 = vadd.f32 %v4342_v55, %v8273_v19  ;;  %v8348_v57 = vadd.f32 %v4439_v23, %v4339_v8 }
 0x234   :  { %v4344_v27 = vpop.f32.mrf.mxu0 }
 0x235   :  { %v4445_v38 = vpop.f32.mrf.mxu1  ;;  %v4345_v51 = vadd.f32 %v4344_v27, %v8275_v47  ;;  %v8351_v3 = vadd.f32 %v4443_v32, %v4343_v20 }
 0x236   :  { %v4346_v24 = vpop.f32.mrf.mxu0 }
 0x237   :  { %v4447_v53 = vpop.f32.mrf.mxu1  ;;  %v8353_v63 = vadd.f32 %v4445_v38, %v4345_v51 }
 0x238   :  { %v4347_v37 = vpop.f32.mrf.mxu0 }
 0x239   :  { %8575 = vst [vmem:[#allocation9_spill] sm:$0xff] %v8353_v63  ;;  %v4448_v35 = vpop.f32.mrf.mxu1 }
 0x242   :  { %v4484_v18 = vpop.f32.mrf.mxu0 }
 0x243   :  { %v4585_v44 = vpop.f32.mrf.mxu1 }
 0x244   :  { %v4486_v10 = vpop.f32.mrf.mxu0 }
 0x245   :  { %v8355_v9 = vpop.f32.mrf.mxu1  ;;  %v4487_v31 = vadd.f32 %v4486_v10, %v8282_v13 }
 0x246   :  { %v4488_v19 = vpop.f32.mrf.mxu0 }
 0x247   :  { %v8357_v6 = vpop.f32.mrf.mxu1  ;;  %v4489_v63 = vadd.f32 %v4488_v19, %v8285_v1 }
 0x248   :  { %v4490_v14 = vpop.f32.mrf.mxu0 }
 0x249   :  { %v8359_v0 = vpop.f32.mrf.mxu1 }
 0x24a   :  { %v8361_v47 = vpop.f32.mrf.mxu0 }
 0x24b   :  { %v8363_v21 = vpop.f32.mrf.mxu1  ;;  %v4495_v1 = vadd.f32 %v8361_v47, %v8291_v2 }
 0x24c   :  { %v8365_v59 = vpop.f32.mrf.mxu0 }
 0x24d   :  { %v8367_v16 = vpop.f32.mrf.mxu1  ;;  %v4596_v47 = vadd.f32 %v8363_v21, %v4495_v1 }
 0x24e   :  { %v8369_v5 = vpop.f32.mrf.mxu0 }
 0x24f   :  { %v8371_v45 = vpop.f32.mrf.mxu1 }
 0x250   :  { %v8373_v50 = vpop.f32.mrf.mxu0 }
 0x251   :  { %v8375_v52 = vpop.f32.mrf.mxu1 }
 0x252   :  { %v8377_v39 = vpop.f32.mrf.mxu0 }
 0x253   :  { %v8379_v30 = vpop.f32.mrf.mxu1 }
 0x254   :  { %8576 = vst [vmem:[#allocation10_spill] sm:$0xff] %v8379_v30  ;;  %v8381_v40 = vpop.f32.mrf.mxu0 }
 0x255   :  { %8577 = vst [vmem:[#allocation11_spill] sm:$0xff] %v8381_v40  ;;  %v8383_v58 = vpop.f32.mrf.mxu1 }
 0x256   :  { %8578 = vst [vmem:[#allocation12_spill] sm:$0xff] %v8383_v58  ;;  %v8385_v36 = vpop.f32.mrf.mxu0 }
 0x257   :  { %8579 = vst [vmem:[#allocation13_spill] sm:$0xff] %v8385_v36  ;;  %v8387_v41 = vpop.f32.mrf.mxu1 }
 0x258   :  { %8580 = vst [vmem:[#allocation14_spill] sm:$0xff] %v8387_v41  ;;  %v8389_v49 = vpop.f32.mrf.mxu0 }
 0x259   :  { %8581 = vst [vmem:[#allocation15_spill] sm:$0xff] %v8389_v49  ;;  %v8391_v26 = vpop.f32.mrf.mxu1  ;;  %v4485_v49 = vadd.f32 %v4484_v18, %v8279_v4 }
 0x25a   :  { %8582 = vst [vmem:[#allocation16_spill] sm:$0xff] %v8391_v26  ;;  %v8393_v61 = vpop.f32.mrf.mxu0 }
 0x25b   :  { %8583 = vst [vmem:[#allocation17_spill] sm:$0xff] %v8393_v61  ;;  %v8395_v46 = vpop.f32.mrf.mxu1  ;;  %v4586_v11 = vadd.f32 %v4585_v44, %v4485_v49  ;;  %v8600_v1 = vld [vmem:[#allocation10_spill] sm:$0xff] }
 0x25c   :  { %8584 = vst [vmem:[#allocation18_spill] sm:$0xff] %v8395_v46  ;;  %v8397_v23 = vpop.f32.mrf.mxu0 }
 0x25d   :  { %8585 = vst [vmem:[#allocation19_spill] sm:$0xff] %v8397_v23  ;;  %v8399_v8 = vpop.f32.mrf.mxu1 }
 0x25e   :  { %8586 = vst [vmem:[#allocation20_spill] sm:$0xff] %v8399_v8  ;;  %v8401_v55 = vpop.f32.mrf.mxu0 }
 0x25f   :  { %8587 = vst [vmem:[#allocation21_spill] sm:$0xff] %v8401_v55  ;;  %v8403_v32 = vpop.f32.mrf.mxu1 }
 0x260   :  { %8588 = vst [vmem:[#allocation22_spill] sm:$0xff] %v8403_v32  ;;  %v8405_v20 = vpop.f32.mrf.mxu0 }
 0x261   :  { %8589 = vst [vmem:[#allocation23_spill] sm:$0xff] %v8405_v20  ;;  %v8407_v27 = vpop.f32.mrf.mxu1 }
 0x262   :  { %8590 = vst [vmem:[#allocation24_spill] sm:$0xff] %v8407_v27  ;;  %v4524_v38 = vpop.f32.mrf.mxu0 }
 0x263   :  { %v4625_v51 = vpop.f32.mrf.mxu1  ;;  %v4525_v25 = vadd.f32 %v4524_v38, %v8327_v56 }
 0x264   :  { %v4526_v24 = vpop.f32.mrf.mxu0 }
 0x265   :  { %v4627_v53 = vpop.f32.mrf.mxu1  ;;  %v4527_v30 = vadd.f32 %v4526_v24, %v8330_v62  ;;  %v4590_v62 = vadd.f32 %v8357_v6, %v4489_v63 }
 0x266   :  { %v4528_v37 = vpop.f32.mrf.mxu0 }
 0x267   :  { %v4629_v35 = vpop.f32.mrf.mxu1 }
 0x268   :  { %v4530_v17 = vpop.f32.mrf.mxu0 }
 0x269   :  { %v4631_v12 = vpop.f32.mrf.mxu1  ;;  %v4531_v4 = vadd.f32 %v4530_v17, %v8336_v7 }
 0x26a   :  { %v4534_v46 = vpop.f32.mrf.mxu0 }
 0x26b   :  { %v4635_v23 = vpop.f32.mrf.mxu1  ;;  %v4535_v44 = vadd.f32 %v4534_v46, %v8339_v15 }
 0x26c   :  { %v4536_v33 = vpop.f32.mrf.mxu0 }
 0x26d   :  { %v8409_v8 = vpop.f32.mrf.mxu1 }
 0x26e   :  { %v4538_v55 = vpop.f32.mrf.mxu0 }
 0x26f   :  { %v8411_v26 = vpop.f32.mrf.mxu1 }
 0x270   :  { %v8413_v32 = vpop.f32.mrf.mxu0 }
 0x271   :  { %v8415_v20 = vpop.f32.mrf.mxu1 }
 0x272   :  { %8591 = vst [vmem:[#allocation25_spill] sm:$0xff] %v8415_v20  ;;  %v8417_v27 = vpop.f32.mrf.mxu0  ;;  %v4529_v20 = vadd.f32 %v4528_v37, %v8333_v34 }
 0x273   :  { %v8419_v61 = vpop.f32.mrf.mxu1 }
 0x274   :  { %8592 = vst [vmem:[#allocation26_spill] sm:$0xff] %v8419_v61  ;;  %v8421_v42 = vpop.f32.mrf.mxu0  ;;  %v4630_v34 = vadd.f32 %v4629_v35, %v4529_v20 }
 0x275   :  { %8593 = vst [vmem:[#allocation27_spill] sm:$0xff] %v8421_v42  ;;  %v8423_v41 = vpop.f32.mrf.mxu1  ;;  %v4626_v42 = vadd.f32 %v4625_v51, %v4525_v25 }
 0x276   :  { %8594 = vst [vmem:[#allocation28_spill] sm:$0xff] %v8423_v41  ;;  %v4548_v58 = vpop.f32.mrf.mxu0  ;;  %v4491_v41 = vadd.f32 %v4490_v14, %v8288_v29 }
 0x277   :  { %v4649_v36 = vpop.f32.mrf.mxu1  ;;  %v4588_v58 = vadd.f32 %v8355_v9, %v4487_v31  ;;  %v4632_v31 = vadd.f32 %v4631_v12, %v4531_v4  ;;  %v4539_v12 = vadd.f32 %v4538_v55, %v8345_v54  ;;  %v8598_v4 = vld [vmem:[#allocation9_spill] sm:$0xff] }
 0x278   :  { %v4549_v40 = vpop.f32.mrf.mxu0  ;;  %v4628_v36 = vadd.f32 %v4627_v53, %v4527_v30 }
 0x279   :  { %v4650_v61 = vpop.f32.mrf.mxu1  ;;  %v4592_v40 = vadd.f32 %v8359_v0, %v4491_v41 }
 0x27a   :  { %v4686_v18 = vpop.f32.mrf.mxu0 }
 0x27b   :  { %v4726_v56 = vpop.f32.mrf.mxu1  ;;  %v4687_v13 = vadd.f32 %v4686_v18, %v4586_v11  ;;  %v4497_v11 = vadd.f32 %v8365_v59, %v8294_v48  ;;  %v4499_v48 = vadd.f32 %v8369_v5, %v8297_v28  ;;  %v4501_v28 = vadd.f32 %v8373_v50, %v8300_v60 }
 0x27c   :  { %v4727_v10 = vadd.f32 %v4726_v56, %v4626_v42  ;;  %v4688_v25 = vpop.f32.mrf.mxu0  ;;  %v4537_v42 = vadd.f32 %v4536_v33, %v8342_v22  ;;  %v4636_v33 = vadd.f32 %v4635_v23, %v4535_v44  ;;  %v4541_v5 = vadd.f32 %v8413_v32, %v8348_v57  ;;  %v8599_v18 = vld [vmem:[#allocation27_spill] sm:$0xff] }
 0x27d   :  { %v4728_v19 = vpop.f32.mrf.mxu1  ;;  %v4753_v29 = vmax.f32 %v4687_v13, 0.0  ;;  %v4689_v17 = vadd.f32 %v4688_v25, %v4588_v58  ;;  %v4598_v61 = vadd.f32 %v8367_v16, %v4497_v11  ;;  %v4600_v60 = vadd.f32 %v8371_v45, %v4499_v48  ;;  %v8601_v44 = vld [vmem:[#allocation3_spill] sm:$0xff]  ;;  %v8602_v25 = vld [vmem:[#allocation13_spill] sm:$0xff] }
 0x27e   :  { %v4769_v14 = vmax.f32 %v4727_v10, 0.0  ;;  %v4729_v7 = vadd.f32 %v4728_v19, %v4628_v36  ;;  %v4690_v63 = vpop.f32.mrf.mxu0  ;;  %v4638_v54 = vadd.f32 %v8409_v8, %v4537_v42  ;;  %v4505_v50 = vadd.f32 %v8377_v39, %v8303_v43  ;;  %v8595_v39 = vld [vmem:[#allocation2_spill] sm:$0xff] }
 0x27f   :  { %v4730_v9 = vpop.f32.mrf.mxu1  ;;  %4779 = vst [vmem:[%s8567_s3] sm:$0xff] %v4753_v29  ;;  %v4754_v2 = vmax.f32 %v4689_v17, 0.0  ;;  %v4691_v6 = vadd.f32 %v4690_v63, %v4590_v62  ;;  %v4640_v57 = vadd.f32 %v8411_v26, %v4539_v12  ;;  %v4545_v8 = vadd.f32 %v8417_v27, %v8351_v3  ;;  %v8596_v26 = vld [vmem:[#allocation11_spill] sm:$0xff]  ;;  %v8597_v3 = vld [vmem:[#allocation25_spill] sm:$0xff]  ;;  %v8603_v29 = vld [vmem:[#allocation26_spill] sm:$0xff] }
 0x280   :  { %4795 = vst [vmem:[%s8567_s3 + $0x80] sm:$0xff] %v4769_v14  ;;  %v4770_v15 = vmax.f32 %v4729_v7, 0.0  ;;  %v4731_v0 = vadd.f32 %v4730_v9, %v4630_v34  ;;  %v4692_v22 = vpop.f32.mrf.mxu0  ;;  %v4602_v43 = vadd.f32 %v8375_v52, %v4501_v28  ;;  %v4507_v35 = vadd.f32 %v8596_v26, %v8595_v39  ;;  %v8604_v63 = vld [vmem:[#allocation12_spill] sm:$0xff]  ;;  %v8615_v26 = vld [vmem:[#allocation7_spill] sm:$0xff] }
 0x281   :  { %v4732_v59 = vpop.f32.mrf.mxu1  ;;  %4780 = vst [vmem:[%s8567_s3 + $0x8] sm:$0xff] %v4754_v2  ;;  %v4755_v30 = vmax.f32 %v4691_v6, 0.0  ;;  %v4693_v49 = vadd.f32 %v4692_v22, %v4592_v40  ;;  %v4642_v27 = vadd.f32 %v8597_v3, %v4541_v5  ;;  %v4547_v56 = vadd.f32 %v8599_v18, %v8598_v4  ;;  %v8605_v2 = vld [vmem:[#allocation4_spill] sm:$0xff] }
 0x282   :  { %4796 = vst [vmem:[%s8567_s3 + $0x88] sm:$0xff] %v4770_v15  ;;  %v4771_v41 = vmax.f32 %v4731_v0, 0.0  ;;  %v4733_v21 = vadd.f32 %v4732_v59, %v4632_v31  ;;  %v4696_v46 = vpop.f32.mrf.mxu0  ;;  %v4606_v34 = vadd.f32 %v8600_v1, %v4505_v50  ;;  %v4509_v19 = vadd.f32 %v8602_v25, %v8601_v44  ;;  %v8606_v15 = vld [vmem:[#allocation15_spill] sm:$0xff]  ;;  %v8607_v0 = vld [vmem:[#allocation28_spill] sm:$0xff] }
 0x283   :  { %v4736_v23 = vpop.f32.mrf.mxu1  ;;  %4781 = vst [vmem:[%s8567_s3 + $0x10] sm:$0xff] %v4755_v30  ;;  %v4756_v55 = vmax.f32 %v4693_v49, 0.0  ;;  %v4697_v20 = vadd.f32 %v4696_v46, %v4596_v47  ;;  %v4646_v14 = vadd.f32 %v8603_v29, %v4545_v8  ;;  %v4608_v9 = vadd.f32 %v8604_v63, %v4507_v35  ;;  %v8613_v8 = vld [vmem:[#allocation19_spill] sm:$0xff]  ;;  %v8616_v35 = vld [vmem:[#allocation21_spill] sm:$0xff] }
 0x284   :  { %4797 = vst [vmem:[%s8567_s3 + $0x90] sm:$0xff] %v4771_v41  ;;  %v4772_v16 = vmax.f32 %v4733_v21, 0.0  ;;  %v4737_v38 = vadd.f32 %v4736_v23, %v4636_v33  ;;  %v4698_v32 = vpop.f32.mrf.mxu0  ;;  %v4511_v6 = vadd.f32 %v8606_v15, %v8605_v2  ;;  %v4648_v47 = vadd.f32 %v8607_v0, %v4547_v56  ;;  %v8608_v41 = vld [vmem:[#allocation14_spill] sm:$0xff]  ;;  %v8609_v21 = vld [vmem:[#allocation5_spill] sm:$0xff]  ;;  %v8617_v56 = vld [vmem:[#allocation20_spill] sm:$0xff] }
 0x285   :  { %v4738_v51 = vpop.f32.mrf.mxu1  ;;  %4782 = vst [vmem:[%s8567_s3 + $0x18] sm:$0xff] %v4756_v55  ;;  %v4757_v24 = vmax.f32 %v4697_v20, 0.0  ;;  %v4699_v53 = vadd.f32 %v4698_v32, %v4598_v61  ;;  %v4610_v49 = vadd.f32 %v8608_v41, %v4509_v19  ;;  %v8610_v61 = vld [vmem:[#allocation17_spill] sm:$0xff]  ;;  %v8611_v20 = vld [vmem:[#allocation16_spill] sm:$0xff]  ;;  %v4519_v3 = vadd.f32 %v8616_v35, %v8615_v26 }
 0x286   :  { %4798 = vst [vmem:[%s8567_s3 + $0x98] sm:$0xff] %v4772_v16  ;;  %v4773_v45 = vmax.f32 %v4737_v38, 0.0  ;;  %v4739_v37 = vadd.f32 %v4738_v51, %v4638_v54  ;;  %v4700_v58 = vpop.f32.mrf.mxu0  ;;  %v4515_v28 = vadd.f32 %v8610_v61, %v8609_v21  ;;  %v4612_v38 = vadd.f32 %v8611_v20, %v4511_v6 }
 0x287   :  { %v4740_v36 = vpop.f32.mrf.mxu1  ;;  %4783 = vst [vmem:[%s8567_s3 + $0x20] sm:$0xff] %v4757_v24  ;;  %v4758_v13 = vmax.f32 %v4699_v53, 0.0  ;;  %v4701_v10 = vadd.f32 %v4700_v58, %v4600_v60 }
 0x288   :  { %4799 = vst [vmem:[%s8567_s3 + $0xa0] sm:$0xff] %v4773_v45  ;;  %v4774_v52 = vmax.f32 %v4739_v37, 0.0  ;;  %v4741_v62 = vadd.f32 %v4740_v36, %v4640_v57  ;;  %v4702_v17 = vpop.f32.mrf.mxu0  ;;  %v8612_v57 = vld [vmem:[#allocation6_spill] sm:$0xff]  ;;  %v8618_v36 = vld [vmem:[#allocation8_spill] sm:$0xff] }
 0x289   :  { %v4742_v7 = vpop.f32.mrf.mxu1  ;;  %4784 = vst [vmem:[%s8567_s3 + $0x28] sm:$0xff] %v4758_v13  ;;  %v4759_v40 = vmax.f32 %v4701_v10, 0.0  ;;  %v4703_v31 = vadd.f32 %v4702_v17, %v4602_v43  ;;  %v4517_v32 = vadd.f32 %v8613_v8, %v8612_v57  ;;  %v8614_v43 = vld [vmem:[#allocation18_spill] sm:$0xff]  ;;  %v8619_v13 = vld [vmem:[#allocation23_spill] sm:$0xff] }
 0x28a   :  { %4800 = vst [vmem:[%s8567_s3 + $0xa8] sm:$0xff] %v4774_v52  ;;  %v4775_v11 = vmax.f32 %v4741_v62, 0.0  ;;  %v4743_v42 = vadd.f32 %v4742_v7, %v4642_v27  ;;  %v4706_v48 = vpop.f32.mrf.mxu0  ;;  %v4616_v39 = vadd.f32 %v8614_v43, %v4515_v28  ;;  %v4521_v52 = vadd.f32 %v8619_v13, %v8618_v36 }
 0x28b   :  { %v4746_v33 = vpop.f32.mrf.mxu1  ;;  %4785 = vst [vmem:[%s8567_s3 + $0x30] sm:$0xff] %v4759_v40  ;;  %v4760_v12 = vmax.f32 %v4703_v31, 0.0  ;;  %v4707_v59 = vadd.f32 %v4706_v48, %v4606_v34  ;;  %v4618_v58 = vadd.f32 %v8617_v56, %v4517_v32  ;;  %v8620_v34 = vld [vmem:[#allocation22_spill] sm:$0xff] }
 0x28c   :  { %4801 = vst [vmem:[%s8567_s3 + $0xb0] sm:$0xff] %v4775_v11  ;;  %v4776_v22 = vmax.f32 %v4743_v42, 0.0  ;;  %v4747_v30 = vadd.f32 %v4746_v33, %v4646_v14  ;;  %v4708_v54 = vpop.f32.mrf.mxu0  ;;  %v4620_v44 = vadd.f32 %v8620_v34, %v4519_v3  ;;  %v8621_v14 = vld [vmem:[#allocation24_spill] sm:$0xff] }
 0x28d   :  { %v4748_v5 = vpop.f32.mrf.mxu1  ;;  %4786 = vst [vmem:[%s8567_s3 + $0x38] sm:$0xff] %v4760_v12  ;;  %v4761_v46 = vmax.f32 %v4707_v59, 0.0  ;;  %v4709_v55 = vadd.f32 %v4708_v54, %v4608_v9  ;;  %v4622_v17 = vadd.f32 %v8621_v14, %v4521_v52 }
 0x28e   :  { %4802 = vst [vmem:[%s8567_s3 + $0xb8] sm:$0xff] %v4776_v22  ;;  %v4777_v23 = vmax.f32 %v4747_v30, 0.0  ;;  %v4749_v16 = vadd.f32 %v4748_v5, %v4648_v47  ;;  %v4710_v60 = vpop.f32.mrf.mxu0 }
 0x28f   :  { %v4750_v50 = vpop.f32.mrf.mxu1  ;;  %4787 = vst [vmem:[%s8567_s3 + $0x40] sm:$0xff] %v4761_v46  ;;  %v4762_v51 = vmax.f32 %v4709_v55, 0.0  ;;  %v4711_v45 = vadd.f32 %v4710_v60, %v4610_v49 }
 0x290   :  { %4803 = vst [vmem:[%s8567_s3 + $0xc0] sm:$0xff] %v4777_v23  ;;  %v4778_v24 = vmax.f32 %v4749_v16, 0.0  ;;  %v4712_v53 = vpop.f32.mrf.mxu0 }
 0x291   :  { %v4751_v37 = vpop.f32.mrf.mxu1  ;;  %4788 = vst [vmem:[%s8567_s3 + $0x48] sm:$0xff] %v4762_v51  ;;  %v4763_v27 = vmax.f32 %v4711_v45, 0.0  ;;  %v4713_v4 = vadd.f32 %v4712_v53, %v4612_v38 }
 0x292   :  { %4804 = vst [vmem:[%s8567_s3 + $0xc8] sm:$0xff] %v4778_v24  ;;  %v4716_v18 = vpop.f32.mrf.mxu0 }
 0x293   :  { %4789 = vst [vmem:[%s8567_s3 + $0x50] sm:$0xff] %v4763_v27  ;;  %v4764_v10 = vmax.f32 %v4713_v4, 0.0  ;;  %v4717_v62 = vadd.f32 %v4716_v18, %v4616_v39 }
 0x294   :  { %v4718_v1 = vpop.f32.mrf.mxu0 }
 0x295   :  { %4790 = vst [vmem:[%s8567_s3 + $0x58] sm:$0xff] %v4764_v10  ;;  %v4765_v25 = vmax.f32 %v4717_v62, 0.0  ;;  %v4719_v19 = vadd.f32 %v4718_v1, %v4618_v58 }
 0x296   :  { %v4720_v29 = vpop.f32.mrf.mxu0 }
 0x297   :  { %4791 = vst [vmem:[%s8567_s3 + $0x60] sm:$0xff] %v4765_v25  ;;  %v4766_v7 = vmax.f32 %v4719_v19, 0.0  ;;  %v4721_v40 = vadd.f32 %v4720_v29, %v4620_v44 }
 0x298   :  { %v4722_v11 = vpop.f32.mrf.mxu0 }
 0x299   :  { %4792 = vst [vmem:[%s8567_s3 + $0x68] sm:$0xff] %v4766_v7  ;;  %v4767_v31 = vmax.f32 %v4721_v40, 0.0  ;;  %v4723_v42 = vadd.f32 %v4722_v11, %v4622_v17 }
 0x29b   :  { %4793 = vst [vmem:[%s8567_s3 + $0x70] sm:$0xff] %v4767_v31  ;;  %v4768_v63 = vmax.f32 %v4723_v42, 0.0 }
 0x29d   :  { %4794 = vst [vmem:[%s8567_s3 + $0x78] sm:$0xff] %v4768_v63 }

// kernel: featurenet_forward.12
= control target key start
LH: loop header
LB: loop body
LE: loop exit
PB: predicated region body
PF: predicated region fallthrough
CT: control target
= control target key end

     0   :  { %s7006_s1 = inlined_call_operand.vmem [shape: bf16[2304,384], index: 1, kind: input, shape index: {}]   ;;  %s7007_s0 = inlined_call_operand.vmem [shape: bf16[24,2304], index: 0, kind: input, shape index: {}]   ;;  %s7008_s2 = inlined_call_operand.vmem [shape: f32[1,384], index: 2, kind: input, shape index: {}]   ;;  %s7009_s3 = inlined_call_operand.vmem [shape: f32[24,384], index: 3, kind: output, shape index: {}]  }
   0x1   :  { %v4741_v0 = vld [vmem:[%s7006_s1 + $0xac] ss:$12 sps:$4 sm:$0xff]   ;;  %v4745_v2 = vld [vmem:[%s7006_s1 + $0xa8] ss:$12 sps:$4 sm:$0xff]   ;;  %v4751_v6 = vld [vmem:[%s7006_s1 + $0x90] ss:$12 sps:$4 sm:$0xff]  }
   0x2   :  { %v4743_v1 = vld [vmem:[%s7006_s1 + $0x22c] ss:$12 sps:$4 sm:$0xff]   ;;  %3092 = vmatprep.subr.bf16.mxu0 %v4741_v0  ;;  %v4746_v3 = vld [vmem:[%s7006_s1 + $0x228] ss:$12 sps:$4 sm:$0xff]   ;;  %v4752_v7 = vld [vmem:[%s7006_s1 + $0x210] ss:$12 sps:$4 sm:$0xff]  }
   0x3   :  { %3143 = vmatprep.subr.bf16.mxu1 %v4743_v1  ;;  %v4747_v4 = vld [vmem:[%s7006_s1 + $0x94] ss:$12 sps:$4 sm:$0xff]   ;;  %3093 = vmatpush1.bf16.msra.mxu0 %v4745_v2  ;;  %v4753_v8 = vld [vmem:[%s7006_s1 + $0x7c] ss:$12 sps:$4 sm:$0xff]   ;;  %v4757_v10 = vld [vmem:[%s7006_s1 + $0x78] ss:$12 sps:$4 sm:$0xff]  }
   0x4   :  { %3144 = vmatpush1.bf16.msra.mxu1 %v4746_v3  ;;  %v4749_v5 = vld [vmem:[%s7006_s1 + $0x214] ss:$12 sps:$4 sm:$0xff]   ;;  %3094 = vmatprep.subr.bf16.mxu0 %v4747_v4  ;;  %v4755_v9 = vld [vmem:[%s7006_s1 + $0x1fc] ss:$12 sps:$4 sm:$0xff]   ;;  %v4758_v11 = vld [vmem:[%s7006_s1 + $0x1f8] ss:$12 sps:$4 sm:$0xff]  }
   0x5   :  { %3145 = vmatprep.subr.bf16.mxu1 %v4749_v5  ;;  %v4759_v12 = vld [vmem:[%s7006_s1 + $0x64] ss:$12 sps:$4 sm:$0xff]   ;;  %v4763_v14 = vld [vmem:[%s7006_s1 + $0x60] ss:$12 sps:$4 sm:$0xff]   ;;  %v4769_v18 = vld [vmem:[%s7006_s1 + $0x48] ss:$12 sps:$4 sm:$0xff]  }
   0x6   :  { %v4761_v13 = vld [vmem:[%s7006_s1 + $0x1e4] ss:$12 sps:$4 sm:$0xff]   ;;  %v4764_v15 = vld [vmem:[%s7006_s1 + $0x1e0] ss:$12 sps:$4 sm:$0xff]   ;;  %v4770_v19 = vld [vmem:[%s7006_s1 + $0x1c8] ss:$12 sps:$4 sm:$0xff]  }
   0x7   :  { %3095 = vmatpush1.bf16.msra.mxu0 %v4751_v6  ;;  %v4765_v16 = vld [vmem:[%s7006_s1 + $0x4c] ss:$12 sps:$4 sm:$0xff]   ;;  %v4771_v20 = vld [vmem:[%s7006_s1 + $0x34] ss:$12 sps:$4 sm:$0xff]   ;;  %v4775_v22 = vld [vmem:[%s7006_s1 + $0x30] ss:$12 sps:$4 sm:$0xff]  }
   0x8   :  { %3146 = vmatpush1.bf16.msra.mxu1 %v4752_v7  ;;  %3096 = vmatprep.subr.bf16.mxu0 %v4753_v8  ;;  %v4767_v17 = vld [vmem:[%s7006_s1 + $0x1cc] ss:$12 sps:$4 sm:$0xff]   ;;  %v4773_v21 = vld [vmem:[%s7006_s1 + $0x1b4] ss:$12 sps:$4 sm:$0xff]   ;;  %v4776_v23 = vld [vmem:[%s7006_s1 + $0x1b0] ss:$12 sps:$4 sm:$0xff]  }
   0x9   :  { %3147 = vmatprep.subr.bf16.mxu1 %v4755_v9  ;;  %v4777_v24 = vld [vmem:[%s7006_s1 + $0x1c] ss:$12 sps:$4 sm:$0xff]   ;;  %v4781_v26 = vld [vmem:[%s7006_s1 + $0x18] ss:$12 sps:$4 sm:$0xff]   ;;  %v4787_v30 = vld [vmem:[%s7006_s1] ss:$12 sps:$4 sm:$0xff]  }
   0xa   :  { %v4779_v25 = vld [vmem:[%s7006_s1 + $0x19c] ss:$12 sps:$4 sm:$0xff]   ;;  %v4782_v27 = vld [vmem:[%s7006_s1 + $0x198] ss:$12 sps:$4 sm:$0xff]   ;;  %v4788_v31 = vld [vmem:[%s7006_s1 + $0x180] ss:$12 sps:$4 sm:$0xff]  }
   0xb   :  { %3097 = vmatpush1.bf16.msra.mxu0 %v4757_v10  ;;  %v4783_v28 = vld [vmem:[%s7006_s1 + $0x4] ss:$12 sps:$4 sm:$0xff]   ;;  %v4789_v32 = vld [vmem:[%s7006_s1 + $0x16c] ss:$12 sps:$4 sm:$0xff]   ;;  %v4793_v34 = vld [vmem:[%s7006_s1 + $0x168] ss:$12 sps:$4 sm:$0xff]  }
   0xc   :  { %3148 = vmatpush1.bf16.msra.mxu1 %v4758_v11  ;;  %3098 = vmatprep.subr.bf16.mxu0 %v4759_v12  ;;  %v4785_v29 = vld [vmem:[%s7006_s1 + $0x184] ss:$12 sps:$4 sm:$0xff]   ;;  %v4791_v33 = vld [vmem:[%s7006_s1 + $0x2ec] ss:$12 sps:$4 sm:$0xff]   ;;  %v4794_v35 = vld [vmem:[%s7006_s1 + $0x2e8] ss:$12 sps:$4 sm:$0xff]  }
   0xd   :  { %3149 = vmatprep.subr.bf16.mxu1 %v4761_v13  ;;  %v4795_v36 = vld [vmem:[%s7006_s1 + $0x154] ss:$12 sps:$4 sm:$0xff]   ;;  %v4799_v38 = vld [vmem:[%s7006_s1 + $0x150] ss:$12 sps:$4 sm:$0xff]   ;;  %v4805_v42 = vld [vmem:[%s7006_s1 + $0x138] ss:$12 sps:$4 sm:$0xff]  }
   0xe   :  { %v4797_v37 = vld [vmem:[%s7006_s1 + $0x2d4] ss:$12 sps:$4 sm:$0xff]   ;;  %v4800_v39 = vld [vmem:[%s7006_s1 + $0x2d0] ss:$12 sps:$4 sm:$0xff]   ;;  %v4806_v43 = vld [vmem:[%s7006_s1 + $0x2b8] ss:$12 sps:$4 sm:$0xff]  }
   0xf   :  { %3099 = vmatpush1.bf16.msra.mxu0 %v4763_v14  ;;  %v4801_v40 = vld [vmem:[%s7006_s1 + $0x13c] ss:$12 sps:$4 sm:$0xff]   ;;  %v4807_v44 = vld [vmem:[%s7006_s1 + $0x124] ss:$12 sps:$4 sm:$0xff]   ;;  %v4811_v46 = vld [vmem:[%s7006_s1 + $0x120] ss:$12 sps:$4 sm:$0xff]  }
  0x10   :  { %3150 = vmatpush1.bf16.msra.mxu1 %v4764_v15  ;;  %3100 = vmatprep.subr.bf16.mxu0 %v4765_v16  ;;  %v4803_v41 = vld [vmem:[%s7006_s1 + $0x2bc] ss:$12 sps:$4 sm:$0xff]   ;;  %v4809_v45 = vld [vmem:[%s7006_s1 + $0x2a4] ss:$12 sps:$4 sm:$0xff]   ;;  %v4812_v47 = vld [vmem:[%s7006_s1 + $0x2a0] ss:$12 sps:$4 sm:$0xff]  }
  0x11   :  { %3151 = vmatprep.subr.bf16.mxu1 %v4767_v17  ;;  %v4813_v48 = vld [vmem:[%s7006_s1 + $0x10c] ss:$12 sps:$4 sm:$0xff]   ;;  %v4817_v52 = vld [vmem:[%s7006_s1 + $0x108] ss:$12 sps:$4 sm:$0xff]   ;;  %v4823_v56 = vld [vmem:[%s7006_s1 + $0xf0] ss:$12 sps:$4 sm:$0xff]  }
  0x12   :  { %v4839_v49 = vld [vmem:[%s7007_s0 + $0x4] ss:$72 sps:$4 sm:$0xff]   ;;  %v4818_v53 = vld [vmem:[%s7006_s1 + $0x288] ss:$12 sps:$4 sm:$0xff]   ;;  %v4824_v57 = vld [vmem:[%s7006_s1 + $0x270] ss:$12 sps:$4 sm:$0xff]  }
  0x13   :  { %3101 = vmatpush1.bf16.msra.mxu0 %v4769_v18  ;;  %v4815_v50 = vld [vmem:[%s7006_s1 + $0x28c] ss:$12 sps:$4 sm:$0xff]   ;;  %3124 = vmatprep.mubr.bf16.mxu0 %v4839_v49  ;;  %v4819_v54 = vld [vmem:[%s7006_s1 + $0xf4] ss:$12 sps:$4 sm:$0xff]   ;;  %v4825_v58 = vld [vmem:[%s7006_s1 + $0xdc] ss:$12 sps:$4 sm:$0xff]  }
  0x14   :  { %3152 = vmatpush1.bf16.msra.mxu1 %v4770_v19  ;;  %3102 = vmatprep.subr.bf16.mxu0 %v4771_v20  ;;  %v4842_v51 = vld [vmem:[%s7007_s0 + $0xc] ss:$72 sps:$4 sm:$0xff]   ;;  %v4827_v59 = vld [vmem:[%s7006_s1 + $0x25c] ss:$12 sps:$4 sm:$0xff]   ;;  %v4829_v60 = vld [vmem:[%s7006_s1 + $0xd8] ss:$12 sps:$4 sm:$0xff]  }
  0x15   :  { %3153 = vmatprep.subr.bf16.mxu1 %v4773_v21  ;;  %3175 = vmatprep.mubr.bf16.mxu1 %v4842_v51  ;;  %v4821_v55 = vld [vmem:[%s7006_s1 + $0x274] ss:$12 sps:$4 sm:$0xff]   ;;  %v4830_v61 = vld [vmem:[%s7006_s1 + $0x258] ss:$12 sps:$4 sm:$0xff]   ;;  %v4840_v5 = vld [vmem:[%s7007_s0 + $0x8] ss:$72 sps:$4 sm:$0xff]  }
  0x16   :  { %v4831_v62 = vld [vmem:[%s7006_s1 + $0xc4] ss:$12 sps:$4 sm:$0xff]   ;;  %v4835_v0 = vld [vmem:[%s7006_s1 + $0xc0] ss:$12 sps:$4 sm:$0xff]   ;;  %v4843_v6 = vld [vmem:[%s7006_s1 + $0x3a8] ss:$12 sps:$4 sm:$0xff]  }
  0x17   :  { %3103 = vmatpush1.bf16.msra.mxu0 %v4775_v22  ;;  %v4833_v63 = vld [vmem:[%s7006_s1 + $0x244] ss:$12 sps:$4 sm:$0xff]   ;;  %v4836_v1 = vld [vmem:[%s7006_s1 + $0x240] ss:$12 sps:$4 sm:$0xff]   ;;  %v4846_v7 = vld [vmem:[%s7006_s1 + $0x528] ss:$12 sps:$4 sm:$0xff]  }
  0x18   :  { %3154 = vmatpush1.bf16.msra.mxu1 %v4776_v23  ;;  %3104 = vmatprep.subr.bf16.mxu0 %v4777_v24  ;;  %v4845_v2 = vld [vmem:[%s7006_s1 + $0x3ac] ss:$12 sps:$4 sm:$0xff]   ;;  %v4837_v4 = vld [vmem:[%s7007_s0] ss:$72 sps:$4 sm:$0xff]   ;;  %v4849_v10 = vld [vmem:[%s7006_s1 + $0x390] ss:$12 sps:$4 sm:$0xff]  }
  0x19   :  { %3155 = vmatprep.subr.bf16.mxu1 %v4779_v25  ;;  %v4848_v3 = vld [vmem:[%s7006_s1 + $0x52c] ss:$12 sps:$4 sm:$0xff]   ;;  %v4851_v8 = vld [vmem:[%s7006_s1 + $0x394] ss:$12 sps:$4 sm:$0xff]   ;;  %v4852_v11 = vld [vmem:[%s7006_s1 + $0x510] ss:$12 sps:$4 sm:$0xff]  }
  0x1a   :  { %v4854_v9 = vld [vmem:[%s7006_s1 + $0x514] ss:$12 sps:$4 sm:$0xff]   ;;  %v4857_v12 = vld [vmem:[%s7006_s1 + $0x37c] ss:$12 sps:$4 sm:$0xff]   ;;  %v4855_v14 = vld [vmem:[%s7006_s1 + $0x378] ss:$12 sps:$4 sm:$0xff]  }
  0x1b   :  { %3105 = vmatpush1.bf16.msra.mxu0 %v4781_v26  ;;  %v4860_v13 = vld [vmem:[%s7006_s1 + $0x4fc] ss:$12 sps:$4 sm:$0xff]   ;;  %v4858_v15 = vld [vmem:[%s7006_s1 + $0x4f8] ss:$12 sps:$4 sm:$0xff]   ;;  %v4861_v18 = vld [vmem:[%s7006_s1 + $0x360] ss:$12 sps:$4 sm:$0xff]  }
  0x1c   :  { %3156 = vmatpush1.bf16.msra.mxu1 %v4782_v27  ;;  %3106 = vmatprep.subr.bf16.mxu0 %v4783_v28  ;;  %v4863_v16 = vld [vmem:[%s7006_s1 + $0x364] ss:$12 sps:$4 sm:$0xff]   ;;  %v4864_v19 = vld [vmem:[%s7006_s1 + $0x4e0] ss:$12 sps:$4 sm:$0xff]   ;;  %v4867_v22 = vld [vmem:[%s7006_s1 + $0x348] ss:$12 sps:$4 sm:$0xff]  }
  0x1d   :  { %3157 = vmatprep.subr.bf16.mxu1 %v4785_v29  ;;  %v4866_v17 = vld [vmem:[%s7006_s1 + $0x4e4] ss:$12 sps:$4 sm:$0xff]   ;;  %v4869_v20 = vld [vmem:[%s7006_s1 + $0x34c] ss:$12 sps:$4 sm:$0xff]   ;;  %v4870_v23 = vld [vmem:[%s7006_s1 + $0x4c8] ss:$12 sps:$4 sm:$0xff]  }
  0x1e   :  { %v4872_v21 = vld [vmem:[%s7006_s1 + $0x4cc] ss:$12 sps:$4 sm:$0xff]   ;;  %v33_v24 = vld [vmem:[%s7007_s0 + $0x90] sm:$0xff] }
  0x1f   :  { %3107 = vmatpush1.bf16.msra.mxu0 %v4787_v30  ;;  %v4875_v25 = vld [vmem:[%s7006_s1 + $0x334] ss:$12 sps:$4 sm:$0xff]   ;;  %v5673_v27 = vcombine.high %v33_v24, %v33_v24  ;;  %v5675_v28 = vcombine.low %v33_v24, %v33_v24  ;;  %v34_v29 = vld [vmem:[%s7007_s0 + $0x98] sm:$0xff] }
  0x20   :  { %3158 = vmatpush1.bf16.msra.mxu1 %v4788_v31  ;;  %3108 = vmatprep.subr.bf16.mxu0 %v4789_v32  ;;  %v4878_v26 = vld [vmem:[%s7006_s1 + $0x4b4] ss:$12 sps:$4 sm:$0xff]   ;;  %v4873_v30 = vld [vmem:[%s7006_s1 + $0x330] ss:$12 sps:$4 sm:$0xff]   ;;  %v5687_v32 = vcombine.high %v34_v29, %v34_v29 }
  0x21   :  { %3159 = vmatprep.subr.bf16.mxu1 %v4791_v33  ;;  %v4876_v31 = vld [vmem:[%s7006_s1 + $0x4b0] ss:$12 sps:$4 sm:$0xff]   ;;  %v5689_v33 = vcombine.low %v34_v29, %v34_v29  ;;  %v4902_v49 = vld [vmem:[%s7006_s1 + $0x5d4] ss:$12 sps:$4 sm:$0xff]  }
  0x22   :  { %v4900_v51 = vld [vmem:[%s7006_s1 + $0x5d0] ss:$12 sps:$4 sm:$0xff]  }
  0x23   :  { %3109 = vmatpush2.bf16.msra.mxu0 %v4793_v34  ;;  %v4881_v34 = vld [vmem:[%s7006_s1 + $0x31c] ss:$12 sps:$4 sm:$0xff]  }
  0x24   :  { %3160 = vmatpush2.bf16.msra.mxu1 %v4794_v35  ;;  %3110 = vmatprep.subr.bf16.mxu0 %v4795_v36  ;;  %v4884_v35 = vld [vmem:[%s7006_s1 + $0x49c] ss:$12 sps:$4 sm:$0xff]   ;;  %v4879_v36 = vld [vmem:[%s7006_s1 + $0x318] ss:$12 sps:$4 sm:$0xff]  }
  0x25   :  { %3161 = vmatprep.subr.bf16.mxu1 %v4797_v37  ;;  %v4882_v37 = vld [vmem:[%s7006_s1 + $0x498] ss:$12 sps:$4 sm:$0xff]   ;;  %v4955_v24 = vld [vmem:[%s7006_s1 + $0x690] ss:$12 sps:$4 sm:$0xff]  }
  0x26   :  { %v4968_v29 = vld [vmem:[%s7006_s1 + $0x7fc] ss:$12 sps:$4 sm:$0xff]  }
  0x27   :  { %3111 = vmatpush2.bf16.msra.mxu0 %v4799_v38  ;;  %v4887_v38 = vld [vmem:[%s7006_s1 + $0x304] ss:$12 sps:$4 sm:$0xff]  }
  0x28   :  { %3162 = vmatpush2.bf16.msra.mxu1 %v4800_v39  ;;  %3112 = vmatprep.subr.bf16.mxu0 %v4801_v40  ;;  %v4890_v39 = vld [vmem:[%s7006_s1 + $0x484] ss:$12 sps:$4 sm:$0xff]   ;;  %v4945_v40 = vld [vmem:[%s7007_s0 + $0x14] ss:$72 sps:$4 sm:$0xff]  }
  0x29   :  { %3163 = vmatprep.subr.bf16.mxu1 %v4803_v41  ;;  %v4948_v41 = vld [vmem:[%s7007_s0 + $0x1c] ss:$72 sps:$4 sm:$0xff]  }
  0x2b   :  { %3113 = vmatpush2.bf16.msra.mxu0 %v4805_v42  ;;  %v4885_v42 = vld [vmem:[%s7006_s1 + $0x300] ss:$12 sps:$4 sm:$0xff]  }
  0x2c   :  { %3164 = vmatpush2.bf16.msra.mxu1 %v4806_v43  ;;  %3114 = vmatprep.subr.bf16.mxu0 %v4807_v44  ;;  %v4888_v43 = vld [vmem:[%s7006_s1 + $0x480] ss:$12 sps:$4 sm:$0xff]  }
  0x2d   :  { %3165 = vmatprep.subr.bf16.mxu1 %v4809_v45  ;;  %v4893_v44 = vld [vmem:[%s7006_s1 + $0x46c] ss:$12 sps:$4 sm:$0xff]  }
  0x2e   :  { %v4896_v45 = vld [vmem:[%s7006_s1 + $0x5ec] ss:$12 sps:$4 sm:$0xff]  }
  0x2f   :  { %3115 = vmatpush2.bf16.msra.mxu0 %v4811_v46  ;;  %v4891_v46 = vld [vmem:[%s7006_s1 + $0x468] ss:$12 sps:$4 sm:$0xff]  }
  0x30   :  { %3166 = vmatpush2.bf16.msra.mxu1 %v4812_v47  ;;  %3116 = vmatprep.subr.bf16.mxu0 %v4813_v48  ;;  %v4894_v47 = vld [vmem:[%s7006_s1 + $0x5e8] ss:$12 sps:$4 sm:$0xff]  }
  0x31   :  { %3167 = vmatprep.subr.bf16.mxu1 %v4815_v50  ;;  %v4899_v48 = vld [vmem:[%s7006_s1 + $0x454] ss:$12 sps:$4 sm:$0xff]   ;;  %v4897_v50 = vld [vmem:[%s7006_s1 + $0x450] ss:$12 sps:$4 sm:$0xff]  }
  0x33   :  { %3117 = vmatpush2.bf16.msra.mxu0 %v4817_v52  ;;  %v4905_v52 = vld [vmem:[%s7006_s1 + $0x43c] ss:$12 sps:$4 sm:$0xff]  }
  0x34   :  { %3168 = vmatpush2.bf16.msra.mxu1 %v4818_v53  ;;  %3118 = vmatprep.subr.bf16.mxu0 %v4819_v54  ;;  %v4908_v53 = vld [vmem:[%s7006_s1 + $0x5bc] ss:$12 sps:$4 sm:$0xff]   ;;  %v4903_v54 = vld [vmem:[%s7006_s1 + $0x438] ss:$12 sps:$4 sm:$0xff]  }
  0x35   :  { %3169 = vmatprep.subr.bf16.mxu1 %v4821_v55  ;;  %v4906_v55 = vld [vmem:[%s7006_s1 + $0x5b8] ss:$12 sps:$4 sm:$0xff]  }
  0x37   :  { %3119 = vmatpush2.bf16.msra.mxu0 %v4823_v56  ;;  %v4911_v56 = vld [vmem:[%s7006_s1 + $0x424] ss:$12 sps:$4 sm:$0xff]  }
  0x38   :  { %3170 = vmatpush2.bf16.msra.mxu1 %v4824_v57  ;;  %3120 = vmatprep.subr.bf16.mxu0 %v4825_v58  ;;  %v4914_v57 = vld [vmem:[%s7006_s1 + $0x5a4] ss:$12 sps:$4 sm:$0xff]   ;;  %v4909_v58 = vld [vmem:[%s7006_s1 + $0x420] ss:$12 sps:$4 sm:$0xff]  }
  0x39   :  { %3171 = vmatprep.subr.bf16.mxu1 %v4827_v59  ;;  %v4912_v59 = vld [vmem:[%s7006_s1 + $0x5a0] ss:$12 sps:$4 sm:$0xff]  }
  0x3b   :  { %3121 = vmatpush2.bf16.msra.mxu0 %v4829_v60  ;;  %v4917_v60 = vld [vmem:[%s7006_s1 + $0x40c] ss:$12 sps:$4 sm:$0xff]  }
  0x3c   :  { %3172 = vmatpush2.bf16.msra.mxu1 %v4830_v61  ;;  %3122 = vmatprep.subr.bf16.mxu0 %v4831_v62  ;;  %v4920_v61 = vld [vmem:[%s7006_s1 + $0x58c] ss:$12 sps:$4 sm:$0xff]   ;;  %v4915_v62 = vld [vmem:[%s7006_s1 + $0x408] ss:$12 sps:$4 sm:$0xff]  }
  0x3d   :  { %3173 = vmatprep.subr.bf16.mxu1 %v4833_v63  ;;  %v4918_v63 = vld [vmem:[%s7006_s1 + $0x588] ss:$12 sps:$4 sm:$0xff]  }
  0x3f   :  { %3123 = vmatpush2.bf16.msra.mxu0 %v4835_v0  ;;  %v4925_v0 = vld [vmem:[%s7006_s1 + $0x3f4] ss:$12 sps:$4 sm:$0xff]  }
  0x40   :  { %3174 = vmatpush2.bf16.msra.mxu1 %v4836_v1  ;;  %3194 = vmatprep.subr.bf16.mxu0 %v4845_v2  ;;  %v4928_v1 = vld [vmem:[%s7006_s1 + $0x574] ss:$12 sps:$4 sm:$0xff]   ;;  %v4923_v2 = vld [vmem:[%s7006_s1 + $0x3f0] ss:$12 sps:$4 sm:$0xff]  }
  0x41   :  { %3245 = vmatprep.subr.bf16.mxu1 %v4848_v3  ;;  %v4926_v3 = vld [vmem:[%s7006_s1 + $0x570] ss:$12 sps:$4 sm:$0xff]  }
  0x42   :  { %3125 = vmatmul.mubr.bf16.vlgmr.msra.gmra.mxu0 %v4837_v4  ;;  %v4933_v4 = vld [vmem:[%s7006_s1 + $0x3dc] ss:$12 sps:$4 sm:$0xff]  }
  0x43   :  { %3176 = vmatmul.mubr.bf16.vlgmr.msra.gmra.mxu1 %v4840_v5  ;;  %3195 = vmatpush1.bf16.msra.mxu0 %v4843_v6  ;;  %v4936_v5 = vld [vmem:[%s7006_s1 + $0x55c] ss:$12 sps:$4 sm:$0xff]   ;;  %v4931_v6 = vld [vmem:[%s7006_s1 + $0x3d8] ss:$12 sps:$4 sm:$0xff]  }
  0x44   :  { %3246 = vmatpush1.bf16.msra.mxu1 %v4846_v7  ;;  %3196 = vmatprep.subr.bf16.mxu0 %v4851_v8  ;;  %v4934_v7 = vld [vmem:[%s7006_s1 + $0x558] ss:$12 sps:$4 sm:$0xff]  }
  0x45   :  { %3247 = vmatprep.subr.bf16.mxu1 %v4854_v9  ;;  %3134 = vmatprep.mubr.bf16.mxu0 %v5673_v27  ;;  %v4939_v8 = vld [vmem:[%s7006_s1 + $0x3c4] ss:$12 sps:$4 sm:$0xff]  }
  0x46   :  { %3185 = vmatprep.mubr.bf16.mxu1 %v5687_v32  ;;  %v4942_v9 = vld [vmem:[%s7006_s1 + $0x544] ss:$12 sps:$4 sm:$0xff]  }
  0x47   :  { %3197 = vmatpush1.bf16.msra.mxu0 %v4849_v10  ;;  %v4937_v10 = vld [vmem:[%s7006_s1 + $0x3c0] ss:$12 sps:$4 sm:$0xff]  }
  0x48   :  { %3248 = vmatpush1.bf16.msra.mxu1 %v4852_v11  ;;  %3198 = vmatprep.subr.bf16.mxu0 %v4857_v12  ;;  %v4940_v11 = vld [vmem:[%s7006_s1 + $0x540] ss:$12 sps:$4 sm:$0xff]  }
  0x49   :  { %3249 = vmatprep.subr.bf16.mxu1 %v4860_v13  ;;  %v4951_v12 = vld [vmem:[%s7006_s1 + $0x6ac] ss:$12 sps:$4 sm:$0xff]  }
  0x4a   :  { %3135 = vmatmul.mubr.bf16.gmra.mxu0 %v5675_v28  ;;  %v4943_v13 = vld [vmem:[%s7007_s0 + $0x10] ss:$72 sps:$4 sm:$0xff]  }
  0x4b   :  { %3199 = vmatpush1.bf16.msra.mxu0 %v4855_v14  ;;  %3186 = vmatmul.mubr.bf16.gmra.mxu1 %v5689_v33  ;;  %v4946_v14 = vld [vmem:[%s7007_s0 + $0x18] ss:$72 sps:$4 sm:$0xff]  }
  0x4c   :  { %3250 = vmatpush1.bf16.msra.mxu1 %v4858_v15  ;;  %3200 = vmatprep.subr.bf16.mxu0 %v4863_v16  ;;  %v4954_v15 = vld [vmem:[%s7006_s1 + $0x82c] ss:$12 sps:$4 sm:$0xff]   ;;  %v4949_v16 = vld [vmem:[%s7006_s1 + $0x6a8] ss:$12 sps:$4 sm:$0xff]  }
  0x4d   :  { %3251 = vmatprep.subr.bf16.mxu1 %v4866_v17  ;;  %3226 = vmatprep.mubr.bf16.mxu0 %v4945_v40  ;;  %v4952_v17 = vld [vmem:[%s7006_s1 + $0x828] ss:$12 sps:$4 sm:$0xff]   ;;  %v4971_v40 = vld [vmem:[%s7006_s1 + $0x660] ss:$12 sps:$4 sm:$0xff]  }
  0x4e   :  { %3277 = vmatprep.mubr.bf16.mxu1 %v4948_v41  ;;  %v4974_v41 = vld [vmem:[%s7006_s1 + $0x7e0] ss:$12 sps:$4 sm:$0xff]  }
  0x4f   :  { %3201 = vmatpush1.bf16.msra.mxu0 %v4861_v18  ;;  %v35_v18 = vld [vmem:[%s7007_s0 + $0xa0] sm:$0xff] }
  0x50   :  { %3252 = vmatpush1.bf16.msra.mxu1 %v4864_v19  ;;  %3202 = vmatprep.subr.bf16.mxu0 %v4869_v20  ;;  %v36_v19 = vld [vmem:[%s7007_s0 + $0xa8] sm:$0xff]  ;;  %v4957_v20 = vld [vmem:[%s7006_s1 + $0x694] ss:$12 sps:$4 sm:$0xff]  }
  0x51   :  { %3253 = vmatprep.subr.bf16.mxu1 %v4872_v21  ;;  %v4960_v21 = vld [vmem:[%s7006_s1 + $0x814] ss:$12 sps:$4 sm:$0xff]  }
  0x53   :  { %3203 = vmatpush1.bf16.msra.mxu0 %v4867_v22  ;;  %v5850_v22 = vcombine.high %v35_v18, %v35_v18 }
  0x54   :  { %3254 = vmatpush1.bf16.msra.mxu1 %v4870_v23  ;;  %3204 = vmatprep.subr.bf16.mxu0 %v4875_v25  ;;  %v5852_v23 = vcombine.high %v36_v19, %v36_v19  ;;  %v4958_v25 = vld [vmem:[%s7006_s1 + $0x810] ss:$12 sps:$4 sm:$0xff]  }
  0x55   :  { %3255 = vmatprep.subr.bf16.mxu1 %v4878_v26  ;;  %v4965_v26 = vld [vmem:[%s7006_s1 + $0x67c] ss:$12 sps:$4 sm:$0xff]  }
  0x57   :  { %3205 = vmatpush1.bf16.msra.mxu0 %v4873_v30  ;;  %v5868_v30 = vcombine.low %v35_v18, %v35_v18  ;;  %v5039_v18 = vld [vmem:[%s7006_s1 + $0x6dc] ss:$12 sps:$4 sm:$0xff]  }
  0x58   :  { %3256 = vmatpush1.bf16.msra.mxu1 %v4876_v31  ;;  %3206 = vmatprep.subr.bf16.mxu0 %v4881_v34  ;;  %v4963_v31 = vld [vmem:[%s7006_s1 + $0x678] ss:$12 sps:$4 sm:$0xff]  }
  0x59   :  { %3257 = vmatprep.subr.bf16.mxu1 %v4884_v35  ;;  %v4966_v34 = vld [vmem:[%s7006_s1 + $0x7f8] ss:$12 sps:$4 sm:$0xff]   ;;  %v5876_v35 = vcombine.low %v36_v19, %v36_v19  ;;  %v5042_v19 = vld [vmem:[%s7006_s1 + $0x85c] ss:$12 sps:$4 sm:$0xff]  }
  0x5b   :  { %3207 = vmatpush1.bf16.msra.mxu0 %v4879_v36  ;;  %v4973_v36 = vld [vmem:[%s7006_s1 + $0x664] ss:$12 sps:$4 sm:$0xff]  }
  0x5c   :  { %3258 = vmatpush1.bf16.msra.mxu1 %v4882_v37  ;;  %3208 = vmatprep.subr.bf16.mxu0 %v4887_v38  ;;  %v4976_v37 = vld [vmem:[%s7006_s1 + $0x7e4] ss:$12 sps:$4 sm:$0xff]  }
  0x5d   :  { %3259 = vmatprep.subr.bf16.mxu1 %v4890_v39  ;;  %v5051_v38 = vld [vmem:[%s7007_s0 + $0x24] ss:$72 sps:$4 sm:$0xff]  }
  0x5e   :  { %v5054_v39 = vld [vmem:[%s7007_s0 + $0x2c] ss:$72 sps:$4 sm:$0xff]  }
  0x5f   :  { %3209 = vmatpush1.bf16.msra.mxu0 %v4885_v42  ;;  %v4979_v42 = vld [vmem:[%s7006_s1 + $0x64c] ss:$12 sps:$4 sm:$0xff]  }
  0x60   :  { %3260 = vmatpush1.bf16.msra.mxu1 %v4888_v43  ;;  %3210 = vmatprep.subr.bf16.mxu0 %v4893_v44  ;;  %v4982_v43 = vld [vmem:[%s7006_s1 + $0x7cc] ss:$12 sps:$4 sm:$0xff]   ;;  %v4977_v44 = vld [vmem:[%s7006_s1 + $0x648] ss:$12 sps:$4 sm:$0xff]  }
  0x61   :  { %3261 = vmatprep.subr.bf16.mxu1 %v4896_v45  ;;  %v4980_v45 = vld [vmem:[%s7006_s1 + $0x7c8] ss:$12 sps:$4 sm:$0xff]  }
  0x63   :  { %3211 = vmatpush2.bf16.msra.mxu0 %v4891_v46  ;;  %v4985_v46 = vld [vmem:[%s7006_s1 + $0x634] ss:$12 sps:$4 sm:$0xff]  }
  0x64   :  { %3262 = vmatpush2.bf16.msra.mxu1 %v4894_v47  ;;  %3212 = vmatprep.subr.bf16.mxu0 %v4899_v48  ;;  %v4988_v47 = vld [vmem:[%s7006_s1 + $0x7b4] ss:$12 sps:$4 sm:$0xff]   ;;  %v4983_v48 = vld [vmem:[%s7006_s1 + $0x630] ss:$12 sps:$4 sm:$0xff]  }
  0x65   :  { %3263 = vmatprep.subr.bf16.mxu1 %v4902_v49  ;;  %v4986_v49 = vld [vmem:[%s7006_s1 + $0x7b0] ss:$12 sps:$4 sm:$0xff]  }
  0x67   :  { %3213 = vmatpush2.bf16.msra.mxu0 %v4897_v50  ;;  %v4991_v50 = vld [vmem:[%s7006_s1 + $0x61c] ss:$12 sps:$4 sm:$0xff]  }
  0x68   :  { %3264 = vmatpush2.bf16.msra.mxu1 %v4900_v51  ;;  %3214 = vmatprep.subr.bf16.mxu0 %v4905_v52  ;;  %v4994_v51 = vld [vmem:[%s7006_s1 + $0x79c] ss:$12 sps:$4 sm:$0xff]   ;;  %v4989_v52 = vld [vmem:[%s7006_s1 + $0x618] ss:$12 sps:$4 sm:$0xff]  }
  0x69   :  { %3265 = vmatprep.subr.bf16.mxu1 %v4908_v53  ;;  %v4992_v53 = vld [vmem:[%s7006_s1 + $0x798] ss:$12 sps:$4 sm:$0xff]  }
  0x6b   :  { %3215 = vmatpush2.bf16.msra.mxu0 %v4903_v54  ;;  %v4997_v54 = vld [vmem:[%s7006_s1 + $0x604] ss:$12 sps:$4 sm:$0xff]  }
  0x6c   :  { %3266 = vmatpush2.bf16.msra.mxu1 %v4906_v55  ;;  %3216 = vmatprep.subr.bf16.mxu0 %v4911_v56  ;;  %v5000_v55 = vld [vmem:[%s7006_s1 + $0x784] ss:$12 sps:$4 sm:$0xff]   ;;  %v4995_v56 = vld [vmem:[%s7006_s1 + $0x600] ss:$12 sps:$4 sm:$0xff]  }
  0x6d   :  { %3267 = vmatprep.subr.bf16.mxu1 %v4914_v57  ;;  %v4998_v57 = vld [vmem:[%s7006_s1 + $0x780] ss:$12 sps:$4 sm:$0xff]  }
  0x6f   :  { %3217 = vmatpush2.bf16.msra.mxu0 %v4909_v58  ;;  %v5003_v58 = vld [vmem:[%s7006_s1 + $0x76c] ss:$12 sps:$4 sm:$0xff]  }
  0x70   :  { %3268 = vmatpush2.bf16.msra.mxu1 %v4912_v59  ;;  %3218 = vmatprep.subr.bf16.mxu0 %v4917_v60  ;;  %v5006_v59 = vld [vmem:[%s7006_s1 + $0x8ec] ss:$12 sps:$4 sm:$0xff]   ;;  %v5001_v60 = vld [vmem:[%s7006_s1 + $0x768] ss:$12 sps:$4 sm:$0xff]  }
  0x71   :  { %3269 = vmatprep.subr.bf16.mxu1 %v4920_v61  ;;  %v5004_v61 = vld [vmem:[%s7006_s1 + $0x8e8] ss:$12 sps:$4 sm:$0xff]  }
  0x73   :  { %3219 = vmatpush2.bf16.msra.mxu0 %v4915_v62  ;;  %v5009_v62 = vld [vmem:[%s7006_s1 + $0x754] ss:$12 sps:$4 sm:$0xff]  }
  0x74   :  { %3270 = vmatpush2.bf16.msra.mxu1 %v4918_v63  ;;  %3220 = vmatprep.subr.bf16.mxu0 %v4925_v0  ;;  %v5012_v63 = vld [vmem:[%s7006_s1 + $0x8d4] ss:$12 sps:$4 sm:$0xff]   ;;  %v5007_v0 = vld [vmem:[%s7006_s1 + $0x750] ss:$12 sps:$4 sm:$0xff]  }
  0x75   :  { %3271 = vmatprep.subr.bf16.mxu1 %v4928_v1  ;;  %v5010_v1 = vld [vmem:[%s7006_s1 + $0x8d0] ss:$12 sps:$4 sm:$0xff]  }
  0x77   :  { %3221 = vmatpush2.bf16.msra.mxu0 %v4923_v2  ;;  %v5015_v2 = vld [vmem:[%s7006_s1 + $0x73c] ss:$12 sps:$4 sm:$0xff]  }
  0x78   :  { %3272 = vmatpush2.bf16.msra.mxu1 %v4926_v3  ;;  %3222 = vmatprep.subr.bf16.mxu0 %v4933_v4  ;;  %v5018_v3 = vld [vmem:[%s7006_s1 + $0x8bc] ss:$12 sps:$4 sm:$0xff]   ;;  %v5013_v4 = vld [vmem:[%s7006_s1 + $0x738] ss:$12 sps:$4 sm:$0xff]  }
  0x79   :  { %3273 = vmatprep.subr.bf16.mxu1 %v4936_v5  ;;  %v5016_v5 = vld [vmem:[%s7006_s1 + $0x8b8] ss:$12 sps:$4 sm:$0xff]  }
  0x7b   :  { %3223 = vmatpush2.bf16.msra.mxu0 %v4931_v6  ;;  %v5021_v6 = vld [vmem:[%s7006_s1 + $0x724] ss:$12 sps:$4 sm:$0xff]  }
  0x7c   :  { %3274 = vmatpush2.bf16.msra.mxu1 %v4934_v7  ;;  %3224 = vmatprep.subr.bf16.mxu0 %v4939_v8  ;;  %v5024_v7 = vld [vmem:[%s7006_s1 + $0x8a4] ss:$12 sps:$4 sm:$0xff]   ;;  %v5019_v8 = vld [vmem:[%s7006_s1 + $0x720] ss:$12 sps:$4 sm:$0xff]  }
  0x7d   :  { %3275 = vmatprep.subr.bf16.mxu1 %v4942_v9  ;;  %v5022_v9 = vld [vmem:[%s7006_s1 + $0x8a0] ss:$12 sps:$4 sm:$0xff]  }
  0x7f   :  { %3225 = vmatpush2.bf16.msra.mxu0 %v4937_v10  ;;  %v5027_v10 = vld [vmem:[%s7006_s1 + $0x70c] ss:$12 sps:$4 sm:$0xff]  }
  0x80   :  { %3276 = vmatpush2.bf16.msra.mxu1 %v4940_v11  ;;  %3296 = vmatprep.subr.bf16.mxu0 %v4951_v12  ;;  %v5030_v11 = vld [vmem:[%s7006_s1 + $0x88c] ss:$12 sps:$4 sm:$0xff]   ;;  %v5025_v12 = vld [vmem:[%s7006_s1 + $0x708] ss:$12 sps:$4 sm:$0xff]  }
  0x81   :  { %3347 = vmatprep.subr.bf16.mxu1 %v4954_v15  ;;  %v5036_v15 = vld [vmem:[%s7006_s1 + $0x874] ss:$12 sps:$4 sm:$0xff]  }
  0x82   :  { %3227 = vmatmul.mubr.bf16.vlgmr.msra.gmra.mxu0 %v4943_v13  ;;  %v5028_v13 = vld [vmem:[%s7006_s1 + $0x888] ss:$12 sps:$4 sm:$0xff]  }
  0x83   :  { %3278 = vmatmul.mubr.bf16.vlgmr.msra.gmra.mxu1 %v4946_v14  ;;  %3297 = vmatpush1.bf16.msra.mxu0 %v4949_v16  ;;  %v5033_v14 = vld [vmem:[%s7006_s1 + $0x6f4] ss:$12 sps:$4 sm:$0xff]   ;;  %v5031_v16 = vld [vmem:[%s7006_s1 + $0x6f0] ss:$12 sps:$4 sm:$0xff]  }
  0x84   :  { %3348 = vmatpush1.bf16.msra.mxu1 %v4952_v17  ;;  %3298 = vmatprep.subr.bf16.mxu0 %v4957_v20  ;;  %v5034_v17 = vld [vmem:[%s7006_s1 + $0x870] ss:$12 sps:$4 sm:$0xff]   ;;  %v5037_v20 = vld [vmem:[%s7006_s1 + $0x6d8] ss:$12 sps:$4 sm:$0xff]  }
  0x85   :  { %3349 = vmatprep.subr.bf16.mxu1 %v4960_v21  ;;  %3236 = vmatprep.mubr.bf16.mxu0 %v5850_v22  ;;  %v5040_v21 = vld [vmem:[%s7006_s1 + $0x858] ss:$12 sps:$4 sm:$0xff]  }
  0x86   :  { %3287 = vmatprep.mubr.bf16.mxu1 %v5852_v23 }
  0x87   :  { %3299 = vmatpush1.bf16.msra.mxu0 %v4955_v24  ;;  %v5045_v24 = vld [vmem:[%s7006_s1 + $0x6c4] ss:$12 sps:$4 sm:$0xff]  }
  0x88   :  { %3350 = vmatpush1.bf16.msra.mxu1 %v4958_v25  ;;  %3300 = vmatprep.subr.bf16.mxu0 %v4965_v26  ;;  %v5048_v25 = vld [vmem:[%s7006_s1 + $0x844] ss:$12 sps:$4 sm:$0xff]   ;;  %v5043_v26 = vld [vmem:[%s7006_s1 + $0x6c0] ss:$12 sps:$4 sm:$0xff]  }
  0x89   :  { %3351 = vmatprep.subr.bf16.mxu1 %v4968_v29  ;;  %v5046_v29 = vld [vmem:[%s7006_s1 + $0x840] ss:$12 sps:$4 sm:$0xff]  }
  0x8a   :  { %3237 = vmatmul.mubr.bf16.gmra.mxu0 %v5868_v30 }
  0x8b   :  { %3288 = vmatmul.mubr.bf16.gmra.mxu1 %v5876_v35  ;;  %3301 = vmatpush1.bf16.msra.mxu0 %v4963_v31  ;;  %v5057_v31 = vld [vmem:[%s7006_s1 + $0x9ac] ss:$12 sps:$4 sm:$0xff]  }
  0x8c   :  { %3352 = vmatpush1.bf16.msra.mxu1 %v4966_v34  ;;  %3302 = vmatprep.subr.bf16.mxu0 %v4973_v36  ;;  %v5049_v34 = vld [vmem:[%s7007_s0 + $0x20] ss:$72 sps:$4 sm:$0xff]  }
  0x8d   :  { %3353 = vmatprep.subr.bf16.mxu1 %v4976_v37  ;;  %3328 = vmatprep.mubr.bf16.mxu0 %v5051_v38  ;;  %v5052_v36 = vld [vmem:[%s7007_s0 + $0x28] ss:$72 sps:$4 sm:$0xff]   ;;  %v5060_v37 = vld [vmem:[%s7006_s1 + $0xb2c] ss:$12 sps:$4 sm:$0xff]  }
  0x8e   :  { %3379 = vmatprep.mubr.bf16.mxu1 %v5054_v39  ;;  %v5055_v38 = vld [vmem:[%s7006_s1 + $0x9a8] ss:$12 sps:$4 sm:$0xff]  }
  0x8f   :  { %3303 = vmatpush1.bf16.msra.mxu0 %v4971_v40  ;;  %v5058_v39 = vld [vmem:[%s7006_s1 + $0xb28] ss:$12 sps:$4 sm:$0xff]  }
  0x90   :  { %3354 = vmatpush1.bf16.msra.mxu1 %v4974_v41  ;;  %3304 = vmatprep.subr.bf16.mxu0 %v4979_v42  ;;  %v37_v40 = vld [vmem:[%s7007_s0 + $0xb0] sm:$0xff]  ;;  %v38_v41 = vld [vmem:[%s7007_s0 + $0xb8] sm:$0xff] }
  0x91   :  { %3355 = vmatprep.subr.bf16.mxu1 %v4982_v43  ;;  %v5063_v42 = vld [vmem:[%s7006_s1 + $0x994] ss:$12 sps:$4 sm:$0xff]  }
  0x92   :  { %v5066_v43 = vld [vmem:[%s7006_s1 + $0xb14] ss:$12 sps:$4 sm:$0xff]  }
  0x93   :  { %3305 = vmatpush1.bf16.msra.mxu0 %v4977_v44  ;;  %v6072_v44 = vcombine.high %v37_v40, %v37_v40 }
  0x94   :  { %3356 = vmatpush1.bf16.msra.mxu1 %v4980_v45  ;;  %3306 = vmatprep.subr.bf16.mxu0 %v4985_v46  ;;  %v6074_v45 = vcombine.high %v38_v41, %v38_v41  ;;  %v5061_v46 = vld [vmem:[%s7006_s1 + $0x990] ss:$12 sps:$4 sm:$0xff]  }
  0x95   :  { %3357 = vmatprep.subr.bf16.mxu1 %v4988_v47  ;;  %v5064_v47 = vld [vmem:[%s7006_s1 + $0xb10] ss:$12 sps:$4 sm:$0xff]  }
  0x97   :  { %3307 = vmatpush1.bf16.msra.mxu0 %v4983_v48  ;;  %v5071_v48 = vld [vmem:[%s7006_s1 + $0x97c] ss:$12 sps:$4 sm:$0xff]  }
  0x98   :  { %3358 = vmatpush1.bf16.msra.mxu1 %v4986_v49  ;;  %3308 = vmatprep.subr.bf16.mxu0 %v4991_v50  ;;  %v5074_v49 = vld [vmem:[%s7006_s1 + $0xafc] ss:$12 sps:$4 sm:$0xff]   ;;  %v5069_v50 = vld [vmem:[%s7006_s1 + $0x978] ss:$12 sps:$4 sm:$0xff]  }
  0x99   :  { %3359 = vmatprep.subr.bf16.mxu1 %v4994_v51  ;;  %v5072_v51 = vld [vmem:[%s7006_s1 + $0xaf8] ss:$12 sps:$4 sm:$0xff]  }
  0x9b   :  { %3309 = vmatpush1.bf16.msra.mxu0 %v4989_v52  ;;  %v6096_v52 = vcombine.low %v37_v40, %v37_v40  ;;  %v5131_v40 = vld [vmem:[%s7006_s1 + $0xa08] ss:$12 sps:$4 sm:$0xff]  }
  0x9c   :  { %3360 = vmatpush1.bf16.msra.mxu1 %v4992_v53  ;;  %3310 = vmatprep.subr.bf16.mxu0 %v4997_v54  ;;  %v6098_v53 = vcombine.low %v38_v41, %v38_v41  ;;  %v5079_v54 = vld [vmem:[%s7006_s1 + $0x964] ss:$12 sps:$4 sm:$0xff]  }
  0x9d   :  { %3361 = vmatprep.subr.bf16.mxu1 %v5000_v55  ;;  %v5082_v55 = vld [vmem:[%s7006_s1 + $0xae4] ss:$12 sps:$4 sm:$0xff]  }
  0x9f   :  { %3311 = vmatpush1.bf16.msra.mxu0 %v4995_v56  ;;  %v5157_v56 = vld [vmem:[%s7007_s0 + $0x34] ss:$72 sps:$4 sm:$0xff]  }
  0xa0   :  { %3362 = vmatpush1.bf16.msra.mxu1 %v4998_v57  ;;  %3312 = vmatprep.subr.bf16.mxu0 %v5003_v58  ;;  %v5160_v57 = vld [vmem:[%s7007_s0 + $0x3c] ss:$72 sps:$4 sm:$0xff]   ;;  %v5077_v58 = vld [vmem:[%s7006_s1 + $0x960] ss:$12 sps:$4 sm:$0xff]  }
  0xa1   :  { %3363 = vmatprep.subr.bf16.mxu1 %v5006_v59  ;;  %v5080_v59 = vld [vmem:[%s7006_s1 + $0xae0] ss:$12 sps:$4 sm:$0xff]  }
  0xa3   :  { %3313 = vmatpush2.bf16.msra.mxu0 %v5001_v60  ;;  %v5085_v60 = vld [vmem:[%s7006_s1 + $0x94c] ss:$12 sps:$4 sm:$0xff]  }
  0xa4   :  { %3364 = vmatpush2.bf16.msra.mxu1 %v5004_v61  ;;  %3314 = vmatprep.subr.bf16.mxu0 %v5009_v62  ;;  %v5088_v61 = vld [vmem:[%s7006_s1 + $0xacc] ss:$12 sps:$4 sm:$0xff]   ;;  %v5083_v62 = vld [vmem:[%s7006_s1 + $0x948] ss:$12 sps:$4 sm:$0xff]  }
  0xa5   :  { %3365 = vmatprep.subr.bf16.mxu1 %v5012_v63  ;;  %v5086_v63 = vld [vmem:[%s7006_s1 + $0xac8] ss:$12 sps:$4 sm:$0xff]  }
  0xa7   :  { %3315 = vmatpush2.bf16.msra.mxu0 %v5007_v0  ;;  %v5091_v0 = vld [vmem:[%s7006_s1 + $0x934] ss:$12 sps:$4 sm:$0xff]  }
  0xa8   :  { %3366 = vmatpush2.bf16.msra.mxu1 %v5010_v1  ;;  %3316 = vmatprep.subr.bf16.mxu0 %v5015_v2  ;;  %v5094_v1 = vld [vmem:[%s7006_s1 + $0xab4] ss:$12 sps:$4 sm:$0xff]   ;;  %v5089_v2 = vld [vmem:[%s7006_s1 + $0x930] ss:$12 sps:$4 sm:$0xff]  }
  0xa9   :  { %3367 = vmatprep.subr.bf16.mxu1 %v5018_v3  ;;  %v5092_v3 = vld [vmem:[%s7006_s1 + $0xab0] ss:$12 sps:$4 sm:$0xff]  }
  0xab   :  { %3317 = vmatpush2.bf16.msra.mxu0 %v5013_v4  ;;  %v5097_v4 = vld [vmem:[%s7006_s1 + $0x91c] ss:$12 sps:$4 sm:$0xff]  }
  0xac   :  { %3368 = vmatpush2.bf16.msra.mxu1 %v5016_v5  ;;  %3318 = vmatprep.subr.bf16.mxu0 %v5021_v6  ;;  %v5100_v5 = vld [vmem:[%s7006_s1 + $0xa9c] ss:$12 sps:$4 sm:$0xff]   ;;  %v5095_v6 = vld [vmem:[%s7006_s1 + $0x918] ss:$12 sps:$4 sm:$0xff]  }
  0xad   :  { %3369 = vmatprep.subr.bf16.mxu1 %v5024_v7  ;;  %v5098_v7 = vld [vmem:[%s7006_s1 + $0xa98] ss:$12 sps:$4 sm:$0xff]  }
  0xaf   :  { %3319 = vmatpush2.bf16.msra.mxu0 %v5019_v8  ;;  %v5103_v8 = vld [vmem:[%s7006_s1 + $0x904] ss:$12 sps:$4 sm:$0xff]  }
  0xb0   :  { %3370 = vmatpush2.bf16.msra.mxu1 %v5022_v9  ;;  %3320 = vmatprep.subr.bf16.mxu0 %v5027_v10  ;;  %v5106_v9 = vld [vmem:[%s7006_s1 + $0xa84] ss:$12 sps:$4 sm:$0xff]   ;;  %v5101_v10 = vld [vmem:[%s7006_s1 + $0x900] ss:$12 sps:$4 sm:$0xff]  }
  0xb1   :  { %3371 = vmatprep.subr.bf16.mxu1 %v5030_v11  ;;  %v5104_v11 = vld [vmem:[%s7006_s1 + $0xa80] ss:$12 sps:$4 sm:$0xff]  }
  0xb3   :  { %3321 = vmatpush2.bf16.msra.mxu0 %v5025_v12  ;;  %v5109_v12 = vld [vmem:[%s7006_s1 + $0xa6c] ss:$12 sps:$4 sm:$0xff]  }
  0xb4   :  { %3372 = vmatpush2.bf16.msra.mxu1 %v5028_v13  ;;  %3322 = vmatprep.subr.bf16.mxu0 %v5033_v14  ;;  %v5112_v13 = vld [vmem:[%s7006_s1 + $0xbec] ss:$12 sps:$4 sm:$0xff]   ;;  %v5107_v14 = vld [vmem:[%s7006_s1 + $0xa68] ss:$12 sps:$4 sm:$0xff]  }
  0xb5   :  { %3373 = vmatprep.subr.bf16.mxu1 %v5036_v15  ;;  %v5110_v15 = vld [vmem:[%s7006_s1 + $0xbe8] ss:$12 sps:$4 sm:$0xff]  }
  0xb7   :  { %3323 = vmatpush2.bf16.msra.mxu0 %v5031_v16  ;;  %v5115_v16 = vld [vmem:[%s7006_s1 + $0xa54] ss:$12 sps:$4 sm:$0xff]  }
  0xb8   :  { %3374 = vmatpush2.bf16.msra.mxu1 %v5034_v17  ;;  %3324 = vmatprep.subr.bf16.mxu0 %v5039_v18  ;;  %v5118_v17 = vld [vmem:[%s7006_s1 + $0xbd4] ss:$12 sps:$4 sm:$0xff]   ;;  %v5113_v18 = vld [vmem:[%s7006_s1 + $0xa50] ss:$12 sps:$4 sm:$0xff]  }
  0xb9   :  { %3375 = vmatprep.subr.bf16.mxu1 %v5042_v19  ;;  %v5116_v19 = vld [vmem:[%s7006_s1 + $0xbd0] ss:$12 sps:$4 sm:$0xff]  }
  0xbb   :  { %3325 = vmatpush2.bf16.msra.mxu0 %v5037_v20  ;;  %v5121_v20 = vld [vmem:[%s7006_s1 + $0xa3c] ss:$12 sps:$4 sm:$0xff]  }
  0xbc   :  { %3376 = vmatpush2.bf16.msra.mxu1 %v5040_v21  ;;  %3326 = vmatprep.subr.bf16.mxu0 %v5045_v24  ;;  %v5124_v21 = vld [vmem:[%s7006_s1 + $0xbbc] ss:$12 sps:$4 sm:$0xff]   ;;  %v5119_v24 = vld [vmem:[%s7006_s1 + $0xa38] ss:$12 sps:$4 sm:$0xff]  }
  0xbd   :  { %3377 = vmatprep.subr.bf16.mxu1 %v5048_v25  ;;  %v620_v25 = vlaneseq }
  0xbf   :  { %3327 = vmatpush2.bf16.msra.mxu0 %v5043_v26  ;;  %v5122_v26 = vld [vmem:[%s7006_s1 + $0xbb8] ss:$12 sps:$4 sm:$0xff]  }
  0xc0   :  { %3378 = vmatpush2.bf16.msra.mxu1 %v5046_v29  ;;  %3398 = vmatprep.subr.bf16.mxu0 %v5057_v31  ;;  %v5127_v29 = vld [vmem:[%s7006_s1 + $0xa24] ss:$12 sps:$4 sm:$0xff]  }
  0xc1   :  { %3449 = vmatprep.subr.bf16.mxu1 %v5060_v37  ;;  %v5130_v31 = vld [vmem:[%s7006_s1 + $0xba4] ss:$12 sps:$4 sm:$0xff]   ;;  %v5128_v37 = vld [vmem:[%s7006_s1 + $0xba0] ss:$12 sps:$4 sm:$0xff]  }
  0xc2   :  { %3329 = vmatmul.mubr.bf16.vlgmr.msra.gmra.mxu0 %v5049_v34  ;;  %v6210_v34 = vshrl.u32 %v620_v25, 7 }
  0xc3   :  { %3380 = vmatmul.mubr.bf16.vlgmr.msra.gmra.mxu1 %v5052_v36  ;;  %3399 = vmatpush1.bf16.msra.mxu0 %v5055_v38  ;;  %v5125_v36 = vld [vmem:[%s7006_s1 + $0xa20] ss:$12 sps:$4 sm:$0xff]  }
  0xc4   :  { %3450 = vmatpush1.bf16.msra.mxu1 %v5058_v39  ;;  %3400 = vmatprep.subr.bf16.mxu0 %v5063_v42  ;;  %v5133_v38 = vld [vmem:[%s7006_s1 + $0xa0c] ss:$12 sps:$4 sm:$0xff]   ;;  %v622_v41 = vsub.s32 0, %v6210_v34  ;;  %v5134_v42 = vld [vmem:[%s7006_s1 + $0xb88] ss:$12 sps:$4 sm:$0xff]  }
  0xc5   :  { %3451 = vmatprep.subr.bf16.mxu1 %v5066_v43  ;;  %3338 = vmatprep.mubr.bf16.mxu0 %v6072_v44  ;;  %v5136_v39 = vld [vmem:[%s7006_s1 + $0xb8c] ss:$12 sps:$4 sm:$0xff]   ;;  %v5139_v43 = vld [vmem:[%s7006_s1 + $0x9f4] ss:$12 sps:$4 sm:$0xff]  }
  0xc6   :  { %3389 = vmatprep.mubr.bf16.mxu1 %v6074_v45 }
  0xc7   :  { %3401 = vmatpush1.bf16.msra.mxu0 %v5061_v46  ;;  %v5142_v46 = vld [vmem:[%s7006_s1 + $0xb74] ss:$12 sps:$4 sm:$0xff]  }
  0xc8   :  { %3452 = vmatpush1.bf16.msra.mxu1 %v5064_v47  ;;  %3402 = vmatprep.subr.bf16.mxu0 %v5071_v48  ;;  %v5137_v47 = vld [vmem:[%s7006_s1 + $0x9f0] ss:$12 sps:$4 sm:$0xff]  }
  0xc9   :  { %3453 = vmatprep.subr.bf16.mxu1 %v5074_v49  ;;  %v5140_v48 = vld [vmem:[%s7006_s1 + $0xb70] ss:$12 sps:$4 sm:$0xff]  }
  0xca   :  { %3339 = vmatmul.mubr.bf16.gmra.mxu0 %v6096_v52  ;;  %v5145_v49 = vld [vmem:[%s7006_s1 + $0x9dc] ss:$12 sps:$4 sm:$0xff]  }
  0xcb   :  { %3390 = vmatmul.mubr.bf16.gmra.mxu1 %v6098_v53  ;;  %3403 = vmatpush1.bf16.msra.mxu0 %v5069_v50  ;;  %v5148_v50 = vld [vmem:[%s7006_s1 + $0xb5c] ss:$12 sps:$4 sm:$0xff]  }
  0xcc   :  { %3454 = vmatpush1.bf16.msra.mxu1 %v5072_v51  ;;  %3404 = vmatprep.subr.bf16.mxu0 %v5079_v54  ;;  %v5143_v51 = vld [vmem:[%s7006_s1 + $0x9d8] ss:$12 sps:$4 sm:$0xff]  }
  0xcd   :  { %3455 = vmatprep.subr.bf16.mxu1 %v5082_v55  ;;  %3430 = vmatprep.mubr.bf16.mxu0 %v5157_v56  ;;  %v5146_v54 = vld [vmem:[%s7006_s1 + $0xb58] ss:$12 sps:$4 sm:$0xff]  }
  0xce   :  { %3481 = vmatprep.mubr.bf16.mxu1 %v5160_v57  ;;  %v5151_v55 = vld [vmem:[%s7006_s1 + $0x9c4] ss:$12 sps:$4 sm:$0xff]   ;;  %v5149_v57 = vld [vmem:[%s7006_s1 + $0x9c0] ss:$12 sps:$4 sm:$0xff]  }
  0xcf   :  { %3405 = vmatpush1.bf16.msra.mxu0 %v5077_v58  ;;  %v5154_v56 = vld [vmem:[%s7006_s1 + $0xb44] ss:$12 sps:$4 sm:$0xff]   ;;  %v5152_v58 = vld [vmem:[%s7006_s1 + $0xb40] ss:$12 sps:$4 sm:$0xff]  }
  0xd0   :  { %3456 = vmatpush1.bf16.msra.mxu1 %v5080_v59  ;;  %3406 = vmatprep.subr.bf16.mxu0 %v5085_v60  ;;  %v618_v59 = vld [vmem:[%s7008_s2] sm:$0x7]  ;;  %v5163_v60 = vld [vmem:[%s7006_s1 + $0xcac] ss:$12 sps:$4 sm:$0xff]  }
  0xd1   :  { %3457 = vmatprep.subr.bf16.mxu1 %v5088_v61  ;;  %v5155_v61 = vld [vmem:[%s7007_s0 + $0x30] ss:$72 sps:$4 sm:$0xff]  }
  0xd3   :  { %3407 = vmatpush1.bf16.msra.mxu0 %v5083_v62  ;;  %v5158_v62 = vld [vmem:[%s7007_s0 + $0x38] ss:$72 sps:$4 sm:$0xff]  }
  0xd4   :  { %3458 = vmatpush1.bf16.msra.mxu1 %v5086_v63  ;;  %3408 = vmatprep.subr.bf16.mxu0 %v5091_v0  ;;  %v5164_v63 = vld [vmem:[%s7006_s1 + $0x170] ss:$12 sps:$4 sm:$0xff]   ;;  %v5161_v0 = vld [vmem:[%s7006_s1 + $0xca8] ss:$12 sps:$4 sm:$0xff]  }
  0xd5   :  { %3459 = vmatprep.subr.bf16.mxu1 %v5094_v1  ;;  %v5165_v1 = vld [vmem:[%s7006_s1 + $0xb0] ss:$12 sps:$4 sm:$0xff]  }
  0xd7   :  { %3409 = vmatpush1.bf16.msra.mxu0 %v5089_v2  ;;  %v626_v2 = vsub.s32 1, %v6210_v34 }
  0xd8   :  { %3460 = vmatpush1.bf16.msra.mxu1 %v5092_v3  ;;  %3410 = vmatprep.subr.bf16.mxu0 %v5097_v4  ;;  %v39_v3 = vld [vmem:[%s7007_s0 + $0xc0] sm:$0xff]  ;;  %v40_v4 = vld [vmem:[%s7007_s0 + $0xc8] sm:$0xff] }
  0xd9   :  { %3461 = vmatprep.subr.bf16.mxu1 %v5100_v5  ;;  %v6295_v5 = vrot.slane %v618_v59, %v622_v41  ;;  %v5183_v41 = vld [vmem:[%s7006_s1 + $0x128] ss:$12 sps:$4 sm:$0xff]  }
  0xdb   :  { %3411 = vmatpush1.bf16.msra.mxu0 %v5095_v6  ;;  %v5168_v6 = vld [vmem:[%s7006_s1 + $0xc94] ss:$12 sps:$4 sm:$0xff]  }
  0xdc   :  { %3462 = vmatpush1.bf16.msra.mxu1 %v5098_v7  ;;  %3412 = vmatprep.subr.bf16.mxu0 %v5103_v8  ;;  %v5169_v7 = vld [vmem:[%s7006_s1 + $0x158] ss:$12 sps:$4 sm:$0xff]   ;;  %v6303_v8 = vrot.slane %v618_v59, %v626_v2  ;;  %v5199_v2 = vld [vmem:[%s7006_s1 + $0x20] ss:$12 sps:$4 sm:$0xff]  }
  0xdd   :  { %3463 = vmatprep.subr.bf16.mxu1 %v5106_v9  ;;  %v5166_v9 = vld [vmem:[%s7006_s1 + $0xc90] ss:$12 sps:$4 sm:$0xff]   ;;  %v5193_v59 = vld [vmem:[%s7006_s1 + $0xf8] ss:$12 sps:$4 sm:$0xff]  }
  0xdf   :  { %3413 = vmatpush1.bf16.msra.mxu0 %v5101_v10  ;;  %v6308_v10 = vcombine.high %v39_v3, %v39_v3 }
  0xe0   :  { %3464 = vmatpush1.bf16.msra.mxu1 %v5104_v11  ;;  %3414 = vmatprep.subr.bf16.mxu0 %v5109_v12  ;;  %v6310_v11 = vcombine.high %v40_v4, %v40_v4 }
  0xe1   :  { %3465 = vmatprep.subr.bf16.mxu1 %v5112_v13 }
  0xe3   :  { %3415 = vmatpush2.bf16.msra.mxu0 %v5107_v14  ;;  %v5170_v14 = vld [vmem:[%s7006_s1 + $0x98] ss:$12 sps:$4 sm:$0xff]  }
  0xe4   :  { %3466 = vmatpush2.bf16.msra.mxu1 %v5110_v15  ;;  %3416 = vmatprep.subr.bf16.mxu0 %v5115_v16  ;;  %v5175_v16 = vld [vmem:[%s7006_s1 + $0xc7c] ss:$12 sps:$4 sm:$0xff]  }
  0xe5   :  { %3467 = vmatprep.subr.bf16.mxu1 %v5118_v17 }
  0xe7   :  { %3417 = vmatpush2.bf16.msra.mxu0 %v5113_v18 }
  0xe8   :  { %3468 = vmatpush2.bf16.msra.mxu1 %v5116_v19  ;;  %3418 = vmatprep.subr.bf16.mxu0 %v5121_v20  ;;  %v5176_v19 = vld [vmem:[%s7006_s1 + $0x140] ss:$12 sps:$4 sm:$0xff]  }
  0xe9   :  { %3469 = vmatprep.subr.bf16.mxu1 %v5124_v21 }
  0xeb   :  { %3419 = vmatpush2.bf16.msra.mxu0 %v5119_v24  ;;  %v5173_v24 = vld [vmem:[%s7006_s1 + $0xc78] ss:$12 sps:$4 sm:$0xff]  }
  0xec   :  { %3470 = vmatpush2.bf16.msra.mxu1 %v5122_v26  ;;  %3420 = vmatprep.subr.bf16.mxu0 %v5127_v29  ;;  %v6330_v29 = vcombine.low %v39_v3, %v39_v3 }
  0xed   :  { %3471 = vmatprep.subr.bf16.mxu1 %v5130_v31  ;;  %v5178_v31 = vld [vmem:[%s7006_s1 + $0x80] ss:$12 sps:$4 sm:$0xff]  }
  0xef   :  { %3421 = vmatpush2.bf16.msra.mxu0 %v5125_v36  ;;  %v6335_v36 = vcombine.low %v40_v4, %v40_v4 }
  0xf0   :  { %3472 = vmatpush2.bf16.msra.mxu1 %v5128_v37  ;;  %3422 = vmatprep.subr.bf16.mxu0 %v5133_v38 }
  0xf1   :  { %3473 = vmatprep.subr.bf16.mxu1 %v5136_v39  ;;  %v5182_v39 = vld [vmem:[%s7006_s1 + $0xc64] ss:$12 sps:$4 sm:$0xff]  }
  0xf3   :  { %3423 = vmatpush2.bf16.msra.mxu0 %v5131_v40 }
  0xf4   :  { %3474 = vmatpush2.bf16.msra.mxu1 %v5134_v42  ;;  %3424 = vmatprep.subr.bf16.mxu0 %v5139_v43 }
  0xf5   :  { %3475 = vmatprep.subr.bf16.mxu1 %v5142_v46  ;;  %v5180_v46 = vld [vmem:[%s7006_s1 + $0xc60] ss:$12 sps:$4 sm:$0xff]  }
  0xf7   :  { %3425 = vmatpush2.bf16.msra.mxu0 %v5137_v47  ;;  %v5247_v47 = vld [vmem:[%s7007_s0 + $0x44] ss:$72 sps:$4 sm:$0xff]  }
  0xf8   :  { %3476 = vmatpush2.bf16.msra.mxu1 %v5140_v48  ;;  %3426 = vmatprep.subr.bf16.mxu0 %v5145_v49  ;;  %v5184_v49 = vld [vmem:[%s7006_s1 + $0x68] ss:$12 sps:$4 sm:$0xff]  }
  0xf9   :  { %3477 = vmatprep.subr.bf16.mxu1 %v5148_v50 }
  0xfb   :  { %3427 = vmatpush2.bf16.msra.mxu0 %v5143_v51  ;;  %v5187_v51 = vld [vmem:[%s7006_s1 + $0xc4c] ss:$12 sps:$4 sm:$0xff]  }
  0xfc   :  { %3478 = vmatpush2.bf16.msra.mxu1 %v5146_v54  ;;  %3428 = vmatprep.subr.bf16.mxu0 %v5151_v55  ;;  %v5188_v54 = vld [vmem:[%s7006_s1 + $0x110] ss:$12 sps:$4 sm:$0xff]   ;;  %v5185_v55 = vld [vmem:[%s7006_s1 + $0xc48] ss:$12 sps:$4 sm:$0xff]  }
  0xfd   :  { %3479 = vmatprep.subr.bf16.mxu1 %v5154_v56  ;;  %v5362_v56 = vld [vmem:[%s7007_s0 + $0x4] ss:$72 sps:$4 sm:$0xff]  }
  0xff   :  { %3429 = vmatpush2.bf16.msra.mxu0 %v5149_v57  ;;  %v5189_v57 = vld [vmem:[%s7006_s1 + $0x50] ss:$12 sps:$4 sm:$0xff]  }
 0x100   :  { %3480 = vmatpush2.bf16.msra.mxu1 %v5152_v58  ;;  %3500 = vmatprep.subr.bf16.mxu0 %v5163_v60  ;;  %v5192_v58 = vld [vmem:[%s7006_s1 + $0xc34] ss:$12 sps:$4 sm:$0xff]   ;;  %v5190_v60 = vld [vmem:[%s7006_s1 + $0xc30] ss:$12 sps:$4 sm:$0xff]  }
 0x101   :  { %4473 = vmatprep.subr.bf16.mxu1 %v5164_v63  ;;  %v5198_v63 = vld [vmem:[%s7006_s1 + $0xe0] ss:$12 sps:$4 sm:$0xff]  }
 0x102   :  { %v3126_v12 = vpop.f32.mrf.mxu0  ;;  %3431 = vmatmul.mubr.bf16.vlgmr.msra.gmra.mxu0 %v5155_v61  ;;  %v5194_v61 = vld [vmem:[%s7006_s1 + $0x38] ss:$12 sps:$4 sm:$0xff]  }
 0x103   :  { %v3177_v13 = vpop.f32.mrf.mxu1  ;;  %3482 = vmatmul.mubr.bf16.vlgmr.msra.gmra.mxu1 %v5158_v62  ;;  %v3127_v15 = vadd.f32 %v3126_v12, %v6295_v5  ;;  %3501 = vmatpush1.bf16.msra.mxu0 %v5161_v0  ;;  %v5197_v62 = vld [vmem:[%s7006_s1 + $0xc1c] ss:$12 sps:$4 sm:$0xff]   ;;  %v5195_v0 = vld [vmem:[%s7006_s1 + $0xc18] ss:$12 sps:$4 sm:$0xff]  }
 0x104   :  { %4474 = vmatpush3.bf16.msra.mxu1 %v5165_v1  ;;  %v3128_v17 = vpop.f32.mrf.mxu0  ;;  %3502 = vmatprep.subr.bf16.mxu0 %v5168_v6  ;;  %v5202_v6 = vld [vmem:[%s7006_s1 + $0xc04] ss:$12 sps:$4 sm:$0xff]  }
 0x105   :  { %v3179_v18 = vpop.f32.mrf.mxu1  ;;  %4475 = vmatprep.subr.bf16.mxu1 %v5169_v7  ;;  %v6322_v20 = vadd.f32 %v3177_v13, %v3127_v15  ;;  %v3129_v21 = vadd.f32 %v3128_v17, %v6303_v8  ;;  %3440 = vmatprep.mubr.bf16.mxu0 %v6308_v10 }
 0x106   :  { %3491 = vmatprep.mubr.bf16.mxu1 %v6310_v11  ;;  %v3130_v25 = vpop.f32.mrf.mxu0 }
 0x107   :  { %v3181_v26 = vpop.f32.mrf.mxu1  ;;  %v6337_v37 = vadd.f32 %v3179_v18, %v3129_v21  ;;  %v3131_v38 = vadd.f32 %v3130_v25, %v6295_v5  ;;  %3503 = vmatpush1.bf16.msra.mxu0 %v5166_v9  ;;  %v5203_v9 = vld [vmem:[%s7006_s1 + $0xc8] ss:$12 sps:$4 sm:$0xff]   ;;  %v5208_v21 = vld [vmem:[%s7006_s1 + $0x2f0] ss:$12 sps:$4 sm:$0xff]  }
 0x108   :  { %4476 = vmatpush3.bf16.msra.mxu1 %v5170_v14  ;;  %v3132_v40 = vpop.f32.mrf.mxu0  ;;  %3504 = vmatprep.subr.bf16.mxu0 %v5175_v16  ;;  %v5204_v16 = vld [vmem:[%s7006_s1 + $0x8] ss:$12 sps:$4 sm:$0xff]  }
 0x109   :  { %4477 = vmatprep.subr.bf16.mxu1 %v5176_v19  ;;  %v6346_v42 = vadd.f32 %v3181_v26, %v3131_v38  ;;  %v3133_v43 = vadd.f32 %v3132_v40, %v6303_v8  ;;  %v3183_v48 = vpop.f32.mrf.mxu1  ;;  %v5205_v25 = vld [vmem:[%s7006_s1 + $0xd68] ss:$12 sps:$4 sm:$0xff]   ;;  %v5209_v26 = vld [vmem:[%s7006_s1 + $0x230] ss:$12 sps:$4 sm:$0xff]   ;;  %v5213_v38 = vld [vmem:[%s7006_s1 + $0x2d8] ss:$12 sps:$4 sm:$0xff]  }
 0x10a   :  { %3441 = vmatmul.mubr.bf16.gmra.mxu0 %v6330_v29  ;;  %v3136_v1 = vpop.f32.mrf.mxu0  ;;  %v5363_v40 = vld [vmem:[%s7007_s0] ss:$72 sps:$4 sm:$0xff]  }
 0x10b   :  { %3492 = vmatmul.mubr.bf16.gmra.mxu1 %v6335_v36  ;;  %v6360_v50 = vadd.f32 %v3183_v48, %v3133_v43  ;;  %3505 = vmatpush1.bf16.msra.mxu0 %v5173_v24  ;;  %v3137_v3 = vadd.f32 %v3136_v1, %v6295_v5  ;;  %v3187_v4 = vpop.f32.mrf.mxu1  ;;  %v5200_v5 = vld [vmem:[%s7006_s1 + $0xc00] ss:$12 sps:$4 sm:$0xff]   ;;  %v5217_v43 = vld [vmem:[%s7006_s1 + $0xd3c] ss:$12 sps:$4 sm:$0xff]   ;;  %v5235_v1 = vld [vmem:[%s7006_s1 + $0xcd8] ss:$12 sps:$4 sm:$0xff]  }
 0x10c   :  { %4478 = vmatpush3.bf16.msra.mxu1 %v5178_v31  ;;  %3506 = vmatprep.subr.bf16.mxu0 %v5182_v39  ;;  %v3138_v7 = vpop.f32.mrf.mxu0  ;;  %v5212_v31 = vld [vmem:[%s7006_s1 + $0xd54] ss:$12 sps:$4 sm:$0xff]   ;;  %v5210_v39 = vld [vmem:[%s7006_s1 + $0xd50] ss:$12 sps:$4 sm:$0xff]  }
 0x10d   :  { %4479 = vmatprep.subr.bf16.mxu1 %v5183_v41  ;;  %3583 = vmatprep.mubr.bf16.mxu1 %v5362_v56  ;;  %v3139_v12 = vadd.f32 %v3138_v7, %v6303_v8  ;;  %v6409_v13 = vadd.f32 %v3187_v4, %v3137_v3  ;;  %v3189_v14 = vpop.f32.mrf.mxu1  ;;  %v5207_v8 = vld [vmem:[%s7006_s1 + $0xd6c] ss:$12 sps:$4 sm:$0xff]   ;;  %v5228_v56 = vld [vmem:[%s7006_s1 + $0x290] ss:$12 sps:$4 sm:$0xff]   ;;  %v5243_v4 = vld [vmem:[%s7006_s1 + $0x248] ss:$12 sps:$4 sm:$0xff]  }
 0x10e   :  { %3532 = vmatprep.mubr.bf16.mxu0 %v5247_v47  ;;  %v3140_v15 = vpop.f32.mrf.mxu0  ;;  %v5214_v41 = vld [vmem:[%s7006_s1 + $0x218] ss:$12 sps:$4 sm:$0xff]   ;;  %v5219_v48 = vld [vmem:[%s7006_s1 + $0x200] ss:$12 sps:$4 sm:$0xff]   ;;  %v5244_v7 = vld [vmem:[%s7006_s1 + $0x188] ss:$12 sps:$4 sm:$0xff]  }
 0x10f   :  { %3507 = vmatpush1.bf16.msra.mxu0 %v5180_v46  ;;  %v6417_v17 = vadd.f32 %v3189_v14, %v3139_v12  ;;  %v3191_v18 = vpop.f32.mrf.mxu1  ;;  %v5218_v46 = vld [vmem:[%s7006_s1 + $0x2c0] ss:$12 sps:$4 sm:$0xff]   ;;  %v5215_v47 = vld [vmem:[%s7006_s1 + $0xd38] ss:$12 sps:$4 sm:$0xff]   ;;  %v5249_v14 = vld [vmem:[%s7006_s1 + $0x5f0] ss:$12 sps:$4 sm:$0xff]  }
 0x110   :  { %4480 = vmatpush3.bf16.msra.mxu1 %v5184_v49  ;;  %3508 = vmatprep.subr.bf16.mxu0 %v5187_v51  ;;  %v3141_v19 = vpop.f32.mrf.mxu0  ;;  %v5222_v49 = vld [vmem:[%s7006_s1 + $0xd24] ss:$12 sps:$4 sm:$0xff]   ;;  %v5223_v51 = vld [vmem:[%s7006_s1 + $0x2a8] ss:$12 sps:$4 sm:$0xff]  }
 0x111   :  { %4481 = vmatprep.subr.bf16.mxu1 %v5188_v54  ;;  %v3192_v24 = vpop.f32.mrf.mxu1  ;;  %v5224_v54 = vld [vmem:[%s7006_s1 + $0x1e8] ss:$12 sps:$4 sm:$0xff]   ;;  %v5242_v3 = vld [vmem:[%s7006_s1 + $0xcc4] ss:$12 sps:$4 sm:$0xff]  }
 0x112   :  { %v6529_v12 = vld [vmem:[%s7007_s0 + $0x40] ss:$72 sps:$4 sm:$0xff]   ;;  %v5251_v15 = vld [vmem:[%s7006_s1 + $0x530] ss:$12 sps:$4 sm:$0xff]   ;;  %v5252_v18 = vld [vmem:[%s7006_s1 + $0x458] ss:$12 sps:$4 sm:$0xff]  }
 0x113   :  { %3509 = vmatpush1.bf16.msra.mxu0 %v5185_v55  ;;  %v5227_v55 = vld [vmem:[%s7006_s1 + $0xd0c] ss:$12 sps:$4 sm:$0xff]  }
 0x114   :  { %4482 = vmatpush3.bf16.msra.mxu1 %v5189_v57  ;;  %3510 = vmatprep.subr.bf16.mxu0 %v5192_v58  ;;  %v5225_v57 = vld [vmem:[%s7006_s1 + $0xd08] ss:$12 sps:$4 sm:$0xff]   ;;  %v5229_v58 = vld [vmem:[%s7006_s1 + $0x1d0] ss:$12 sps:$4 sm:$0xff]   ;;  %v5254_v19 = vld [vmem:[%s7006_s1 + $0x398] ss:$12 sps:$4 sm:$0xff]  }
 0x115   :  { %4483 = vmatprep.subr.bf16.mxu1 %v5193_v59  ;;  %v5232_v59 = vld [vmem:[%s7006_s1 + $0xcf4] ss:$12 sps:$4 sm:$0xff]  }
 0x117   :  { %3511 = vmatpush1.bf16.msra.mxu0 %v5190_v60  ;;  %v5233_v60 = vld [vmem:[%s7006_s1 + $0x278] ss:$12 sps:$4 sm:$0xff]  }
 0x118   :  { %4484 = vmatpush3.bf16.msra.mxu1 %v5194_v61  ;;  %3512 = vmatprep.subr.bf16.mxu0 %v5197_v62  ;;  %v5230_v61 = vld [vmem:[%s7006_s1 + $0xcf0] ss:$12 sps:$4 sm:$0xff]   ;;  %v5234_v62 = vld [vmem:[%s7006_s1 + $0x1b8] ss:$12 sps:$4 sm:$0xff]  }
 0x119   :  { %4485 = vmatprep.subr.bf16.mxu1 %v5198_v63  ;;  %v5237_v63 = vld [vmem:[%s7006_s1 + $0xcdc] ss:$12 sps:$4 sm:$0xff]  }
 0x11b   :  { %3513 = vmatpush1.bf16.msra.mxu0 %v5195_v0  ;;  %v5238_v0 = vld [vmem:[%s7006_s1 + $0x260] ss:$12 sps:$4 sm:$0xff]  }
 0x11c   :  { %4486 = vmatpush3.bf16.msra.mxu1 %v5199_v2  ;;  %3514 = vmatprep.subr.bf16.mxu0 %v5202_v6  ;;  %v5239_v2 = vld [vmem:[%s7006_s1 + $0x1a0] ss:$12 sps:$4 sm:$0xff]  }
 0x11d   :  { %4487 = vmatprep.subr.bf16.mxu1 %v5203_v9  ;;  %v5240_v6 = vld [vmem:[%s7006_s1 + $0xcc0] ss:$12 sps:$4 sm:$0xff]   ;;  %v5248_v9 = vld [vmem:[%s7006_s1 + $0x470] ss:$12 sps:$4 sm:$0xff]  }
 0x11f   :  { %3515 = vmatpush1.bf16.msra.mxu0 %v5200_v5  ;;  %v5250_v5 = vld [vmem:[%s7006_s1 + $0x3b0] ss:$12 sps:$4 sm:$0xff]  }
 0x120   :  { %4488 = vmatpush3.bf16.msra.mxu1 %v5204_v16  ;;  %3516 = vmatprep.subr.bf16.mxu0 %v5207_v8  ;;  %v41_v16 = vld [vmem:[%s7007_s0 + $0xd0] sm:$0xff]  ;;  %v5253_v8 = vld [vmem:[%s7006_s1 + $0x5d8] ss:$12 sps:$4 sm:$0xff]  }
 0x121   :  { %4501 = vmatprep.subr.bf16.mxu1 %v5208_v21  ;;  %v6552_v21 = vcombine.high %v41_v16, %v41_v16 }
 0x123   :  { %3584 = vmatmul.mubr.bf16.vlgmr.msra.gmra.mxu1 %v5363_v40  ;;  %3517 = vmatpush2.bf16.msra.mxu0 %v5205_v25 }
 0x124   :  { %4502 = vmatpush3.bf16.msra.mxu1 %v5209_v26  ;;  %3518 = vmatprep.subr.bf16.mxu0 %v5212_v31  ;;  %v5365_v26 = vld [vmem:[%s7007_s0 + $0x8] ss:$72 sps:$4 sm:$0xff]   ;;  %v5255_v31 = vld [vmem:[%s7006_s1 + $0x518] ss:$12 sps:$4 sm:$0xff]  }
 0x125   :  { %4503 = vmatprep.subr.bf16.mxu1 %v5213_v38  ;;  %3591 = vmatprep.mubr.bf16.mxu1 %v5673_v27  ;;  %v5220_v27 = vld [vmem:[%s7006_s1 + $0xd20] ss:$12 sps:$4 sm:$0xff]  }
 0x127   :  { %3519 = vmatpush2.bf16.msra.mxu0 %v5210_v39  ;;  %v5258_v39 = vld [vmem:[%s7006_s1 + $0x440] ss:$12 sps:$4 sm:$0xff]  }
 0x128   :  { %4504 = vmatpush3.bf16.msra.mxu1 %v5214_v41  ;;  %3520 = vmatprep.subr.bf16.mxu0 %v5217_v43  ;;  %v5259_v43 = vld [vmem:[%s7006_s1 + $0x5c0] ss:$12 sps:$4 sm:$0xff]  }
 0x129   :  { %4505 = vmatprep.subr.bf16.mxu1 %v5218_v46 }
 0x12b   :  { %3592 = vmatmul.mubr.bf16.gmra.mxu1 %v5675_v28  ;;  %3521 = vmatpush2.bf16.msra.mxu0 %v5215_v47  ;;  %v5364_v28 = vld [vmem:[%s7007_s0 + $0xc] ss:$72 sps:$4 sm:$0xff]  }
 0x12c   :  { %4506 = vmatpush3.bf16.msra.mxu1 %v5219_v48  ;;  %3522 = vmatprep.subr.bf16.mxu0 %v5222_v49 }
 0x12d   :  { %4507 = vmatprep.subr.bf16.mxu1 %v5223_v51  ;;  %3631 = vmatprep.mubr.bf16.mxu1 %v5364_v28  ;;  %v6576_v51 = vcombine.low %v41_v16, %v41_v16 }
 0x12f   :  { %3523 = vmatpush2.bf16.msra.mxu0 %v5220_v27  ;;  %v5261_v27 = vld [vmem:[%s7006_s1 + $0x500] ss:$12 sps:$4 sm:$0xff]  }
 0x130   :  { %4508 = vmatpush3.bf16.msra.mxu1 %v5224_v54  ;;  %3524 = vmatprep.subr.bf16.mxu0 %v5227_v55 }
 0x131   :  { %4509 = vmatprep.subr.bf16.mxu1 %v5228_v56 }
 0x133   :  { %3525 = vmatpush2.bf16.msra.mxu0 %v5225_v57  ;;  %v5263_v57 = vld [vmem:[%s7006_s1 + $0x5a8] ss:$12 sps:$4 sm:$0xff]  }
 0x134   :  { %4510 = vmatpush3.bf16.msra.mxu1 %v5229_v58  ;;  %3526 = vmatprep.subr.bf16.mxu0 %v5232_v59 }
 0x135   :  { %4511 = vmatprep.subr.bf16.mxu1 %v5233_v60 }
 0x137   :  { %3527 = vmatpush2.bf16.msra.mxu0 %v5230_v61  ;;  %v5265_v61 = vld [vmem:[%s7006_s1 + $0x4e8] ss:$12 sps:$4 sm:$0xff]  }
 0x138   :  { %4512 = vmatpush3.bf16.msra.mxu1 %v5234_v62  ;;  %3528 = vmatprep.subr.bf16.mxu0 %v5237_v63 }
 0x139   :  { %4513 = vmatprep.subr.bf16.mxu1 %v5238_v0 }
 0x13b   :  { %3529 = vmatpush2.bf16.msra.mxu0 %v5235_v1 }
 0x13c   :  { %4514 = vmatpush3.bf16.msra.mxu1 %v5239_v2  ;;  %3530 = vmatprep.subr.bf16.mxu0 %v5242_v3 }
 0x13d   :  { %4515 = vmatprep.subr.bf16.mxu1 %v5243_v4  ;;  %v5366_v4 = vld [vmem:[%s7007_s0 + $0x14] ss:$72 sps:$4 sm:$0xff]  }
 0x13f   :  { %3531 = vmatpush2.bf16.msra.mxu0 %v5240_v6  ;;  %v5367_v6 = vld [vmem:[%s7007_s0 + $0x1c] ss:$72 sps:$4 sm:$0xff]  }
 0x140   :  { %4516 = vmatpush3.bf16.msra.mxu1 %v5244_v7  ;;  %4529 = vmatprep.subr.bf16.mxu0 %v5248_v9 }
 0x141   :  { %4557 = vmatprep.subr.bf16.mxu1 %v5249_v14 }
 0x142   :  { %v3228_v24 = vpop.f32.mrf.mxu0  ;;  %3533 = vmatmul.mubr.bf16.vlgmr.msra.gmra.mxu0 %v6529_v12 }
 0x143   :  { %v3279_v25 = vpop.f32.mrf.mxu1  ;;  %3632 = vmatmul.mubr.bf16.vlgmr.msra.gmra.mxu1 %v5365_v26  ;;  %v3229_v38 = vadd.f32 %v3228_v24, %v6322_v20  ;;  %4530 = vmatpush3.bf16.msra.mxu0 %v5250_v5  ;;  %v5260_v20 = vld [vmem:[%s7006_s1 + $0x380] ss:$12 sps:$4 sm:$0xff]   ;;  %v5270_v5 = vld [vmem:[%s7006_s1 + $0x3f8] ss:$12 sps:$4 sm:$0xff]  }
 0x144   :  { %4558 = vmatpush3.bf16.msra.mxu1 %v5251_v15  ;;  %v3230_v40 = vpop.f32.mrf.mxu0  ;;  %4531 = vmatprep.subr.bf16.mxu0 %v5252_v18  ;;  %v5271_v15 = vld [vmem:[%s7006_s1 + $0x578] ss:$12 sps:$4 sm:$0xff]   ;;  %v5274_v24 = vld [vmem:[%s7006_s1 + $0x3e0] ss:$12 sps:$4 sm:$0xff]  }
 0x145   :  { %v3281_v41 = vpop.f32.mrf.mxu1  ;;  %4559 = vmatprep.subr.bf16.mxu1 %v5253_v8  ;;  %v6568_v46 = vadd.f32 %v3279_v25, %v3229_v38  ;;  %v3231_v47 = vadd.f32 %v3230_v40, %v6337_v37  ;;  %3542 = vmatprep.mubr.bf16.mxu0 %v6552_v21  ;;  %v5272_v8 = vld [vmem:[%s7006_s1 + $0x338] ss:$12 sps:$4 sm:$0xff]   ;;  %v5275_v25 = vld [vmem:[%s7006_s1 + $0x560] ss:$12 sps:$4 sm:$0xff]   ;;  %v5278_v38 = vld [vmem:[%s7006_s1 + $0x3c8] ss:$12 sps:$4 sm:$0xff]  }
 0x146   :  { %3639 = vmatprep.mubr.bf16.mxu1 %v5687_v32  ;;  %v3232_v48 = vpop.f32.mrf.mxu0  ;;  %v5262_v32 = vld [vmem:[%s7006_s1 + $0x428] ss:$12 sps:$4 sm:$0xff]   ;;  %v5276_v26 = vld [vmem:[%s7006_s1 + $0x320] ss:$12 sps:$4 sm:$0xff]  }
 0x147   :  { %v3283_v49 = vpop.f32.mrf.mxu1  ;;  %v6581_v54 = vadd.f32 %v3281_v41, %v3231_v47  ;;  %v3233_v37 = vadd.f32 %v3232_v48, %v6346_v42  ;;  %4532 = vmatpush3.bf16.msra.mxu0 %v5254_v19  ;;  %v5264_v42 = vld [vmem:[%s7006_s1 + $0x368] ss:$12 sps:$4 sm:$0xff]   ;;  %v5273_v19 = vld [vmem:[%s7006_s1 + $0x4b8] ss:$12 sps:$4 sm:$0xff]   ;;  %v5283_v47 = vld [vmem:[%s7006_s1 + $0x8f0] ss:$12 sps:$4 sm:$0xff]  }
 0x148   :  { %4560 = vmatpush3.bf16.msra.mxu1 %v5255_v31  ;;  %v3234_v55 = vpop.f32.mrf.mxu0  ;;  %4533 = vmatprep.subr.bf16.mxu0 %v5258_v39  ;;  %v5277_v31 = vld [vmem:[%s7006_s1 + $0x4a0] ss:$12 sps:$4 sm:$0xff]   ;;  %v5279_v39 = vld [vmem:[%s7006_s1 + $0x548] ss:$12 sps:$4 sm:$0xff]   ;;  %v5285_v48 = vld [vmem:[%s7006_s1 + $0x830] ss:$12 sps:$4 sm:$0xff]  }
 0x149   :  { %v3285_v56 = vpop.f32.mrf.mxu1  ;;  %4561 = vmatprep.subr.bf16.mxu1 %v5259_v43  ;;  %v6590_v28 = vadd.f32 %v3283_v49, %v3233_v37  ;;  %v3235_v58 = vadd.f32 %v3234_v55, %v6360_v50  ;;  %v5266_v50 = vld [vmem:[%s7006_s1 + $0x410] ss:$12 sps:$4 sm:$0xff]   ;;  %v5280_v40 = vld [vmem:[%s7006_s1 + $0x308] ss:$12 sps:$4 sm:$0xff]   ;;  %v5286_v49 = vld [vmem:[%s7006_s1 + $0x758] ss:$12 sps:$4 sm:$0xff]  }
 0x14a   :  { %v3238_v59 = vpop.f32.mrf.mxu0  ;;  %3543 = vmatmul.mubr.bf16.gmra.mxu0 %v6576_v51  ;;  %v5281_v41 = vld [vmem:[%s7006_s1 + $0x488] ss:$12 sps:$4 sm:$0xff]   ;;  %v5282_v43 = vld [vmem:[%s7006_s1 + $0x770] ss:$12 sps:$4 sm:$0xff]   ;;  %v5288_v55 = vld [vmem:[%s7006_s1 + $0x698] ss:$12 sps:$4 sm:$0xff]  }
 0x14b   :  { %3640 = vmatmul.mubr.bf16.gmra.mxu1 %v5689_v33  ;;  %v3289_v60 = vpop.f32.mrf.mxu1  ;;  %v6601_v62 = vadd.f32 %v3285_v56, %v3235_v58  ;;  %v3239_v63 = vadd.f32 %v3238_v59, %v6409_v13  ;;  %4534 = vmatpush3.bf16.msra.mxu0 %v5260_v20  ;;  %v5267_v33 = vld [vmem:[%s7006_s1 + $0x590] ss:$12 sps:$4 sm:$0xff]   ;;  %v5289_v56 = vld [vmem:[%s7006_s1 + $0x818] ss:$12 sps:$4 sm:$0xff]   ;;  %v5291_v58 = vld [vmem:[%s7006_s1 + $0x8c0] ss:$12 sps:$4 sm:$0xff]  }
 0x14c   :  { %4562 = vmatpush3.bf16.msra.mxu1 %v5261_v27  ;;  %v3240_v0 = vpop.f32.mrf.mxu0  ;;  %4535 = vmatprep.subr.bf16.mxu0 %v5262_v32  ;;  %v5268_v13 = vld [vmem:[%s7006_s1 + $0x350] ss:$12 sps:$4 sm:$0xff]   ;;  %v5287_v27 = vld [vmem:[%s7006_s1 + $0x8d8] ss:$12 sps:$4 sm:$0xff]   ;;  %v5293_v59 = vld [vmem:[%s7006_s1 + $0x800] ss:$12 sps:$4 sm:$0xff]  }
 0x14d   :  { %v3291_v1 = vpop.f32.mrf.mxu1  ;;  %4563 = vmatprep.subr.bf16.mxu1 %v5263_v57  ;;  %v3241_v2 = vadd.f32 %v3240_v0, %v6417_v17  ;;  %v6611_v3 = vadd.f32 %v3289_v60, %v3239_v63  ;;  %3679 = vmatprep.mubr.bf16.mxu0 %v5366_v4  ;;  %v5269_v17 = vld [vmem:[%s7006_s1 + $0x4d0] ss:$12 sps:$4 sm:$0xff]   ;;  %v5369_v32 = vld [vmem:[%s7007_s0 + $0x18] ss:$72 sps:$4 sm:$0xff]   ;;  %v5294_v60 = vld [vmem:[%s7006_s1 + $0x728] ss:$12 sps:$4 sm:$0xff]  }
 0x14e   :  { %3727 = vmatprep.mubr.bf16.mxu1 %v5367_v6  ;;  %v3242_v7 = vpop.f32.mrf.mxu0  ;;  %v5284_v20 = vld [vmem:[%s7006_s1 + $0x6b0] ss:$12 sps:$4 sm:$0xff]   ;;  %v5290_v57 = vld [vmem:[%s7006_s1 + $0x740] ss:$12 sps:$4 sm:$0xff]   ;;  %v5305_v4 = vld [vmem:[%s7006_s1 + $0x7b8] ss:$12 sps:$4 sm:$0xff]  }
 0x14f   :  { %v3293_v9 = vpop.f32.mrf.mxu1  ;;  %v6625_v14 = vadd.f32 %v3291_v1, %v3241_v2  ;;  %4536 = vmatpush3.bf16.msra.mxu0 %v5264_v42  ;;  %v5368_v37 = vld [vmem:[%s7007_s0 + $0x10] ss:$72 sps:$4 sm:$0xff]   ;;  %v5292_v42 = vld [vmem:[%s7006_s1 + $0x680] ss:$12 sps:$4 sm:$0xff]  }
 0x150   :  { %4564 = vmatpush3.bf16.msra.mxu1 %v5265_v61  ;;  %4537 = vmatprep.subr.bf16.mxu0 %v5266_v50  ;;  %v3243_v16 = vpop.f32.mrf.mxu0  ;;  %v5297_v61 = vld [vmem:[%s7006_s1 + $0x7e8] ss:$12 sps:$4 sm:$0xff]   ;;  %v5298_v63 = vld [vmem:[%s7006_s1 + $0x710] ss:$12 sps:$4 sm:$0xff]   ;;  %v5303_v2 = vld [vmem:[%s7006_s1 + $0x878] ss:$12 sps:$4 sm:$0xff]  }
 0x151   :  { %4565 = vmatprep.subr.bf16.mxu1 %v5267_v33  ;;  %v3294_v18 = vpop.f32.mrf.mxu1  ;;  %v5371_v50 = vld [vmem:[%s7007_s0 + $0x2c] ss:$72 sps:$4 sm:$0xff]   ;;  %v5300_v0 = vld [vmem:[%s7006_s1 + $0x650] ss:$12 sps:$4 sm:$0xff]   ;;  %v5302_v33 = vld [vmem:[%s7006_s1 + $0x6f8] ss:$12 sps:$4 sm:$0xff]  }
 0x152   :  { %v5301_v1 = vld [vmem:[%s7006_s1 + $0x7d0] ss:$12 sps:$4 sm:$0xff]   ;;  %v5306_v6 = vld [vmem:[%s7006_s1 + $0x6e0] ss:$12 sps:$4 sm:$0xff]   ;;  %v5312_v16 = vld [vmem:[%s7006_s1 + $0x608] ss:$12 sps:$4 sm:$0xff]  }
 0x153   :  { %4538 = vmatpush3.bf16.msra.mxu0 %v5268_v13  ;;  %v5304_v13 = vld [vmem:[%s7006_s1 + $0x638] ss:$12 sps:$4 sm:$0xff]   ;;  %v5308_v7 = vld [vmem:[%s7006_s1 + $0x620] ss:$12 sps:$4 sm:$0xff]   ;;  %v5313_v18 = vld [vmem:[%s7006_s1 + $0x788] ss:$12 sps:$4 sm:$0xff]  }
 0x154   :  { %4566 = vmatpush3.bf16.msra.mxu1 %v5269_v17  ;;  %4539 = vmatprep.subr.bf16.mxu0 %v5270_v5  ;;  %v5307_v17 = vld [vmem:[%s7006_s1 + $0x860] ss:$12 sps:$4 sm:$0xff]   ;;  %v5310_v5 = vld [vmem:[%s7006_s1 + $0x6c8] ss:$12 sps:$4 sm:$0xff]  }
 0x155   :  { %4567 = vmatprep.subr.bf16.mxu1 %v5271_v15  ;;  %v5309_v9 = vld [vmem:[%s7006_s1 + $0x7a0] ss:$12 sps:$4 sm:$0xff]   ;;  %v5311_v15 = vld [vmem:[%s7006_s1 + $0x848] ss:$12 sps:$4 sm:$0xff]  }
 0x157   :  { %4540 = vmatpush3.bf16.msra.mxu0 %v5272_v8  ;;  %v5314_v8 = vld [vmem:[%s7006_s1 + $0xa70] ss:$12 sps:$4 sm:$0xff]  }
 0x158   :  { %4568 = vmatpush3.bf16.msra.mxu1 %v5273_v19  ;;  %4541 = vmatprep.subr.bf16.mxu0 %v5274_v24  ;;  %v5315_v19 = vld [vmem:[%s7006_s1 + $0xbf0] ss:$12 sps:$4 sm:$0xff]  }
 0x159   :  { %4569 = vmatprep.subr.bf16.mxu1 %v5275_v25  ;;  %v5316_v24 = vld [vmem:[%s7006_s1 + $0x9b0] ss:$12 sps:$4 sm:$0xff]  }
 0x15a   :  { %v5317_v25 = vld [vmem:[%s7006_s1 + $0xb30] ss:$12 sps:$4 sm:$0xff]  }
 0x15b   :  { %4542 = vmatpush3.bf16.msra.mxu0 %v5276_v26  ;;  %v5318_v26 = vld [vmem:[%s7006_s1 + $0xa58] ss:$12 sps:$4 sm:$0xff]  }
 0x15c   :  { %4570 = vmatpush3.bf16.msra.mxu1 %v5277_v31  ;;  %4543 = vmatprep.subr.bf16.mxu0 %v5278_v38  ;;  %v5319_v31 = vld [vmem:[%s7006_s1 + $0xbd8] ss:$12 sps:$4 sm:$0xff]  }
 0x15d   :  { %4571 = vmatprep.subr.bf16.mxu1 %v5279_v39 }
 0x15f   :  { %4544 = vmatpush3.bf16.msra.mxu0 %v5280_v40  ;;  %v5372_v40 = vld [vmem:[%s7007_s0 + $0x20] ss:$72 sps:$4 sm:$0xff]  }
 0x160   :  { %4572 = vmatpush3.bf16.msra.mxu1 %v5281_v41  ;;  %4585 = vmatprep.subr.bf16.mxu0 %v5282_v43  ;;  %v5373_v41 = vld [vmem:[%s7007_s0 + $0x28] ss:$72 sps:$4 sm:$0xff]  }
 0x161   :  { %4613 = vmatprep.subr.bf16.mxu1 %v5283_v47  ;;  %v5320_v47 = vld [vmem:[%s7006_s1 + $0x998] ss:$12 sps:$4 sm:$0xff]  }
 0x162   :  { %3680 = vmatmul.mubr.bf16.vlgmr.msra.gmra.mxu0 %v5368_v37 }
 0x163   :  { %3728 = vmatmul.mubr.bf16.vlgmr.msra.gmra.mxu1 %v5369_v32  ;;  %4586 = vmatpush3.bf16.msra.mxu0 %v5284_v20  ;;  %v5321_v20 = vld [vmem:[%s7006_s1 + $0xb18] ss:$12 sps:$4 sm:$0xff]  }
 0x164   :  { %4614 = vmatpush3.bf16.msra.mxu1 %v5285_v48  ;;  %4587 = vmatprep.subr.bf16.mxu0 %v5286_v49 }
 0x165   :  { %4615 = vmatprep.subr.bf16.mxu1 %v5287_v27  ;;  %3687 = vmatprep.mubr.bf16.mxu0 %v5850_v22  ;;  %v5295_v22 = vld [vmem:[%s7006_s1 + $0x8a8] ss:$12 sps:$4 sm:$0xff]   ;;  %v5322_v27 = vld [vmem:[%s7006_s1 + $0xa40] ss:$12 sps:$4 sm:$0xff]  }
 0x166   :  { %3735 = vmatprep.mubr.bf16.mxu1 %v5852_v23  ;;  %v5296_v23 = vld [vmem:[%s7006_s1 + $0x668] ss:$12 sps:$4 sm:$0xff]  }
 0x167   :  { %4588 = vmatpush3.bf16.msra.mxu0 %v5288_v55 }
 0x168   :  { %4616 = vmatpush3.bf16.msra.mxu1 %v5289_v56  ;;  %4589 = vmatprep.subr.bf16.mxu0 %v5290_v57 }
 0x169   :  { %4617 = vmatprep.subr.bf16.mxu1 %v5291_v58 }
 0x16a   :  { %3688 = vmatmul.mubr.bf16.gmra.mxu0 %v5868_v30  ;;  %v5299_v30 = vld [vmem:[%s7006_s1 + $0x890] ss:$12 sps:$4 sm:$0xff]  }
 0x16b   :  { %3736 = vmatmul.mubr.bf16.gmra.mxu1 %v5876_v35  ;;  %4590 = vmatpush3.bf16.msra.mxu0 %v5292_v42  ;;  %v5370_v35 = vld [vmem:[%s7007_s0 + $0x24] ss:$72 sps:$4 sm:$0xff]  }
 0x16c   :  { %4618 = vmatpush3.bf16.msra.mxu1 %v5293_v59  ;;  %4591 = vmatprep.subr.bf16.mxu0 %v5294_v60  ;;  %v5324_v42 = vld [vmem:[%s7006_s1 + $0x980] ss:$12 sps:$4 sm:$0xff]  }
 0x16d   :  { %4619 = vmatprep.subr.bf16.mxu1 %v5295_v22  ;;  %3775 = vmatprep.mubr.bf16.mxu0 %v5370_v35  ;;  %v5328_v35 = vld [vmem:[%s7006_s1 + $0x968] ss:$12 sps:$4 sm:$0xff]  }
 0x16e   :  { %3823 = vmatprep.mubr.bf16.mxu1 %v5371_v50 }
 0x16f   :  { %4592 = vmatpush3.bf16.msra.mxu0 %v5296_v23 }
 0x170   :  { %4620 = vmatpush3.bf16.msra.mxu1 %v5297_v61  ;;  %4593 = vmatprep.subr.bf16.mxu0 %v5298_v63 }
 0x171   :  { %4621 = vmatprep.subr.bf16.mxu1 %v5299_v30 }
 0x173   :  { %4594 = vmatpush3.bf16.msra.mxu0 %v5300_v0 }
 0x174   :  { %4622 = vmatpush3.bf16.msra.mxu1 %v5301_v1  ;;  %4595 = vmatprep.subr.bf16.mxu0 %v5302_v33  ;;  %v5374_v33 = vld [vmem:[%s7007_s0 + $0x34] ss:$72 sps:$4 sm:$0xff]  }
 0x175   :  { %4623 = vmatprep.subr.bf16.mxu1 %v5303_v2  ;;  %v5375_v2 = vld [vmem:[%s7007_s0 + $0x3c] ss:$72 sps:$4 sm:$0xff]  }
 0x177   :  { %4596 = vmatpush3.bf16.msra.mxu0 %v5304_v13 }
 0x178   :  { %4624 = vmatpush3.bf16.msra.mxu1 %v5305_v4  ;;  %4597 = vmatprep.subr.bf16.mxu0 %v5306_v6 }
 0x179   :  { %4625 = vmatprep.subr.bf16.mxu1 %v5307_v17  ;;  %v5333_v17 = vld [vmem:[%s7006_s1 + $0xad0] ss:$12 sps:$4 sm:$0xff]  }
 0x17b   :  { %4598 = vmatpush3.bf16.msra.mxu0 %v5308_v7  ;;  %v5334_v7 = vld [vmem:[%s7006_s1 + $0x9f8] ss:$12 sps:$4 sm:$0xff]  }
 0x17c   :  { %4626 = vmatpush3.bf16.msra.mxu1 %v5309_v9  ;;  %4599 = vmatprep.subr.bf16.mxu0 %v5310_v5  ;;  %v5335_v9 = vld [vmem:[%s7006_s1 + $0xb78] ss:$12 sps:$4 sm:$0xff]  }
 0x17d   :  { %4627 = vmatprep.subr.bf16.mxu1 %v5311_v15 }
 0x17f   :  { %4600 = vmatpush3.bf16.msra.mxu0 %v5312_v16  ;;  %v5336_v16 = vld [vmem:[%s7006_s1 + $0x938] ss:$12 sps:$4 sm:$0xff]  }
 0x180   :  { %4628 = vmatpush3.bf16.msra.mxu1 %v5313_v18  ;;  %4641 = vmatprep.subr.bf16.mxu0 %v5314_v8  ;;  %v5337_v18 = vld [vmem:[%s7006_s1 + $0xab8] ss:$12 sps:$4 sm:$0xff]   ;;  %v5338_v8 = vld [vmem:[%s7006_s1 + $0x9e0] ss:$12 sps:$4 sm:$0xff]  }
 0x181   :  { %4669 = vmatprep.subr.bf16.mxu1 %v5315_v19  ;;  %v5339_v19 = vld [vmem:[%s7006_s1 + $0xb60] ss:$12 sps:$4 sm:$0xff]  }
 0x182   :  { %v3330_v38 = vpop.f32.mrf.mxu0  ;;  %3776 = vmatmul.mubr.bf16.vlgmr.msra.gmra.mxu0 %v5372_v40  ;;  %v5346_v40 = vld [vmem:[%s7006_s1 + $0xd70] ss:$12 sps:$4 sm:$0xff]  }
 0x183   :  { %v3381_v39 = vpop.f32.mrf.mxu1  ;;  %3824 = vmatmul.mubr.bf16.vlgmr.msra.gmra.mxu1 %v5373_v41  ;;  %v3331_v43 = vadd.f32 %v3330_v38, %v6568_v46  ;;  %4642 = vmatpush3.bf16.msra.mxu0 %v5316_v24  ;;  %v5323_v46 = vld [vmem:[%s7006_s1 + $0xbc0] ss:$12 sps:$4 sm:$0xff]   ;;  %v5344_v38 = vld [vmem:[%s7006_s1 + $0x908] ss:$12 sps:$4 sm:$0xff]   ;;  %v5347_v41 = vld [vmem:[%s7006_s1 + $0xcb0] ss:$12 sps:$4 sm:$0xff]  }
 0x184   :  { %4670 = vmatpush3.bf16.msra.mxu1 %v5317_v25  ;;  %v3332_v48 = vpop.f32.mrf.mxu0  ;;  %4643 = vmatprep.subr.bf16.mxu0 %v5318_v26  ;;  %v5340_v24 = vld [vmem:[%s7006_s1 + $0x920] ss:$12 sps:$4 sm:$0xff]   ;;  %v5342_v26 = vld [vmem:[%s7006_s1 + $0x9c8] ss:$12 sps:$4 sm:$0xff]  }
 0x185   :  { %v3383_v49 = vpop.f32.mrf.mxu1  ;;  %4671 = vmatprep.subr.bf16.mxu1 %v5319_v31  ;;  %v6812_v37 = vadd.f32 %v3381_v39, %v3331_v43  ;;  %v3333_v32 = vadd.f32 %v3332_v48, %v6581_v54  ;;  %3783 = vmatprep.mubr.bf16.mxu0 %v6072_v44  ;;  %v5325_v54 = vld [vmem:[%s7006_s1 + $0xb00] ss:$12 sps:$4 sm:$0xff]   ;;  %v5343_v31 = vld [vmem:[%s7006_s1 + $0xb48] ss:$12 sps:$4 sm:$0xff]   ;;  %v5348_v43 = vld [vmem:[%s7006_s1 + $0xd58] ss:$12 sps:$4 sm:$0xff]  }
 0x186   :  { %3831 = vmatprep.mubr.bf16.mxu1 %v6074_v45  ;;  %v3334_v55 = vpop.f32.mrf.mxu0  ;;  %v5326_v45 = vld [vmem:[%s7006_s1 + $0xa28] ss:$12 sps:$4 sm:$0xff]   ;;  %v5341_v25 = vld [vmem:[%s7006_s1 + $0xaa0] ss:$12 sps:$4 sm:$0xff]   ;;  %v5349_v48 = vld [vmem:[%s7006_s1 + $0xc98] ss:$12 sps:$4 sm:$0xff]  }
 0x187   :  { %v3385_v56 = vpop.f32.mrf.mxu1  ;;  %v6817_v57 = vadd.f32 %v3383_v49, %v3333_v32  ;;  %v3335_v58 = vadd.f32 %v3334_v55, %v6590_v28  ;;  %4644 = vmatpush3.bf16.msra.mxu0 %v5320_v47  ;;  %v5327_v28 = vld [vmem:[%s7006_s1 + $0xba8] ss:$12 sps:$4 sm:$0xff]   ;;  %v5376_v47 = vld [vmem:[%s7007_s0 + $0x30] ss:$72 sps:$4 sm:$0xff]   ;;  %v5350_v49 = vld [vmem:[%s7006_s1 + $0xd40] ss:$12 sps:$4 sm:$0xff]  }
 0x188   :  { %4672 = vmatpush3.bf16.msra.mxu1 %v5321_v20  ;;  %v3336_v59 = vpop.f32.mrf.mxu0  ;;  %4645 = vmatprep.subr.bf16.mxu0 %v5322_v27  ;;  %v5345_v39 = vld [vmem:[%s7006_s1 + $0xa88] ss:$12 sps:$4 sm:$0xff]   ;;  %v5377_v20 = vld [vmem:[%s7007_s0 + $0x38] ss:$72 sps:$4 sm:$0xff]   ;;  %v5378_v32 = vld [vmem:[%s7007_s0 + $0x44] ss:$72 sps:$4 sm:$0xff]  }
 0x189   :  { %v3387_v44 = vpop.f32.mrf.mxu1  ;;  %4673 = vmatprep.subr.bf16.mxu1 %v5323_v46  ;;  %v6832_v60 = vadd.f32 %v3385_v56, %v3335_v58  ;;  %v3337_v22 = vadd.f32 %v3336_v59, %v6601_v62  ;;  %v5329_v62 = vld [vmem:[%s7006_s1 + $0xae8] ss:$12 sps:$4 sm:$0xff]   ;;  %v5351_v27 = vld [vmem:[%s7006_s1 + $0xc80] ss:$12 sps:$4 sm:$0xff]   ;;  %v5357_v55 = vld [vmem:[%s7006_s1 + $0xc38] ss:$12 sps:$4 sm:$0xff]  }
 0x18a   :  { %v3340_v23 = vpop.f32.mrf.mxu0  ;;  %3784 = vmatmul.mubr.bf16.gmra.mxu0 %v6096_v52  ;;  %v5330_v52 = vld [vmem:[%s7006_s1 + $0xa10] ss:$12 sps:$4 sm:$0xff]   ;;  %v5352_v46 = vld [vmem:[%s7006_s1 + $0xd28] ss:$12 sps:$4 sm:$0xff]   ;;  %v5359_v56 = vld [vmem:[%s7006_s1 + $0xc20] ss:$12 sps:$4 sm:$0xff]  }
 0x18b   :  { %v3391_v61 = vpop.f32.mrf.mxu1  ;;  %3832 = vmatmul.mubr.bf16.gmra.mxu1 %v6098_v53  ;;  %v6837_v63 = vadd.f32 %v3387_v44, %v3337_v22  ;;  %v3341_v30 = vadd.f32 %v3340_v23, %v6611_v3  ;;  %4646 = vmatpush3.bf16.msra.mxu0 %v5324_v42  ;;  %v5331_v53 = vld [vmem:[%s7006_s1 + $0xb90] ss:$12 sps:$4 sm:$0xff]   ;;  %v5360_v58 = vld [vmem:[%s7006_s1 + $0xcc8] ss:$12 sps:$4 sm:$0xff]  }
 0x18c   :  { %4674 = vmatpush3.bf16.msra.mxu1 %v5325_v54  ;;  %v3342_v50 = vpop.f32.mrf.mxu0  ;;  %4647 = vmatprep.subr.bf16.mxu0 %v5326_v45  ;;  %v5361_v42 = vld [vmem:[%s7006_s1 + $0xc08] ss:$12 sps:$4 sm:$0xff]  }
 0x18d   :  { %v3393_v0 = vpop.f32.mrf.mxu1  ;;  %4675 = vmatprep.subr.bf16.mxu1 %v5327_v28  ;;  %v3343_v3 = vadd.f32 %v3342_v50, %v6625_v14  ;;  %v6853_v1 = vadd.f32 %v3391_v61, %v3341_v30  ;;  %3871 = vmatprep.mubr.bf16.mxu0 %v5374_v33  ;;  %v5332_v14 = vld [vmem:[%s7006_s1 + $0x950] ss:$12 sps:$4 sm:$0xff]  }
 0x18e   :  { %3919 = vmatprep.mubr.bf16.mxu1 %v5375_v2  ;;  %v3344_v13 = vpop.f32.mrf.mxu0 }
 0x18f   :  { %v3395_v4 = vpop.f32.mrf.mxu1  ;;  %v6861_v6 = vadd.f32 %v3393_v0, %v3343_v3  ;;  %4648 = vmatpush3.bf16.msra.mxu0 %v5328_v35 }
 0x190   :  { %4676 = vmatpush3.bf16.msra.mxu1 %v5329_v62  ;;  %4649 = vmatprep.subr.bf16.mxu0 %v5330_v52  ;;  %v3345_v5 = vpop.f32.mrf.mxu0 }
 0x191   :  { %4677 = vmatprep.subr.bf16.mxu1 %v5331_v53  ;;  %v3396_v15 = vpop.f32.mrf.mxu1 }
 0x193   :  { %4650 = vmatpush3.bf16.msra.mxu0 %v5332_v14 }
 0x194   :  { %4678 = vmatpush3.bf16.msra.mxu1 %v5333_v17  ;;  %4651 = vmatprep.subr.bf16.mxu0 %v5334_v7 }
 0x195   :  { %4679 = vmatprep.subr.bf16.mxu1 %v5335_v9 }
 0x197   :  { %4652 = vmatpush3.bf16.msra.mxu0 %v5336_v16  ;;  %v630_v16 = vsub.s32 2, %v6210_v34 }
 0x198   :  { %4680 = vmatpush3.bf16.msra.mxu1 %v5337_v18  ;;  %4653 = vmatprep.subr.bf16.mxu0 %v5338_v8 }
 0x199   :  { %4681 = vmatprep.subr.bf16.mxu1 %v5339_v19 }
 0x19b   :  { %4654 = vmatpush3.bf16.msra.mxu0 %v5340_v24  ;;  %v5379_v24 = vld [vmem:[%s7008_s2] sm:$0x7] }
 0x19c   :  { %4682 = vmatpush3.bf16.msra.mxu1 %v5341_v25  ;;  %4655 = vmatprep.subr.bf16.mxu0 %v5342_v26  ;;  %v631_v25 = vrot.slane %v5379_v24, %v630_v16 }
 0x19d   :  { %4683 = vmatprep.subr.bf16.mxu1 %v5343_v31 }
 0x19f   :  { %4656 = vmatpush3.bf16.msra.mxu0 %v5344_v38 }
 0x1a0   :  { %4684 = vmatpush3.bf16.msra.mxu1 %v5345_v39  ;;  %4697 = vmatprep.subr.bf16.mxu0 %v5346_v40 }
 0x1a1   :  { %4725 = vmatprep.subr.bf16.mxu1 %v5346_v40 }
 0x1a2   :  { %3872 = vmatmul.mubr.bf16.vlgmr.msra.gmra.mxu0 %v5376_v47 }
 0x1a3   :  { %3920 = vmatmul.mubr.bf16.vlgmr.msra.gmra.mxu1 %v5377_v20  ;;  %4698 = vmatpush3.bf16.msra.mxu0 %v5347_v41 }
 0x1a4   :  { %4733 = vmatpush3.bf16.msra.mxu1 %v5347_v41  ;;  %4699 = vmatprep.subr.bf16.mxu0 %v5348_v43 }
 0x1a5   :  { %4726 = vmatprep.subr.bf16.mxu1 %v5348_v43  ;;  %3879 = vmatprep.mubr.bf16.mxu0 %v6308_v10  ;;  %v5353_v10 = vld [vmem:[%s7006_s1 + $0xc68] ss:$12 sps:$4 sm:$0xff]  }
 0x1a6   :  { %3927 = vmatprep.mubr.bf16.mxu1 %v6310_v11  ;;  %v5354_v11 = vld [vmem:[%s7006_s1 + $0xd10] ss:$12 sps:$4 sm:$0xff]  }
 0x1a7   :  { %4700 = vmatpush3.bf16.msra.mxu0 %v5349_v48 }
 0x1a8   :  { %4734 = vmatpush3.bf16.msra.mxu1 %v5349_v48  ;;  %4701 = vmatprep.subr.bf16.mxu0 %v5350_v49 }
 0x1a9   :  { %4727 = vmatprep.subr.bf16.mxu1 %v5350_v49 }
 0x1aa   :  { %3880 = vmatmul.mubr.bf16.gmra.mxu0 %v6330_v29  ;;  %v5355_v29 = vld [vmem:[%s7006_s1 + $0xc50] ss:$12 sps:$4 sm:$0xff]  }
 0x1ab   :  { %3928 = vmatmul.mubr.bf16.gmra.mxu1 %v6335_v36  ;;  %4702 = vmatpush3.bf16.msra.mxu0 %v5351_v27  ;;  %v5356_v36 = vld [vmem:[%s7006_s1 + $0xcf8] ss:$12 sps:$4 sm:$0xff]  }
 0x1ac   :  { %4735 = vmatpush3.bf16.msra.mxu1 %v5351_v27  ;;  %4703 = vmatprep.subr.bf16.mxu0 %v5352_v46 }
 0x1ad   :  { %4728 = vmatprep.subr.bf16.mxu1 %v5352_v46  ;;  %3967 = vmatprep.mubr.bf16.mxu0 %v5378_v32 }
 0x1ae   :  { %3975 = vmatprep.mubr.bf16.mxu1 %v6552_v21  ;;  %v5358_v21 = vld [vmem:[%s7006_s1 + $0xce0] ss:$12 sps:$4 sm:$0xff]  }
 0x1af   :  { %4704 = vmatpush3.bf16.msra.mxu0 %v5353_v10 }
 0x1b0   :  { %4736 = vmatpush3.bf16.msra.mxu1 %v5353_v10  ;;  %4705 = vmatprep.subr.bf16.mxu0 %v5354_v11 }
 0x1b1   :  { %4729 = vmatprep.subr.bf16.mxu1 %v5354_v11 }
 0x1b3   :  { %4706 = vmatpush3.bf16.msra.mxu0 %v5355_v29 }
 0x1b4   :  { %4737 = vmatpush3.bf16.msra.mxu1 %v5355_v29  ;;  %4707 = vmatprep.subr.bf16.mxu0 %v5356_v36 }
 0x1b5   :  { %4730 = vmatprep.subr.bf16.mxu1 %v5356_v36 }
 0x1b7   :  { %4708 = vmatpush3.bf16.msra.mxu0 %v5357_v55 }
 0x1b8   :  { %4738 = vmatpush3.bf16.msra.mxu1 %v5357_v55  ;;  %4709 = vmatprep.subr.bf16.mxu0 %v5358_v21 }
 0x1b9   :  { %4731 = vmatprep.subr.bf16.mxu1 %v5358_v21 }
 0x1bb   :  { %4710 = vmatpush3.bf16.msra.mxu0 %v5359_v56 }
 0x1bc   :  { %4739 = vmatpush3.bf16.msra.mxu1 %v5359_v56  ;;  %4711 = vmatprep.subr.bf16.mxu0 %v5360_v58 }
 0x1bd   :  { %4732 = vmatprep.subr.bf16.mxu1 %v5360_v58 }
 0x1bf   :  { %4712 = vmatpush3.bf16.msra.mxu0 %v5361_v42 }
 0x1c0   :  { %4740 = vmatpush3.bf16.msra.mxu1 %v5361_v42 }
 0x1c2   :  { %v3432_v54 = vpop.f32.mrf.mxu0  ;;  %3968 = vmatmul.mubr.bf16.vlgmr.msra.gmra.mxu0 %v6529_v12 }
 0x1c3   :  { %v3483_v59 = vpop.f32.mrf.mxu1  ;;  %3976 = vmatmul.mubr.bf16.vlgmr.msra.gmra.mxu1 %v6576_v51  ;;  %v3433_v15 = vadd.f32 %v3432_v54, %v6812_v37 }
 0x1c4   :  { %v3434_v44 = vpop.f32.mrf.mxu0 }
 0x1c5   :  { %v3485_v45 = vpop.f32.mrf.mxu1  ;;  %v3435_v18 = vadd.f32 %v3434_v44, %v6817_v57  ;;  %v3484_v19 = vadd.f32 %v3483_v59, %v3433_v15 }
 0x1c6   :  { %v3436_v28 = vpop.f32.mrf.mxu0 }
 0x1c7   :  { %v3487_v22 = vpop.f32.mrf.mxu1  ;;  %v3437_v8 = vadd.f32 %v3436_v28, %v6832_v60  ;;  %v3486_v39 = vadd.f32 %v3485_v45, %v3435_v18 }
 0x1c8   :  { %v3438_v23 = vpop.f32.mrf.mxu0 }
 0x1c9   :  { %v3489_v61 = vpop.f32.mrf.mxu1  ;;  %v3439_v26 = vadd.f32 %v3438_v23, %v6837_v63  ;;  %v3488_v41 = vadd.f32 %v3487_v22, %v3437_v8 }
 0x1ca   :  { %v3442_v30 = vpop.f32.mrf.mxu0 }
 0x1cb   :  { %v3493_v35 = vpop.f32.mrf.mxu1  ;;  %v3443_v37 = vadd.f32 %v3442_v30, %v6853_v1  ;;  %v3490_v48 = vadd.f32 %v3489_v61, %v3439_v26 }
 0x1cc   :  { %v3444_v62 = vpop.f32.mrf.mxu0 }
 0x1cd   :  { %v3495_v50 = vpop.f32.mrf.mxu1  ;;  %v3445_v46 = vadd.f32 %v3444_v62, %v6861_v6  ;;  %v3494_v32 = vadd.f32 %v3493_v35, %v3443_v37 }
 0x1ce   :  { %v3446_v52 = vpop.f32.mrf.mxu0 }
 0x1cf   :  { %v3497_v0 = vpop.f32.mrf.mxu1  ;;  %v3496_v42 = vadd.f32 %v3495_v50, %v3445_v46 }
 0x1d0   :  { %v3447_v3 = vpop.f32.mrf.mxu0 }
 0x1d1   :  { %v3498_v53 = vpop.f32.mrf.mxu1 }
 0x1e3   :  { %v4489_v33 = vpop.f32.mrf.mxu1 }
 0x1e5   :  { %v4490_v2 = vpop.f32.mrf.mxu1 }
 0x1e6   :  { %v4491_v13 = vadd.f32 %v4490_v2, %v4489_v33 }
 0x1e7   :  { %v4492_v12 = vpop.f32.mrf.mxu1 }
 0x1e8   :  { %v3586_v57 = vadd.f32 %v4491_v13, %v631_v25 }
 0x1e9   :  { %v4493_v4 = vpop.f32.mrf.mxu1 }
 0x1ea   :  { %v4494_v51 = vadd.f32 %v4493_v4, %v4492_v12 }
 0x1eb   :  { %v4495_v14 = vpop.f32.mrf.mxu1 }
 0x1ec   :  { %v3589_v36 = vadd.f32 %v4494_v51, %v631_v25 }
 0x1ed   :  { %v4496_v17 = vpop.f32.mrf.mxu1 }
 0x1ee   :  { %v4497_v7 = vadd.f32 %v4496_v17, %v4495_v14 }
 0x1ef   :  { %v4498_v9 = vpop.f32.mrf.mxu1 }
 0x1f0   :  { %v3594_v22 = vadd.f32 %v4497_v7, %v631_v25 }
 0x1f1   :  { %v4499_v5 = vpop.f32.mrf.mxu1 }
 0x202   :  { %v3534_v31 = vpop.f32.mrf.mxu0 }
 0x203   :  { %v4517_v38 = vpop.f32.mrf.mxu1  ;;  %v3535_v40 = vadd.f32 %v3534_v31, %v3484_v19 }
 0x204   :  { %v3536_v34 = vpop.f32.mrf.mxu0 }
 0x205   :  { %v4518_v43 = vpop.f32.mrf.mxu1  ;;  %v3983_v47 = vmax.f32 %v3535_v40, 0.0  ;;  %v3537_v60 = vadd.f32 %v3536_v34, %v3486_v39 }
 0x206   :  { %v4519_v20 = vadd.f32 %v4518_v43, %v4517_v38  ;;  %v3538_v49 = vpop.f32.mrf.mxu0 }
 0x207   :  { %v4520_v27 = vpop.f32.mrf.mxu1  ;;  %3992 = vst [vmem:[%s7009_s3] sm:$0xff] %v3983_v47  ;;  %v3984_v63 = vmax.f32 %v3537_v60, 0.0  ;;  %v3539_v11 = vadd.f32 %v3538_v49, %v3488_v41 }
 0x208   :  { %v3634_v10 = vadd.f32 %v4519_v20, %v3586_v57  ;;  %v3540_v1 = vpop.f32.mrf.mxu0 }
 0x209   :  { %v4521_v29 = vpop.f32.mrf.mxu1  ;;  %3993 = vst [vmem:[%s7009_s3 + $0x8] sm:$0xff] %v3984_v63  ;;  %v3986_v55 = vmax.f32 %v3539_v11, 0.0  ;;  %v3541_v21 = vadd.f32 %v3540_v1, %v3490_v48 }
 0x20a   :  { %v4522_v56 = vadd.f32 %v4521_v29, %v4520_v27  ;;  %v3544_v58 = vpop.f32.mrf.mxu0 }
 0x20b   :  { %v4523_v6 = vpop.f32.mrf.mxu1  ;;  %3995 = vst [vmem:[%s7009_s3 + $0x18] sm:$0xff] %v3986_v55  ;;  %v3987_v54 = vmax.f32 %v3541_v21, 0.0  ;;  %v3545_v44 = vadd.f32 %v3544_v58, %v3494_v32 }
 0x20c   :  { %v3637_v59 = vadd.f32 %v4522_v56, %v3589_v36  ;;  %v3546_v45 = vpop.f32.mrf.mxu0 }
 0x20d   :  { %v4524_v28 = vpop.f32.mrf.mxu1  ;;  %3996 = vst [vmem:[%s7009_s3 + $0x20] sm:$0xff] %v3987_v54  ;;  %v3989_v23 = vmax.f32 %v3545_v44, 0.0  ;;  %v3547_v61 = vadd.f32 %v3546_v45, %v3496_v42 }
 0x20e   :  { %v4525_v30 = vadd.f32 %v4524_v28, %v4523_v6  ;;  %v3548_v35 = vpop.f32.mrf.mxu0 }
 0x20f   :  { %v4526_v62 = vpop.f32.mrf.mxu1  ;;  %3998 = vst [vmem:[%s7009_s3 + $0x30] sm:$0xff] %v3989_v23  ;;  %v3990_v50 = vmax.f32 %v3547_v61, 0.0 }
 0x210   :  { %v3642_v0 = vadd.f32 %v4525_v30, %v3594_v22  ;;  %v3549_v52 = vpop.f32.mrf.mxu0 }
 0x211   :  { %v4527_v53 = vpop.f32.mrf.mxu1  ;;  %3999 = vst [vmem:[%s7009_s3 + $0x38] sm:$0xff] %v3990_v50 }
 0x222   :  { %v4545_v3 = vpop.f32.mrf.mxu0 }
 0x223   :  { %v4573_v33 = vpop.f32.mrf.mxu1 }
 0x224   :  { %v4546_v2 = vpop.f32.mrf.mxu0 }
 0x225   :  { %v4574_v13 = vpop.f32.mrf.mxu1  ;;  %v4547_v12 = vadd.f32 %v4546_v2, %v4545_v3 }
 0x226   :  { %v4575_v4 = vadd.f32 %v4574_v13, %v4573_v33  ;;  %v4548_v51 = vpop.f32.mrf.mxu0 }
 0x227   :  { %v4576_v14 = vpop.f32.mrf.mxu1  ;;  %v3682_v17 = vadd.f32 %v4547_v12, %v3634_v10 }
 0x228   :  { %v4549_v7 = vpop.f32.mrf.mxu0 }
 0x229   :  { %v4577_v9 = vpop.f32.mrf.mxu1  ;;  %v3730_v5 = vadd.f32 %v4575_v4, %v3682_v17  ;;  %v4550_v15 = vadd.f32 %v4549_v7, %v4548_v51 }
 0x22a   :  { %v4578_v16 = vadd.f32 %v4577_v9, %v4576_v14  ;;  %v4551_v18 = vpop.f32.mrf.mxu0 }
 0x22b   :  { %v4579_v8 = vpop.f32.mrf.mxu1  ;;  %v3685_v19 = vadd.f32 %v4550_v15, %v3637_v59 }
 0x22c   :  { %v4552_v24 = vpop.f32.mrf.mxu0 }
 0x22d   :  { %v4580_v25 = vpop.f32.mrf.mxu1  ;;  %v3733_v26 = vadd.f32 %v4578_v16, %v3685_v19  ;;  %v4553_v31 = vadd.f32 %v4552_v24, %v4551_v18 }
 0x22e   :  { %v4581_v38 = vadd.f32 %v4580_v25, %v4579_v8  ;;  %v4554_v39 = vpop.f32.mrf.mxu0 }
 0x22f   :  { %v4582_v40 = vpop.f32.mrf.mxu1  ;;  %v3690_v41 = vadd.f32 %v4553_v31, %v3642_v0 }
 0x230   :  { %v4555_v37 = vpop.f32.mrf.mxu0 }
 0x231   :  { %v4583_v34 = vpop.f32.mrf.mxu1  ;;  %v3738_v43 = vadd.f32 %v4581_v38, %v3690_v41 }
 0x242   :  { %v4601_v57 = vpop.f32.mrf.mxu0 }
 0x243   :  { %v4629_v47 = vpop.f32.mrf.mxu1 }
 0x244   :  { %v4602_v60 = vpop.f32.mrf.mxu0 }
 0x245   :  { %v4630_v20 = vpop.f32.mrf.mxu1  ;;  %v4603_v50 = vadd.f32 %v4602_v60, %v4601_v57 }
 0x246   :  { %v4604_v48 = vpop.f32.mrf.mxu0  ;;  %v4631_v53 = vadd.f32 %v4630_v20, %v4629_v47 }
 0x247   :  { %v4632_v49 = vpop.f32.mrf.mxu1  ;;  %v3778_v52 = vadd.f32 %v4603_v50, %v3730_v5 }
 0x248   :  { %v4605_v27 = vpop.f32.mrf.mxu0 }
 0x249   :  { %v4633_v46 = vpop.f32.mrf.mxu1  ;;  %v4606_v3 = vadd.f32 %v4605_v27, %v4604_v48  ;;  %v3826_v4 = vadd.f32 %v4631_v53, %v3778_v52 }
 0x24a   :  { %v4607_v63 = vpop.f32.mrf.mxu0  ;;  %v4634_v9 = vadd.f32 %v4633_v46, %v4632_v49 }
 0x24b   :  { %v4635_v10 = vpop.f32.mrf.mxu1  ;;  %v3781_v51 = vadd.f32 %v4606_v3, %v3733_v26 }
 0x24c   :  { %v4608_v11 = vpop.f32.mrf.mxu0 }
 0x24d   :  { %v4636_v32 = vpop.f32.mrf.mxu1  ;;  %v4609_v0 = vadd.f32 %v4608_v11, %v4607_v63  ;;  %v3829_v24 = vadd.f32 %v4634_v9, %v3781_v51 }
 0x24e   :  { %v4610_v1 = vpop.f32.mrf.mxu0  ;;  %v4637_v2 = vadd.f32 %v4636_v32, %v4635_v10 }
 0x24f   :  { %v4638_v29 = vpop.f32.mrf.mxu1  ;;  %v3786_v33 = vadd.f32 %v4609_v0, %v3738_v43 }
 0x250   :  { %v4611_v36 = vpop.f32.mrf.mxu0 }
 0x251   :  { %v4639_v55 = vpop.f32.mrf.mxu1  ;;  %v3834_v14 = vadd.f32 %v4637_v2, %v3786_v33 }
 0x262   :  { %v4657_v21 = vpop.f32.mrf.mxu0 }
 0x263   :  { %v4685_v56 = vpop.f32.mrf.mxu1 }
 0x264   :  { %v4658_v58 = vpop.f32.mrf.mxu0 }
 0x265   :  { %v4686_v6 = vpop.f32.mrf.mxu1  ;;  %v4659_v13 = vadd.f32 %v4658_v58, %v4657_v21 }
 0x266   :  { %v4660_v42 = vpop.f32.mrf.mxu0  ;;  %v4687_v7 = vadd.f32 %v4686_v6, %v4685_v56 }
 0x267   :  { %v4688_v54 = vpop.f32.mrf.mxu1  ;;  %v3874_v17 = vadd.f32 %v4659_v13, %v3826_v4 }
 0x268   :  { %v4661_v59 = vpop.f32.mrf.mxu0 }
 0x269   :  { %v4689_v44 = vpop.f32.mrf.mxu1  ;;  %v4662_v15 = vadd.f32 %v4661_v59, %v4660_v42  ;;  %v3922_v25 = vadd.f32 %v4687_v7, %v3874_v17 }
 0x26a   :  { %v4663_v45 = vpop.f32.mrf.mxu0  ;;  %v4690_v26 = vadd.f32 %v4689_v44, %v4688_v54 }
 0x26b   :  { %v4691_v28 = vpop.f32.mrf.mxu1  ;;  %v3877_v38 = vadd.f32 %v4662_v15, %v3829_v24 }
 0x26c   :  { %v4664_v22 = vpop.f32.mrf.mxu0 }
 0x26d   :  { %v4692_v23 = vpop.f32.mrf.mxu1  ;;  %v4665_v12 = vadd.f32 %v4664_v22, %v4663_v45  ;;  %v3925_v20 = vadd.f32 %v4690_v26, %v3877_v38 }
 0x26e   :  { %v4666_v61 = vpop.f32.mrf.mxu0  ;;  %v4693_v18 = vadd.f32 %v4692_v23, %v4691_v28 }
 0x26f   :  { %v4694_v30 = vpop.f32.mrf.mxu1  ;;  %v3882_v16 = vadd.f32 %v4665_v12, %v3834_v14 }
 0x270   :  { %v4667_v35 = vpop.f32.mrf.mxu0 }
 0x271   :  { %v4695_v62 = vpop.f32.mrf.mxu1  ;;  %v3930_v39 = vadd.f32 %v4693_v18, %v3882_v16 }
 0x282   :  { %v4713_v8 = vpop.f32.mrf.mxu0 }
 0x283   :  { %v4719_v19 = vpop.f32.mrf.mxu1 }
 0x284   :  { %v4714_v5 = vpop.f32.mrf.mxu0 }
 0x285   :  { %v4720_v31 = vpop.f32.mrf.mxu1  ;;  %v4715_v40 = vadd.f32 %v4714_v5, %v4713_v8 }
 0x286   :  { %v4721_v41 = vadd.f32 %v4720_v31, %v4719_v19  ;;  %v4716_v37 = vpop.f32.mrf.mxu0 }
 0x287   :  { %v4722_v34 = vpop.f32.mrf.mxu1  ;;  %v3970_v43 = vadd.f32 %v4715_v40, %v3922_v25 }
 0x288   :  { %v3978_v57 = vadd.f32 %v4721_v41, %v3930_v39  ;;  %v4717_v47 = vpop.f32.mrf.mxu0 }
 0x289   :  { %v4723_v60 = vpop.f32.mrf.mxu1  ;;  %v3985_v48 = vmax.f32 %v3970_v43, 0.0  ;;  %v4718_v27 = vadd.f32 %v4717_v47, %v4716_v37 }
 0x28a   :  { %v3991_v49 = vmax.f32 %v3978_v57, 0.0 }
 0x28b   :  { %3994 = vst [vmem:[%s7009_s3 + $0x10] sm:$0xff] %v3985_v48  ;;  %v3973_v46 = vadd.f32 %v4718_v27, %v3925_v20 }
 0x28c   :  { %4000 = vst [vmem:[%s7009_s3 + $0x40] sm:$0xff] %v3991_v49 }
 0x28d   :  { %v3988_v63 = vmax.f32 %v3973_v46, 0.0 }
 0x28f   :  { %3997 = vst [vmem:[%s7009_s3 + $0x28] sm:$0xff] %v3988_v63 }

// kernel: featurenet_forward.13
= control target key start
LH: loop header
LB: loop body
LE: loop exit
PB: predicated region body
PF: predicated region fallthrough
CT: control target
= control target key end

     0   :  { %s6349_s1 = inlined_call_operand.vmem [shape: bf16[3456,256], index: 1, kind: input, shape index: {}]   ;;  %s6350_s0 = inlined_call_operand.vmem [shape: bf16[24,3456], index: 0, kind: input, shape index: {}]   ;;  %s6351_s2 = inlined_call_operand.vmem [shape: f32[1,256], index: 2, kind: input, shape index: {}]   ;;  %s6352_s3 = inlined_call_operand.vmem [shape: f32[24,256], index: 3, kind: output, shape index: {}]  }
   0x1   :  { %v4109_v0 = vld [vmem:[%s6349_s1 + $0x74] ss:$8 sps:$4 sm:$0xff]   ;;  %v4111_v1 = vld [vmem:[%s6349_s1 + $0x70] ss:$8 sps:$4 sm:$0xff]   ;;  %v4115_v4 = vld [vmem:[%s6349_s1 + $0x64] ss:$8 sps:$4 sm:$0xff]  }
   0x2   :  { %2892 = vmatprep.subr.bf16.mxu0 %v4109_v0  ;;  %v4112_v2 = vld [vmem:[%s6349_s1 + $0x174] ss:$8 sps:$4 sm:$0xff]   ;;  %v4114_v3 = vld [vmem:[%s6349_s1 + $0x170] ss:$8 sps:$4 sm:$0xff]   ;;  %v4117_v5 = vld [vmem:[%s6349_s1 + $0x60] ss:$8 sps:$4 sm:$0xff]  }
   0x3   :  { %2893 = vmatpush1.bf16.msra.mxu0 %v4111_v1  ;;  %2943 = vmatprep.subr.bf16.mxu1 %v4112_v2  ;;  %v4118_v6 = vld [vmem:[%s6349_s1 + $0x164] ss:$8 sps:$4 sm:$0xff]   ;;  %v4120_v7 = vld [vmem:[%s6349_s1 + $0x160] ss:$8 sps:$4 sm:$0xff]   ;;  %v4121_v8 = vld [vmem:[%s6349_s1 + $0x54] ss:$8 sps:$4 sm:$0xff]  }
   0x4   :  { %2944 = vmatpush1.bf16.msra.mxu1 %v4114_v3  ;;  %2894 = vmatprep.subr.bf16.mxu0 %v4115_v4  ;;  %v4123_v9 = vld [vmem:[%s6349_s1 + $0x50] ss:$8 sps:$4 sm:$0xff]   ;;  %v4124_v10 = vld [vmem:[%s6349_s1 + $0x154] ss:$8 sps:$4 sm:$0xff]   ;;  %v4127_v11 = vld [vmem:[%s6349_s1 + $0x44] ss:$8 sps:$4 sm:$0xff]  }
   0x5   :  { %2945 = vmatprep.subr.bf16.mxu1 %v4118_v6  ;;  %v4126_v12 = vld [vmem:[%s6349_s1 + $0x150] ss:$8 sps:$4 sm:$0xff]   ;;  %v4130_v13 = vld [vmem:[%s6349_s1 + $0x144] ss:$8 sps:$4 sm:$0xff]   ;;  %v4129_v14 = vld [vmem:[%s6349_s1 + $0x40] ss:$8 sps:$4 sm:$0xff]  }
   0x6   :  { %v4133_v15 = vld [vmem:[%s6349_s1 + $0x34] ss:$8 sps:$4 sm:$0xff]   ;;  %v4132_v16 = vld [vmem:[%s6349_s1 + $0x140] ss:$8 sps:$4 sm:$0xff]   ;;  %v4135_v18 = vld [vmem:[%s6349_s1 + $0x30] ss:$8 sps:$4 sm:$0xff]  }
   0x7   :  { %2895 = vmatpush1.bf16.msra.mxu0 %v4117_v5  ;;  %v4136_v17 = vld [vmem:[%s6349_s1 + $0x134] ss:$8 sps:$4 sm:$0xff]   ;;  %v4139_v19 = vld [vmem:[%s6349_s1 + $0x24] ss:$8 sps:$4 sm:$0xff]   ;;  %v4138_v20 = vld [vmem:[%s6349_s1 + $0x130] ss:$8 sps:$4 sm:$0xff]  }
   0x8   :  { %2896 = vmatprep.subr.bf16.mxu0 %v4121_v8  ;;  %2946 = vmatpush1.bf16.msra.mxu1 %v4120_v7  ;;  %v4142_v21 = vld [vmem:[%s6349_s1 + $0x124] ss:$8 sps:$4 sm:$0xff]   ;;  %v4141_v22 = vld [vmem:[%s6349_s1 + $0x20] ss:$8 sps:$4 sm:$0xff]   ;;  %v4145_v23 = vld [vmem:[%s6349_s1 + $0x14] ss:$8 sps:$4 sm:$0xff]  }
   0x9   :  { %2947 = vmatprep.subr.bf16.mxu1 %v4124_v10  ;;  %v4144_v24 = vld [vmem:[%s6349_s1 + $0x120] ss:$8 sps:$4 sm:$0xff]   ;;  %v4148_v25 = vld [vmem:[%s6349_s1 + $0x114] ss:$8 sps:$4 sm:$0xff]   ;;  %v4147_v26 = vld [vmem:[%s6349_s1 + $0x10] ss:$8 sps:$4 sm:$0xff]  }
   0xa   :  { %v4151_v27 = vld [vmem:[%s6349_s1 + $0x4] ss:$8 sps:$4 sm:$0xff]   ;;  %v4150_v28 = vld [vmem:[%s6349_s1 + $0x110] ss:$8 sps:$4 sm:$0xff]   ;;  %v4153_v30 = vld [vmem:[%s6349_s1] ss:$8 sps:$4 sm:$0xff]  }
   0xb   :  { %2897 = vmatpush1.bf16.msra.mxu0 %v4123_v9  ;;  %v4154_v29 = vld [vmem:[%s6349_s1 + $0x104] ss:$8 sps:$4 sm:$0xff]   ;;  %v4157_v31 = vld [vmem:[%s6349_s1 + $0xf4] ss:$8 sps:$4 sm:$0xff]   ;;  %v4156_v32 = vld [vmem:[%s6349_s1 + $0x100] ss:$8 sps:$4 sm:$0xff]  }
   0xc   :  { %2898 = vmatprep.subr.bf16.mxu0 %v4127_v11  ;;  %2948 = vmatpush1.bf16.msra.mxu1 %v4126_v12  ;;  %v4160_v33 = vld [vmem:[%s6349_s1 + $0x1f4] ss:$8 sps:$4 sm:$0xff]   ;;  %v4159_v34 = vld [vmem:[%s6349_s1 + $0xf0] ss:$8 sps:$4 sm:$0xff]   ;;  %v4163_v35 = vld [vmem:[%s6349_s1 + $0xe4] ss:$8 sps:$4 sm:$0xff]  }
   0xd   :  { %2949 = vmatprep.subr.bf16.mxu1 %v4130_v13  ;;  %v4162_v36 = vld [vmem:[%s6349_s1 + $0x1f0] ss:$8 sps:$4 sm:$0xff]   ;;  %v4166_v37 = vld [vmem:[%s6349_s1 + $0x1e4] ss:$8 sps:$4 sm:$0xff]   ;;  %v4165_v38 = vld [vmem:[%s6349_s1 + $0xe0] ss:$8 sps:$4 sm:$0xff]  }
   0xe   :  { %v4169_v39 = vld [vmem:[%s6349_s1 + $0xd4] ss:$8 sps:$4 sm:$0xff]   ;;  %v4168_v40 = vld [vmem:[%s6349_s1 + $0x1e0] ss:$8 sps:$4 sm:$0xff]   ;;  %v4171_v42 = vld [vmem:[%s6349_s1 + $0xd0] ss:$8 sps:$4 sm:$0xff]  }
   0xf   :  { %2899 = vmatpush1.bf16.msra.mxu0 %v4129_v14  ;;  %v4172_v41 = vld [vmem:[%s6349_s1 + $0x1d4] ss:$8 sps:$4 sm:$0xff]   ;;  %v4175_v43 = vld [vmem:[%s6349_s1 + $0xc4] ss:$8 sps:$4 sm:$0xff]   ;;  %v4174_v44 = vld [vmem:[%s6349_s1 + $0x1d0] ss:$8 sps:$4 sm:$0xff]  }
  0x10   :  { %2900 = vmatprep.subr.bf16.mxu0 %v4133_v15  ;;  %2950 = vmatpush1.bf16.msra.mxu1 %v4132_v16  ;;  %v4178_v45 = vld [vmem:[%s6349_s1 + $0x1c4] ss:$8 sps:$4 sm:$0xff]   ;;  %v4177_v46 = vld [vmem:[%s6349_s1 + $0xc0] ss:$8 sps:$4 sm:$0xff]   ;;  %v4181_v48 = vld [vmem:[%s6349_s1 + $0xb4] ss:$8 sps:$4 sm:$0xff]  }
  0x11   :  { %2951 = vmatprep.subr.bf16.mxu1 %v4136_v17  ;;  %v4206_v47 = vld [vmem:[%s6350_s0 + $0x4] ss:$108 sps:$4 sm:$0xff]   ;;  %v4180_v49 = vld [vmem:[%s6349_s1 + $0x1c0] ss:$8 sps:$4 sm:$0xff]   ;;  %v4184_v50 = vld [vmem:[%s6349_s1 + $0x1b4] ss:$8 sps:$4 sm:$0xff]  }
  0x12   :  { %2924 = vmatprep.mubr.bf16.mxu0 %v4206_v47  ;;  %v4213_v51 = vld [vmem:[%s6350_s0 + $0xc] ss:$108 sps:$4 sm:$0xff]   ;;  %v4189_v56 = vld [vmem:[%s6349_s1 + $0xa0] ss:$8 sps:$4 sm:$0xff]   ;;  %v4193_v57 = vld [vmem:[%s6349_s1 + $0x94] ss:$8 sps:$4 sm:$0xff]  }
  0x13   :  { %2901 = vmatpush1.bf16.msra.mxu0 %v4135_v18  ;;  %v4183_v52 = vld [vmem:[%s6349_s1 + $0xb0] ss:$8 sps:$4 sm:$0xff]   ;;  %v4187_v53 = vld [vmem:[%s6349_s1 + $0xa4] ss:$8 sps:$4 sm:$0xff]   ;;  %2975 = vmatprep.mubr.bf16.mxu1 %v4213_v51  ;;  %v4192_v58 = vld [vmem:[%s6349_s1 + $0x1a0] ss:$8 sps:$4 sm:$0xff]  }
  0x14   :  { %2902 = vmatprep.subr.bf16.mxu0 %v4139_v19  ;;  %2952 = vmatpush1.bf16.msra.mxu1 %v4138_v20  ;;  %v4186_v54 = vld [vmem:[%s6349_s1 + $0x1b0] ss:$8 sps:$4 sm:$0xff]   ;;  %v4190_v55 = vld [vmem:[%s6349_s1 + $0x1a4] ss:$8 sps:$4 sm:$0xff]   ;;  %v4196_v59 = vld [vmem:[%s6349_s1 + $0x194] ss:$8 sps:$4 sm:$0xff]  }
  0x15   :  { %2953 = vmatprep.subr.bf16.mxu1 %v4142_v21  ;;  %v4195_v60 = vld [vmem:[%s6349_s1 + $0x90] ss:$8 sps:$4 sm:$0xff]   ;;  %v4199_v61 = vld [vmem:[%s6349_s1 + $0x84] ss:$8 sps:$4 sm:$0xff]   ;;  %v4201_v0 = vld [vmem:[%s6349_s1 + $0x80] ss:$8 sps:$4 sm:$0xff]  }
  0x16   :  { %v4198_v62 = vld [vmem:[%s6349_s1 + $0x190] ss:$8 sps:$4 sm:$0xff]   ;;  %v4202_v63 = vld [vmem:[%s6349_s1 + $0x184] ss:$8 sps:$4 sm:$0xff]   ;;  %v4210_v1 = vld [vmem:[%s6349_s1 + $0x274] ss:$8 sps:$4 sm:$0xff]  }
  0x17   :  { %2903 = vmatpush1.bf16.msra.mxu0 %v4141_v22  ;;  %v4207_v2 = vld [vmem:[%s6349_s1 + $0x180] ss:$8 sps:$4 sm:$0xff]   ;;  %v4216_v4 = vld [vmem:[%s6349_s1 + $0x374] ss:$8 sps:$4 sm:$0xff]   ;;  %v4208_v5 = vld [vmem:[%s6349_s1 + $0x270] ss:$8 sps:$4 sm:$0xff]  }
  0x18   :  { %2904 = vmatprep.subr.bf16.mxu0 %v4145_v23  ;;  %2954 = vmatpush1.bf16.msra.mxu1 %v4144_v24  ;;  %v4204_v3 = vld [vmem:[%s6350_s0] ss:$108 sps:$4 sm:$0xff]   ;;  %v4211_v6 = vld [vmem:[%s6350_s0 + $0x8] ss:$108 sps:$4 sm:$0xff]   ;;  %v4214_v8 = vld [vmem:[%s6349_s1 + $0x370] ss:$8 sps:$4 sm:$0xff]  }
  0x19   :  { %2955 = vmatprep.subr.bf16.mxu1 %v4148_v25  ;;  %v4219_v7 = vld [vmem:[%s6349_s1 + $0x264] ss:$8 sps:$4 sm:$0xff]   ;;  %v4217_v10 = vld [vmem:[%s6349_s1 + $0x260] ss:$8 sps:$4 sm:$0xff]   ;;  %v4225_v11 = vld [vmem:[%s6349_s1 + $0x254] ss:$8 sps:$4 sm:$0xff]  }
  0x1a   :  { %v4222_v9 = vld [vmem:[%s6349_s1 + $0x364] ss:$8 sps:$4 sm:$0xff]   ;;  %v4220_v12 = vld [vmem:[%s6349_s1 + $0x360] ss:$8 sps:$4 sm:$0xff]   ;;  %v4228_v13 = vld [vmem:[%s6349_s1 + $0x354] ss:$8 sps:$4 sm:$0xff]  }
  0x1b   :  { %2905 = vmatpush1.bf16.msra.mxu0 %v4147_v26  ;;  %v4223_v14 = vld [vmem:[%s6349_s1 + $0x250] ss:$8 sps:$4 sm:$0xff]   ;;  %v4231_v15 = vld [vmem:[%s6349_s1 + $0x244] ss:$8 sps:$4 sm:$0xff]   ;;  %v4229_v18 = vld [vmem:[%s6349_s1 + $0x240] ss:$8 sps:$4 sm:$0xff]  }
  0x1c   :  { %2906 = vmatprep.subr.bf16.mxu0 %v4151_v27  ;;  %2956 = vmatpush1.bf16.msra.mxu1 %v4150_v28  ;;  %v4226_v16 = vld [vmem:[%s6349_s1 + $0x350] ss:$8 sps:$4 sm:$0xff]   ;;  %v4234_v17 = vld [vmem:[%s6349_s1 + $0x344] ss:$8 sps:$4 sm:$0xff]   ;;  %v4237_v19 = vld [vmem:[%s6349_s1 + $0x234] ss:$8 sps:$4 sm:$0xff]  }
  0x1d   :  { %2957 = vmatprep.subr.bf16.mxu1 %v4154_v29  ;;  %v4232_v20 = vld [vmem:[%s6349_s1 + $0x340] ss:$8 sps:$4 sm:$0xff]   ;;  %v4240_v21 = vld [vmem:[%s6349_s1 + $0x334] ss:$8 sps:$4 sm:$0xff]   ;;  %v4235_v23 = vld [vmem:[%s6349_s1 + $0x230] ss:$8 sps:$4 sm:$0xff]  }
  0x1e   :  { %v43_v22 = vld [vmem:[%s6350_s0 + $0xd8] sm:$0xff]  ;;  %v4243_v26 = vld [vmem:[%s6349_s1 + $0x224] ss:$8 sps:$4 sm:$0xff]   ;;  %v4241_v28 = vld [vmem:[%s6349_s1 + $0x220] ss:$8 sps:$4 sm:$0xff]  }
  0x1f   :  { %2907 = vmatpush1.bf16.msra.mxu0 %v4153_v30  ;;  %v3650_v24 = vcombine.high %v43_v22, %v43_v22  ;;  %v3649_v25 = vcombine.low %v43_v22, %v43_v22  ;;  %v4238_v27 = vld [vmem:[%s6349_s1 + $0x330] ss:$8 sps:$4 sm:$0xff]   ;;  %v4246_v29 = vld [vmem:[%s6349_s1 + $0x324] ss:$8 sps:$4 sm:$0xff]   ;;  %v4273_v51 = vld [vmem:[%s6349_s1 + $0x2d4] ss:$8 sps:$4 sm:$0xff]  }
  0x20   :  { %2908 = vmatprep.subr.bf16.mxu0 %v4157_v31  ;;  %2958 = vmatpush1.bf16.msra.mxu1 %v4156_v32  ;;  %v44_v30 = vld [vmem:[%s6350_s0 + $0xe0] sm:$0xff]  ;;  %v4249_v31 = vld [vmem:[%s6349_s1 + $0x214] ss:$8 sps:$4 sm:$0xff]  }
  0x21   :  { %2959 = vmatprep.subr.bf16.mxu1 %v4160_v33  ;;  %v3652_v32 = vcombine.high %v44_v30, %v44_v30  ;;  %v3651_v33 = vcombine.low %v44_v30, %v44_v30  ;;  %v4267_v47 = vld [vmem:[%s6349_s1 + $0x2e4] ss:$8 sps:$4 sm:$0xff]  }
  0x22   :  { %v4419_v30 = vld [vmem:[%s6350_s0 + $0x24] ss:$108 sps:$4 sm:$0xff]  }
  0x23   :  { %2909 = vmatpush2.bf16.msra.mxu0 %v4159_v34  ;;  %v4244_v34 = vld [vmem:[%s6349_s1 + $0x320] ss:$8 sps:$4 sm:$0xff]  }
  0x24   :  { %2910 = vmatprep.subr.bf16.mxu0 %v4163_v35  ;;  %2960 = vmatpush2.bf16.msra.mxu1 %v4162_v36  ;;  %v4252_v35 = vld [vmem:[%s6349_s1 + $0x314] ss:$8 sps:$4 sm:$0xff]   ;;  %v4247_v36 = vld [vmem:[%s6349_s1 + $0x210] ss:$8 sps:$4 sm:$0xff]  }
  0x25   :  { %2961 = vmatprep.subr.bf16.mxu1 %v4166_v37  ;;  %v4255_v37 = vld [vmem:[%s6349_s1 + $0x204] ss:$8 sps:$4 sm:$0xff]  }
  0x27   :  { %2911 = vmatpush2.bf16.msra.mxu0 %v4165_v38  ;;  %v4250_v38 = vld [vmem:[%s6349_s1 + $0x310] ss:$8 sps:$4 sm:$0xff]  }
  0x28   :  { %2912 = vmatprep.subr.bf16.mxu0 %v4169_v39  ;;  %2962 = vmatpush2.bf16.msra.mxu1 %v4168_v40  ;;  %v4313_v39 = vld [vmem:[%s6350_s0 + $0x14] ss:$108 sps:$4 sm:$0xff]   ;;  %v4258_v40 = vld [vmem:[%s6349_s1 + $0x304] ss:$8 sps:$4 sm:$0xff]  }
  0x29   :  { %2963 = vmatprep.subr.bf16.mxu1 %v4172_v41  ;;  %v4253_v41 = vld [vmem:[%s6349_s1 + $0x200] ss:$8 sps:$4 sm:$0xff]  }
  0x2b   :  { %2913 = vmatpush2.bf16.msra.mxu0 %v4171_v42  ;;  %v4261_v42 = vld [vmem:[%s6349_s1 + $0x2f4] ss:$8 sps:$4 sm:$0xff]  }
  0x2c   :  { %2914 = vmatprep.subr.bf16.mxu0 %v4175_v43  ;;  %2964 = vmatpush2.bf16.msra.mxu1 %v4174_v44  ;;  %v4319_v43 = vld [vmem:[%s6350_s0 + $0x1c] ss:$108 sps:$4 sm:$0xff]  }
  0x2d   :  { %2965 = vmatprep.subr.bf16.mxu1 %v4178_v45  ;;  %v4256_v44 = vld [vmem:[%s6349_s1 + $0x300] ss:$8 sps:$4 sm:$0xff]   ;;  %v4264_v45 = vld [vmem:[%s6349_s1 + $0x3f4] ss:$8 sps:$4 sm:$0xff]  }
  0x2f   :  { %2915 = vmatpush2.bf16.msra.mxu0 %v4177_v46  ;;  %v4259_v46 = vld [vmem:[%s6349_s1 + $0x2f0] ss:$8 sps:$4 sm:$0xff]  }
  0x30   :  { %2916 = vmatprep.subr.bf16.mxu0 %v4181_v48  ;;  %2966 = vmatpush2.bf16.msra.mxu1 %v4180_v49  ;;  %v4262_v48 = vld [vmem:[%s6349_s1 + $0x3f0] ss:$8 sps:$4 sm:$0xff]   ;;  %v4270_v49 = vld [vmem:[%s6349_s1 + $0x3e4] ss:$8 sps:$4 sm:$0xff]  }
  0x31   :  { %2967 = vmatprep.subr.bf16.mxu1 %v4184_v50  ;;  %v4265_v50 = vld [vmem:[%s6349_s1 + $0x2e0] ss:$8 sps:$4 sm:$0xff]  }
  0x33   :  { %2917 = vmatpush2.bf16.msra.mxu0 %v4183_v52  ;;  %v4268_v52 = vld [vmem:[%s6349_s1 + $0x3e0] ss:$8 sps:$4 sm:$0xff]  }
  0x34   :  { %2918 = vmatprep.subr.bf16.mxu0 %v4187_v53  ;;  %2968 = vmatpush2.bf16.msra.mxu1 %v4186_v54  ;;  %v4276_v53 = vld [vmem:[%s6349_s1 + $0x3d4] ss:$8 sps:$4 sm:$0xff]   ;;  %v4271_v54 = vld [vmem:[%s6349_s1 + $0x2d0] ss:$8 sps:$4 sm:$0xff]  }
  0x35   :  { %2969 = vmatprep.subr.bf16.mxu1 %v4190_v55  ;;  %v4279_v55 = vld [vmem:[%s6349_s1 + $0x2c4] ss:$8 sps:$4 sm:$0xff]  }
  0x37   :  { %2919 = vmatpush2.bf16.msra.mxu0 %v4189_v56  ;;  %v4274_v56 = vld [vmem:[%s6349_s1 + $0x3d0] ss:$8 sps:$4 sm:$0xff]  }
  0x38   :  { %2920 = vmatprep.subr.bf16.mxu0 %v4193_v57  ;;  %2970 = vmatpush2.bf16.msra.mxu1 %v4192_v58  ;;  %v4282_v57 = vld [vmem:[%s6349_s1 + $0x3c4] ss:$8 sps:$4 sm:$0xff]   ;;  %v4277_v58 = vld [vmem:[%s6349_s1 + $0x2c0] ss:$8 sps:$4 sm:$0xff]  }
  0x39   :  { %2971 = vmatprep.subr.bf16.mxu1 %v4196_v59  ;;  %v4285_v59 = vld [vmem:[%s6349_s1 + $0x2b4] ss:$8 sps:$4 sm:$0xff]  }
  0x3b   :  { %2921 = vmatpush2.bf16.msra.mxu0 %v4195_v60  ;;  %v4280_v60 = vld [vmem:[%s6349_s1 + $0x3c0] ss:$8 sps:$4 sm:$0xff]  }
  0x3c   :  { %2922 = vmatprep.subr.bf16.mxu0 %v4199_v61  ;;  %2972 = vmatpush2.bf16.msra.mxu1 %v4198_v62  ;;  %v4289_v61 = vld [vmem:[%s6349_s1 + $0x3b4] ss:$8 sps:$4 sm:$0xff]   ;;  %v4283_v62 = vld [vmem:[%s6349_s1 + $0x2b0] ss:$8 sps:$4 sm:$0xff]  }
  0x3d   :  { %2973 = vmatprep.subr.bf16.mxu1 %v4202_v63  ;;  %v4293_v63 = vld [vmem:[%s6349_s1 + $0x2a4] ss:$8 sps:$4 sm:$0xff]  }
  0x3f   :  { %2923 = vmatpush2.bf16.msra.mxu0 %v4201_v0  ;;  %v4287_v0 = vld [vmem:[%s6349_s1 + $0x3b0] ss:$8 sps:$4 sm:$0xff]  }
  0x40   :  { %2994 = vmatprep.subr.bf16.mxu0 %v4210_v1  ;;  %2974 = vmatpush2.bf16.msra.mxu1 %v4207_v2  ;;  %v4296_v1 = vld [vmem:[%s6349_s1 + $0x3a4] ss:$8 sps:$4 sm:$0xff]   ;;  %v4291_v2 = vld [vmem:[%s6349_s1 + $0x2a0] ss:$8 sps:$4 sm:$0xff]  }
  0x41   :  { %3045 = vmatprep.subr.bf16.mxu1 %v4216_v4  ;;  %v4294_v4 = vld [vmem:[%s6349_s1 + $0x3a0] ss:$8 sps:$4 sm:$0xff]  }
  0x42   :  { %2925 = vmatmul.mubr.bf16.vlgmr.msra.gmra.mxu0 %v4204_v3  ;;  %v4300_v3 = vld [vmem:[%s6349_s1 + $0x294] ss:$8 sps:$4 sm:$0xff]  }
  0x43   :  { %2995 = vmatpush1.bf16.msra.mxu0 %v4208_v5  ;;  %2976 = vmatmul.mubr.bf16.vlgmr.msra.gmra.mxu1 %v4211_v6  ;;  %v4304_v5 = vld [vmem:[%s6349_s1 + $0x394] ss:$8 sps:$4 sm:$0xff]   ;;  %v4298_v6 = vld [vmem:[%s6349_s1 + $0x290] ss:$8 sps:$4 sm:$0xff]  }
  0x44   :  { %2996 = vmatprep.subr.bf16.mxu0 %v4219_v7  ;;  %3046 = vmatpush1.bf16.msra.mxu1 %v4214_v8  ;;  %v4307_v7 = vld [vmem:[%s6349_s1 + $0x284] ss:$8 sps:$4 sm:$0xff]   ;;  %v4302_v8 = vld [vmem:[%s6349_s1 + $0x390] ss:$8 sps:$4 sm:$0xff]  }
  0x45   :  { %3047 = vmatprep.subr.bf16.mxu1 %v4222_v9  ;;  %2934 = vmatprep.mubr.bf16.mxu0 %v3650_v24  ;;  %v4305_v9 = vld [vmem:[%s6349_s1 + $0x280] ss:$8 sps:$4 sm:$0xff]  }
  0x46   :  { %2985 = vmatprep.mubr.bf16.mxu1 %v3652_v32  ;;  %v4323_v24 = vld [vmem:[%s6349_s1 + $0x460] ss:$8 sps:$4 sm:$0xff]   ;;  %v4341_v32 = vld [vmem:[%s6349_s1 + $0x444] ss:$8 sps:$4 sm:$0xff]  }
  0x47   :  { %2997 = vmatpush1.bf16.msra.mxu0 %v4217_v10  ;;  %v4310_v10 = vld [vmem:[%s6349_s1 + $0x384] ss:$8 sps:$4 sm:$0xff]  }
  0x48   :  { %2998 = vmatprep.subr.bf16.mxu0 %v4225_v11  ;;  %3048 = vmatpush1.bf16.msra.mxu1 %v4220_v12  ;;  %v4308_v11 = vld [vmem:[%s6349_s1 + $0x380] ss:$8 sps:$4 sm:$0xff]   ;;  %v4316_v12 = vld [vmem:[%s6349_s1 + $0x474] ss:$8 sps:$4 sm:$0xff]  }
  0x49   :  { %3049 = vmatprep.subr.bf16.mxu1 %v4228_v13  ;;  %v45_v13 = vld [vmem:[%s6350_s0 + $0xe8] sm:$0xff] }
  0x4a   :  { %2935 = vmatmul.mubr.bf16.gmra.mxu0 %v3649_v25  ;;  %v4333_v25 = vld [vmem:[%s6349_s1 + $0x454] ss:$8 sps:$4 sm:$0xff]  }
  0x4b   :  { %2999 = vmatpush1.bf16.msra.mxu0 %v4223_v14  ;;  %2986 = vmatmul.mubr.bf16.gmra.mxu1 %v3651_v33  ;;  %v4311_v14 = vld [vmem:[%s6350_s0 + $0x10] ss:$108 sps:$4 sm:$0xff]  }
  0x4c   :  { %3000 = vmatprep.subr.bf16.mxu0 %v4231_v15  ;;  %3050 = vmatpush1.bf16.msra.mxu1 %v4226_v16  ;;  %v4322_v15 = vld [vmem:[%s6349_s1 + $0x574] ss:$8 sps:$4 sm:$0xff]   ;;  %v4336_v33 = vld [vmem:[%s6349_s1 + $0x550] ss:$8 sps:$4 sm:$0xff]  }
  0x4d   :  { %3051 = vmatprep.subr.bf16.mxu1 %v4234_v17  ;;  %3026 = vmatprep.mubr.bf16.mxu0 %v4313_v39  ;;  %v46_v16 = vld [vmem:[%s6350_s0 + $0xf0] sm:$0xff] }
  0x4e   :  { %3077 = vmatprep.mubr.bf16.mxu1 %v4319_v43  ;;  %v4314_v17 = vld [vmem:[%s6349_s1 + $0x470] ss:$8 sps:$4 sm:$0xff]   ;;  %v3656_v22 = vcombine.high %v46_v16, %v46_v16  ;;  %v4350_v39 = vld [vmem:[%s6349_s1 + $0x534] ss:$8 sps:$4 sm:$0xff]   ;;  %v4356_v43 = vld [vmem:[%s6349_s1 + $0x524] ss:$8 sps:$4 sm:$0xff]  }
  0x4f   :  { %3001 = vmatpush1.bf16.msra.mxu0 %v4229_v18  ;;  %v4317_v18 = vld [vmem:[%s6350_s0 + $0x18] ss:$108 sps:$4 sm:$0xff]  }
  0x50   :  { %3002 = vmatprep.subr.bf16.mxu0 %v4237_v19  ;;  %3052 = vmatpush1.bf16.msra.mxu1 %v4232_v20  ;;  %v3654_v19 = vcombine.high %v45_v13, %v45_v13  ;;  %v4325_v20 = vld [vmem:[%s6349_s1 + $0x464] ss:$8 sps:$4 sm:$0xff]  }
  0x51   :  { %3053 = vmatprep.subr.bf16.mxu1 %v4240_v21  ;;  %v4320_v21 = vld [vmem:[%s6349_s1 + $0x570] ss:$8 sps:$4 sm:$0xff]  }
  0x53   :  { %3003 = vmatpush1.bf16.msra.mxu0 %v4235_v23  ;;  %v4328_v23 = vld [vmem:[%s6349_s1 + $0x564] ss:$8 sps:$4 sm:$0xff]  }
  0x54   :  { %3004 = vmatprep.subr.bf16.mxu0 %v4243_v26  ;;  %3054 = vmatpush1.bf16.msra.mxu1 %v4238_v27  ;;  %v4326_v26 = vld [vmem:[%s6349_s1 + $0x560] ss:$8 sps:$4 sm:$0xff]   ;;  %v3653_v27 = vcombine.low %v45_v13, %v45_v13  ;;  %v4407_v13 = vld [vmem:[%s6349_s1 + $0x494] ss:$8 sps:$4 sm:$0xff]  }
  0x55   :  { %3055 = vmatprep.subr.bf16.mxu1 %v4246_v29  ;;  %v4331_v29 = vld [vmem:[%s6349_s1 + $0x450] ss:$8 sps:$4 sm:$0xff]  }
  0x57   :  { %3005 = vmatpush1.bf16.msra.mxu0 %v4241_v28  ;;  %v4338_v28 = vld [vmem:[%s6349_s1 + $0x554] ss:$8 sps:$4 sm:$0xff]  }
  0x58   :  { %3006 = vmatprep.subr.bf16.mxu0 %v4249_v31  ;;  %3056 = vmatpush1.bf16.msra.mxu1 %v4244_v34  ;;  %v3655_v31 = vcombine.low %v46_v16, %v46_v16  ;;  %v4344_v34 = vld [vmem:[%s6349_s1 + $0x544] ss:$8 sps:$4 sm:$0xff]   ;;  %v4405_v16 = vld [vmem:[%s6349_s1 + $0x490] ss:$8 sps:$4 sm:$0xff]  }
  0x59   :  { %3057 = vmatprep.subr.bf16.mxu1 %v4252_v35  ;;  %v4425_v35 = vld [vmem:[%s6350_s0 + $0x2c] ss:$108 sps:$4 sm:$0xff]  }
  0x5b   :  { %3007 = vmatpush1.bf16.msra.mxu0 %v4247_v36  ;;  %v4339_v36 = vld [vmem:[%s6349_s1 + $0x440] ss:$8 sps:$4 sm:$0xff]  }
  0x5c   :  { %3008 = vmatprep.subr.bf16.mxu0 %v4255_v37  ;;  %3058 = vmatpush1.bf16.msra.mxu1 %v4250_v38  ;;  %v4347_v37 = vld [vmem:[%s6349_s1 + $0x434] ss:$8 sps:$4 sm:$0xff]   ;;  %v4342_v38 = vld [vmem:[%s6349_s1 + $0x540] ss:$8 sps:$4 sm:$0xff]  }
  0x5d   :  { %3059 = vmatprep.subr.bf16.mxu1 %v4258_v40  ;;  %v4345_v40 = vld [vmem:[%s6349_s1 + $0x430] ss:$8 sps:$4 sm:$0xff]  }
  0x5f   :  { %3009 = vmatpush1.bf16.msra.mxu0 %v4253_v41  ;;  %v4353_v41 = vld [vmem:[%s6349_s1 + $0x424] ss:$8 sps:$4 sm:$0xff]  }
  0x60   :  { %3010 = vmatprep.subr.bf16.mxu0 %v4261_v42  ;;  %3060 = vmatpush1.bf16.msra.mxu1 %v4256_v44  ;;  %v4348_v42 = vld [vmem:[%s6349_s1 + $0x530] ss:$8 sps:$4 sm:$0xff]   ;;  %v4351_v44 = vld [vmem:[%s6349_s1 + $0x420] ss:$8 sps:$4 sm:$0xff]  }
  0x61   :  { %3061 = vmatprep.subr.bf16.mxu1 %v4264_v45  ;;  %v4359_v45 = vld [vmem:[%s6349_s1 + $0x414] ss:$8 sps:$4 sm:$0xff]  }
  0x63   :  { %3011 = vmatpush2.bf16.msra.mxu0 %v4259_v46  ;;  %v4354_v46 = vld [vmem:[%s6349_s1 + $0x520] ss:$8 sps:$4 sm:$0xff]  }
  0x64   :  { %3012 = vmatprep.subr.bf16.mxu0 %v4267_v47  ;;  %3062 = vmatpush2.bf16.msra.mxu1 %v4262_v48  ;;  %v4362_v47 = vld [vmem:[%s6349_s1 + $0x514] ss:$8 sps:$4 sm:$0xff]   ;;  %v4357_v48 = vld [vmem:[%s6349_s1 + $0x410] ss:$8 sps:$4 sm:$0xff]  }
  0x65   :  { %3063 = vmatprep.subr.bf16.mxu1 %v4270_v49  ;;  %v4365_v49 = vld [vmem:[%s6349_s1 + $0x404] ss:$8 sps:$4 sm:$0xff]  }
  0x67   :  { %3013 = vmatpush2.bf16.msra.mxu0 %v4265_v50  ;;  %v4360_v50 = vld [vmem:[%s6349_s1 + $0x510] ss:$8 sps:$4 sm:$0xff]  }
  0x68   :  { %3014 = vmatprep.subr.bf16.mxu0 %v4273_v51  ;;  %3064 = vmatpush2.bf16.msra.mxu1 %v4268_v52  ;;  %v4368_v51 = vld [vmem:[%s6349_s1 + $0x504] ss:$8 sps:$4 sm:$0xff]   ;;  %v4363_v52 = vld [vmem:[%s6349_s1 + $0x400] ss:$8 sps:$4 sm:$0xff]  }
  0x69   :  { %3065 = vmatprep.subr.bf16.mxu1 %v4276_v53  ;;  %v4371_v53 = vld [vmem:[%s6349_s1 + $0x4f4] ss:$8 sps:$4 sm:$0xff]  }
  0x6b   :  { %3015 = vmatpush2.bf16.msra.mxu0 %v4271_v54  ;;  %v4366_v54 = vld [vmem:[%s6349_s1 + $0x500] ss:$8 sps:$4 sm:$0xff]  }
  0x6c   :  { %3016 = vmatprep.subr.bf16.mxu0 %v4279_v55  ;;  %3066 = vmatpush2.bf16.msra.mxu1 %v4274_v56  ;;  %v4374_v55 = vld [vmem:[%s6349_s1 + $0x5f4] ss:$8 sps:$4 sm:$0xff]   ;;  %v4369_v56 = vld [vmem:[%s6349_s1 + $0x4f0] ss:$8 sps:$4 sm:$0xff]  }
  0x6d   :  { %3067 = vmatprep.subr.bf16.mxu1 %v4282_v57  ;;  %v4377_v57 = vld [vmem:[%s6349_s1 + $0x4e4] ss:$8 sps:$4 sm:$0xff]  }
  0x6f   :  { %3017 = vmatpush2.bf16.msra.mxu0 %v4277_v58  ;;  %v4372_v58 = vld [vmem:[%s6349_s1 + $0x5f0] ss:$8 sps:$4 sm:$0xff]  }
  0x70   :  { %3018 = vmatprep.subr.bf16.mxu0 %v4285_v59  ;;  %3068 = vmatpush2.bf16.msra.mxu1 %v4280_v60  ;;  %v4380_v59 = vld [vmem:[%s6349_s1 + $0x5e4] ss:$8 sps:$4 sm:$0xff]   ;;  %v4375_v60 = vld [vmem:[%s6349_s1 + $0x4e0] ss:$8 sps:$4 sm:$0xff]  }
  0x71   :  { %3069 = vmatprep.subr.bf16.mxu1 %v4289_v61  ;;  %v4383_v61 = vld [vmem:[%s6349_s1 + $0x4d4] ss:$8 sps:$4 sm:$0xff]  }
  0x73   :  { %3019 = vmatpush2.bf16.msra.mxu0 %v4283_v62  ;;  %v4378_v62 = vld [vmem:[%s6349_s1 + $0x5e0] ss:$8 sps:$4 sm:$0xff]  }
  0x74   :  { %3020 = vmatprep.subr.bf16.mxu0 %v4293_v63  ;;  %3070 = vmatpush2.bf16.msra.mxu1 %v4287_v0  ;;  %v4386_v63 = vld [vmem:[%s6349_s1 + $0x5d4] ss:$8 sps:$4 sm:$0xff]   ;;  %v4381_v0 = vld [vmem:[%s6349_s1 + $0x4d0] ss:$8 sps:$4 sm:$0xff]  }
  0x75   :  { %3071 = vmatprep.subr.bf16.mxu1 %v4296_v1  ;;  %v4389_v1 = vld [vmem:[%s6349_s1 + $0x4c4] ss:$8 sps:$4 sm:$0xff]  }
  0x77   :  { %3021 = vmatpush2.bf16.msra.mxu0 %v4291_v2  ;;  %v4384_v2 = vld [vmem:[%s6349_s1 + $0x5d0] ss:$8 sps:$4 sm:$0xff]  }
  0x78   :  { %3022 = vmatprep.subr.bf16.mxu0 %v4300_v3  ;;  %3072 = vmatpush2.bf16.msra.mxu1 %v4294_v4  ;;  %v4392_v3 = vld [vmem:[%s6349_s1 + $0x5c4] ss:$8 sps:$4 sm:$0xff]   ;;  %v4387_v4 = vld [vmem:[%s6349_s1 + $0x4c0] ss:$8 sps:$4 sm:$0xff]  }
  0x79   :  { %3073 = vmatprep.subr.bf16.mxu1 %v4304_v5  ;;  %v4395_v5 = vld [vmem:[%s6349_s1 + $0x4b4] ss:$8 sps:$4 sm:$0xff]  }
  0x7b   :  { %3023 = vmatpush2.bf16.msra.mxu0 %v4298_v6  ;;  %v4390_v6 = vld [vmem:[%s6349_s1 + $0x5c0] ss:$8 sps:$4 sm:$0xff]  }
  0x7c   :  { %3024 = vmatprep.subr.bf16.mxu0 %v4307_v7  ;;  %3074 = vmatpush2.bf16.msra.mxu1 %v4302_v8  ;;  %v4398_v7 = vld [vmem:[%s6349_s1 + $0x5b4] ss:$8 sps:$4 sm:$0xff]   ;;  %v4393_v8 = vld [vmem:[%s6349_s1 + $0x4b0] ss:$8 sps:$4 sm:$0xff]  }
  0x7d   :  { %3075 = vmatprep.subr.bf16.mxu1 %v4310_v10  ;;  %v4396_v10 = vld [vmem:[%s6349_s1 + $0x5b0] ss:$8 sps:$4 sm:$0xff]  }
  0x7f   :  { %3025 = vmatpush2.bf16.msra.mxu0 %v4305_v9  ;;  %v4401_v9 = vld [vmem:[%s6349_s1 + $0x4a4] ss:$8 sps:$4 sm:$0xff]  }
  0x80   :  { %3096 = vmatprep.subr.bf16.mxu0 %v4316_v12  ;;  %3076 = vmatpush2.bf16.msra.mxu1 %v4308_v11  ;;  %v4404_v11 = vld [vmem:[%s6349_s1 + $0x5a4] ss:$8 sps:$4 sm:$0xff]   ;;  %v4399_v12 = vld [vmem:[%s6349_s1 + $0x4a0] ss:$8 sps:$4 sm:$0xff]  }
  0x81   :  { %3147 = vmatprep.subr.bf16.mxu1 %v4322_v15  ;;  %v4410_v15 = vld [vmem:[%s6349_s1 + $0x594] ss:$8 sps:$4 sm:$0xff]  }
  0x82   :  { %3027 = vmatmul.mubr.bf16.vlgmr.msra.gmra.mxu0 %v4311_v14  ;;  %v4402_v14 = vld [vmem:[%s6349_s1 + $0x5a0] ss:$8 sps:$4 sm:$0xff]  }
  0x83   :  { %3097 = vmatpush1.bf16.msra.mxu0 %v4314_v17  ;;  %3036 = vmatprep.mubr.bf16.mxu0 %v3654_v19  ;;  %v4413_v17 = vld [vmem:[%s6349_s1 + $0x484] ss:$8 sps:$4 sm:$0xff]  }
  0x84   :  { %3078 = vmatmul.mubr.bf16.vlgmr.msra.gmra.mxu1 %v4317_v18  ;;  %3098 = vmatprep.subr.bf16.mxu0 %v4325_v20  ;;  %v4408_v18 = vld [vmem:[%s6349_s1 + $0x590] ss:$8 sps:$4 sm:$0xff]   ;;  %v4416_v19 = vld [vmem:[%s6349_s1 + $0x584] ss:$8 sps:$4 sm:$0xff]   ;;  %v4411_v20 = vld [vmem:[%s6349_s1 + $0x480] ss:$8 sps:$4 sm:$0xff]  }
  0x85   :  { %3148 = vmatpush1.bf16.msra.mxu1 %v4320_v21  ;;  %3087 = vmatprep.mubr.bf16.mxu1 %v3656_v22  ;;  %v4414_v21 = vld [vmem:[%s6349_s1 + $0x580] ss:$8 sps:$4 sm:$0xff]   ;;  %v4422_v22 = vld [vmem:[%s6349_s1 + $0x674] ss:$8 sps:$4 sm:$0xff]  }
  0x86   :  { %3149 = vmatprep.subr.bf16.mxu1 %v4328_v23  ;;  %v47_v23 = vld [vmem:[%s6350_s0 + $0xf8] sm:$0xff] }
  0x87   :  { %3099 = vmatpush1.bf16.msra.mxu0 %v4323_v24  ;;  %v4417_v24 = vld [vmem:[%s6350_s0 + $0x20] ss:$108 sps:$4 sm:$0xff]  }
  0x88   :  { %3100 = vmatprep.subr.bf16.mxu0 %v4333_v25  ;;  %v4420_v25 = vld [vmem:[%s6349_s1 + $0x670] ss:$8 sps:$4 sm:$0xff]  }
  0x89   :  { %3150 = vmatpush1.bf16.msra.mxu1 %v4326_v26  ;;  %v4428_v26 = vld [vmem:[%s6349_s1 + $0x774] ss:$8 sps:$4 sm:$0xff]  }
  0x8a   :  { %3037 = vmatmul.mubr.bf16.gmra.mxu0 %v3653_v27  ;;  %3151 = vmatprep.subr.bf16.mxu1 %v4338_v28  ;;  %v48_v27 = vld [vmem:[%s6350_s0 + $0x100] sm:$0xff]  ;;  %v4423_v28 = vld [vmem:[%s6350_s0 + $0x28] ss:$108 sps:$4 sm:$0xff]  }
  0x8b   :  { %3101 = vmatpush1.bf16.msra.mxu0 %v4331_v29  ;;  %3128 = vmatprep.mubr.bf16.mxu0 %v4419_v30  ;;  %v3658_v29 = vcombine.high %v47_v23, %v47_v23  ;;  %v4431_v30 = vld [vmem:[%s6349_s1 + $0x664] ss:$8 sps:$4 sm:$0xff]  }
  0x8c   :  { %3088 = vmatmul.mubr.bf16.gmra.mxu1 %v3655_v31  ;;  %3102 = vmatprep.subr.bf16.mxu0 %v4341_v32  ;;  %v4426_v31 = vld [vmem:[%s6349_s1 + $0x770] ss:$8 sps:$4 sm:$0xff]   ;;  %v3660_v32 = vcombine.high %v48_v27, %v48_v27 }
  0x8d   :  { %3152 = vmatpush1.bf16.msra.mxu1 %v4336_v33  ;;  %3179 = vmatprep.mubr.bf16.mxu1 %v4425_v35  ;;  %v4434_v33 = vld [vmem:[%s6349_s1 + $0x764] ss:$8 sps:$4 sm:$0xff]   ;;  %v4439_v35 = vld [vmem:[%s6349_s1 + $0x654] ss:$8 sps:$4 sm:$0xff]  }
  0x8e   :  { %3153 = vmatprep.subr.bf16.mxu1 %v4344_v34  ;;  %v4429_v34 = vld [vmem:[%s6349_s1 + $0x660] ss:$8 sps:$4 sm:$0xff]  }
  0x8f   :  { %3103 = vmatpush1.bf16.msra.mxu0 %v4339_v36  ;;  %v4432_v36 = vld [vmem:[%s6349_s1 + $0x760] ss:$8 sps:$4 sm:$0xff]  }
  0x90   :  { %3104 = vmatprep.subr.bf16.mxu0 %v4347_v37  ;;  %v3657_v37 = vcombine.low %v47_v23, %v47_v23  ;;  %v491_v23 = vlaneseq }
  0x91   :  { %3154 = vmatpush1.bf16.msra.mxu1 %v4342_v38  ;;  %v4437_v38 = vld [vmem:[%s6349_s1 + $0x650] ss:$8 sps:$4 sm:$0xff]  }
  0x92   :  { %3155 = vmatprep.subr.bf16.mxu1 %v4350_v39  ;;  %v4444_v39 = vld [vmem:[%s6349_s1 + $0x754] ss:$8 sps:$4 sm:$0xff]  }
  0x93   :  { %3105 = vmatpush1.bf16.msra.mxu0 %v4345_v40  ;;  %v4525_v40 = vld [vmem:[%s6350_s0 + $0x34] ss:$108 sps:$4 sm:$0xff]  }
  0x94   :  { %3106 = vmatprep.subr.bf16.mxu0 %v4353_v41  ;;  %v3659_v41 = vcombine.low %v48_v27, %v48_v27  ;;  %v4511_v27 = vld [vmem:[%s6349_s1 + $0x690] ss:$8 sps:$4 sm:$0xff]  }
  0x95   :  { %3156 = vmatpush1.bf16.msra.mxu1 %v4348_v42  ;;  %v4447_v42 = vld [vmem:[%s6349_s1 + $0x644] ss:$8 sps:$4 sm:$0xff]  }
  0x96   :  { %3157 = vmatprep.subr.bf16.mxu1 %v4356_v43  ;;  %v4442_v43 = vld [vmem:[%s6349_s1 + $0x750] ss:$8 sps:$4 sm:$0xff]  }
  0x97   :  { %3107 = vmatpush1.bf16.msra.mxu0 %v4351_v44  ;;  %v4531_v44 = vld [vmem:[%s6350_s0 + $0x3c] ss:$108 sps:$4 sm:$0xff]  }
  0x98   :  { %3108 = vmatprep.subr.bf16.mxu0 %v4359_v45  ;;  %v4450_v45 = vld [vmem:[%s6349_s1 + $0x744] ss:$8 sps:$4 sm:$0xff]  }
  0x99   :  { %3158 = vmatpush1.bf16.msra.mxu1 %v4354_v46  ;;  %v4445_v46 = vld [vmem:[%s6349_s1 + $0x640] ss:$8 sps:$4 sm:$0xff]  }
  0x9a   :  { %3159 = vmatprep.subr.bf16.mxu1 %v4362_v47  ;;  %v4453_v47 = vld [vmem:[%s6349_s1 + $0x634] ss:$8 sps:$4 sm:$0xff]  }
  0x9b   :  { %3109 = vmatpush1.bf16.msra.mxu0 %v4357_v48  ;;  %v4448_v48 = vld [vmem:[%s6349_s1 + $0x740] ss:$8 sps:$4 sm:$0xff]  }
  0x9c   :  { %3110 = vmatprep.subr.bf16.mxu0 %v4365_v49  ;;  %v4456_v49 = vld [vmem:[%s6349_s1 + $0x734] ss:$8 sps:$4 sm:$0xff]  }
  0x9d   :  { %3160 = vmatpush1.bf16.msra.mxu1 %v4360_v50  ;;  %v4451_v50 = vld [vmem:[%s6349_s1 + $0x630] ss:$8 sps:$4 sm:$0xff]  }
  0x9e   :  { %3161 = vmatprep.subr.bf16.mxu1 %v4368_v51  ;;  %v4459_v51 = vld [vmem:[%s6349_s1 + $0x624] ss:$8 sps:$4 sm:$0xff]  }
  0x9f   :  { %3111 = vmatpush1.bf16.msra.mxu0 %v4363_v52  ;;  %v4454_v52 = vld [vmem:[%s6349_s1 + $0x730] ss:$8 sps:$4 sm:$0xff]  }
  0xa0   :  { %3112 = vmatprep.subr.bf16.mxu0 %v4371_v53  ;;  %v4462_v53 = vld [vmem:[%s6349_s1 + $0x724] ss:$8 sps:$4 sm:$0xff]  }
  0xa1   :  { %3162 = vmatpush1.bf16.msra.mxu1 %v4366_v54  ;;  %v4457_v54 = vld [vmem:[%s6349_s1 + $0x620] ss:$8 sps:$4 sm:$0xff]  }
  0xa2   :  { %3163 = vmatprep.subr.bf16.mxu1 %v4374_v55  ;;  %v4465_v55 = vld [vmem:[%s6349_s1 + $0x614] ss:$8 sps:$4 sm:$0xff]  }
  0xa3   :  { %3113 = vmatpush2.bf16.msra.mxu0 %v4369_v56  ;;  %v4460_v56 = vld [vmem:[%s6349_s1 + $0x720] ss:$8 sps:$4 sm:$0xff]  }
  0xa4   :  { %3114 = vmatprep.subr.bf16.mxu0 %v4377_v57  ;;  %v4468_v57 = vld [vmem:[%s6349_s1 + $0x714] ss:$8 sps:$4 sm:$0xff]  }
  0xa5   :  { %3164 = vmatpush2.bf16.msra.mxu1 %v4372_v58  ;;  %v4463_v58 = vld [vmem:[%s6349_s1 + $0x610] ss:$8 sps:$4 sm:$0xff]  }
  0xa6   :  { %3165 = vmatprep.subr.bf16.mxu1 %v4380_v59  ;;  %v4471_v59 = vld [vmem:[%s6349_s1 + $0x604] ss:$8 sps:$4 sm:$0xff]  }
  0xa7   :  { %3115 = vmatpush2.bf16.msra.mxu0 %v4375_v60  ;;  %v4466_v60 = vld [vmem:[%s6349_s1 + $0x710] ss:$8 sps:$4 sm:$0xff]  }
  0xa8   :  { %3116 = vmatprep.subr.bf16.mxu0 %v4383_v61  ;;  %v4474_v61 = vld [vmem:[%s6349_s1 + $0x704] ss:$8 sps:$4 sm:$0xff]  }
  0xa9   :  { %3166 = vmatpush2.bf16.msra.mxu1 %v4378_v62  ;;  %v4469_v62 = vld [vmem:[%s6349_s1 + $0x600] ss:$8 sps:$4 sm:$0xff]  }
  0xaa   :  { %3167 = vmatprep.subr.bf16.mxu1 %v4386_v63  ;;  %v4477_v63 = vld [vmem:[%s6349_s1 + $0x6f4] ss:$8 sps:$4 sm:$0xff]  }
  0xab   :  { %3117 = vmatpush2.bf16.msra.mxu0 %v4381_v0  ;;  %v4472_v0 = vld [vmem:[%s6349_s1 + $0x700] ss:$8 sps:$4 sm:$0xff]  }
  0xac   :  { %3118 = vmatprep.subr.bf16.mxu0 %v4389_v1  ;;  %v4480_v1 = vld [vmem:[%s6349_s1 + $0x7f4] ss:$8 sps:$4 sm:$0xff]  }
  0xad   :  { %3168 = vmatpush2.bf16.msra.mxu1 %v4384_v2  ;;  %v4475_v2 = vld [vmem:[%s6349_s1 + $0x6f0] ss:$8 sps:$4 sm:$0xff]  }
  0xae   :  { %3169 = vmatprep.subr.bf16.mxu1 %v4392_v3  ;;  %v4483_v3 = vld [vmem:[%s6349_s1 + $0x6e4] ss:$8 sps:$4 sm:$0xff]  }
  0xaf   :  { %3119 = vmatpush2.bf16.msra.mxu0 %v4387_v4  ;;  %v4478_v4 = vld [vmem:[%s6349_s1 + $0x7f0] ss:$8 sps:$4 sm:$0xff]  }
  0xb0   :  { %3120 = vmatprep.subr.bf16.mxu0 %v4395_v5  ;;  %v4486_v5 = vld [vmem:[%s6349_s1 + $0x7e4] ss:$8 sps:$4 sm:$0xff]  }
  0xb1   :  { %3170 = vmatpush2.bf16.msra.mxu1 %v4390_v6  ;;  %v4481_v6 = vld [vmem:[%s6349_s1 + $0x6e0] ss:$8 sps:$4 sm:$0xff]  }
  0xb2   :  { %3171 = vmatprep.subr.bf16.mxu1 %v4398_v7  ;;  %v4489_v7 = vld [vmem:[%s6349_s1 + $0x6d4] ss:$8 sps:$4 sm:$0xff]  }
  0xb3   :  { %3121 = vmatpush2.bf16.msra.mxu0 %v4393_v8  ;;  %v4484_v8 = vld [vmem:[%s6349_s1 + $0x7e0] ss:$8 sps:$4 sm:$0xff]  }
  0xb4   :  { %3122 = vmatprep.subr.bf16.mxu0 %v4401_v9  ;;  %v4492_v9 = vld [vmem:[%s6349_s1 + $0x7d4] ss:$8 sps:$4 sm:$0xff]  }
  0xb5   :  { %3172 = vmatpush2.bf16.msra.mxu1 %v4396_v10  ;;  %v4487_v10 = vld [vmem:[%s6349_s1 + $0x6d0] ss:$8 sps:$4 sm:$0xff]  }
  0xb6   :  { %3173 = vmatprep.subr.bf16.mxu1 %v4404_v11  ;;  %v4495_v11 = vld [vmem:[%s6349_s1 + $0x6c4] ss:$8 sps:$4 sm:$0xff]  }
  0xb7   :  { %3123 = vmatpush2.bf16.msra.mxu0 %v4399_v12  ;;  %v4490_v12 = vld [vmem:[%s6349_s1 + $0x7d0] ss:$8 sps:$4 sm:$0xff]  }
  0xb8   :  { %3124 = vmatprep.subr.bf16.mxu0 %v4407_v13  ;;  %v4498_v13 = vld [vmem:[%s6349_s1 + $0x7c4] ss:$8 sps:$4 sm:$0xff]  }
  0xb9   :  { %3174 = vmatpush2.bf16.msra.mxu1 %v4402_v14  ;;  %v4493_v14 = vld [vmem:[%s6349_s1 + $0x6c0] ss:$8 sps:$4 sm:$0xff]  }
  0xba   :  { %3175 = vmatprep.subr.bf16.mxu1 %v4410_v15  ;;  %v4501_v15 = vld [vmem:[%s6349_s1 + $0x6b4] ss:$8 sps:$4 sm:$0xff]  }
  0xbb   :  { %3125 = vmatpush2.bf16.msra.mxu0 %v4405_v16  ;;  %v4496_v16 = vld [vmem:[%s6349_s1 + $0x7c0] ss:$8 sps:$4 sm:$0xff]  }
  0xbc   :  { %3126 = vmatprep.subr.bf16.mxu0 %v4413_v17  ;;  %v4504_v17 = vld [vmem:[%s6349_s1 + $0x7b4] ss:$8 sps:$4 sm:$0xff]  }
  0xbd   :  { %3176 = vmatpush2.bf16.msra.mxu1 %v4408_v18  ;;  %v4499_v18 = vld [vmem:[%s6349_s1 + $0x6b0] ss:$8 sps:$4 sm:$0xff]  }
  0xbe   :  { %3177 = vmatprep.subr.bf16.mxu1 %v4416_v19  ;;  %v4507_v19 = vld [vmem:[%s6349_s1 + $0x6a4] ss:$8 sps:$4 sm:$0xff]  }
  0xbf   :  { %3127 = vmatpush2.bf16.msra.mxu0 %v4411_v20  ;;  %v4502_v20 = vld [vmem:[%s6349_s1 + $0x7b0] ss:$8 sps:$4 sm:$0xff]  }
  0xc0   :  { %3198 = vmatprep.subr.bf16.mxu0 %v4422_v22  ;;  %v4505_v22 = vld [vmem:[%s6349_s1 + $0x6a0] ss:$8 sps:$4 sm:$0xff]  }
  0xc1   :  { %3178 = vmatpush2.bf16.msra.mxu1 %v4414_v21  ;;  %v4510_v21 = vld [vmem:[%s6349_s1 + $0x7a4] ss:$8 sps:$4 sm:$0xff]  }
  0xc2   :  { %3129 = vmatmul.mubr.bf16.vlgmr.msra.gmra.mxu0 %v4417_v24  ;;  %3249 = vmatprep.subr.bf16.mxu1 %v4428_v26  ;;  %v4513_v24 = vld [vmem:[%s6349_s1 + $0x694] ss:$8 sps:$4 sm:$0xff]  }
  0xc3   :  { %3199 = vmatpush1.bf16.msra.mxu0 %v4420_v25  ;;  %3138 = vmatprep.mubr.bf16.mxu0 %v3658_v29  ;;  %v4508_v25 = vld [vmem:[%s6349_s1 + $0x7a0] ss:$8 sps:$4 sm:$0xff]   ;;  %v4516_v26 = vld [vmem:[%s6349_s1 + $0x794] ss:$8 sps:$4 sm:$0xff]   ;;  %v4514_v29 = vld [vmem:[%s6349_s1 + $0x790] ss:$8 sps:$4 sm:$0xff]  }
  0xc4   :  { %3180 = vmatmul.mubr.bf16.vlgmr.msra.gmra.mxu1 %v4423_v28  ;;  %3200 = vmatprep.subr.bf16.mxu0 %v4431_v30  ;;  %v492_v28 = vshrl.u32 %v491_v23, 7  ;;  %v4519_v30 = vld [vmem:[%s6349_s1 + $0x684] ss:$8 sps:$4 sm:$0xff]  }
  0xc5   :  { %3250 = vmatpush1.bf16.msra.mxu1 %v4426_v31  ;;  %3189 = vmatprep.mubr.bf16.mxu1 %v3660_v32  ;;  %v4517_v31 = vld [vmem:[%s6349_s1 + $0x680] ss:$8 sps:$4 sm:$0xff]   ;;  %v4522_v32 = vld [vmem:[%s6349_s1 + $0x784] ss:$8 sps:$4 sm:$0xff]  }
  0xc6   :  { %3251 = vmatprep.subr.bf16.mxu1 %v4434_v33  ;;  %v4520_v33 = vld [vmem:[%s6349_s1 + $0x780] ss:$8 sps:$4 sm:$0xff]  }
  0xc7   :  { %3201 = vmatpush1.bf16.msra.mxu0 %v4429_v34  ;;  %v489_v34 = vld [vmem:[%s6351_s2] sm:$0x3] }
  0xc8   :  { %3202 = vmatprep.subr.bf16.mxu0 %v4439_v35  ;;  %v493_v35 = vsub.s32 0, %v492_v28 }
  0xc9   :  { %3252 = vmatpush1.bf16.msra.mxu1 %v4432_v36  ;;  %v4523_v36 = vld [vmem:[%s6350_s0 + $0x30] ss:$108 sps:$4 sm:$0xff]  }
  0xca   :  { %3139 = vmatmul.mubr.bf16.gmra.mxu0 %v3657_v37  ;;  %3253 = vmatprep.subr.bf16.mxu1 %v4444_v39  ;;  %v4528_v37 = vld [vmem:[%s6349_s1 + $0x874] ss:$8 sps:$4 sm:$0xff]   ;;  %v497_v39 = vsub.s32 1, %v492_v28  ;;  %v4566_v28 = vld [vmem:[%s6349_s1 + $0x920] ss:$8 sps:$4 sm:$0xff]  }
  0xcb   :  { %3203 = vmatpush1.bf16.msra.mxu0 %v4437_v38  ;;  %3230 = vmatprep.mubr.bf16.mxu0 %v4525_v40  ;;  %v49_v38 = vld [vmem:[%s6350_s0 + $0x108] sm:$0xff]  ;;  %v4534_v40 = vld [vmem:[%s6349_s1 + $0x974] ss:$8 sps:$4 sm:$0xff]  }
  0xcc   :  { %3190 = vmatmul.mubr.bf16.gmra.mxu1 %v3659_v41  ;;  %3204 = vmatprep.subr.bf16.mxu0 %v4447_v42  ;;  %v50_v41 = vld [vmem:[%s6350_s0 + $0x110] sm:$0xff]  ;;  %v5691_v42 = vrot.slane %v489_v34, %v493_v35 }
  0xcd   :  { %3254 = vmatpush1.bf16.msra.mxu1 %v4442_v43  ;;  %3281 = vmatprep.mubr.bf16.mxu1 %v4531_v44  ;;  %v4526_v43 = vld [vmem:[%s6349_s1 + $0x870] ss:$8 sps:$4 sm:$0xff]   ;;  %v3662_v44 = vcombine.high %v49_v38, %v49_v38 }
  0xce   :  { %3255 = vmatprep.subr.bf16.mxu1 %v4450_v45  ;;  %v4529_v45 = vld [vmem:[%s6350_s0 + $0x38] ss:$108 sps:$4 sm:$0xff]  }
  0xcf   :  { %3205 = vmatpush1.bf16.msra.mxu0 %v4445_v46  ;;  %v4537_v46 = vld [vmem:[%s6349_s1 + $0x864] ss:$8 sps:$4 sm:$0xff]  }
  0xd0   :  { %3206 = vmatprep.subr.bf16.mxu0 %v4453_v47  ;;  %v5702_v47 = vrot.slane %v489_v34, %v497_v39  ;;  %v4577_v34 = vld [vmem:[%s6349_s1 + $0x804] ss:$8 sps:$4 sm:$0xff]  }
  0xd1   :  { %3256 = vmatpush1.bf16.msra.mxu1 %v4448_v48  ;;  %v4532_v48 = vld [vmem:[%s6349_s1 + $0x970] ss:$8 sps:$4 sm:$0xff]   ;;  %v4580_v39 = vld [vmem:[%s6349_s1 + $0x904] ss:$8 sps:$4 sm:$0xff]  }
  0xd2   :  { %3257 = vmatprep.subr.bf16.mxu1 %v4456_v49  ;;  %v3664_v49 = vcombine.high %v50_v41, %v50_v41 }
  0xd3   :  { %3207 = vmatpush1.bf16.msra.mxu0 %v4451_v50 }
  0xd4   :  { %3208 = vmatprep.subr.bf16.mxu0 %v4459_v51  ;;  %v4540_v51 = vld [vmem:[%s6349_s1 + $0x964] ss:$8 sps:$4 sm:$0xff]  }
  0xd5   :  { %3258 = vmatpush1.bf16.msra.mxu1 %v4454_v52 }
  0xd6   :  { %3259 = vmatprep.subr.bf16.mxu1 %v4462_v53  ;;  %v4535_v53 = vld [vmem:[%s6349_s1 + $0x860] ss:$8 sps:$4 sm:$0xff]  }
  0xd7   :  { %3209 = vmatpush1.bf16.msra.mxu0 %v4457_v54 }
  0xd8   :  { %3210 = vmatprep.subr.bf16.mxu0 %v4465_v55 }
  0xd9   :  { %3260 = vmatpush1.bf16.msra.mxu1 %v4460_v56  ;;  %v4545_v56 = vld [vmem:[%s6349_s1 + $0x854] ss:$8 sps:$4 sm:$0xff]  }
  0xda   :  { %3261 = vmatprep.subr.bf16.mxu1 %v4468_v57 }
  0xdb   :  { %3211 = vmatpush1.bf16.msra.mxu0 %v4463_v58 }
  0xdc   :  { %3212 = vmatprep.subr.bf16.mxu0 %v4471_v59  ;;  %v4538_v59 = vld [vmem:[%s6349_s1 + $0x960] ss:$8 sps:$4 sm:$0xff]  }
  0xdd   :  { %3262 = vmatpush1.bf16.msra.mxu1 %v4466_v60 }
  0xde   :  { %3263 = vmatprep.subr.bf16.mxu1 %v4474_v61 }
  0xdf   :  { %3213 = vmatpush1.bf16.msra.mxu0 %v4469_v62  ;;  %v3661_v62 = vcombine.low %v49_v38, %v49_v38 }
  0xe0   :  { %3214 = vmatprep.subr.bf16.mxu0 %v4477_v63  ;;  %v4550_v63 = vld [vmem:[%s6349_s1 + $0x954] ss:$8 sps:$4 sm:$0xff]  }
  0xe1   :  { %3264 = vmatpush1.bf16.msra.mxu1 %v4472_v0 }
  0xe2   :  { %3265 = vmatprep.subr.bf16.mxu1 %v4480_v1 }
  0xe3   :  { %3215 = vmatpush2.bf16.msra.mxu0 %v4475_v2  ;;  %v4543_v2 = vld [vmem:[%s6349_s1 + $0x850] ss:$8 sps:$4 sm:$0xff]  }
  0xe4   :  { %3216 = vmatprep.subr.bf16.mxu0 %v4483_v3  ;;  %v4631_v3 = vld [vmem:[%s6350_s0 + $0x44] ss:$108 sps:$4 sm:$0xff]  }
  0xe5   :  { %3266 = vmatpush2.bf16.msra.mxu1 %v4478_v4 }
  0xe6   :  { %3267 = vmatprep.subr.bf16.mxu1 %v4486_v5 }
  0xe7   :  { %3217 = vmatpush2.bf16.msra.mxu0 %v4481_v6  ;;  %v3663_v6 = vcombine.low %v50_v41, %v50_v41  ;;  %v4575_v41 = vld [vmem:[%s6349_s1 + $0x800] ss:$8 sps:$4 sm:$0xff]  }
  0xe8   :  { %3218 = vmatprep.subr.bf16.mxu0 %v4489_v7  ;;  %v4548_v7 = vld [vmem:[%s6349_s1 + $0x950] ss:$8 sps:$4 sm:$0xff]  }
  0xe9   :  { %3268 = vmatpush2.bf16.msra.mxu1 %v4484_v8  ;;  %v4553_v8 = vld [vmem:[%s6349_s1 + $0x844] ss:$8 sps:$4 sm:$0xff]  }
  0xea   :  { %3269 = vmatprep.subr.bf16.mxu1 %v4492_v9 }
  0xeb   :  { %3219 = vmatpush2.bf16.msra.mxu0 %v4487_v10 }
  0xec   :  { %3220 = vmatprep.subr.bf16.mxu0 %v4495_v11  ;;  %v4637_v11 = vld [vmem:[%s6350_s0 + $0x4c] ss:$108 sps:$4 sm:$0xff]  }
  0xed   :  { %3270 = vmatpush2.bf16.msra.mxu1 %v4490_v12 }
  0xee   :  { %3271 = vmatprep.subr.bf16.mxu1 %v4498_v13  ;;  %v4556_v13 = vld [vmem:[%s6349_s1 + $0x944] ss:$8 sps:$4 sm:$0xff]  }
  0xef   :  { %3221 = vmatpush2.bf16.msra.mxu0 %v4493_v14 }
  0xf0   :  { %3222 = vmatprep.subr.bf16.mxu0 %v4501_v15  ;;  %v4551_v15 = vld [vmem:[%s6349_s1 + $0x840] ss:$8 sps:$4 sm:$0xff]  }
  0xf1   :  { %3272 = vmatpush2.bf16.msra.mxu1 %v4496_v16  ;;  %v4559_v16 = vld [vmem:[%s6349_s1 + $0x834] ss:$8 sps:$4 sm:$0xff]  }
  0xf2   :  { %3273 = vmatprep.subr.bf16.mxu1 %v4504_v17  ;;  %v4554_v17 = vld [vmem:[%s6349_s1 + $0x940] ss:$8 sps:$4 sm:$0xff]  }
  0xf3   :  { %3223 = vmatpush2.bf16.msra.mxu0 %v4499_v18  ;;  %v4562_v18 = vld [vmem:[%s6349_s1 + $0x934] ss:$8 sps:$4 sm:$0xff]  }
  0xf4   :  { %3224 = vmatprep.subr.bf16.mxu0 %v4507_v19  ;;  %v4557_v19 = vld [vmem:[%s6349_s1 + $0x830] ss:$8 sps:$4 sm:$0xff]  }
  0xf5   :  { %3274 = vmatpush2.bf16.msra.mxu1 %v4502_v20  ;;  %v4565_v20 = vld [vmem:[%s6349_s1 + $0x824] ss:$8 sps:$4 sm:$0xff]  }
  0xf6   :  { %3275 = vmatprep.subr.bf16.mxu1 %v4510_v21  ;;  %v4560_v21 = vld [vmem:[%s6349_s1 + $0x930] ss:$8 sps:$4 sm:$0xff]  }
  0xf7   :  { %3225 = vmatpush2.bf16.msra.mxu0 %v4505_v22  ;;  %v4568_v22 = vld [vmem:[%s6349_s1 + $0x924] ss:$8 sps:$4 sm:$0xff]  }
  0xf8   :  { %3226 = vmatprep.subr.bf16.mxu0 %v4513_v24  ;;  %v4563_v24 = vld [vmem:[%s6349_s1 + $0x820] ss:$8 sps:$4 sm:$0xff]  }
  0xf9   :  { %3276 = vmatpush2.bf16.msra.mxu1 %v4508_v25  ;;  %v4571_v25 = vld [vmem:[%s6349_s1 + $0x814] ss:$8 sps:$4 sm:$0xff]  }
  0xfa   :  { %3277 = vmatprep.subr.bf16.mxu1 %v4516_v26 }
  0xfb   :  { %3227 = vmatpush2.bf16.msra.mxu0 %v4511_v27 }
  0xfc   :  { %3228 = vmatprep.subr.bf16.mxu0 %v4519_v30 }
  0xfd   :  { %3278 = vmatpush2.bf16.msra.mxu1 %v4514_v29  ;;  %v4574_v29 = vld [vmem:[%s6349_s1 + $0x914] ss:$8 sps:$4 sm:$0xff]  }
  0xfe   :  { %3279 = vmatprep.subr.bf16.mxu1 %v4522_v32  ;;  %v4569_v32 = vld [vmem:[%s6349_s1 + $0x810] ss:$8 sps:$4 sm:$0xff]  }
  0xff   :  { %3229 = vmatpush2.bf16.msra.mxu0 %v4517_v31 }
 0x100   :  { %3300 = vmatprep.subr.bf16.mxu0 %v4528_v37  ;;  %v4572_v37 = vld [vmem:[%s6349_s1 + $0x910] ss:$8 sps:$4 sm:$0xff]  }
 0x101   :  { %3280 = vmatpush2.bf16.msra.mxu1 %v4520_v33 }
 0x102   :  { %v2926_v50 = vpop.f32.mrf.mxu0  ;;  %3231 = vmatmul.mubr.bf16.vlgmr.msra.gmra.mxu0 %v4523_v36  ;;  %3351 = vmatprep.subr.bf16.mxu1 %v4534_v40 }
 0x103   :  { %v2927_v52 = vadd.f32 %v2926_v50, %v5691_v42  ;;  %3301 = vmatpush1.bf16.msra.mxu0 %v4526_v43  ;;  %3240 = vmatprep.mubr.bf16.mxu0 %v3662_v44  ;;  %v2977_v55 = vpop.f32.mrf.mxu1  ;;  %v4583_v43 = vld [vmem:[%s6349_s1 + $0x8f4] ss:$8 sps:$4 sm:$0xff]   ;;  %v4578_v44 = vld [vmem:[%s6349_s1 + $0x900] ss:$8 sps:$4 sm:$0xff]   ;;  %v4592_v50 = vld [vmem:[%s6349_s1 + $0x9e4] ss:$8 sps:$4 sm:$0xff]  }
 0x104   :  { %v2928_v54 = vpop.f32.mrf.mxu0  ;;  %3282 = vmatmul.mubr.bf16.vlgmr.msra.gmra.mxu1 %v4529_v45  ;;  %3302 = vmatprep.subr.bf16.mxu0 %v4537_v46  ;;  %v4586_v46 = vld [vmem:[%s6349_s1 + $0x9f4] ss:$8 sps:$4 sm:$0xff]  }
 0x105   :  { %v2929_v57 = vadd.f32 %v2928_v54, %v5702_v47  ;;  %v5718_v58 = vadd.f32 %v2977_v55, %v2927_v52  ;;  %3352 = vmatpush1.bf16.msra.mxu1 %v4532_v48  ;;  %3291 = vmatprep.mubr.bf16.mxu1 %v3664_v49  ;;  %v2979_v61 = vpop.f32.mrf.mxu1  ;;  %v4589_v48 = vld [vmem:[%s6349_s1 + $0x8e4] ss:$8 sps:$4 sm:$0xff]   ;;  %v4584_v49 = vld [vmem:[%s6349_s1 + $0x9f0] ss:$8 sps:$4 sm:$0xff]   ;;  %v4595_v52 = vld [vmem:[%s6349_s1 + $0x8d4] ss:$8 sps:$4 sm:$0xff]  }
 0x106   :  { %v2930_v60 = vpop.f32.mrf.mxu0  ;;  %3353 = vmatprep.subr.bf16.mxu1 %v4540_v51  ;;  %v4587_v51 = vld [vmem:[%s6349_s1 + $0x8e0] ss:$8 sps:$4 sm:$0xff]   ;;  %v4598_v54 = vld [vmem:[%s6349_s1 + $0x9d4] ss:$8 sps:$4 sm:$0xff]   ;;  %v4593_v55 = vld [vmem:[%s6349_s1 + $0x8d0] ss:$8 sps:$4 sm:$0xff]  }
 0x107   :  { %v2931_v0 = vadd.f32 %v2930_v60, %v5691_v42  ;;  %v5727_v1 = vadd.f32 %v2979_v61, %v2929_v57  ;;  %3303 = vmatpush1.bf16.msra.mxu0 %v4535_v53  ;;  %v2981_v5 = vpop.f32.mrf.mxu1  ;;  %v4590_v53 = vld [vmem:[%s6349_s1 + $0x9e0] ss:$8 sps:$4 sm:$0xff]   ;;  %v4601_v57 = vld [vmem:[%s6349_s1 + $0x8c4] ss:$8 sps:$4 sm:$0xff]  }
 0x108   :  { %v2932_v4 = vpop.f32.mrf.mxu0  ;;  %3304 = vmatprep.subr.bf16.mxu0 %v4545_v56  ;;  %v4596_v56 = vld [vmem:[%s6349_s1 + $0x9d0] ss:$8 sps:$4 sm:$0xff]   ;;  %v4599_v60 = vld [vmem:[%s6349_s1 + $0x8c0] ss:$8 sps:$4 sm:$0xff]  }
 0x109   :  { %v2933_v9 = vadd.f32 %v2932_v4, %v5702_v47  ;;  %v5742_v10 = vadd.f32 %v2981_v5, %v2931_v0  ;;  %3354 = vmatpush1.bf16.msra.mxu1 %v4538_v59  ;;  %v2983_v12 = vpop.f32.mrf.mxu1  ;;  %v4604_v59 = vld [vmem:[%s6349_s1 + $0x9c4] ss:$8 sps:$4 sm:$0xff]   ;;  %v4602_v61 = vld [vmem:[%s6349_s1 + $0x9c0] ss:$8 sps:$4 sm:$0xff]   ;;  %v4605_v0 = vld [vmem:[%s6349_s1 + $0x8b0] ss:$8 sps:$4 sm:$0xff]  }
 0x10a   :  { %3241 = vmatmul.mubr.bf16.gmra.mxu0 %v3661_v62  ;;  %3355 = vmatprep.subr.bf16.mxu1 %v4550_v63  ;;  %v2936_v23 = vpop.f32.mrf.mxu0  ;;  %v4607_v62 = vld [vmem:[%s6349_s1 + $0x8b4] ss:$8 sps:$4 sm:$0xff]   ;;  %v4616_v4 = vld [vmem:[%s6349_s1 + $0x9a4] ss:$8 sps:$4 sm:$0xff]   ;;  %v4611_v5 = vld [vmem:[%s6349_s1 + $0x8a0] ss:$8 sps:$4 sm:$0xff]  }
 0x10b   :  { %v5750_v14 = vadd.f32 %v2983_v12, %v2933_v9  ;;  %3305 = vmatpush1.bf16.msra.mxu0 %v4543_v2  ;;  %3332 = vmatprep.mubr.bf16.mxu0 %v4631_v3  ;;  %v2937_v26 = vadd.f32 %v2936_v23, %v5691_v42  ;;  %v2987_v33 = vpop.f32.mrf.mxu1  ;;  %v4610_v63 = vld [vmem:[%s6349_s1 + $0x9b4] ss:$8 sps:$4 sm:$0xff]   ;;  %v4608_v2 = vld [vmem:[%s6349_s1 + $0x9b0] ss:$8 sps:$4 sm:$0xff]   ;;  %v4613_v3 = vld [vmem:[%s6349_s1 + $0x8a4] ss:$8 sps:$4 sm:$0xff]  }
 0x10c   :  { %3292 = vmatmul.mubr.bf16.gmra.mxu1 %v3663_v6  ;;  %3306 = vmatprep.subr.bf16.mxu0 %v4553_v8  ;;  %v2938_v27 = vpop.f32.mrf.mxu0  ;;  %v4619_v6 = vld [vmem:[%s6349_s1 + $0x894] ss:$8 sps:$4 sm:$0xff]   ;;  %v4617_v9 = vld [vmem:[%s6349_s1 + $0x890] ss:$8 sps:$4 sm:$0xff]  }
 0x10d   :  { %3356 = vmatpush1.bf16.msra.mxu1 %v4548_v7  ;;  %3383 = vmatprep.mubr.bf16.mxu1 %v4637_v11  ;;  %v2939_v30 = vadd.f32 %v2938_v27, %v5702_v47  ;;  %v5796_v36 = vadd.f32 %v2987_v33, %v2937_v26  ;;  %v2989_v38 = vpop.f32.mrf.mxu1  ;;  %v4581_v47 = vld [vmem:[%s6349_s1 + $0x8f0] ss:$8 sps:$4 sm:$0xff]   ;;  %v4614_v7 = vld [vmem:[%s6349_s1 + $0x9a0] ss:$8 sps:$4 sm:$0xff]   ;;  %v4622_v8 = vld [vmem:[%s6349_s1 + $0x994] ss:$8 sps:$4 sm:$0xff]  }
 0x10e   :  { %3357 = vmatprep.subr.bf16.mxu1 %v4556_v13  ;;  %v2940_v31 = vpop.f32.mrf.mxu0  ;;  %v4625_v11 = vld [vmem:[%s6349_s1 + $0x884] ss:$8 sps:$4 sm:$0xff]   ;;  %v4620_v12 = vld [vmem:[%s6349_s1 + $0x990] ss:$8 sps:$4 sm:$0xff]  }
 0x10f   :  { %3307 = vmatpush1.bf16.msra.mxu0 %v4551_v15  ;;  %v5804_v40 = vadd.f32 %v2989_v38, %v2939_v30  ;;  %v2991_v42 = vpop.f32.mrf.mxu1  ;;  %v4628_v13 = vld [vmem:[%s6349_s1 + $0x984] ss:$8 sps:$4 sm:$0xff]   ;;  %v4623_v15 = vld [vmem:[%s6349_s1 + $0x880] ss:$8 sps:$4 sm:$0xff]   ;;  %v4638_v26 = vld [vmem:[%s6349_s1 + $0xb70] ss:$8 sps:$4 sm:$0xff]  }
 0x110   :  { %3308 = vmatprep.subr.bf16.mxu0 %v4559_v16  ;;  %v2941_v35 = vpop.f32.mrf.mxu0  ;;  %v4634_v16 = vld [vmem:[%s6349_s1 + $0xa74] ss:$8 sps:$4 sm:$0xff]   ;;  %v4641_v31 = vld [vmem:[%s6349_s1 + $0xa60] ss:$8 sps:$4 sm:$0xff]  }
 0x111   :  { %3358 = vmatpush1.bf16.msra.mxu1 %v4554_v17  ;;  %v2992_v45 = vpop.f32.mrf.mxu1  ;;  %v51_v17 = vld [vmem:[%s6350_s0 + $0x118] sm:$0xff] }
 0x112   :  { %3359 = vmatprep.subr.bf16.mxu1 %v4562_v18  ;;  %v4626_v18 = vld [vmem:[%s6349_s1 + $0x980] ss:$8 sps:$4 sm:$0xff]   ;;  %v3666_v23 = vcombine.high %v51_v17, %v51_v17  ;;  %v4656_v42 = vld [vmem:[%s6349_s1 + $0xb54] ss:$8 sps:$4 sm:$0xff]  }
 0x113   :  { %3309 = vmatpush1.bf16.msra.mxu0 %v4557_v19  ;;  %v4629_v19 = vld [vmem:[%s6350_s0 + $0x40] ss:$108 sps:$4 sm:$0xff]  }
 0x114   :  { %3310 = vmatprep.subr.bf16.mxu0 %v4565_v20  ;;  %v4640_v20 = vld [vmem:[%s6349_s1 + $0xb74] ss:$8 sps:$4 sm:$0xff]  }
 0x115   :  { %3360 = vmatpush1.bf16.msra.mxu1 %v4560_v21  ;;  %v52_v21 = vld [vmem:[%s6350_s0 + $0x120] sm:$0xff] }
 0x116   :  { %3361 = vmatprep.subr.bf16.mxu1 %v4568_v22  ;;  %v4632_v22 = vld [vmem:[%s6349_s1 + $0xa70] ss:$8 sps:$4 sm:$0xff]   ;;  %v3668_v27 = vcombine.high %v52_v21, %v52_v21  ;;  %v4737_v45 = vld [vmem:[%s6350_s0 + $0x54] ss:$108 sps:$4 sm:$0xff]  }
 0x117   :  { %3311 = vmatpush1.bf16.msra.mxu0 %v4563_v24  ;;  %v4635_v24 = vld [vmem:[%s6350_s0 + $0x48] ss:$108 sps:$4 sm:$0xff]  }
 0x118   :  { %3312 = vmatprep.subr.bf16.mxu0 %v4571_v25  ;;  %v4643_v25 = vld [vmem:[%s6349_s1 + $0xa64] ss:$8 sps:$4 sm:$0xff]  }
 0x119   :  { %3362 = vmatpush1.bf16.msra.mxu1 %v4566_v28 }
 0x11a   :  { %3363 = vmatprep.subr.bf16.mxu1 %v4574_v29  ;;  %v4646_v29 = vld [vmem:[%s6349_s1 + $0xb64] ss:$8 sps:$4 sm:$0xff]  }
 0x11b   :  { %3313 = vmatpush1.bf16.msra.mxu0 %v4569_v32 }
 0x11c   :  { %3314 = vmatprep.subr.bf16.mxu0 %v4577_v34  ;;  %v4651_v34 = vld [vmem:[%s6349_s1 + $0xa54] ss:$8 sps:$4 sm:$0xff]  }
 0x11d   :  { %3364 = vmatpush1.bf16.msra.mxu1 %v4572_v37 }
 0x11e   :  { %3365 = vmatprep.subr.bf16.mxu1 %v4580_v39 }
 0x11f   :  { %3315 = vmatpush1.bf16.msra.mxu0 %v4575_v41  ;;  %v3665_v41 = vcombine.low %v51_v17, %v51_v17  ;;  %v4675_v17 = vld [vmem:[%s6349_s1 + $0xa10] ss:$8 sps:$4 sm:$0xff]  }
 0x120   :  { %3316 = vmatprep.subr.bf16.mxu0 %v4583_v43 }
 0x121   :  { %3366 = vmatpush1.bf16.msra.mxu1 %v4578_v44 }
 0x122   :  { %3367 = vmatprep.subr.bf16.mxu1 %v4586_v46 }
 0x123   :  { %3317 = vmatpush2.bf16.msra.mxu0 %v4581_v47 }
 0x124   :  { %3318 = vmatprep.subr.bf16.mxu0 %v4589_v48  ;;  %v3667_v48 = vcombine.low %v52_v21, %v52_v21  ;;  %v4681_v21 = vld [vmem:[%s6349_s1 + $0xa00] ss:$8 sps:$4 sm:$0xff]  }
 0x125   :  { %3368 = vmatpush2.bf16.msra.mxu1 %v4584_v49  ;;  %v4659_v49 = vld [vmem:[%s6349_s1 + $0xa44] ss:$8 sps:$4 sm:$0xff]  }
 0x126   :  { %3369 = vmatprep.subr.bf16.mxu1 %v4592_v50 }
 0x127   :  { %3319 = vmatpush2.bf16.msra.mxu0 %v4587_v51  ;;  %v4654_v51 = vld [vmem:[%s6349_s1 + $0xb50] ss:$8 sps:$4 sm:$0xff]  }
 0x128   :  { %3320 = vmatprep.subr.bf16.mxu0 %v4595_v52  ;;  %v4743_v52 = vld [vmem:[%s6350_s0 + $0x5c] ss:$108 sps:$4 sm:$0xff]  }
 0x129   :  { %3370 = vmatpush2.bf16.msra.mxu1 %v4590_v53 }
 0x12a   :  { %3371 = vmatprep.subr.bf16.mxu1 %v4598_v54 }
 0x12b   :  { %3321 = vmatpush2.bf16.msra.mxu0 %v4593_v55  ;;  %v4662_v55 = vld [vmem:[%s6349_s1 + $0xb44] ss:$8 sps:$4 sm:$0xff]  }
 0x12c   :  { %3322 = vmatprep.subr.bf16.mxu0 %v4601_v57  ;;  %v4657_v57 = vld [vmem:[%s6349_s1 + $0xa40] ss:$8 sps:$4 sm:$0xff]  }
 0x12d   :  { %3372 = vmatpush2.bf16.msra.mxu1 %v4596_v56 }
 0x12e   :  { %3373 = vmatprep.subr.bf16.mxu1 %v4604_v59 }
 0x12f   :  { %3323 = vmatpush2.bf16.msra.mxu0 %v4599_v60 }
 0x130   :  { %3324 = vmatprep.subr.bf16.mxu0 %v4607_v62 }
 0x131   :  { %3374 = vmatpush2.bf16.msra.mxu1 %v4602_v61  ;;  %v4665_v61 = vld [vmem:[%s6349_s1 + $0xa34] ss:$8 sps:$4 sm:$0xff]  }
 0x132   :  { %3375 = vmatprep.subr.bf16.mxu1 %v4610_v63 }
 0x133   :  { %3325 = vmatpush2.bf16.msra.mxu0 %v4605_v0 }
 0x134   :  { %3326 = vmatprep.subr.bf16.mxu0 %v4613_v3 }
 0x135   :  { %3376 = vmatpush2.bf16.msra.mxu1 %v4608_v2  ;;  %v4668_v2 = vld [vmem:[%s6349_s1 + $0xb34] ss:$8 sps:$4 sm:$0xff]  }
 0x136   :  { %3377 = vmatprep.subr.bf16.mxu1 %v4616_v4 }
 0x137   :  { %3327 = vmatpush2.bf16.msra.mxu0 %v4611_v5  ;;  %v4671_v5 = vld [vmem:[%s6349_s1 + $0xa24] ss:$8 sps:$4 sm:$0xff]  }
 0x138   :  { %3328 = vmatprep.subr.bf16.mxu0 %v4619_v6 }
 0x139   :  { %3378 = vmatpush2.bf16.msra.mxu1 %v4614_v7 }
 0x13a   :  { %3379 = vmatprep.subr.bf16.mxu1 %v4622_v8  ;;  %v4666_v8 = vld [vmem:[%s6349_s1 + $0xb30] ss:$8 sps:$4 sm:$0xff]  }
 0x13b   :  { %3329 = vmatpush2.bf16.msra.mxu0 %v4617_v9  ;;  %v4674_v9 = vld [vmem:[%s6349_s1 + $0xb24] ss:$8 sps:$4 sm:$0xff]  }
 0x13c   :  { %3330 = vmatprep.subr.bf16.mxu0 %v4625_v11 }
 0x13d   :  { %3380 = vmatpush2.bf16.msra.mxu1 %v4620_v12  ;;  %v4669_v12 = vld [vmem:[%s6349_s1 + $0xa20] ss:$8 sps:$4 sm:$0xff]  }
 0x13e   :  { %3381 = vmatprep.subr.bf16.mxu1 %v4628_v13  ;;  %v4677_v13 = vld [vmem:[%s6349_s1 + $0xa14] ss:$8 sps:$4 sm:$0xff]  }
 0x13f   :  { %3331 = vmatpush2.bf16.msra.mxu0 %v4623_v15  ;;  %v4672_v15 = vld [vmem:[%s6349_s1 + $0xb20] ss:$8 sps:$4 sm:$0xff]  }
 0x140   :  { %3402 = vmatprep.subr.bf16.mxu0 %v4634_v16  ;;  %v4680_v16 = vld [vmem:[%s6349_s1 + $0xb14] ss:$8 sps:$4 sm:$0xff]  }
 0x141   :  { %3382 = vmatpush2.bf16.msra.mxu1 %v4626_v18  ;;  %v4683_v18 = vld [vmem:[%s6349_s1 + $0xa04] ss:$8 sps:$4 sm:$0xff]  }
 0x142   :  { %v3028_v28 = vpop.f32.mrf.mxu0  ;;  %3333 = vmatmul.mubr.bf16.vlgmr.msra.gmra.mxu0 %v4629_v19  ;;  %3453 = vmatprep.subr.bf16.mxu1 %v4640_v20  ;;  %v4678_v19 = vld [vmem:[%s6349_s1 + $0xb10] ss:$8 sps:$4 sm:$0xff]   ;;  %v4686_v20 = vld [vmem:[%s6349_s1 + $0xb04] ss:$8 sps:$4 sm:$0xff]  }
 0x143   :  { %v3029_v30 = vadd.f32 %v3028_v28, %v5718_v58  ;;  %3403 = vmatpush1.bf16.msra.mxu0 %v4632_v22  ;;  %3342 = vmatprep.mubr.bf16.mxu0 %v3666_v23  ;;  %v4644_v58 = vld [vmem:[%s6349_s1 + $0xb60] ss:$8 sps:$4 sm:$0xff]   ;;  %v4689_v22 = vld [vmem:[%s6349_s1 + $0xaf4] ss:$8 sps:$4 sm:$0xff]   ;;  %v4698_v28 = vld [vmem:[%s6349_s1 + $0xbe4] ss:$8 sps:$4 sm:$0xff]  }
 0x144   :  { %v3030_v32 = vpop.f32.mrf.mxu0  ;;  %v3079_v33 = vpop.f32.mrf.mxu1  ;;  %3384 = vmatmul.mubr.bf16.vlgmr.msra.gmra.mxu1 %v4635_v24  ;;  %3404 = vmatprep.subr.bf16.mxu0 %v4643_v25  ;;  %v4684_v23 = vld [vmem:[%s6349_s1 + $0xb00] ss:$8 sps:$4 sm:$0xff]   ;;  %v4692_v24 = vld [vmem:[%s6349_s1 + $0xbf4] ss:$8 sps:$4 sm:$0xff]   ;;  %v4687_v25 = vld [vmem:[%s6349_s1 + $0xaf0] ss:$8 sps:$4 sm:$0xff]  }
 0x145   :  { %v3031_v35 = vadd.f32 %v3030_v32, %v5727_v1  ;;  %v5946_v37 = vadd.f32 %v3079_v33, %v3029_v30  ;;  %3454 = vmatpush1.bf16.msra.mxu1 %v4638_v26  ;;  %3393 = vmatprep.mubr.bf16.mxu1 %v3668_v27  ;;  %v4649_v1 = vld [vmem:[%s6349_s1 + $0xa50] ss:$8 sps:$4 sm:$0xff]   ;;  %v4695_v26 = vld [vmem:[%s6349_s1 + $0xae4] ss:$8 sps:$4 sm:$0xff]   ;;  %v4701_v30 = vld [vmem:[%s6349_s1 + $0xad4] ss:$8 sps:$4 sm:$0xff]  }
 0x146   :  { %v3032_v38 = vpop.f32.mrf.mxu0  ;;  %v3081_v39 = vpop.f32.mrf.mxu1  ;;  %3455 = vmatprep.subr.bf16.mxu1 %v4646_v29  ;;  %v4690_v27 = vld [vmem:[%s6349_s1 + $0xbf0] ss:$8 sps:$4 sm:$0xff]   ;;  %v4693_v29 = vld [vmem:[%s6349_s1 + $0xae0] ss:$8 sps:$4 sm:$0xff]   ;;  %v4704_v32 = vld [vmem:[%s6349_s1 + $0xbd4] ss:$8 sps:$4 sm:$0xff]  }
 0x147   :  { %v3033_v43 = vadd.f32 %v3032_v38, %v5742_v10  ;;  %v5955_v44 = vadd.f32 %v3081_v39, %v3031_v35  ;;  %3405 = vmatpush1.bf16.msra.mxu0 %v4641_v31  ;;  %v4696_v31 = vld [vmem:[%s6349_s1 + $0xbe0] ss:$8 sps:$4 sm:$0xff]   ;;  %v4699_v33 = vld [vmem:[%s6349_s1 + $0xad0] ss:$8 sps:$4 sm:$0xff]   ;;  %v4713_v39 = vld [vmem:[%s6349_s1 + $0xab4] ss:$8 sps:$4 sm:$0xff]  }
 0x148   :  { %v3034_v46 = vpop.f32.mrf.mxu0  ;;  %v3083_v47 = vpop.f32.mrf.mxu1  ;;  %3406 = vmatprep.subr.bf16.mxu0 %v4651_v34  ;;  %v4707_v34 = vld [vmem:[%s6349_s1 + $0xac4] ss:$8 sps:$4 sm:$0xff]   ;;  %v4702_v35 = vld [vmem:[%s6349_s1 + $0xbd0] ss:$8 sps:$4 sm:$0xff]   ;;  %v4705_v38 = vld [vmem:[%s6349_s1 + $0xac0] ss:$8 sps:$4 sm:$0xff]  }
 0x149   :  { %v3035_v10 = vadd.f32 %v3034_v46, %v5750_v14  ;;  %v5967_v50 = vadd.f32 %v3083_v47, %v3033_v43  ;;  %3456 = vmatpush1.bf16.msra.mxu1 %v4644_v58  ;;  %v4710_v58 = vld [vmem:[%s6349_s1 + $0xbc4] ss:$8 sps:$4 sm:$0xff]   ;;  %v4711_v43 = vld [vmem:[%s6349_s1 + $0xab0] ss:$8 sps:$4 sm:$0xff]   ;;  %v4717_v47 = vld [vmem:[%s6349_s1 + $0xaa0] ss:$8 sps:$4 sm:$0xff]  }
 0x14a   :  { %v3038_v53 = vpop.f32.mrf.mxu0  ;;  %v3085_v54 = vpop.f32.mrf.mxu1  ;;  %3343 = vmatmul.mubr.bf16.gmra.mxu0 %v3665_v41  ;;  %3457 = vmatprep.subr.bf16.mxu1 %v4656_v42  ;;  %v4708_v41 = vld [vmem:[%s6349_s1 + $0xbc0] ss:$8 sps:$4 sm:$0xff]   ;;  %v4716_v42 = vld [vmem:[%s6349_s1 + $0xbb4] ss:$8 sps:$4 sm:$0xff]   ;;  %v4722_v46 = vld [vmem:[%s6349_s1 + $0xba4] ss:$8 sps:$4 sm:$0xff]  }
 0x14b   :  { %v3039_v14 = vadd.f32 %v3038_v53, %v5796_v36  ;;  %v5979_v56 = vadd.f32 %v3085_v54, %v3035_v10  ;;  %3407 = vmatpush1.bf16.msra.mxu0 %v4649_v1  ;;  %3434 = vmatprep.mubr.bf16.mxu0 %v4737_v45  ;;  %v4660_v36 = vld [vmem:[%s6349_s1 + $0xb40] ss:$8 sps:$4 sm:$0xff]   ;;  %v4719_v1 = vld [vmem:[%s6349_s1 + $0xaa4] ss:$8 sps:$4 sm:$0xff]   ;;  %v4714_v45 = vld [vmem:[%s6349_s1 + $0xbb0] ss:$8 sps:$4 sm:$0xff]  }
 0x14c   :  { %v3040_v59 = vpop.f32.mrf.mxu0  ;;  %v3089_v60 = vpop.f32.mrf.mxu1  ;;  %3394 = vmatmul.mubr.bf16.gmra.mxu1 %v3667_v48  ;;  %3408 = vmatprep.subr.bf16.mxu0 %v4659_v49  ;;  %v4725_v48 = vld [vmem:[%s6349_s1 + $0xa94] ss:$8 sps:$4 sm:$0xff]   ;;  %v4720_v49 = vld [vmem:[%s6349_s1 + $0xba0] ss:$8 sps:$4 sm:$0xff]   ;;  %v4726_v53 = vld [vmem:[%s6349_s1 + $0xb90] ss:$8 sps:$4 sm:$0xff]  }
 0x14d   :  { %v3041_v62 = vadd.f32 %v3040_v59, %v5804_v40  ;;  %v5988_v63 = vadd.f32 %v3089_v60, %v3039_v14  ;;  %3458 = vmatpush1.bf16.msra.mxu1 %v4654_v51  ;;  %3485 = vmatprep.mubr.bf16.mxu1 %v4743_v52  ;;  %v4663_v40 = vld [vmem:[%s6349_s1 + $0xa30] ss:$8 sps:$4 sm:$0xff]   ;;  %v4728_v10 = vld [vmem:[%s6349_s1 + $0xb94] ss:$8 sps:$4 sm:$0xff]   ;;  %v4731_v52 = vld [vmem:[%s6349_s1 + $0xa84] ss:$8 sps:$4 sm:$0xff]  }
 0x14e   :  { %v3091_v0 = vpop.f32.mrf.mxu1  ;;  %3459 = vmatprep.subr.bf16.mxu1 %v4662_v55  ;;  %v3042_v3 = vpop.f32.mrf.mxu0  ;;  %v4723_v51 = vld [vmem:[%s6349_s1 + $0xa90] ss:$8 sps:$4 sm:$0xff]   ;;  %v4734_v54 = vld [vmem:[%s6349_s1 + $0xb84] ss:$8 sps:$4 sm:$0xff]   ;;  %v4729_v55 = vld [vmem:[%s6349_s1 + $0xa80] ss:$8 sps:$4 sm:$0xff]  }
 0x14f   :  { %v5996_v4 = vadd.f32 %v3091_v0, %v3041_v62  ;;  %3409 = vmatpush1.bf16.msra.mxu0 %v4657_v57  ;;  %v4740_v14 = vld [vmem:[%s6349_s1 + $0xc74] ss:$8 sps:$4 sm:$0xff]   ;;  %v53_v57 = vld [vmem:[%s6350_s0 + $0x128] sm:$0xff] }
 0x150   :  { %3410 = vmatprep.subr.bf16.mxu0 %v4665_v61  ;;  %v3043_v6 = vpop.f32.mrf.mxu0  ;;  %v3093_v7 = vpop.f32.mrf.mxu1  ;;  %v4732_v59 = vld [vmem:[%s6349_s1 + $0xb80] ss:$8 sps:$4 sm:$0xff]   ;;  %v4735_v60 = vld [vmem:[%s6350_s0 + $0x50] ss:$108 sps:$4 sm:$0xff]   ;;  %v3670_v0 = vcombine.high %v53_v57, %v53_v57  ;;  %v4746_v3 = vld [vmem:[%s6349_s1 + $0xc64] ss:$8 sps:$4 sm:$0xff]  }
 0x151   :  { %3460 = vmatpush1.bf16.msra.mxu1 %v4660_v36  ;;  %v54_v61 = vld [vmem:[%s6350_s0 + $0x130] sm:$0xff]  ;;  %v4777_v7 = vld [vmem:[%s6349_s1 + $0xd64] ss:$8 sps:$4 sm:$0xff]  }
 0x152   :  { %3461 = vmatprep.subr.bf16.mxu1 %v4668_v2  ;;  %v3094_v11 = vpop.f32.mrf.mxu1  ;;  %v4771_v62 = vld [vmem:[%s6349_s1 + $0xd74] ss:$8 sps:$4 sm:$0xff]   ;;  %v4738_v36 = vld [vmem:[%s6349_s1 + $0xc70] ss:$8 sps:$4 sm:$0xff]  }
 0x153   :  { %3411 = vmatpush1.bf16.msra.mxu0 %v4663_v40  ;;  %v4741_v2 = vld [vmem:[%s6350_s0 + $0x58] ss:$108 sps:$4 sm:$0xff]   ;;  %v3672_v40 = vcombine.high %v54_v61, %v54_v61 }
 0x154   :  { %3412 = vmatprep.subr.bf16.mxu0 %v4671_v5  ;;  %v4769_v5 = vld [vmem:[%s6349_s1 + $0xd70] ss:$8 sps:$4 sm:$0xff]  }
 0x155   :  { %3462 = vmatpush1.bf16.msra.mxu1 %v4666_v8 }
 0x156   :  { %3463 = vmatprep.subr.bf16.mxu1 %v4674_v9  ;;  %v4744_v9 = vld [vmem:[%s6349_s1 + $0xc60] ss:$8 sps:$4 sm:$0xff]  }
 0x157   :  { %3413 = vmatpush1.bf16.msra.mxu0 %v4669_v12 }
 0x158   :  { %3414 = vmatprep.subr.bf16.mxu0 %v4677_v13  ;;  %v4751_v13 = vld [vmem:[%s6349_s1 + $0xc54] ss:$8 sps:$4 sm:$0xff]  }
 0x159   :  { %3464 = vmatpush1.bf16.msra.mxu1 %v4672_v15 }
 0x15a   :  { %3465 = vmatprep.subr.bf16.mxu1 %v4680_v16 }
 0x15b   :  { %3415 = vmatpush1.bf16.msra.mxu0 %v4675_v17 }
 0x15c   :  { %3416 = vmatprep.subr.bf16.mxu0 %v4683_v18 }
 0x15d   :  { %3466 = vmatpush1.bf16.msra.mxu1 %v4678_v19  ;;  %v3669_v19 = vcombine.low %v53_v57, %v53_v57  ;;  %v4763_v57 = vld [vmem:[%s6349_s1 + $0xc10] ss:$8 sps:$4 sm:$0xff]  }
 0x15e   :  { %3467 = vmatprep.subr.bf16.mxu1 %v4686_v20  ;;  %v4783_v20 = vld [vmem:[%s6349_s1 + $0xd54] ss:$8 sps:$4 sm:$0xff]  }
 0x15f   :  { %3417 = vmatpush1.bf16.msra.mxu0 %v4681_v21 }
 0x160   :  { %3418 = vmatprep.subr.bf16.mxu0 %v4689_v22 }
 0x161   :  { %3468 = vmatpush1.bf16.msra.mxu1 %v4684_v23  ;;  %v4820_v23 = vld [vmem:[%s6350_s0 + $0x64] ss:$108 sps:$4 sm:$0xff]  }
 0x162   :  { %3469 = vmatprep.subr.bf16.mxu1 %v4692_v24 }
 0x163   :  { %3419 = vmatpush2.bf16.msra.mxu0 %v4687_v25 }
 0x164   :  { %3420 = vmatprep.subr.bf16.mxu0 %v4695_v26  ;;  %v3671_v26 = vcombine.low %v54_v61, %v54_v61  ;;  %v4813_v61 = vld [vmem:[%s6349_s1 + $0xd04] ss:$8 sps:$4 sm:$0xff]  }
 0x165   :  { %3470 = vmatpush2.bf16.msra.mxu1 %v4690_v27  ;;  %v4756_v27 = vld [vmem:[%s6349_s1 + $0xc44] ss:$8 sps:$4 sm:$0xff]  }
 0x166   :  { %3471 = vmatprep.subr.bf16.mxu1 %v4698_v28 }
 0x167   :  { %3421 = vmatpush2.bf16.msra.mxu0 %v4693_v29  ;;  %v4781_v29 = vld [vmem:[%s6349_s1 + $0xd50] ss:$8 sps:$4 sm:$0xff]  }
 0x168   :  { %3422 = vmatprep.subr.bf16.mxu0 %v4701_v30 }
 0x169   :  { %3472 = vmatpush2.bf16.msra.mxu1 %v4696_v31 }
 0x16a   :  { %3473 = vmatprep.subr.bf16.mxu1 %v4704_v32  ;;  %v4789_v32 = vld [vmem:[%s6349_s1 + $0xd44] ss:$8 sps:$4 sm:$0xff]  }
 0x16b   :  { %3423 = vmatpush2.bf16.msra.mxu0 %v4699_v33 }
 0x16c   :  { %3424 = vmatprep.subr.bf16.mxu0 %v4707_v34 }
 0x16d   :  { %3474 = vmatpush2.bf16.msra.mxu1 %v4702_v35 }
 0x16e   :  { %3475 = vmatprep.subr.bf16.mxu1 %v4710_v58 }
 0x16f   :  { %3425 = vmatpush2.bf16.msra.mxu0 %v4705_v38  ;;  %v4759_v38 = vld [vmem:[%s6349_s1 + $0xc34] ss:$8 sps:$4 sm:$0xff]  }
 0x170   :  { %3426 = vmatprep.subr.bf16.mxu0 %v4713_v39 }
 0x171   :  { %3476 = vmatpush2.bf16.msra.mxu1 %v4708_v41 }
 0x172   :  { %3477 = vmatprep.subr.bf16.mxu1 %v4716_v42  ;;  %v4824_v42 = vmov 0  }
 0x173   :  { %3427 = vmatpush2.bf16.msra.mxu0 %v4711_v43 }
 0x174   :  { %3428 = vmatprep.subr.bf16.mxu0 %v4719_v1  ;;  %v4795_v1 = vld [vmem:[%s6349_s1 + $0xd34] ss:$8 sps:$4 sm:$0xff]  }
 0x175   :  { %3478 = vmatpush2.bf16.msra.mxu1 %v4714_v45 }
 0x176   :  { %3479 = vmatprep.subr.bf16.mxu1 %v4722_v46 }
 0x177   :  { %3429 = vmatpush2.bf16.msra.mxu0 %v4717_v47  ;;  %v4762_v47 = vld [vmem:[%s6349_s1 + $0xc24] ss:$8 sps:$4 sm:$0xff]  }
 0x178   :  { %3430 = vmatprep.subr.bf16.mxu0 %v4725_v48 }
 0x179   :  { %3480 = vmatpush2.bf16.msra.mxu1 %v4720_v49 }
 0x17a   :  { %3481 = vmatprep.subr.bf16.mxu1 %v4728_v10  ;;  %v4793_v10 = vld [vmem:[%s6349_s1 + $0xd30] ss:$8 sps:$4 sm:$0xff]  }
 0x17b   :  { %3431 = vmatpush2.bf16.msra.mxu0 %v4723_v51  ;;  %v4801_v51 = vld [vmem:[%s6349_s1 + $0xd24] ss:$8 sps:$4 sm:$0xff]  }
 0x17c   :  { %3432 = vmatprep.subr.bf16.mxu0 %v4731_v52 }
 0x17d   :  { %3482 = vmatpush2.bf16.msra.mxu1 %v4726_v53  ;;  %v4760_v53 = vld [vmem:[%s6349_s1 + $0xc20] ss:$8 sps:$4 sm:$0xff]  }
 0x17e   :  { %3483 = vmatprep.subr.bf16.mxu1 %v4734_v54  ;;  %v4765_v54 = vld [vmem:[%s6349_s1 + $0xc14] ss:$8 sps:$4 sm:$0xff]  }
 0x17f   :  { %3433 = vmatpush2.bf16.msra.mxu0 %v4729_v55  ;;  %v4799_v55 = vld [vmem:[%s6349_s1 + $0xd20] ss:$8 sps:$4 sm:$0xff]  }
 0x180   :  { %3504 = vmatprep.subr.bf16.mxu0 %v4740_v14  ;;  %v4807_v14 = vld [vmem:[%s6349_s1 + $0xd14] ss:$8 sps:$4 sm:$0xff]  }
 0x181   :  { %3484 = vmatpush2.bf16.msra.mxu1 %v4732_v59  ;;  %v4768_v59 = vld [vmem:[%s6349_s1 + $0xc04] ss:$8 sps:$4 sm:$0xff]  }
 0x182   :  { %v3130_v6 = vpop.f32.mrf.mxu0  ;;  %3435 = vmatmul.mubr.bf16.vlgmr.msra.gmra.mxu0 %v4735_v60  ;;  %3555 = vmatprep.subr.bf16.mxu1 %v4771_v62  ;;  %v4805_v60 = vld [vmem:[%s6349_s1 + $0xd10] ss:$8 sps:$4 sm:$0xff]   ;;  %v4766_v62 = vld [vmem:[%s6349_s1 + $0xc00] ss:$8 sps:$4 sm:$0xff]  }
 0x183   :  { %v3131_v8 = vadd.f32 %v3130_v6, %v5946_v37  ;;  %3505 = vmatpush1.bf16.msra.mxu0 %v4738_v36  ;;  %3444 = vmatprep.mubr.bf16.mxu0 %v3670_v0  ;;  %v4775_v37 = vld [vmem:[%s6349_s1 + $0xd60] ss:$8 sps:$4 sm:$0xff]   ;;  %v4774_v36 = vld [vmem:[%s6349_s1 + $0xcf4] ss:$8 sps:$4 sm:$0xff]  }
 0x184   :  { %v3132_v11 = vpop.f32.mrf.mxu0  ;;  %v3181_v12 = vpop.f32.mrf.mxu1  ;;  %3486 = vmatmul.mubr.bf16.vlgmr.msra.gmra.mxu1 %v4741_v2  ;;  %3506 = vmatprep.subr.bf16.mxu0 %v4746_v3  ;;  %v4811_v0 = vld [vmem:[%s6349_s1 + $0xd00] ss:$8 sps:$4 sm:$0xff]   ;;  %v4772_v2 = vld [vmem:[%s6349_s1 + $0xcf0] ss:$8 sps:$4 sm:$0xff]   ;;  %v4780_v3 = vld [vmem:[%s6349_s1 + $0xce4] ss:$8 sps:$4 sm:$0xff]  }
 0x185   :  { %v3133_v15 = vadd.f32 %v3132_v11, %v5955_v44  ;;  %v6174_v16 = vadd.f32 %v3181_v12, %v3131_v8  ;;  %3495 = vmatprep.mubr.bf16.mxu1 %v3672_v40  ;;  %3556 = vmatpush1.bf16.msra.mxu1 %v4769_v5  ;;  %v4749_v44 = vld [vmem:[%s6349_s1 + $0xc50] ss:$8 sps:$4 sm:$0xff]   ;;  %v4817_v40 = vld [vmem:[%s6350_s0 + $0x68] ss:$108 sps:$4 sm:$0xff]   ;;  %v4792_v8 = vld [vmem:[%s6349_s1 + $0xcc4] ss:$8 sps:$4 sm:$0xff]  }
 0x186   :  { %v3134_v17 = vpop.f32.mrf.mxu0  ;;  %v3183_v18 = vpop.f32.mrf.mxu1  ;;  %3557 = vmatprep.subr.bf16.mxu1 %v4777_v7  ;;  %v4778_v5 = vld [vmem:[%s6349_s1 + $0xce0] ss:$8 sps:$4 sm:$0xff]   ;;  %v4786_v6 = vld [vmem:[%s6349_s1 + $0xcd4] ss:$8 sps:$4 sm:$0xff]   ;;  %v4784_v7 = vld [vmem:[%s6349_s1 + $0xcd0] ss:$8 sps:$4 sm:$0xff]  }
 0x187   :  { %v3135_v21 = vadd.f32 %v3134_v17, %v5967_v50  ;;  %v6183_v22 = vadd.f32 %v3183_v18, %v3133_v15  ;;  %3507 = vmatpush1.bf16.msra.mxu0 %v4744_v9  ;;  %v4821_v9 = vld [vmem:[%s6350_s0 + $0x140] ss:$0 sps:$4 sm:$0xff]   ;;  %v4798_v12 = vld [vmem:[%s6349_s1 + $0xcb4] ss:$8 sps:$4 sm:$0xff]   ;;  %v4804_v15 = vld [vmem:[%s6349_s1 + $0xca4] ss:$8 sps:$4 sm:$0xff]  }
 0x188   :  { %v3136_v24 = vpop.f32.mrf.mxu0  ;;  %v3185_v25 = vpop.f32.mrf.mxu1  ;;  %3508 = vmatprep.subr.bf16.mxu0 %v4751_v13  ;;  %v4790_v11 = vld [vmem:[%s6349_s1 + $0xcc0] ss:$8 sps:$4 sm:$0xff]   ;;  %v4796_v13 = vld [vmem:[%s6349_s1 + $0xcb0] ss:$8 sps:$4 sm:$0xff]   ;;  %v4810_v17 = vld [vmem:[%s6349_s1 + $0xc94] ss:$8 sps:$4 sm:$0xff]  }
 0x189   :  { %v3137_v50 = vadd.f32 %v3136_v24, %v5979_v56  ;;  %v6195_v28 = vadd.f32 %v3185_v25, %v3135_v21  ;;  %3558 = vmatpush1.bf16.msra.mxu1 %v4775_v37  ;;  %v4754_v56 = vld [vmem:[%s6349_s1 + $0xc40] ss:$8 sps:$4 sm:$0xff]   ;;  %v4808_v18 = vld [vmem:[%s6349_s1 + $0xc90] ss:$8 sps:$4 sm:$0xff]  }
 0x18a   :  { %v3140_v30 = vpop.f32.mrf.mxu0  ;;  %v3187_v31 = vpop.f32.mrf.mxu1  ;;  %3445 = vmatmul.mubr.bf16.gmra.mxu0 %v3669_v19  ;;  %3559 = vmatprep.subr.bf16.mxu1 %v4783_v20  ;;  %v4802_v37 = vld [vmem:[%s6349_s1 + $0xca0] ss:$8 sps:$4 sm:$0xff]   ;;  %v4816_v19 = vld [vmem:[%s6349_s1 + $0xc84] ss:$8 sps:$4 sm:$0xff]   ;;  %v55_v21 = vld [vmem:[%s6350_s0 + $0x138] sm:$0xff] }
 0x18b   :  { %v3141_v33 = vadd.f32 %v3140_v30, %v5988_v63  ;;  %v6204_v34 = vadd.f32 %v3187_v31, %v3137_v50  ;;  %3509 = vmatpush1.bf16.msra.mxu0 %v4749_v44  ;;  %3536 = vmatprep.mubr.bf16.mxu0 %v4820_v23  ;;  %v4787_v63 = vld [vmem:[%s6349_s1 + $0xd40] ss:$8 sps:$4 sm:$0xff]   ;;  %v3674_v23 = vcombine.high %v55_v21, %v55_v21 }
 0x18c   :  { %v3142_v35 = vpop.f32.mrf.mxu0  ;;  %v3191_v58 = vpop.f32.mrf.mxu1  ;;  %3496 = vmatmul.mubr.bf16.gmra.mxu1 %v3671_v26  ;;  %3510 = vmatprep.subr.bf16.mxu0 %v4756_v27  ;;  %v4814_v20 = vld [vmem:[%s6349_s1 + $0xc80] ss:$8 sps:$4 sm:$0xff]  }
 0x18d   :  { %v3143_v39 = vadd.f32 %v3142_v35, %v5996_v4  ;;  %v6213_v41 = vadd.f32 %v3191_v58, %v3141_v33  ;;  %3560 = vmatpush1.bf16.msra.mxu1 %v4781_v29  ;;  %3587 = vmatprep.mubr.bf16.mxu1 %v4824_v42  ;;  %v4757_v4 = vld [vmem:[%s6349_s1 + $0xc30] ss:$8 sps:$4 sm:$0xff]   ;;  %v4818_v44 = vld [vmem:[%s6350_s0 + $0x60] ss:$108 sps:$4 sm:$0xff]  }
 0x18e   :  { %v3193_v43 = vpop.f32.mrf.mxu1  ;;  %3561 = vmatprep.subr.bf16.mxu1 %v4789_v32  ;;  %v3144_v45 = vpop.f32.mrf.mxu0  ;;  %v3673_v32 = vcombine.low %v55_v21, %v55_v21 }
 0x18f   :  { %v6221_v46 = vadd.f32 %v3193_v43, %v3143_v39  ;;  %3511 = vmatpush1.bf16.msra.mxu0 %v4754_v56 }
 0x190   :  { %3512 = vmatprep.subr.bf16.mxu0 %v4759_v38  ;;  %v3145_v48 = vpop.f32.mrf.mxu0  ;;  %v3195_v49 = vpop.f32.mrf.mxu1 }
 0x191   :  { %3562 = vmatpush1.bf16.msra.mxu1 %v4787_v63 }
 0x192   :  { %3563 = vmatprep.subr.bf16.mxu1 %v4795_v1  ;;  %v3196_v52 = vpop.f32.mrf.mxu1 }
 0x193   :  { %3513 = vmatpush1.bf16.msra.mxu0 %v4757_v4 }
 0x194   :  { %3514 = vmatprep.subr.bf16.mxu0 %v4762_v47 }
 0x195   :  { %3564 = vmatpush1.bf16.msra.mxu1 %v4793_v10 }
 0x196   :  { %3565 = vmatprep.subr.bf16.mxu1 %v4801_v51 }
 0x197   :  { %3515 = vmatpush1.bf16.msra.mxu0 %v4760_v53 }
 0x198   :  { %3516 = vmatprep.subr.bf16.mxu0 %v4765_v54 }
 0x199   :  { %3566 = vmatpush1.bf16.msra.mxu1 %v4799_v55 }
 0x19a   :  { %3567 = vmatprep.subr.bf16.mxu1 %v4807_v14 }
 0x19b   :  { %3517 = vmatpush1.bf16.msra.mxu0 %v4763_v57 }
 0x19c   :  { %3518 = vmatprep.subr.bf16.mxu0 %v4768_v59 }
 0x19d   :  { %3568 = vmatpush1.bf16.msra.mxu1 %v4805_v60 }
 0x19e   :  { %3569 = vmatprep.subr.bf16.mxu1 %v4813_v61 }
 0x19f   :  { %3519 = vmatpush1.bf16.msra.mxu0 %v4766_v62 }
 0x1a0   :  { %3520 = vmatprep.subr.bf16.mxu0 %v4774_v36 }
 0x1a1   :  { %3570 = vmatpush1.bf16.msra.mxu1 %v4811_v0 }
 0x1a3   :  { %3521 = vmatpush2.bf16.msra.mxu0 %v4772_v2 }
 0x1a4   :  { %3522 = vmatprep.subr.bf16.mxu0 %v4780_v3  ;;  %3588 = vmatmul.mubr.bf16.vlgmr.msra.gmra.mxu1 %v4817_v40 }
 0x1a5   :  { %3597 = vmatprep.mubr.bf16.mxu1 %v4824_v42 }
 0x1a7   :  { %3523 = vmatpush2.bf16.msra.mxu0 %v4778_v5 }
 0x1a8   :  { %3524 = vmatprep.subr.bf16.mxu0 %v4786_v6 }
 0x1ab   :  { %3525 = vmatpush2.bf16.msra.mxu0 %v4784_v7 }
 0x1ac   :  { %3526 = vmatprep.subr.bf16.mxu0 %v4792_v8  ;;  %3598 = vmatmul.mubr.bf16.gmra.mxu1 %v4821_v9 }
 0x1af   :  { %3527 = vmatpush2.bf16.msra.mxu0 %v4790_v11 }
 0x1b0   :  { %3528 = vmatprep.subr.bf16.mxu0 %v4798_v12 }
 0x1b3   :  { %3529 = vmatpush2.bf16.msra.mxu0 %v4796_v13 }
 0x1b4   :  { %3530 = vmatprep.subr.bf16.mxu0 %v4804_v15 }
 0x1b7   :  { %3531 = vmatpush2.bf16.msra.mxu0 %v4802_v37 }
 0x1b8   :  { %3532 = vmatprep.subr.bf16.mxu0 %v4810_v17 }
 0x1bb   :  { %3533 = vmatpush2.bf16.msra.mxu0 %v4808_v18 }
 0x1bc   :  { %3534 = vmatprep.subr.bf16.mxu0 %v4816_v19 }
 0x1bf   :  { %3535 = vmatpush2.bf16.msra.mxu0 %v4814_v20 }
 0x1c2   :  { %v3232_v24 = vpop.f32.mrf.mxu0  ;;  %3537 = vmatmul.mubr.bf16.vlgmr.msra.gmra.mxu0 %v4818_v44 }
 0x1c3   :  { %v3233_v25 = vadd.f32 %v3232_v24, %v6174_v16  ;;  %3546 = vmatprep.mubr.bf16.mxu0 %v3674_v23 }
 0x1c4   :  { %v3234_v26 = vpop.f32.mrf.mxu0  ;;  %v3283_v27 = vpop.f32.mrf.mxu1 }
 0x1c5   :  { %v3235_v50 = vadd.f32 %v3234_v26, %v6183_v22  ;;  %v3284_v29 = vadd.f32 %v3283_v27, %v3233_v25 }
 0x1c6   :  { %v3236_v30 = vpop.f32.mrf.mxu0  ;;  %v3285_v31 = vpop.f32.mrf.mxu1 }
 0x1c7   :  { %v3237_v33 = vadd.f32 %v3236_v30, %v6195_v28  ;;  %v3286_v56 = vadd.f32 %v3285_v31, %v3235_v50 }
 0x1c8   :  { %v3238_v35 = vpop.f32.mrf.mxu0  ;;  %v3287_v58 = vpop.f32.mrf.mxu1 }
 0x1c9   :  { %v3239_v38 = vadd.f32 %v3238_v35, %v6204_v34  ;;  %v3288_v39 = vadd.f32 %v3287_v58, %v3237_v33 }
 0x1ca   :  { %v3242_v63 = vpop.f32.mrf.mxu0  ;;  %v3289_v42 = vpop.f32.mrf.mxu1  ;;  %3547 = vmatmul.mubr.bf16.gmra.mxu0 %v3673_v32 }
 0x1cb   :  { %v3243_v16 = vadd.f32 %v3242_v63, %v6213_v41  ;;  %v3290_v43 = vadd.f32 %v3289_v42, %v3239_v38 }
 0x1cc   :  { %v3244_v1 = vpop.f32.mrf.mxu0  ;;  %v3293_v22 = vpop.f32.mrf.mxu1 }
 0x1cd   :  { %v3245_v45 = vadd.f32 %v3244_v1, %v6221_v46  ;;  %v3294_v4 = vadd.f32 %v3293_v22, %v3243_v16 }
 0x1ce   :  { %v3295_v47 = vpop.f32.mrf.mxu1  ;;  %v3246_v48 = vpop.f32.mrf.mxu0 }
 0x1cf   :  { %v3296_v28 = vadd.f32 %v3295_v47, %v3245_v45 }
 0x1d0   :  { %v3247_v49 = vpop.f32.mrf.mxu0  ;;  %v3297_v10 = vpop.f32.mrf.mxu1 }
 0x1d2   :  { %v3298_v51 = vpop.f32.mrf.mxu1 }
 0x202   :  { %v3334_v52 = vpop.f32.mrf.mxu0 }
 0x203   :  { %v3335_v34 = vadd.f32 %v3334_v52, %v3284_v29 }
 0x204   :  { %v3336_v53 = vpop.f32.mrf.mxu0  ;;  %v3385_v54 = vpop.f32.mrf.mxu1 }
 0x205   :  { %v3337_v55 = vadd.f32 %v3336_v53, %v3286_v56  ;;  %v3386_v14 = vadd.f32 %v3385_v54, %v3335_v34 }
 0x206   :  { %v3338_v57 = vpop.f32.mrf.mxu0  ;;  %v3387_v41 = vpop.f32.mrf.mxu1 }
 0x207   :  { %v3339_v59 = vadd.f32 %v3338_v57, %v3288_v39  ;;  %v3388_v60 = vadd.f32 %v3387_v41, %v3337_v55 }
 0x208   :  { %v3340_v61 = vpop.f32.mrf.mxu0  ;;  %v3389_v62 = vpop.f32.mrf.mxu1 }
 0x209   :  { %v3341_v46 = vadd.f32 %v3340_v61, %v3290_v43  ;;  %v3390_v36 = vadd.f32 %v3389_v62, %v3339_v59 }
 0x20a   :  { %v3344_v0 = vpop.f32.mrf.mxu0  ;;  %v3391_v2 = vpop.f32.mrf.mxu1 }
 0x20b   :  { %v3345_v3 = vadd.f32 %v3344_v0, %v3294_v4  ;;  %v3392_v40 = vadd.f32 %v3391_v2, %v3341_v46 }
 0x20c   :  { %v3346_v5 = vpop.f32.mrf.mxu0  ;;  %v3395_v6 = vpop.f32.mrf.mxu1 }
 0x20d   :  { %v3347_v7 = vadd.f32 %v3346_v5, %v3296_v28  ;;  %v3396_v8 = vadd.f32 %v3395_v6, %v3345_v3 }
 0x20e   :  { %v3397_v9 = vpop.f32.mrf.mxu1  ;;  %v3348_v11 = vpop.f32.mrf.mxu0 }
 0x20f   :  { %v3398_v12 = vadd.f32 %v3397_v9, %v3347_v7 }
 0x210   :  { %v3349_v13 = vpop.f32.mrf.mxu0  ;;  %v3399_v15 = vpop.f32.mrf.mxu1 }
 0x212   :  { %v3400_v37 = vpop.f32.mrf.mxu1 }
 0x242   :  { %v3436_v17 = vpop.f32.mrf.mxu0 }
 0x243   :  { %v3437_v16 = vadd.f32 %v3436_v17, %v3386_v14 }
 0x244   :  { %v3438_v18 = vpop.f32.mrf.mxu0  ;;  %v3487_v19 = vpop.f32.mrf.mxu1 }
 0x245   :  { %v3439_v43 = vadd.f32 %v3438_v18, %v3388_v60  ;;  %v3488_v1 = vadd.f32 %v3487_v19, %v3437_v16 }
 0x246   :  { %v3440_v20 = vpop.f32.mrf.mxu0  ;;  %v3489_v21 = vpop.f32.mrf.mxu1 }
 0x247   :  { %v3441_v22 = vadd.f32 %v3440_v20, %v3390_v36  ;;  %v3490_v47 = vadd.f32 %v3489_v21, %v3439_v43 }
 0x248   :  { %v3442_v44 = vpop.f32.mrf.mxu0  ;;  %v3491_v23 = vpop.f32.mrf.mxu1 }
 0x249   :  { %v3443_v45 = vadd.f32 %v3442_v44, %v3392_v40  ;;  %v3492_v49 = vadd.f32 %v3491_v23, %v3441_v22 }
 0x24a   :  { %v3446_v24 = vpop.f32.mrf.mxu0  ;;  %v3493_v25 = vpop.f32.mrf.mxu1 }
 0x24b   :  { %v3447_v10 = vadd.f32 %v3446_v24, %v3396_v8  ;;  %v3494_v34 = vadd.f32 %v3493_v25, %v3443_v45 }
 0x24c   :  { %v3448_v26 = vpop.f32.mrf.mxu0  ;;  %v3497_v27 = vpop.f32.mrf.mxu1 }
 0x24d   :  { %v3449_v54 = vadd.f32 %v3448_v26, %v3398_v12  ;;  %v3498_v14 = vadd.f32 %v3497_v27, %v3447_v10 }
 0x24e   :  { %v3499_v50 = vpop.f32.mrf.mxu1  ;;  %v3450_v29 = vpop.f32.mrf.mxu0 }
 0x24f   :  { %v3500_v36 = vadd.f32 %v3499_v50, %v3449_v54 }
 0x250   :  { %v3451_v30 = vpop.f32.mrf.mxu0  ;;  %v3501_v31 = vpop.f32.mrf.mxu1 }
 0x252   :  { %v3502_v32 = vpop.f32.mrf.mxu1 }
 0x264   :  { %v3589_v33 = vpop.f32.mrf.mxu1 }
 0x266   :  { %v3591_v56 = vpop.f32.mrf.mxu1 }
 0x268   :  { %v3593_v35 = vpop.f32.mrf.mxu1 }
 0x26a   :  { %v3595_v58 = vpop.f32.mrf.mxu1 }
 0x26c   :  { %v3599_v38 = vpop.f32.mrf.mxu1 }
 0x26e   :  { %v3601_v39 = vpop.f32.mrf.mxu1 }
 0x270   :  { %v3603_v63 = vpop.f32.mrf.mxu1 }
 0x272   :  { %v3604_v42 = vpop.f32.mrf.mxu1 }
 0x282   :  { %v3538_v4 = vpop.f32.mrf.mxu0 }
 0x283   :  { %v3539_v48 = vadd.f32 %v3538_v4, %v3488_v1 }
 0x284   :  { %v3540_v28 = vpop.f32.mrf.mxu0 }
 0x285   :  { %v3590_v51 = vadd.f32 %v3589_v33, %v3539_v48  ;;  %v3541_v52 = vadd.f32 %v3540_v28, %v3490_v47 }
 0x286   :  { %v3542_v53 = vpop.f32.mrf.mxu0 }
 0x287   :  { %v3606_v55 = vmax.f32 %v3590_v51, 0.0  ;;  %v3592_v57 = vadd.f32 %v3591_v56, %v3541_v52  ;;  %v3543_v41 = vadd.f32 %v3542_v53, %v3492_v49 }
 0x288   :  { %v3544_v59 = vpop.f32.mrf.mxu0 }
 0x289   :  { %3612 = vst [vmem:[%s6352_s3] sm:$0xff] %v3606_v55  ;;  %v3607_v60 = vmax.f32 %v3592_v57, 0.0  ;;  %v3594_v61 = vadd.f32 %v3593_v35, %v3543_v41  ;;  %v3545_v62 = vadd.f32 %v3544_v59, %v3494_v34 }
 0x28a   :  { %v3548_v46 = vpop.f32.mrf.mxu0 }
 0x28b   :  { %3613 = vst [vmem:[%s6352_s3 + $0x8] sm:$0xff] %v3607_v60  ;;  %v3608_v0 = vmax.f32 %v3594_v61, 0.0  ;;  %v3596_v2 = vadd.f32 %v3595_v58, %v3545_v62  ;;  %v3549_v3 = vadd.f32 %v3548_v46, %v3498_v14 }
 0x28c   :  { %v3550_v40 = vpop.f32.mrf.mxu0 }
 0x28d   :  { %3614 = vst [vmem:[%s6352_s3 + $0x10] sm:$0xff] %v3608_v0  ;;  %v3609_v5 = vmax.f32 %v3596_v2, 0.0  ;;  %v3600_v6 = vadd.f32 %v3599_v38, %v3549_v3  ;;  %v3551_v7 = vadd.f32 %v3550_v40, %v3500_v36 }
 0x28e   :  { %v3552_v8 = vpop.f32.mrf.mxu0 }
 0x28f   :  { %3615 = vst [vmem:[%s6352_s3 + $0x18] sm:$0xff] %v3609_v5  ;;  %v3610_v9 = vmax.f32 %v3600_v6, 0.0  ;;  %v3602_v11 = vadd.f32 %v3601_v39, %v3551_v7 }
 0x290   :  { %v3553_v12 = vpop.f32.mrf.mxu0 }
 0x291   :  { %3616 = vst [vmem:[%s6352_s3 + $0x20] sm:$0xff] %v3610_v9  ;;  %v3611_v13 = vmax.f32 %v3602_v11, 0.0 }
 0x293   :  { %3617 = vst [vmem:[%s6352_s3 + $0x28] sm:$0xff] %v3611_v13 }

// kernel: featurenet_forward.14
= control target key start
LH: loop header
LB: loop body
LE: loop exit
PB: predicated region body
PF: predicated region fallthrough
CT: control target
= control target key end

     0   :  { %s4262_s1 = inlined_call_operand.vmem [shape: bf16[2304,256], index: 1, kind: input, shape index: {}]   ;;  %s4263_s0 = inlined_call_operand.vmem [shape: bf16[24,2304], index: 0, kind: input, shape index: {}]   ;;  %s4264_s2 = inlined_call_operand.vmem [shape: f32[1,256], index: 2, kind: input, shape index: {}]   ;;  %s4265_s3 = inlined_call_operand.vmem [shape: f32[24,256], index: 3, kind: output, shape index: {}]  }
   0x1   :  { %v2765_v0 = vld [vmem:[%s4262_s1 + $0x74] ss:$8 sps:$4 sm:$0xff]   ;;  %v2769_v2 = vld [vmem:[%s4262_s1 + $0x70] ss:$8 sps:$4 sm:$0xff]   ;;  %v2771_v4 = vld [vmem:[%s4262_s1 + $0x64] ss:$8 sps:$4 sm:$0xff]  }
   0x2   :  { %v2767_v1 = vld [vmem:[%s4262_s1 + $0x174] ss:$8 sps:$4 sm:$0xff]   ;;  %1934 = vmatprep.subr.bf16.mxu0 %v2765_v0  ;;  %v2770_v3 = vld [vmem:[%s4262_s1 + $0x170] ss:$8 sps:$4 sm:$0xff]   ;;  %v2773_v5 = vld [vmem:[%s4262_s1 + $0x164] ss:$8 sps:$4 sm:$0xff]  }
   0x3   :  { %1985 = vmatprep.subr.bf16.mxu1 %v2767_v1  ;;  %1935 = vmatpush1.bf16.msra.mxu0 %v2769_v2  ;;  %v2775_v6 = vld [vmem:[%s4262_s1 + $0x60] ss:$8 sps:$4 sm:$0xff]   ;;  %v2777_v8 = vld [vmem:[%s4262_s1 + $0x54] ss:$8 sps:$4 sm:$0xff]   ;;  %v2781_v10 = vld [vmem:[%s4262_s1 + $0x50] ss:$8 sps:$4 sm:$0xff]  }
   0x4   :  { %1986 = vmatpush1.bf16.msra.mxu1 %v2770_v3  ;;  %1936 = vmatprep.subr.bf16.mxu0 %v2771_v4  ;;  %v2776_v7 = vld [vmem:[%s4262_s1 + $0x160] ss:$8 sps:$4 sm:$0xff]   ;;  %v2779_v9 = vld [vmem:[%s4262_s1 + $0x154] ss:$8 sps:$4 sm:$0xff]   ;;  %v2782_v11 = vld [vmem:[%s4262_s1 + $0x150] ss:$8 sps:$4 sm:$0xff]  }
   0x5   :  { %1987 = vmatprep.subr.bf16.mxu1 %v2773_v5  ;;  %v2783_v12 = vld [vmem:[%s4262_s1 + $0x44] ss:$8 sps:$4 sm:$0xff]   ;;  %v2787_v14 = vld [vmem:[%s4262_s1 + $0x40] ss:$8 sps:$4 sm:$0xff]   ;;  %v2789_v16 = vld [vmem:[%s4262_s1 + $0x34] ss:$8 sps:$4 sm:$0xff]  }
   0x6   :  { %v2785_v13 = vld [vmem:[%s4262_s1 + $0x144] ss:$8 sps:$4 sm:$0xff]   ;;  %v2788_v15 = vld [vmem:[%s4262_s1 + $0x140] ss:$8 sps:$4 sm:$0xff]   ;;  %v2791_v17 = vld [vmem:[%s4262_s1 + $0x134] ss:$8 sps:$4 sm:$0xff]  }
   0x7   :  { %1937 = vmatpush1.bf16.msra.mxu0 %v2775_v6  ;;  %v2793_v18 = vld [vmem:[%s4262_s1 + $0x30] ss:$8 sps:$4 sm:$0xff]   ;;  %v2795_v20 = vld [vmem:[%s4262_s1 + $0x24] ss:$8 sps:$4 sm:$0xff]   ;;  %v2799_v22 = vld [vmem:[%s4262_s1 + $0x20] ss:$8 sps:$4 sm:$0xff]  }
   0x8   :  { %1988 = vmatpush1.bf16.msra.mxu1 %v2776_v7  ;;  %1938 = vmatprep.subr.bf16.mxu0 %v2777_v8  ;;  %v2794_v19 = vld [vmem:[%s4262_s1 + $0x130] ss:$8 sps:$4 sm:$0xff]   ;;  %v2797_v21 = vld [vmem:[%s4262_s1 + $0x124] ss:$8 sps:$4 sm:$0xff]   ;;  %v2800_v23 = vld [vmem:[%s4262_s1 + $0x120] ss:$8 sps:$4 sm:$0xff]  }
   0x9   :  { %1989 = vmatprep.subr.bf16.mxu1 %v2779_v9  ;;  %v2801_v24 = vld [vmem:[%s4262_s1 + $0x14] ss:$8 sps:$4 sm:$0xff]   ;;  %v2805_v26 = vld [vmem:[%s4262_s1 + $0x10] ss:$8 sps:$4 sm:$0xff]   ;;  %v2807_v28 = vld [vmem:[%s4262_s1 + $0x4] ss:$8 sps:$4 sm:$0xff]  }
   0xa   :  { %v2803_v25 = vld [vmem:[%s4262_s1 + $0x114] ss:$8 sps:$4 sm:$0xff]   ;;  %v2806_v27 = vld [vmem:[%s4262_s1 + $0x110] ss:$8 sps:$4 sm:$0xff]   ;;  %v2809_v29 = vld [vmem:[%s4262_s1 + $0x104] ss:$8 sps:$4 sm:$0xff]  }
   0xb   :  { %1939 = vmatpush1.bf16.msra.mxu0 %v2781_v10  ;;  %v2811_v30 = vld [vmem:[%s4262_s1] ss:$8 sps:$4 sm:$0xff]   ;;  %v2813_v32 = vld [vmem:[%s4262_s1 + $0xf4] ss:$8 sps:$4 sm:$0xff]   ;;  %v2817_v34 = vld [vmem:[%s4262_s1 + $0xf0] ss:$8 sps:$4 sm:$0xff]  }
   0xc   :  { %1990 = vmatpush1.bf16.msra.mxu1 %v2782_v11  ;;  %1940 = vmatprep.subr.bf16.mxu0 %v2783_v12  ;;  %v2812_v31 = vld [vmem:[%s4262_s1 + $0x100] ss:$8 sps:$4 sm:$0xff]   ;;  %v2815_v33 = vld [vmem:[%s4262_s1 + $0x1f4] ss:$8 sps:$4 sm:$0xff]   ;;  %v2818_v35 = vld [vmem:[%s4262_s1 + $0x1f0] ss:$8 sps:$4 sm:$0xff]  }
   0xd   :  { %1991 = vmatprep.subr.bf16.mxu1 %v2785_v13  ;;  %v2819_v36 = vld [vmem:[%s4262_s1 + $0xe4] ss:$8 sps:$4 sm:$0xff]   ;;  %v2823_v38 = vld [vmem:[%s4262_s1 + $0xe0] ss:$8 sps:$4 sm:$0xff]   ;;  %v2825_v40 = vld [vmem:[%s4262_s1 + $0xd4] ss:$8 sps:$4 sm:$0xff]  }
   0xe   :  { %v2821_v37 = vld [vmem:[%s4262_s1 + $0x1e4] ss:$8 sps:$4 sm:$0xff]   ;;  %v2824_v39 = vld [vmem:[%s4262_s1 + $0x1e0] ss:$8 sps:$4 sm:$0xff]   ;;  %v2827_v41 = vld [vmem:[%s4262_s1 + $0x1d4] ss:$8 sps:$4 sm:$0xff]  }
   0xf   :  { %1941 = vmatpush1.bf16.msra.mxu0 %v2787_v14  ;;  %v2829_v42 = vld [vmem:[%s4262_s1 + $0xd0] ss:$8 sps:$4 sm:$0xff]   ;;  %v2831_v44 = vld [vmem:[%s4262_s1 + $0xc4] ss:$8 sps:$4 sm:$0xff]   ;;  %v2835_v46 = vld [vmem:[%s4262_s1 + $0xc0] ss:$8 sps:$4 sm:$0xff]  }
  0x10   :  { %1992 = vmatpush1.bf16.msra.mxu1 %v2788_v15  ;;  %1942 = vmatprep.subr.bf16.mxu0 %v2789_v16  ;;  %v2830_v43 = vld [vmem:[%s4262_s1 + $0x1d0] ss:$8 sps:$4 sm:$0xff]   ;;  %v2833_v45 = vld [vmem:[%s4262_s1 + $0x1c4] ss:$8 sps:$4 sm:$0xff]   ;;  %v2836_v47 = vld [vmem:[%s4262_s1 + $0x1c0] ss:$8 sps:$4 sm:$0xff]  }
  0x11   :  { %1993 = vmatprep.subr.bf16.mxu1 %v2791_v17  ;;  %v2837_v48 = vld [vmem:[%s4262_s1 + $0xb4] ss:$8 sps:$4 sm:$0xff]   ;;  %v2863_v49 = vld [vmem:[%s4263_s0 + $0x4] ss:$72 sps:$4 sm:$0xff]   ;;  %v2841_v52 = vld [vmem:[%s4262_s1 + $0xb0] ss:$8 sps:$4 sm:$0xff]  }
  0x12   :  { %v2839_v50 = vld [vmem:[%s4262_s1 + $0x1b4] ss:$8 sps:$4 sm:$0xff]   ;;  %1966 = vmatprep.mubr.bf16.mxu0 %v2863_v49  ;;  %v2842_v53 = vld [vmem:[%s4262_s1 + $0x1b0] ss:$8 sps:$4 sm:$0xff]   ;;  %v2843_v54 = vld [vmem:[%s4262_s1 + $0xa4] ss:$8 sps:$4 sm:$0xff]  }
  0x13   :  { %1943 = vmatpush1.bf16.msra.mxu0 %v2793_v18  ;;  %v2866_v51 = vld [vmem:[%s4263_s0 + $0xc] ss:$72 sps:$4 sm:$0xff]   ;;  %v2847_v56 = vld [vmem:[%s4262_s1 + $0xa0] ss:$8 sps:$4 sm:$0xff]   ;;  %v2853_v60 = vld [vmem:[%s4262_s1 + $0x90] ss:$8 sps:$4 sm:$0xff]  }
  0x14   :  { %1994 = vmatpush1.bf16.msra.mxu1 %v2794_v19  ;;  %1944 = vmatprep.subr.bf16.mxu0 %v2795_v20  ;;  %v2845_v55 = vld [vmem:[%s4262_s1 + $0x1a4] ss:$8 sps:$4 sm:$0xff]   ;;  %v2848_v57 = vld [vmem:[%s4262_s1 + $0x1a0] ss:$8 sps:$4 sm:$0xff]   ;;  %v2849_v58 = vld [vmem:[%s4262_s1 + $0x94] ss:$8 sps:$4 sm:$0xff]  }
  0x15   :  { %1995 = vmatprep.subr.bf16.mxu1 %v2797_v21  ;;  %2017 = vmatprep.mubr.bf16.mxu1 %v2866_v51  ;;  %v2851_v59 = vld [vmem:[%s4262_s1 + $0x194] ss:$8 sps:$4 sm:$0xff]   ;;  %v2854_v61 = vld [vmem:[%s4262_s1 + $0x190] ss:$8 sps:$4 sm:$0xff]   ;;  %v2855_v62 = vld [vmem:[%s4262_s1 + $0x84] ss:$8 sps:$4 sm:$0xff]  }
  0x16   :  { %v2857_v63 = vld [vmem:[%s4262_s1 + $0x184] ss:$8 sps:$4 sm:$0xff]   ;;  %v2859_v0 = vld [vmem:[%s4262_s1 + $0x80] ss:$8 sps:$4 sm:$0xff]   ;;  %v2869_v2 = vld [vmem:[%s4262_s1 + $0x274] ss:$8 sps:$4 sm:$0xff]  }
  0x17   :  { %1945 = vmatpush1.bf16.msra.mxu0 %v2799_v22  ;;  %v2860_v1 = vld [vmem:[%s4262_s1 + $0x180] ss:$8 sps:$4 sm:$0xff]   ;;  %v2872_v3 = vld [vmem:[%s4262_s1 + $0x374] ss:$8 sps:$4 sm:$0xff]   ;;  %v2867_v6 = vld [vmem:[%s4262_s1 + $0x270] ss:$8 sps:$4 sm:$0xff]  }
  0x18   :  { %1996 = vmatpush1.bf16.msra.mxu1 %v2800_v23  ;;  %1946 = vmatprep.subr.bf16.mxu0 %v2801_v24  ;;  %v2861_v4 = vld [vmem:[%s4263_s0] ss:$72 sps:$4 sm:$0xff]   ;;  %v2870_v7 = vld [vmem:[%s4262_s1 + $0x370] ss:$8 sps:$4 sm:$0xff]   ;;  %v2875_v8 = vld [vmem:[%s4262_s1 + $0x264] ss:$8 sps:$4 sm:$0xff]  }
  0x19   :  { %1997 = vmatprep.subr.bf16.mxu1 %v2803_v25  ;;  %v2864_v5 = vld [vmem:[%s4263_s0 + $0x8] ss:$72 sps:$4 sm:$0xff]   ;;  %v2878_v9 = vld [vmem:[%s4262_s1 + $0x364] ss:$8 sps:$4 sm:$0xff]   ;;  %v2881_v12 = vld [vmem:[%s4262_s1 + $0x254] ss:$8 sps:$4 sm:$0xff]  }
  0x1a   :  { %v2873_v10 = vld [vmem:[%s4262_s1 + $0x260] ss:$8 sps:$4 sm:$0xff]   ;;  %v2884_v13 = vld [vmem:[%s4262_s1 + $0x354] ss:$8 sps:$4 sm:$0xff]   ;;  %v2879_v14 = vld [vmem:[%s4262_s1 + $0x250] ss:$8 sps:$4 sm:$0xff]  }
  0x1b   :  { %1947 = vmatpush1.bf16.msra.mxu0 %v2805_v26  ;;  %v2876_v11 = vld [vmem:[%s4262_s1 + $0x360] ss:$8 sps:$4 sm:$0xff]   ;;  %v2882_v15 = vld [vmem:[%s4262_s1 + $0x350] ss:$8 sps:$4 sm:$0xff]   ;;  %v2887_v16 = vld [vmem:[%s4262_s1 + $0x244] ss:$8 sps:$4 sm:$0xff]  }
  0x1c   :  { %1998 = vmatpush1.bf16.msra.mxu1 %v2806_v27  ;;  %1948 = vmatprep.subr.bf16.mxu0 %v2807_v28  ;;  %v2890_v17 = vld [vmem:[%s4262_s1 + $0x344] ss:$8 sps:$4 sm:$0xff]   ;;  %v2885_v18 = vld [vmem:[%s4262_s1 + $0x240] ss:$8 sps:$4 sm:$0xff]   ;;  %v2893_v20 = vld [vmem:[%s4262_s1 + $0x234] ss:$8 sps:$4 sm:$0xff]  }
  0x1d   :  { %1999 = vmatprep.subr.bf16.mxu1 %v2809_v29  ;;  %v2888_v19 = vld [vmem:[%s4262_s1 + $0x340] ss:$8 sps:$4 sm:$0xff]   ;;  %v2896_v21 = vld [vmem:[%s4262_s1 + $0x334] ss:$8 sps:$4 sm:$0xff]   ;;  %v2891_v22 = vld [vmem:[%s4262_s1 + $0x230] ss:$8 sps:$4 sm:$0xff]  }
  0x1e   :  { %v2894_v23 = vld [vmem:[%s4262_s1 + $0x330] ss:$8 sps:$4 sm:$0xff]   ;;  %v2899_v25 = vld [vmem:[%s4262_s1 + $0x224] ss:$8 sps:$4 sm:$0xff]   ;;  %v2924_v51 = vld [vmem:[%s4262_s1 + $0x3e0] ss:$8 sps:$4 sm:$0xff]  }
  0x1f   :  { %1949 = vmatpush1.bf16.msra.mxu0 %v2811_v30  ;;  %v32_v24 = vld [vmem:[%s4263_s0 + $0x90] sm:$0xff]  ;;  %v2902_v26 = vld [vmem:[%s4262_s1 + $0x324] ss:$8 sps:$4 sm:$0xff]   ;;  %v33_v29 = vld [vmem:[%s4263_s0 + $0x98] sm:$0xff] }
  0x20   :  { %2000 = vmatpush1.bf16.msra.mxu1 %v2812_v31  ;;  %1950 = vmatprep.subr.bf16.mxu0 %v2813_v32  ;;  %v2428_v27 = vcombine.high %v32_v24, %v32_v24  ;;  %v2427_v28 = vcombine.low %v32_v24, %v32_v24  ;;  %v2897_v30 = vld [vmem:[%s4262_s1 + $0x220] ss:$8 sps:$4 sm:$0xff]   ;;  %v2430_v32 = vcombine.high %v33_v29, %v33_v29  ;;  %v2926_v49 = vld [vmem:[%s4262_s1 + $0x3e4] ss:$8 sps:$4 sm:$0xff]  }
  0x21   :  { %2001 = vmatprep.subr.bf16.mxu1 %v2815_v33  ;;  %v2900_v31 = vld [vmem:[%s4262_s1 + $0x320] ss:$8 sps:$4 sm:$0xff]   ;;  %v2429_v33 = vcombine.low %v33_v29, %v33_v29  ;;  %v2987_v29 = vld [vmem:[%s4262_s1 + $0x450] ss:$8 sps:$4 sm:$0xff]  }
  0x22   :  { %v2979_v24 = vld [vmem:[%s4262_s1 + $0x460] ss:$8 sps:$4 sm:$0xff]  }
  0x23   :  { %1951 = vmatpush2.bf16.msra.mxu0 %v2817_v34  ;;  %v2905_v34 = vld [vmem:[%s4262_s1 + $0x214] ss:$8 sps:$4 sm:$0xff]  }
  0x24   :  { %2002 = vmatpush2.bf16.msra.mxu1 %v2818_v35  ;;  %1952 = vmatprep.subr.bf16.mxu0 %v2819_v36  ;;  %v2908_v35 = vld [vmem:[%s4262_s1 + $0x314] ss:$8 sps:$4 sm:$0xff]   ;;  %v2903_v36 = vld [vmem:[%s4262_s1 + $0x210] ss:$8 sps:$4 sm:$0xff]  }
  0x25   :  { %2003 = vmatprep.subr.bf16.mxu1 %v2821_v37  ;;  %v2906_v37 = vld [vmem:[%s4262_s1 + $0x310] ss:$8 sps:$4 sm:$0xff]  }
  0x27   :  { %1953 = vmatpush2.bf16.msra.mxu0 %v2823_v38  ;;  %v2911_v38 = vld [vmem:[%s4262_s1 + $0x204] ss:$8 sps:$4 sm:$0xff]  }
  0x28   :  { %2004 = vmatpush2.bf16.msra.mxu1 %v2824_v39  ;;  %1954 = vmatprep.subr.bf16.mxu0 %v2825_v40  ;;  %v2914_v39 = vld [vmem:[%s4262_s1 + $0x304] ss:$8 sps:$4 sm:$0xff]   ;;  %v2969_v40 = vld [vmem:[%s4263_s0 + $0x14] ss:$72 sps:$4 sm:$0xff]  }
  0x29   :  { %2005 = vmatprep.subr.bf16.mxu1 %v2827_v41  ;;  %v2972_v41 = vld [vmem:[%s4263_s0 + $0x1c] ss:$72 sps:$4 sm:$0xff]  }
  0x2b   :  { %1955 = vmatpush2.bf16.msra.mxu0 %v2829_v42  ;;  %v2909_v42 = vld [vmem:[%s4262_s1 + $0x200] ss:$8 sps:$4 sm:$0xff]  }
  0x2c   :  { %2006 = vmatpush2.bf16.msra.mxu1 %v2830_v43  ;;  %1956 = vmatprep.subr.bf16.mxu0 %v2831_v44  ;;  %v2912_v43 = vld [vmem:[%s4262_s1 + $0x300] ss:$8 sps:$4 sm:$0xff]   ;;  %v2917_v44 = vld [vmem:[%s4262_s1 + $0x2f4] ss:$8 sps:$4 sm:$0xff]  }
  0x2d   :  { %2007 = vmatprep.subr.bf16.mxu1 %v2833_v45  ;;  %v2920_v45 = vld [vmem:[%s4262_s1 + $0x3f4] ss:$8 sps:$4 sm:$0xff]  }
  0x2f   :  { %1957 = vmatpush2.bf16.msra.mxu0 %v2835_v46  ;;  %v2915_v46 = vld [vmem:[%s4262_s1 + $0x2f0] ss:$8 sps:$4 sm:$0xff]  }
  0x30   :  { %2008 = vmatpush2.bf16.msra.mxu1 %v2836_v47  ;;  %1958 = vmatprep.subr.bf16.mxu0 %v2837_v48  ;;  %v2918_v47 = vld [vmem:[%s4262_s1 + $0x3f0] ss:$8 sps:$4 sm:$0xff]   ;;  %v2923_v48 = vld [vmem:[%s4262_s1 + $0x2e4] ss:$8 sps:$4 sm:$0xff]  }
  0x31   :  { %2009 = vmatprep.subr.bf16.mxu1 %v2839_v50  ;;  %v2921_v50 = vld [vmem:[%s4262_s1 + $0x2e0] ss:$8 sps:$4 sm:$0xff]  }
  0x33   :  { %1959 = vmatpush2.bf16.msra.mxu0 %v2841_v52  ;;  %v2929_v52 = vld [vmem:[%s4262_s1 + $0x2d4] ss:$8 sps:$4 sm:$0xff]  }
  0x34   :  { %2010 = vmatpush2.bf16.msra.mxu1 %v2842_v53  ;;  %1960 = vmatprep.subr.bf16.mxu0 %v2843_v54  ;;  %v2932_v53 = vld [vmem:[%s4262_s1 + $0x3d4] ss:$8 sps:$4 sm:$0xff]   ;;  %v2927_v54 = vld [vmem:[%s4262_s1 + $0x2d0] ss:$8 sps:$4 sm:$0xff]  }
  0x35   :  { %2011 = vmatprep.subr.bf16.mxu1 %v2845_v55  ;;  %v2930_v55 = vld [vmem:[%s4262_s1 + $0x3d0] ss:$8 sps:$4 sm:$0xff]  }
  0x37   :  { %1961 = vmatpush2.bf16.msra.mxu0 %v2847_v56  ;;  %v2935_v56 = vld [vmem:[%s4262_s1 + $0x2c4] ss:$8 sps:$4 sm:$0xff]  }
  0x38   :  { %2012 = vmatpush2.bf16.msra.mxu1 %v2848_v57  ;;  %1962 = vmatprep.subr.bf16.mxu0 %v2849_v58  ;;  %v2938_v57 = vld [vmem:[%s4262_s1 + $0x3c4] ss:$8 sps:$4 sm:$0xff]   ;;  %v2933_v58 = vld [vmem:[%s4262_s1 + $0x2c0] ss:$8 sps:$4 sm:$0xff]  }
  0x39   :  { %2013 = vmatprep.subr.bf16.mxu1 %v2851_v59  ;;  %v2936_v59 = vld [vmem:[%s4262_s1 + $0x3c0] ss:$8 sps:$4 sm:$0xff]  }
  0x3b   :  { %1963 = vmatpush2.bf16.msra.mxu0 %v2853_v60  ;;  %v2941_v60 = vld [vmem:[%s4262_s1 + $0x2b4] ss:$8 sps:$4 sm:$0xff]  }
  0x3c   :  { %2014 = vmatpush2.bf16.msra.mxu1 %v2854_v61  ;;  %1964 = vmatprep.subr.bf16.mxu0 %v2855_v62  ;;  %v2944_v61 = vld [vmem:[%s4262_s1 + $0x3b4] ss:$8 sps:$4 sm:$0xff]   ;;  %v2939_v62 = vld [vmem:[%s4262_s1 + $0x2b0] ss:$8 sps:$4 sm:$0xff]  }
  0x3d   :  { %2015 = vmatprep.subr.bf16.mxu1 %v2857_v63  ;;  %v2942_v63 = vld [vmem:[%s4262_s1 + $0x3b0] ss:$8 sps:$4 sm:$0xff]  }
  0x3f   :  { %1965 = vmatpush2.bf16.msra.mxu0 %v2859_v0  ;;  %v2949_v0 = vld [vmem:[%s4262_s1 + $0x2a4] ss:$8 sps:$4 sm:$0xff]  }
  0x40   :  { %2016 = vmatpush2.bf16.msra.mxu1 %v2860_v1  ;;  %2036 = vmatprep.subr.bf16.mxu0 %v2869_v2  ;;  %v2952_v1 = vld [vmem:[%s4262_s1 + $0x3a4] ss:$8 sps:$4 sm:$0xff]   ;;  %v2947_v2 = vld [vmem:[%s4262_s1 + $0x2a0] ss:$8 sps:$4 sm:$0xff]  }
  0x41   :  { %2087 = vmatprep.subr.bf16.mxu1 %v2872_v3  ;;  %v2950_v3 = vld [vmem:[%s4262_s1 + $0x3a0] ss:$8 sps:$4 sm:$0xff]  }
  0x42   :  { %1967 = vmatmul.mubr.bf16.vlgmr.msra.gmra.mxu0 %v2861_v4  ;;  %v2957_v4 = vld [vmem:[%s4262_s1 + $0x294] ss:$8 sps:$4 sm:$0xff]  }
  0x43   :  { %2018 = vmatmul.mubr.bf16.vlgmr.msra.gmra.mxu1 %v2864_v5  ;;  %2037 = vmatpush1.bf16.msra.mxu0 %v2867_v6  ;;  %v2960_v5 = vld [vmem:[%s4262_s1 + $0x394] ss:$8 sps:$4 sm:$0xff]   ;;  %v2955_v6 = vld [vmem:[%s4262_s1 + $0x290] ss:$8 sps:$4 sm:$0xff]  }
  0x44   :  { %2088 = vmatpush1.bf16.msra.mxu1 %v2870_v7  ;;  %2038 = vmatprep.subr.bf16.mxu0 %v2875_v8  ;;  %v2958_v7 = vld [vmem:[%s4262_s1 + $0x390] ss:$8 sps:$4 sm:$0xff]   ;;  %v2963_v8 = vld [vmem:[%s4262_s1 + $0x284] ss:$8 sps:$4 sm:$0xff]  }
  0x45   :  { %2089 = vmatprep.subr.bf16.mxu1 %v2878_v9  ;;  %1976 = vmatprep.mubr.bf16.mxu0 %v2428_v27  ;;  %v2966_v9 = vld [vmem:[%s4262_s1 + $0x384] ss:$8 sps:$4 sm:$0xff]   ;;  %v2992_v27 = vld [vmem:[%s4262_s1 + $0x554] ss:$8 sps:$4 sm:$0xff]  }
  0x46   :  { %2027 = vmatprep.mubr.bf16.mxu1 %v2430_v32  ;;  %v2997_v32 = vld [vmem:[%s4262_s1 + $0x444] ss:$8 sps:$4 sm:$0xff]  }
  0x47   :  { %2039 = vmatpush1.bf16.msra.mxu0 %v2873_v10  ;;  %v2961_v10 = vld [vmem:[%s4262_s1 + $0x280] ss:$8 sps:$4 sm:$0xff]  }
  0x48   :  { %2090 = vmatpush1.bf16.msra.mxu1 %v2876_v11  ;;  %2040 = vmatprep.subr.bf16.mxu0 %v2881_v12  ;;  %v2964_v11 = vld [vmem:[%s4262_s1 + $0x380] ss:$8 sps:$4 sm:$0xff]   ;;  %v2975_v12 = vld [vmem:[%s4262_s1 + $0x474] ss:$8 sps:$4 sm:$0xff]  }
  0x49   :  { %2091 = vmatprep.subr.bf16.mxu1 %v2884_v13  ;;  %v2967_v13 = vld [vmem:[%s4263_s0 + $0x10] ss:$72 sps:$4 sm:$0xff]  }
  0x4a   :  { %1977 = vmatmul.mubr.bf16.gmra.mxu0 %v2427_v28 }
  0x4b   :  { %2041 = vmatpush1.bf16.msra.mxu0 %v2879_v14  ;;  %2028 = vmatmul.mubr.bf16.gmra.mxu1 %v2429_v33  ;;  %v2970_v14 = vld [vmem:[%s4263_s0 + $0x18] ss:$72 sps:$4 sm:$0xff]   ;;  %v3000_v33 = vld [vmem:[%s4262_s1 + $0x544] ss:$8 sps:$4 sm:$0xff]  }
  0x4c   :  { %2092 = vmatpush1.bf16.msra.mxu1 %v2882_v15  ;;  %2042 = vmatprep.subr.bf16.mxu0 %v2887_v16  ;;  %v2978_v15 = vld [vmem:[%s4262_s1 + $0x574] ss:$8 sps:$4 sm:$0xff]   ;;  %v2973_v16 = vld [vmem:[%s4262_s1 + $0x470] ss:$8 sps:$4 sm:$0xff]  }
  0x4d   :  { %2093 = vmatprep.subr.bf16.mxu1 %v2890_v17  ;;  %2068 = vmatprep.mubr.bf16.mxu0 %v2969_v40  ;;  %v2976_v17 = vld [vmem:[%s4262_s1 + $0x570] ss:$8 sps:$4 sm:$0xff]  }
  0x4e   :  { %2119 = vmatprep.mubr.bf16.mxu1 %v2972_v41  ;;  %v3001_v40 = vld [vmem:[%s4262_s1 + $0x430] ss:$8 sps:$4 sm:$0xff]  }
  0x4f   :  { %2043 = vmatpush1.bf16.msra.mxu0 %v2885_v18  ;;  %v34_v18 = vld [vmem:[%s4263_s0 + $0xa0] sm:$0xff]  ;;  %v3004_v41 = vld [vmem:[%s4262_s1 + $0x530] ss:$8 sps:$4 sm:$0xff]  }
  0x50   :  { %2094 = vmatpush1.bf16.msra.mxu1 %v2888_v19  ;;  %2044 = vmatprep.subr.bf16.mxu0 %v2893_v20  ;;  %v35_v19 = vld [vmem:[%s4263_s0 + $0xa8] sm:$0xff]  ;;  %v2431_v28 = vcombine.low %v34_v18, %v34_v18 }
  0x51   :  { %2095 = vmatprep.subr.bf16.mxu1 %v2896_v21  ;;  %v2981_v20 = vld [vmem:[%s4262_s1 + $0x464] ss:$8 sps:$4 sm:$0xff]  }
  0x52   :  { %v2984_v21 = vld [vmem:[%s4262_s1 + $0x564] ss:$8 sps:$4 sm:$0xff]  }
  0x53   :  { %2045 = vmatpush1.bf16.msra.mxu0 %v2891_v22  ;;  %v2432_v22 = vcombine.high %v34_v18, %v34_v18  ;;  %v3069_v18 = vld [vmem:[%s4262_s1 + $0x484] ss:$8 sps:$4 sm:$0xff]  }
  0x54   :  { %2096 = vmatpush1.bf16.msra.mxu1 %v2894_v23  ;;  %2046 = vmatprep.subr.bf16.mxu0 %v2899_v25  ;;  %v2434_v23 = vcombine.high %v35_v19, %v35_v19  ;;  %v2982_v25 = vld [vmem:[%s4262_s1 + $0x560] ss:$8 sps:$4 sm:$0xff]  }
  0x55   :  { %2097 = vmatprep.subr.bf16.mxu1 %v2902_v26  ;;  %v2989_v26 = vld [vmem:[%s4262_s1 + $0x454] ss:$8 sps:$4 sm:$0xff]  }
  0x57   :  { %2047 = vmatpush1.bf16.msra.mxu0 %v2897_v30  ;;  %v2990_v30 = vld [vmem:[%s4262_s1 + $0x550] ss:$8 sps:$4 sm:$0xff]  }
  0x58   :  { %2098 = vmatpush1.bf16.msra.mxu1 %v2900_v31  ;;  %2048 = vmatprep.subr.bf16.mxu0 %v2905_v34  ;;  %v2433_v31 = vcombine.low %v35_v19, %v35_v19  ;;  %v3075_v34 = vld [vmem:[%s4263_s0 + $0x24] ss:$72 sps:$4 sm:$0xff]  }
  0x59   :  { %2099 = vmatprep.subr.bf16.mxu1 %v2908_v35  ;;  %v3078_v35 = vld [vmem:[%s4263_s0 + $0x2c] ss:$72 sps:$4 sm:$0xff]  }
  0x5a   :  { %v3072_v19 = vld [vmem:[%s4262_s1 + $0x584] ss:$8 sps:$4 sm:$0xff]  }
  0x5b   :  { %2049 = vmatpush1.bf16.msra.mxu0 %v2903_v36  ;;  %v2995_v36 = vld [vmem:[%s4262_s1 + $0x440] ss:$8 sps:$4 sm:$0xff]  }
  0x5c   :  { %2100 = vmatpush1.bf16.msra.mxu1 %v2906_v37  ;;  %2050 = vmatprep.subr.bf16.mxu0 %v2911_v38  ;;  %v2998_v37 = vld [vmem:[%s4262_s1 + $0x540] ss:$8 sps:$4 sm:$0xff]   ;;  %v3003_v38 = vld [vmem:[%s4262_s1 + $0x434] ss:$8 sps:$4 sm:$0xff]  }
  0x5d   :  { %2101 = vmatprep.subr.bf16.mxu1 %v2914_v39  ;;  %v3006_v39 = vld [vmem:[%s4262_s1 + $0x534] ss:$8 sps:$4 sm:$0xff]  }
  0x5f   :  { %2051 = vmatpush1.bf16.msra.mxu0 %v2909_v42  ;;  %v3009_v42 = vld [vmem:[%s4262_s1 + $0x424] ss:$8 sps:$4 sm:$0xff]  }
  0x60   :  { %2102 = vmatpush1.bf16.msra.mxu1 %v2912_v43  ;;  %2052 = vmatprep.subr.bf16.mxu0 %v2917_v44  ;;  %v3012_v43 = vld [vmem:[%s4262_s1 + $0x524] ss:$8 sps:$4 sm:$0xff]   ;;  %v3007_v44 = vld [vmem:[%s4262_s1 + $0x420] ss:$8 sps:$4 sm:$0xff]  }
  0x61   :  { %2103 = vmatprep.subr.bf16.mxu1 %v2920_v45  ;;  %v3010_v45 = vld [vmem:[%s4262_s1 + $0x520] ss:$8 sps:$4 sm:$0xff]  }
  0x63   :  { %2053 = vmatpush2.bf16.msra.mxu0 %v2915_v46  ;;  %v3015_v46 = vld [vmem:[%s4262_s1 + $0x414] ss:$8 sps:$4 sm:$0xff]  }
  0x64   :  { %2104 = vmatpush2.bf16.msra.mxu1 %v2918_v47  ;;  %2054 = vmatprep.subr.bf16.mxu0 %v2923_v48  ;;  %v3018_v47 = vld [vmem:[%s4262_s1 + $0x514] ss:$8 sps:$4 sm:$0xff]   ;;  %v3013_v48 = vld [vmem:[%s4262_s1 + $0x410] ss:$8 sps:$4 sm:$0xff]  }
  0x65   :  { %2105 = vmatprep.subr.bf16.mxu1 %v2926_v49  ;;  %v3016_v49 = vld [vmem:[%s4262_s1 + $0x510] ss:$8 sps:$4 sm:$0xff]  }
  0x67   :  { %2055 = vmatpush2.bf16.msra.mxu0 %v2921_v50  ;;  %v3021_v50 = vld [vmem:[%s4262_s1 + $0x404] ss:$8 sps:$4 sm:$0xff]  }
  0x68   :  { %2106 = vmatpush2.bf16.msra.mxu1 %v2924_v51  ;;  %2056 = vmatprep.subr.bf16.mxu0 %v2929_v52  ;;  %v3024_v51 = vld [vmem:[%s4262_s1 + $0x504] ss:$8 sps:$4 sm:$0xff]   ;;  %v3019_v52 = vld [vmem:[%s4262_s1 + $0x400] ss:$8 sps:$4 sm:$0xff]  }
  0x69   :  { %2107 = vmatprep.subr.bf16.mxu1 %v2932_v53  ;;  %v3022_v53 = vld [vmem:[%s4262_s1 + $0x500] ss:$8 sps:$4 sm:$0xff]  }
  0x6b   :  { %2057 = vmatpush2.bf16.msra.mxu0 %v2927_v54  ;;  %v3027_v54 = vld [vmem:[%s4262_s1 + $0x4f4] ss:$8 sps:$4 sm:$0xff]  }
  0x6c   :  { %2108 = vmatpush2.bf16.msra.mxu1 %v2930_v55  ;;  %2058 = vmatprep.subr.bf16.mxu0 %v2935_v56  ;;  %v3030_v55 = vld [vmem:[%s4262_s1 + $0x5f4] ss:$8 sps:$4 sm:$0xff]   ;;  %v3025_v56 = vld [vmem:[%s4262_s1 + $0x4f0] ss:$8 sps:$4 sm:$0xff]  }
  0x6d   :  { %2109 = vmatprep.subr.bf16.mxu1 %v2938_v57  ;;  %v3028_v57 = vld [vmem:[%s4262_s1 + $0x5f0] ss:$8 sps:$4 sm:$0xff]  }
  0x6f   :  { %2059 = vmatpush2.bf16.msra.mxu0 %v2933_v58  ;;  %v3033_v58 = vld [vmem:[%s4262_s1 + $0x4e4] ss:$8 sps:$4 sm:$0xff]  }
  0x70   :  { %2110 = vmatpush2.bf16.msra.mxu1 %v2936_v59  ;;  %2060 = vmatprep.subr.bf16.mxu0 %v2941_v60  ;;  %v3036_v59 = vld [vmem:[%s4262_s1 + $0x5e4] ss:$8 sps:$4 sm:$0xff]   ;;  %v3031_v60 = vld [vmem:[%s4262_s1 + $0x4e0] ss:$8 sps:$4 sm:$0xff]  }
  0x71   :  { %2111 = vmatprep.subr.bf16.mxu1 %v2944_v61  ;;  %v3034_v61 = vld [vmem:[%s4262_s1 + $0x5e0] ss:$8 sps:$4 sm:$0xff]  }
  0x73   :  { %2061 = vmatpush2.bf16.msra.mxu0 %v2939_v62  ;;  %v3039_v62 = vld [vmem:[%s4262_s1 + $0x4d4] ss:$8 sps:$4 sm:$0xff]  }
  0x74   :  { %2112 = vmatpush2.bf16.msra.mxu1 %v2942_v63  ;;  %2062 = vmatprep.subr.bf16.mxu0 %v2949_v0  ;;  %v3042_v63 = vld [vmem:[%s4262_s1 + $0x5d4] ss:$8 sps:$4 sm:$0xff]   ;;  %v3037_v0 = vld [vmem:[%s4262_s1 + $0x4d0] ss:$8 sps:$4 sm:$0xff]  }
  0x75   :  { %2113 = vmatprep.subr.bf16.mxu1 %v2952_v1  ;;  %v3040_v1 = vld [vmem:[%s4262_s1 + $0x5d0] ss:$8 sps:$4 sm:$0xff]  }
  0x77   :  { %2063 = vmatpush2.bf16.msra.mxu0 %v2947_v2  ;;  %v3045_v2 = vld [vmem:[%s4262_s1 + $0x4c4] ss:$8 sps:$4 sm:$0xff]  }
  0x78   :  { %2114 = vmatpush2.bf16.msra.mxu1 %v2950_v3  ;;  %2064 = vmatprep.subr.bf16.mxu0 %v2957_v4  ;;  %v3048_v3 = vld [vmem:[%s4262_s1 + $0x5c4] ss:$8 sps:$4 sm:$0xff]   ;;  %v3043_v4 = vld [vmem:[%s4262_s1 + $0x4c0] ss:$8 sps:$4 sm:$0xff]  }
  0x79   :  { %2115 = vmatprep.subr.bf16.mxu1 %v2960_v5  ;;  %v3046_v5 = vld [vmem:[%s4262_s1 + $0x5c0] ss:$8 sps:$4 sm:$0xff]  }
  0x7b   :  { %2065 = vmatpush2.bf16.msra.mxu0 %v2955_v6  ;;  %v3051_v6 = vld [vmem:[%s4262_s1 + $0x4b4] ss:$8 sps:$4 sm:$0xff]  }
  0x7c   :  { %2116 = vmatpush2.bf16.msra.mxu1 %v2958_v7  ;;  %2066 = vmatprep.subr.bf16.mxu0 %v2963_v8  ;;  %v3054_v7 = vld [vmem:[%s4262_s1 + $0x5b4] ss:$8 sps:$4 sm:$0xff]   ;;  %v3049_v8 = vld [vmem:[%s4262_s1 + $0x4b0] ss:$8 sps:$4 sm:$0xff]  }
  0x7d   :  { %2117 = vmatprep.subr.bf16.mxu1 %v2966_v9  ;;  %v3052_v9 = vld [vmem:[%s4262_s1 + $0x5b0] ss:$8 sps:$4 sm:$0xff]  }
  0x7f   :  { %2067 = vmatpush2.bf16.msra.mxu0 %v2961_v10  ;;  %v3057_v10 = vld [vmem:[%s4262_s1 + $0x4a4] ss:$8 sps:$4 sm:$0xff]  }
  0x80   :  { %2118 = vmatpush2.bf16.msra.mxu1 %v2964_v11  ;;  %2138 = vmatprep.subr.bf16.mxu0 %v2975_v12  ;;  %v3060_v11 = vld [vmem:[%s4262_s1 + $0x5a4] ss:$8 sps:$4 sm:$0xff]   ;;  %v3055_v12 = vld [vmem:[%s4262_s1 + $0x4a0] ss:$8 sps:$4 sm:$0xff]  }
  0x81   :  { %2189 = vmatprep.subr.bf16.mxu1 %v2978_v15  ;;  %v3066_v15 = vld [vmem:[%s4262_s1 + $0x594] ss:$8 sps:$4 sm:$0xff]  }
  0x82   :  { %2069 = vmatmul.mubr.bf16.vlgmr.msra.gmra.mxu0 %v2967_v13  ;;  %v3058_v13 = vld [vmem:[%s4262_s1 + $0x5a0] ss:$8 sps:$4 sm:$0xff]  }
  0x83   :  { %2120 = vmatmul.mubr.bf16.vlgmr.msra.gmra.mxu1 %v2970_v14  ;;  %2139 = vmatpush1.bf16.msra.mxu0 %v2973_v16  ;;  %v3063_v14 = vld [vmem:[%s4262_s1 + $0x494] ss:$8 sps:$4 sm:$0xff]   ;;  %v3061_v16 = vld [vmem:[%s4262_s1 + $0x490] ss:$8 sps:$4 sm:$0xff]  }
  0x84   :  { %2190 = vmatpush1.bf16.msra.mxu1 %v2976_v17  ;;  %2140 = vmatprep.subr.bf16.mxu0 %v2981_v20  ;;  %v3064_v17 = vld [vmem:[%s4262_s1 + $0x590] ss:$8 sps:$4 sm:$0xff]   ;;  %v3067_v20 = vld [vmem:[%s4262_s1 + $0x480] ss:$8 sps:$4 sm:$0xff]  }
  0x85   :  { %2191 = vmatprep.subr.bf16.mxu1 %v2984_v21  ;;  %2078 = vmatprep.mubr.bf16.mxu0 %v2432_v22  ;;  %v3070_v21 = vld [vmem:[%s4262_s1 + $0x580] ss:$8 sps:$4 sm:$0xff]  }
  0x86   :  { %2129 = vmatprep.mubr.bf16.mxu1 %v2434_v23  ;;  %v3073_v22 = vld [vmem:[%s4263_s0 + $0x20] ss:$72 sps:$4 sm:$0xff]  }
  0x87   :  { %2141 = vmatpush1.bf16.msra.mxu0 %v2979_v24  ;;  %v3076_v23 = vld [vmem:[%s4263_s0 + $0x28] ss:$72 sps:$4 sm:$0xff]   ;;  %v3081_v24 = vld [vmem:[%s4262_s1 + $0x674] ss:$8 sps:$4 sm:$0xff]  }
  0x88   :  { %2192 = vmatpush1.bf16.msra.mxu1 %v2982_v25  ;;  %2142 = vmatprep.subr.bf16.mxu0 %v2989_v26  ;;  %v3084_v25 = vld [vmem:[%s4262_s1 + $0x774] ss:$8 sps:$4 sm:$0xff]   ;;  %v3079_v26 = vld [vmem:[%s4262_s1 + $0x670] ss:$8 sps:$4 sm:$0xff]  }
  0x89   :  { %2193 = vmatprep.subr.bf16.mxu1 %v2992_v27  ;;  %v36_v27 = vld [vmem:[%s4263_s0 + $0xb0] sm:$0xff] }
  0x8a   :  { %2079 = vmatmul.mubr.bf16.gmra.mxu0 %v2431_v28  ;;  %v37_v28 = vld [vmem:[%s4263_s0 + $0xb8] sm:$0xff] }
  0x8b   :  { %2130 = vmatmul.mubr.bf16.gmra.mxu1 %v2433_v31  ;;  %2143 = vmatpush1.bf16.msra.mxu0 %v2987_v29  ;;  %v3082_v29 = vld [vmem:[%s4262_s1 + $0x770] ss:$8 sps:$4 sm:$0xff]   ;;  %v3090_v31 = vld [vmem:[%s4262_s1 + $0x764] ss:$8 sps:$4 sm:$0xff]  }
  0x8c   :  { %2194 = vmatpush1.bf16.msra.mxu1 %v2990_v30  ;;  %2144 = vmatprep.subr.bf16.mxu0 %v2997_v32  ;;  %v3087_v30 = vld [vmem:[%s4262_s1 + $0x664] ss:$8 sps:$4 sm:$0xff]   ;;  %v2436_v32 = vcombine.high %v36_v27, %v36_v27 }
  0x8d   :  { %2195 = vmatprep.subr.bf16.mxu1 %v3000_v33  ;;  %2170 = vmatprep.mubr.bf16.mxu0 %v3075_v34  ;;  %v2438_v33 = vcombine.high %v37_v28, %v37_v28  ;;  %v3085_v34 = vld [vmem:[%s4262_s1 + $0x660] ss:$8 sps:$4 sm:$0xff]  }
  0x8e   :  { %2221 = vmatprep.mubr.bf16.mxu1 %v3078_v35  ;;  %v3088_v35 = vld [vmem:[%s4262_s1 + $0x760] ss:$8 sps:$4 sm:$0xff]  }
  0x8f   :  { %2145 = vmatpush1.bf16.msra.mxu0 %v2995_v36  ;;  %v3095_v36 = vld [vmem:[%s4262_s1 + $0x654] ss:$8 sps:$4 sm:$0xff]  }
  0x90   :  { %2196 = vmatpush1.bf16.msra.mxu1 %v2998_v37  ;;  %2146 = vmatprep.subr.bf16.mxu0 %v3003_v38  ;;  %v3098_v37 = vld [vmem:[%s4262_s1 + $0x754] ss:$8 sps:$4 sm:$0xff]   ;;  %v2435_v38 = vcombine.low %v36_v27, %v36_v27  ;;  %v3167_v27 = vld [vmem:[%s4262_s1 + $0x690] ss:$8 sps:$4 sm:$0xff]  }
  0x91   :  { %2197 = vmatprep.subr.bf16.mxu1 %v3006_v39  ;;  %v3093_v39 = vld [vmem:[%s4262_s1 + $0x650] ss:$8 sps:$4 sm:$0xff]  }
  0x93   :  { %2147 = vmatpush1.bf16.msra.mxu0 %v3001_v40  ;;  %v2437_v40 = vcombine.low %v37_v28, %v37_v28  ;;  %v3170_v28 = vld [vmem:[%s4262_s1 + $0x790] ss:$8 sps:$4 sm:$0xff]  }
  0x94   :  { %2198 = vmatpush1.bf16.msra.mxu1 %v3004_v41  ;;  %2148 = vmatprep.subr.bf16.mxu0 %v3009_v42  ;;  %v3096_v41 = vld [vmem:[%s4262_s1 + $0x750] ss:$8 sps:$4 sm:$0xff]   ;;  %v3103_v42 = vld [vmem:[%s4262_s1 + $0x644] ss:$8 sps:$4 sm:$0xff]  }
  0x95   :  { %2199 = vmatprep.subr.bf16.mxu1 %v3012_v43  ;;  %v3106_v43 = vld [vmem:[%s4262_s1 + $0x744] ss:$8 sps:$4 sm:$0xff]  }
  0x97   :  { %2149 = vmatpush1.bf16.msra.mxu0 %v3007_v44  ;;  %v3181_v44 = vld [vmem:[%s4263_s0 + $0x34] ss:$72 sps:$4 sm:$0xff]  }
  0x98   :  { %2200 = vmatpush1.bf16.msra.mxu1 %v3010_v45  ;;  %2150 = vmatprep.subr.bf16.mxu0 %v3015_v46  ;;  %v3184_v45 = vld [vmem:[%s4263_s0 + $0x3c] ss:$72 sps:$4 sm:$0xff]   ;;  %v3101_v46 = vld [vmem:[%s4262_s1 + $0x640] ss:$8 sps:$4 sm:$0xff]  }
  0x99   :  { %2201 = vmatprep.subr.bf16.mxu1 %v3018_v47  ;;  %v3104_v47 = vld [vmem:[%s4262_s1 + $0x740] ss:$8 sps:$4 sm:$0xff]  }
  0x9b   :  { %2151 = vmatpush1.bf16.msra.mxu0 %v3013_v48  ;;  %v3109_v48 = vld [vmem:[%s4262_s1 + $0x634] ss:$8 sps:$4 sm:$0xff]  }
  0x9c   :  { %2202 = vmatpush1.bf16.msra.mxu1 %v3016_v49  ;;  %2152 = vmatprep.subr.bf16.mxu0 %v3021_v50  ;;  %v3112_v49 = vld [vmem:[%s4262_s1 + $0x734] ss:$8 sps:$4 sm:$0xff]   ;;  %v3107_v50 = vld [vmem:[%s4262_s1 + $0x630] ss:$8 sps:$4 sm:$0xff]  }
  0x9d   :  { %2203 = vmatprep.subr.bf16.mxu1 %v3024_v51  ;;  %v3110_v51 = vld [vmem:[%s4262_s1 + $0x730] ss:$8 sps:$4 sm:$0xff]  }
  0x9f   :  { %2153 = vmatpush1.bf16.msra.mxu0 %v3019_v52  ;;  %v3115_v52 = vld [vmem:[%s4262_s1 + $0x624] ss:$8 sps:$4 sm:$0xff]  }
  0xa0   :  { %2204 = vmatpush1.bf16.msra.mxu1 %v3022_v53  ;;  %2154 = vmatprep.subr.bf16.mxu0 %v3027_v54  ;;  %v3118_v53 = vld [vmem:[%s4262_s1 + $0x724] ss:$8 sps:$4 sm:$0xff]   ;;  %v3113_v54 = vld [vmem:[%s4262_s1 + $0x620] ss:$8 sps:$4 sm:$0xff]  }
  0xa1   :  { %2205 = vmatprep.subr.bf16.mxu1 %v3030_v55  ;;  %v3116_v55 = vld [vmem:[%s4262_s1 + $0x720] ss:$8 sps:$4 sm:$0xff]  }
  0xa3   :  { %2155 = vmatpush2.bf16.msra.mxu0 %v3025_v56  ;;  %v3121_v56 = vld [vmem:[%s4262_s1 + $0x614] ss:$8 sps:$4 sm:$0xff]  }
  0xa4   :  { %2206 = vmatpush2.bf16.msra.mxu1 %v3028_v57  ;;  %2156 = vmatprep.subr.bf16.mxu0 %v3033_v58  ;;  %v3124_v57 = vld [vmem:[%s4262_s1 + $0x714] ss:$8 sps:$4 sm:$0xff]   ;;  %v3119_v58 = vld [vmem:[%s4262_s1 + $0x610] ss:$8 sps:$4 sm:$0xff]  }
  0xa5   :  { %2207 = vmatprep.subr.bf16.mxu1 %v3036_v59  ;;  %v3122_v59 = vld [vmem:[%s4262_s1 + $0x710] ss:$8 sps:$4 sm:$0xff]  }
  0xa7   :  { %2157 = vmatpush2.bf16.msra.mxu0 %v3031_v60  ;;  %v3127_v60 = vld [vmem:[%s4262_s1 + $0x604] ss:$8 sps:$4 sm:$0xff]  }
  0xa8   :  { %2208 = vmatpush2.bf16.msra.mxu1 %v3034_v61  ;;  %2158 = vmatprep.subr.bf16.mxu0 %v3039_v62  ;;  %v3130_v61 = vld [vmem:[%s4262_s1 + $0x704] ss:$8 sps:$4 sm:$0xff]   ;;  %v3125_v62 = vld [vmem:[%s4262_s1 + $0x600] ss:$8 sps:$4 sm:$0xff]  }
  0xa9   :  { %2209 = vmatprep.subr.bf16.mxu1 %v3042_v63  ;;  %v3128_v63 = vld [vmem:[%s4262_s1 + $0x700] ss:$8 sps:$4 sm:$0xff]  }
  0xab   :  { %2159 = vmatpush2.bf16.msra.mxu0 %v3037_v0  ;;  %v3133_v0 = vld [vmem:[%s4262_s1 + $0x6f4] ss:$8 sps:$4 sm:$0xff]  }
  0xac   :  { %2210 = vmatpush2.bf16.msra.mxu1 %v3040_v1  ;;  %2160 = vmatprep.subr.bf16.mxu0 %v3045_v2  ;;  %v3136_v1 = vld [vmem:[%s4262_s1 + $0x7f4] ss:$8 sps:$4 sm:$0xff]   ;;  %v3131_v2 = vld [vmem:[%s4262_s1 + $0x6f0] ss:$8 sps:$4 sm:$0xff]  }
  0xad   :  { %2211 = vmatprep.subr.bf16.mxu1 %v3048_v3  ;;  %v3134_v3 = vld [vmem:[%s4262_s1 + $0x7f0] ss:$8 sps:$4 sm:$0xff]  }
  0xaf   :  { %2161 = vmatpush2.bf16.msra.mxu0 %v3043_v4  ;;  %v3139_v4 = vld [vmem:[%s4262_s1 + $0x6e4] ss:$8 sps:$4 sm:$0xff]  }
  0xb0   :  { %2212 = vmatpush2.bf16.msra.mxu1 %v3046_v5  ;;  %2162 = vmatprep.subr.bf16.mxu0 %v3051_v6  ;;  %v3142_v5 = vld [vmem:[%s4262_s1 + $0x7e4] ss:$8 sps:$4 sm:$0xff]   ;;  %v3137_v6 = vld [vmem:[%s4262_s1 + $0x6e0] ss:$8 sps:$4 sm:$0xff]  }
  0xb1   :  { %2213 = vmatprep.subr.bf16.mxu1 %v3054_v7  ;;  %v3140_v7 = vld [vmem:[%s4262_s1 + $0x7e0] ss:$8 sps:$4 sm:$0xff]  }
  0xb3   :  { %2163 = vmatpush2.bf16.msra.mxu0 %v3049_v8  ;;  %v3145_v8 = vld [vmem:[%s4262_s1 + $0x6d4] ss:$8 sps:$4 sm:$0xff]  }
  0xb4   :  { %2214 = vmatpush2.bf16.msra.mxu1 %v3052_v9  ;;  %2164 = vmatprep.subr.bf16.mxu0 %v3057_v10  ;;  %v3148_v9 = vld [vmem:[%s4262_s1 + $0x7d4] ss:$8 sps:$4 sm:$0xff]   ;;  %v3143_v10 = vld [vmem:[%s4262_s1 + $0x6d0] ss:$8 sps:$4 sm:$0xff]  }
  0xb5   :  { %2215 = vmatprep.subr.bf16.mxu1 %v3060_v11  ;;  %v3146_v11 = vld [vmem:[%s4262_s1 + $0x7d0] ss:$8 sps:$4 sm:$0xff]  }
  0xb7   :  { %2165 = vmatpush2.bf16.msra.mxu0 %v3055_v12  ;;  %v3151_v12 = vld [vmem:[%s4262_s1 + $0x6c4] ss:$8 sps:$4 sm:$0xff]  }
  0xb8   :  { %2216 = vmatpush2.bf16.msra.mxu1 %v3058_v13  ;;  %2166 = vmatprep.subr.bf16.mxu0 %v3063_v14  ;;  %v3154_v13 = vld [vmem:[%s4262_s1 + $0x7c4] ss:$8 sps:$4 sm:$0xff]   ;;  %v3149_v14 = vld [vmem:[%s4262_s1 + $0x6c0] ss:$8 sps:$4 sm:$0xff]  }
  0xb9   :  { %2217 = vmatprep.subr.bf16.mxu1 %v3066_v15  ;;  %v3152_v15 = vld [vmem:[%s4262_s1 + $0x7c0] ss:$8 sps:$4 sm:$0xff]  }
  0xbb   :  { %2167 = vmatpush2.bf16.msra.mxu0 %v3061_v16  ;;  %v3157_v16 = vld [vmem:[%s4262_s1 + $0x6b4] ss:$8 sps:$4 sm:$0xff]  }
  0xbc   :  { %2218 = vmatpush2.bf16.msra.mxu1 %v3064_v17  ;;  %2168 = vmatprep.subr.bf16.mxu0 %v3069_v18  ;;  %v3160_v17 = vld [vmem:[%s4262_s1 + $0x7b4] ss:$8 sps:$4 sm:$0xff]   ;;  %v3155_v18 = vld [vmem:[%s4262_s1 + $0x6b0] ss:$8 sps:$4 sm:$0xff]  }
  0xbd   :  { %2219 = vmatprep.subr.bf16.mxu1 %v3072_v19  ;;  %v3158_v19 = vld [vmem:[%s4262_s1 + $0x7b0] ss:$8 sps:$4 sm:$0xff]  }
  0xbf   :  { %2169 = vmatpush2.bf16.msra.mxu0 %v3067_v20  ;;  %v3163_v20 = vld [vmem:[%s4262_s1 + $0x6a4] ss:$8 sps:$4 sm:$0xff]  }
  0xc0   :  { %2220 = vmatpush2.bf16.msra.mxu1 %v3070_v21  ;;  %2240 = vmatprep.subr.bf16.mxu0 %v3081_v24  ;;  %v3166_v21 = vld [vmem:[%s4262_s1 + $0x7a4] ss:$8 sps:$4 sm:$0xff]   ;;  %v331_v24 = vlaneseq }
  0xc1   :  { %2291 = vmatprep.subr.bf16.mxu1 %v3084_v25  ;;  %v3169_v25 = vld [vmem:[%s4262_s1 + $0x694] ss:$8 sps:$4 sm:$0xff]  }
  0xc2   :  { %2171 = vmatmul.mubr.bf16.vlgmr.msra.gmra.mxu0 %v3073_v22  ;;  %v3161_v22 = vld [vmem:[%s4262_s1 + $0x6a0] ss:$8 sps:$4 sm:$0xff]  }
  0xc3   :  { %2222 = vmatmul.mubr.bf16.vlgmr.msra.gmra.mxu1 %v3076_v23  ;;  %2241 = vmatpush1.bf16.msra.mxu0 %v3079_v26  ;;  %v3164_v23 = vld [vmem:[%s4262_s1 + $0x7a0] ss:$8 sps:$4 sm:$0xff]   ;;  %v3172_v26 = vld [vmem:[%s4262_s1 + $0x794] ss:$8 sps:$4 sm:$0xff]  }
  0xc4   :  { %2292 = vmatpush1.bf16.msra.mxu1 %v3082_v29  ;;  %2242 = vmatprep.subr.bf16.mxu0 %v3087_v30  ;;  %v332_v29 = vshrl.u32 %v331_v24, 7  ;;  %v3175_v30 = vld [vmem:[%s4262_s1 + $0x684] ss:$8 sps:$4 sm:$0xff]  }
  0xc5   :  { %2293 = vmatprep.subr.bf16.mxu1 %v3090_v31  ;;  %2180 = vmatprep.mubr.bf16.mxu0 %v2436_v32  ;;  %v3178_v31 = vld [vmem:[%s4262_s1 + $0x784] ss:$8 sps:$4 sm:$0xff]   ;;  %v3173_v32 = vld [vmem:[%s4262_s1 + $0x680] ss:$8 sps:$4 sm:$0xff]  }
  0xc6   :  { %2231 = vmatprep.mubr.bf16.mxu1 %v2438_v33  ;;  %v3176_v33 = vld [vmem:[%s4262_s1 + $0x780] ss:$8 sps:$4 sm:$0xff]  }
  0xc7   :  { %2243 = vmatpush1.bf16.msra.mxu0 %v3085_v34  ;;  %v333_v34 = vsub.s32 0, %v332_v29 }
  0xc8   :  { %2294 = vmatpush1.bf16.msra.mxu1 %v3088_v35  ;;  %2244 = vmatprep.subr.bf16.mxu0 %v3095_v36  ;;  %v329_v35 = vld [vmem:[%s4264_s2] sm:$0x3]  ;;  %v3187_v36 = vld [vmem:[%s4262_s1 + $0x874] ss:$8 sps:$4 sm:$0xff]  }
  0xc9   :  { %2295 = vmatprep.subr.bf16.mxu1 %v3098_v37  ;;  %v3179_v37 = vld [vmem:[%s4263_s0 + $0x30] ss:$72 sps:$4 sm:$0xff]  }
  0xca   :  { %2181 = vmatmul.mubr.bf16.gmra.mxu0 %v2435_v38  ;;  %v337_v38 = vsub.s32 1, %v332_v29  ;;  %v3215_v29 = vld [vmem:[%s4262_s1 + $0x8f4] ss:$8 sps:$4 sm:$0xff]  }
  0xcb   :  { %2232 = vmatmul.mubr.bf16.gmra.mxu1 %v2437_v40  ;;  %2245 = vmatpush1.bf16.msra.mxu0 %v3093_v39  ;;  %v3182_v39 = vld [vmem:[%s4263_s0 + $0x38] ss:$72 sps:$4 sm:$0xff]  }
  0xcc   :  { %2296 = vmatpush1.bf16.msra.mxu1 %v3096_v41  ;;  %2246 = vmatprep.subr.bf16.mxu0 %v3103_v42  ;;  %v38_v40 = vld [vmem:[%s4263_s0 + $0xc0] sm:$0xff]  ;;  %v39_v41 = vld [vmem:[%s4263_s0 + $0xc8] sm:$0xff]  ;;  %v4108_v42 = vrot.slane %v329_v35, %v333_v34  ;;  %v3221_v34 = vld [vmem:[%s4262_s1 + $0x8d4] ss:$8 sps:$4 sm:$0xff]  }
  0xcd   :  { %2297 = vmatprep.subr.bf16.mxu1 %v3106_v43  ;;  %2272 = vmatprep.mubr.bf16.mxu0 %v3181_v44  ;;  %v3185_v43 = vld [vmem:[%s4262_s1 + $0x870] ss:$8 sps:$4 sm:$0xff]   ;;  %v3190_v44 = vld [vmem:[%s4262_s1 + $0x864] ss:$8 sps:$4 sm:$0xff]  }
  0xce   :  { %2323 = vmatprep.mubr.bf16.mxu1 %v3184_v45  ;;  %v4116_v45 = vrot.slane %v329_v35, %v337_v38  ;;  %v3219_v35 = vld [vmem:[%s4262_s1 + $0x8d0] ss:$8 sps:$4 sm:$0xff]   ;;  %v3227_v38 = vld [vmem:[%s4262_s1 + $0x8b4] ss:$8 sps:$4 sm:$0xff]  }
  0xcf   :  { %2247 = vmatpush1.bf16.msra.mxu0 %v3101_v46  ;;  %v2440_v46 = vcombine.high %v38_v40, %v38_v40 }
  0xd0   :  { %2298 = vmatpush1.bf16.msra.mxu1 %v3104_v47  ;;  %2248 = vmatprep.subr.bf16.mxu0 %v3109_v48  ;;  %v2442_v47 = vcombine.high %v39_v41, %v39_v41 }
  0xd1   :  { %2299 = vmatprep.subr.bf16.mxu1 %v3112_v49 }
  0xd3   :  { %2249 = vmatpush1.bf16.msra.mxu0 %v3107_v50 }
  0xd4   :  { %2300 = vmatpush1.bf16.msra.mxu1 %v3110_v51  ;;  %2250 = vmatprep.subr.bf16.mxu0 %v3115_v52  ;;  %v3188_v51 = vld [vmem:[%s4262_s1 + $0x860] ss:$8 sps:$4 sm:$0xff]  }
  0xd5   :  { %2301 = vmatprep.subr.bf16.mxu1 %v3118_v53 }
  0xd7   :  { %2251 = vmatpush1.bf16.msra.mxu0 %v3113_v54  ;;  %v3195_v54 = vld [vmem:[%s4262_s1 + $0x854] ss:$8 sps:$4 sm:$0xff]  }
  0xd8   :  { %2302 = vmatpush1.bf16.msra.mxu1 %v3116_v55  ;;  %2252 = vmatprep.subr.bf16.mxu0 %v3121_v56 }
  0xd9   :  { %2303 = vmatprep.subr.bf16.mxu1 %v3124_v57 }
  0xdb   :  { %2253 = vmatpush1.bf16.msra.mxu0 %v3119_v58 }
  0xdc   :  { %2304 = vmatpush1.bf16.msra.mxu1 %v3122_v59  ;;  %2254 = vmatprep.subr.bf16.mxu0 %v3127_v60  ;;  %v2439_v59 = vcombine.low %v38_v40, %v38_v40  ;;  %v2441_v60 = vcombine.low %v39_v41, %v39_v41  ;;  %v3230_v40 = vld [vmem:[%s4262_s1 + $0x8a4] ss:$8 sps:$4 sm:$0xff]   ;;  %v3228_v41 = vld [vmem:[%s4262_s1 + $0x8a0] ss:$8 sps:$4 sm:$0xff]  }
  0xdd   :  { %2305 = vmatprep.subr.bf16.mxu1 %v3130_v61  ;;  %v4131_v61 = vld [vmem:[%s4263_s0 + $0xd0] sm:$0xff] }
  0xdf   :  { %2255 = vmatpush1.bf16.msra.mxu0 %v3125_v62 }
  0xe0   :  { %2306 = vmatpush1.bf16.msra.mxu1 %v3128_v63  ;;  %2256 = vmatprep.subr.bf16.mxu0 %v3133_v0  ;;  %v3193_v0 = vld [vmem:[%s4262_s1 + $0x850] ss:$8 sps:$4 sm:$0xff]  }
  0xe1   :  { %2307 = vmatprep.subr.bf16.mxu1 %v3136_v1 }
  0xe3   :  { %2257 = vmatpush2.bf16.msra.mxu0 %v3131_v2  ;;  %v3200_v2 = vld [vmem:[%s4262_s1 + $0x844] ss:$8 sps:$4 sm:$0xff]  }
  0xe4   :  { %2308 = vmatpush2.bf16.msra.mxu1 %v3134_v3  ;;  %2258 = vmatprep.subr.bf16.mxu0 %v3139_v4 }
  0xe5   :  { %2309 = vmatprep.subr.bf16.mxu1 %v3142_v5  ;;  %v3239_v5 = vld [vmem:[%s4263_s0 + $0x44] ss:$72 sps:$4 sm:$0xff]  }
  0xe7   :  { %2259 = vmatpush2.bf16.msra.mxu0 %v3137_v6  ;;  %v2444_v6 = vcombine.high %v4131_v61, %v4131_v61 }
  0xe8   :  { %2310 = vmatpush2.bf16.msra.mxu1 %v3140_v7  ;;  %2260 = vmatprep.subr.bf16.mxu0 %v3145_v8 }
  0xe9   :  { %2311 = vmatprep.subr.bf16.mxu1 %v3148_v9  ;;  %v3198_v9 = vld [vmem:[%s4262_s1 + $0x840] ss:$8 sps:$4 sm:$0xff]  }
  0xeb   :  { %2261 = vmatpush2.bf16.msra.mxu0 %v3143_v10  ;;  %v3203_v10 = vld [vmem:[%s4262_s1 + $0x834] ss:$8 sps:$4 sm:$0xff]  }
  0xec   :  { %2312 = vmatpush2.bf16.msra.mxu1 %v3146_v11  ;;  %2262 = vmatprep.subr.bf16.mxu0 %v3151_v12  ;;  %v3201_v11 = vld [vmem:[%s4262_s1 + $0x830] ss:$8 sps:$4 sm:$0xff]   ;;  %v3206_v12 = vld [vmem:[%s4262_s1 + $0x824] ss:$8 sps:$4 sm:$0xff]  }
  0xed   :  { %2313 = vmatprep.subr.bf16.mxu1 %v3154_v13  ;;  %v3204_v13 = vld [vmem:[%s4262_s1 + $0x820] ss:$8 sps:$4 sm:$0xff]  }
  0xef   :  { %2263 = vmatpush2.bf16.msra.mxu0 %v3149_v14  ;;  %v3209_v14 = vld [vmem:[%s4262_s1 + $0x814] ss:$8 sps:$4 sm:$0xff]  }
  0xf0   :  { %2314 = vmatpush2.bf16.msra.mxu1 %v3152_v15  ;;  %2264 = vmatprep.subr.bf16.mxu0 %v3157_v16 }
  0xf1   :  { %2315 = vmatprep.subr.bf16.mxu1 %v3160_v17 }
  0xf3   :  { %2265 = vmatpush2.bf16.msra.mxu0 %v3155_v18  ;;  %v3207_v18 = vld [vmem:[%s4262_s1 + $0x810] ss:$8 sps:$4 sm:$0xff]  }
  0xf4   :  { %2316 = vmatpush2.bf16.msra.mxu1 %v3158_v19  ;;  %2266 = vmatprep.subr.bf16.mxu0 %v3163_v20  ;;  %v3212_v20 = vld [vmem:[%s4262_s1 + $0x804] ss:$8 sps:$4 sm:$0xff]  }
  0xf5   :  { %2317 = vmatprep.subr.bf16.mxu1 %v3166_v21 }
  0xf7   :  { %2267 = vmatpush2.bf16.msra.mxu0 %v3161_v22 }
  0xf8   :  { %2318 = vmatpush2.bf16.msra.mxu1 %v3164_v23  ;;  %2268 = vmatprep.subr.bf16.mxu0 %v3169_v25 }
  0xf9   :  { %2319 = vmatprep.subr.bf16.mxu1 %v3172_v26 }
  0xfb   :  { %2269 = vmatpush2.bf16.msra.mxu0 %v3167_v27  ;;  %v3210_v27 = vld [vmem:[%s4262_s1 + $0x800] ss:$8 sps:$4 sm:$0xff]  }
  0xfc   :  { %2320 = vmatpush2.bf16.msra.mxu1 %v3170_v28  ;;  %2270 = vmatprep.subr.bf16.mxu0 %v3175_v30 }
  0xfd   :  { %2321 = vmatprep.subr.bf16.mxu1 %v3178_v31  ;;  %v3213_v31 = vld [vmem:[%s4262_s1 + $0x8f0] ss:$8 sps:$4 sm:$0xff]  }
  0xff   :  { %2271 = vmatpush2.bf16.msra.mxu0 %v3173_v32  ;;  %v3218_v32 = vld [vmem:[%s4262_s1 + $0x8e4] ss:$8 sps:$4 sm:$0xff]  }
 0x100   :  { %2322 = vmatpush2.bf16.msra.mxu1 %v3176_v33  ;;  %2342 = vmatprep.subr.bf16.mxu0 %v3187_v36  ;;  %v3216_v33 = vld [vmem:[%s4262_s1 + $0x8e0] ss:$8 sps:$4 sm:$0xff]  }
 0x101   :  { %2733 = vmatprep.subr.bf16.mxu1 %v3187_v36  ;;  %v3224_v36 = vld [vmem:[%s4262_s1 + $0x8c4] ss:$8 sps:$4 sm:$0xff]  }
 0x102   :  { %v1968_v48 = vpop.f32.mrf.mxu0  ;;  %2273 = vmatmul.mubr.bf16.vlgmr.msra.gmra.mxu0 %v3179_v37  ;;  %v3222_v37 = vld [vmem:[%s4262_s1 + $0x8c0] ss:$8 sps:$4 sm:$0xff]  }
 0x103   :  { %v2019_v49 = vpop.f32.mrf.mxu1  ;;  %2324 = vmatmul.mubr.bf16.vlgmr.msra.gmra.mxu1 %v3182_v39  ;;  %v1969_v50 = vadd.f32 %v1968_v48, %v4108_v42  ;;  %2343 = vmatpush1.bf16.msra.mxu0 %v3185_v43  ;;  %v3225_v39 = vld [vmem:[%s4262_s1 + $0x8b0] ss:$8 sps:$4 sm:$0xff]  }
 0x104   :  { %2749 = vmatpush1.bf16.msra.mxu1 %v3185_v43  ;;  %v1970_v52 = vpop.f32.mrf.mxu0  ;;  %2344 = vmatprep.subr.bf16.mxu0 %v3190_v44  ;;  %v3231_v43 = vld [vmem:[%s4262_s1 + $0x890] ss:$8 sps:$4 sm:$0xff]  }
 0x105   :  { %v2021_v53 = vpop.f32.mrf.mxu1  ;;  %2734 = vmatprep.subr.bf16.mxu1 %v3190_v44  ;;  %v4125_v55 = vadd.f32 %v2019_v49, %v1969_v50  ;;  %v1971_v56 = vadd.f32 %v1970_v52, %v4116_v45  ;;  %2282 = vmatprep.mubr.bf16.mxu0 %v2440_v46  ;;  %v3236_v44 = vld [vmem:[%s4262_s1 + $0x884] ss:$8 sps:$4 sm:$0xff]   ;;  %v3237_v46 = vld [vmem:[%s4263_s0 + $0x40] ss:$72 sps:$4 sm:$0xff]  }
 0x106   :  { %2333 = vmatprep.mubr.bf16.mxu1 %v2442_v47  ;;  %v1972_v57 = vpop.f32.mrf.mxu0  ;;  %v2443_v47 = vcombine.low %v4131_v61, %v4131_v61 }
 0x107   :  { %v2023_v58 = vpop.f32.mrf.mxu1  ;;  %v4133_v62 = vadd.f32 %v2021_v53, %v1971_v56  ;;  %v1973_v63 = vadd.f32 %v1972_v57, %v4108_v42  ;;  %2345 = vmatpush1.bf16.msra.mxu0 %v3188_v51 }
 0x108   :  { %2750 = vmatpush1.bf16.msra.mxu1 %v3188_v51  ;;  %v1974_v1 = vpop.f32.mrf.mxu0  ;;  %2346 = vmatprep.subr.bf16.mxu0 %v3195_v54 }
 0x109   :  { %2735 = vmatprep.subr.bf16.mxu1 %v3195_v54  ;;  %v4142_v3 = vadd.f32 %v2023_v58, %v1973_v63  ;;  %v1975_v4 = vadd.f32 %v1974_v1, %v4116_v45  ;;  %v2025_v7 = vpop.f32.mrf.mxu1 }
 0x10a   :  { %2283 = vmatmul.mubr.bf16.gmra.mxu0 %v2439_v59  ;;  %v1978_v15 = vpop.f32.mrf.mxu0 }
 0x10b   :  { %2334 = vmatmul.mubr.bf16.gmra.mxu1 %v2441_v60  ;;  %v4150_v8 = vadd.f32 %v2025_v7, %v1975_v4  ;;  %2347 = vmatpush1.bf16.msra.mxu0 %v3193_v0  ;;  %v1979_v16 = vadd.f32 %v1978_v15, %v4108_v42  ;;  %v2029_v17 = vpop.f32.mrf.mxu1  ;;  %v3233_v42 = vld [vmem:[%s4262_s1 + $0x894] ss:$8 sps:$4 sm:$0xff]  }
 0x10c   :  { %2751 = vmatpush1.bf16.msra.mxu1 %v3193_v0  ;;  %2348 = vmatprep.subr.bf16.mxu0 %v3200_v2  ;;  %v1980_v19 = vpop.f32.mrf.mxu0 }
 0x10d   :  { %2736 = vmatprep.subr.bf16.mxu1 %v3200_v2  ;;  %2374 = vmatprep.mubr.bf16.mxu0 %v3239_v5  ;;  %v1981_v21 = vadd.f32 %v1980_v19, %v4116_v45  ;;  %v4178_v22 = vadd.f32 %v2029_v17, %v1979_v16  ;;  %v2031_v23 = vpop.f32.mrf.mxu1  ;;  %v3234_v45 = vld [vmem:[%s4262_s1 + $0x880] ss:$8 sps:$4 sm:$0xff]  }
 0x10e   :  { %2384 = vmatprep.mubr.bf16.mxu1 %v2444_v6  ;;  %v1982_v24 = vpop.f32.mrf.mxu0 }
 0x10f   :  { %2349 = vmatpush1.bf16.msra.mxu0 %v3198_v9  ;;  %v4180_v25 = vadd.f32 %v2031_v23, %v1981_v21  ;;  %v2033_v26 = vpop.f32.mrf.mxu1 }
 0x110   :  { %2752 = vmatpush1.bf16.msra.mxu1 %v3198_v9  ;;  %2350 = vmatprep.subr.bf16.mxu0 %v3203_v10  ;;  %v1983_v28 = vpop.f32.mrf.mxu0 }
 0x111   :  { %2737 = vmatprep.subr.bf16.mxu1 %v3203_v10  ;;  %v2034_v30 = vpop.f32.mrf.mxu1 }
 0x113   :  { %2351 = vmatpush1.bf16.msra.mxu0 %v3201_v11 }
 0x114   :  { %2753 = vmatpush1.bf16.msra.mxu1 %v3201_v11  ;;  %2352 = vmatprep.subr.bf16.mxu0 %v3206_v12 }
 0x115   :  { %2738 = vmatprep.subr.bf16.mxu1 %v3206_v12 }
 0x117   :  { %2353 = vmatpush1.bf16.msra.mxu0 %v3204_v13 }
 0x118   :  { %2754 = vmatpush1.bf16.msra.mxu1 %v3204_v13  ;;  %2354 = vmatprep.subr.bf16.mxu0 %v3209_v14 }
 0x119   :  { %2739 = vmatprep.subr.bf16.mxu1 %v3209_v14 }
 0x11b   :  { %2355 = vmatpush1.bf16.msra.mxu0 %v3207_v18 }
 0x11c   :  { %2755 = vmatpush1.bf16.msra.mxu1 %v3207_v18  ;;  %2356 = vmatprep.subr.bf16.mxu0 %v3212_v20 }
 0x11d   :  { %2740 = vmatprep.subr.bf16.mxu1 %v3212_v20 }
 0x11f   :  { %2357 = vmatpush1.bf16.msra.mxu0 %v3210_v27 }
 0x120   :  { %2756 = vmatpush1.bf16.msra.mxu1 %v3210_v27  ;;  %2358 = vmatprep.subr.bf16.mxu0 %v3215_v29 }
 0x121   :  { %2741 = vmatprep.subr.bf16.mxu1 %v3215_v29 }
 0x123   :  { %2359 = vmatpush2.bf16.msra.mxu0 %v3213_v31 }
 0x124   :  { %2757 = vmatpush2.bf16.msra.mxu1 %v3213_v31  ;;  %2360 = vmatprep.subr.bf16.mxu0 %v3218_v32 }
 0x125   :  { %2742 = vmatprep.subr.bf16.mxu1 %v3218_v32 }
 0x127   :  { %2361 = vmatpush2.bf16.msra.mxu0 %v3216_v33 }
 0x128   :  { %2758 = vmatpush2.bf16.msra.mxu1 %v3216_v33  ;;  %2362 = vmatprep.subr.bf16.mxu0 %v3221_v34 }
 0x129   :  { %2743 = vmatprep.subr.bf16.mxu1 %v3221_v34 }
 0x12b   :  { %2363 = vmatpush2.bf16.msra.mxu0 %v3219_v35 }
 0x12c   :  { %2759 = vmatpush2.bf16.msra.mxu1 %v3219_v35  ;;  %2364 = vmatprep.subr.bf16.mxu0 %v3224_v36 }
 0x12d   :  { %2744 = vmatprep.subr.bf16.mxu1 %v3224_v36 }
 0x12f   :  { %2365 = vmatpush2.bf16.msra.mxu0 %v3222_v37 }
 0x130   :  { %2760 = vmatpush2.bf16.msra.mxu1 %v3222_v37  ;;  %2366 = vmatprep.subr.bf16.mxu0 %v3227_v38 }
 0x131   :  { %2745 = vmatprep.subr.bf16.mxu1 %v3227_v38 }
 0x133   :  { %2367 = vmatpush2.bf16.msra.mxu0 %v3225_v39 }
 0x134   :  { %2761 = vmatpush2.bf16.msra.mxu1 %v3225_v39  ;;  %2368 = vmatprep.subr.bf16.mxu0 %v3230_v40 }
 0x135   :  { %2746 = vmatprep.subr.bf16.mxu1 %v3230_v40 }
 0x137   :  { %2369 = vmatpush2.bf16.msra.mxu0 %v3228_v41 }
 0x138   :  { %2762 = vmatpush2.bf16.msra.mxu1 %v3228_v41  ;;  %2370 = vmatprep.subr.bf16.mxu0 %v3233_v42 }
 0x139   :  { %2747 = vmatprep.subr.bf16.mxu1 %v3233_v42 }
 0x13b   :  { %2371 = vmatpush2.bf16.msra.mxu0 %v3231_v43 }
 0x13c   :  { %2763 = vmatpush2.bf16.msra.mxu1 %v3231_v43  ;;  %2372 = vmatprep.subr.bf16.mxu0 %v3236_v44 }
 0x13d   :  { %2748 = vmatprep.subr.bf16.mxu1 %v3236_v44 }
 0x13f   :  { %2373 = vmatpush2.bf16.msra.mxu0 %v3234_v45 }
 0x140   :  { %2764 = vmatpush2.bf16.msra.mxu1 %v3234_v45 }
 0x142   :  { %v2070_v48 = vpop.f32.mrf.mxu0  ;;  %2375 = vmatmul.mubr.bf16.vlgmr.msra.gmra.mxu0 %v3237_v46 }
 0x143   :  { %v2121_v49 = vpop.f32.mrf.mxu1  ;;  %2385 = vmatmul.mubr.bf16.vlgmr.msra.gmra.mxu1 %v2443_v47  ;;  %v2071_v50 = vadd.f32 %v2070_v48, %v4125_v55 }
 0x144   :  { %v2072_v51 = vpop.f32.mrf.mxu0 }
 0x145   :  { %v2123_v52 = vpop.f32.mrf.mxu1  ;;  %v2122_v53 = vadd.f32 %v2121_v49, %v2071_v50  ;;  %v2073_v54 = vadd.f32 %v2072_v51, %v4133_v62 }
 0x146   :  { %v2074_v56 = vpop.f32.mrf.mxu0 }
 0x147   :  { %v2125_v57 = vpop.f32.mrf.mxu1  ;;  %v2124_v58 = vadd.f32 %v2123_v52, %v2073_v54  ;;  %v2075_v59 = vadd.f32 %v2074_v56, %v4142_v3 }
 0x148   :  { %v2076_v60 = vpop.f32.mrf.mxu0 }
 0x149   :  { %v2127_v61 = vpop.f32.mrf.mxu1  ;;  %v2126_v63 = vadd.f32 %v2125_v57, %v2075_v59  ;;  %v2077_v0 = vadd.f32 %v2076_v60, %v4150_v8 }
 0x14a   :  { %v2080_v1 = vpop.f32.mrf.mxu0 }
 0x14b   :  { %v2131_v2 = vpop.f32.mrf.mxu1  ;;  %v2128_v4 = vadd.f32 %v2127_v61, %v2077_v0  ;;  %v2081_v55 = vadd.f32 %v2080_v1, %v4178_v22 }
 0x14c   :  { %v2082_v5 = vpop.f32.mrf.mxu0 }
 0x14d   :  { %v2133_v6 = vpop.f32.mrf.mxu1  ;;  %v2083_v7 = vadd.f32 %v2082_v5, %v4180_v25  ;;  %v2132_v62 = vadd.f32 %v2131_v2, %v2081_v55 }
 0x14e   :  { %v2084_v9 = vpop.f32.mrf.mxu0 }
 0x14f   :  { %v2135_v10 = vpop.f32.mrf.mxu1  ;;  %v2134_v11 = vadd.f32 %v2133_v6, %v2083_v7 }
 0x150   :  { %v2085_v12 = vpop.f32.mrf.mxu0 }
 0x151   :  { %v2136_v3 = vpop.f32.mrf.mxu1 }
 0x182   :  { %v2172_v13 = vpop.f32.mrf.mxu0 }
 0x183   :  { %v2223_v14 = vpop.f32.mrf.mxu1  ;;  %v2173_v15 = vadd.f32 %v2172_v13, %v2122_v53 }
 0x184   :  { %v2174_v16 = vpop.f32.mrf.mxu0 }
 0x185   :  { %v2225_v8 = vpop.f32.mrf.mxu1  ;;  %v2224_v17 = vadd.f32 %v2223_v14, %v2173_v15  ;;  %v2175_v18 = vadd.f32 %v2174_v16, %v2124_v58 }
 0x186   :  { %v2176_v19 = vpop.f32.mrf.mxu0 }
 0x187   :  { %v2227_v20 = vpop.f32.mrf.mxu1  ;;  %v2226_v21 = vadd.f32 %v2225_v8, %v2175_v18  ;;  %v2177_v22 = vadd.f32 %v2176_v19, %v2126_v63 }
 0x188   :  { %v2178_v23 = vpop.f32.mrf.mxu0 }
 0x189   :  { %v2229_v24 = vpop.f32.mrf.mxu1  ;;  %v2228_v25 = vadd.f32 %v2227_v20, %v2177_v22  ;;  %v2179_v26 = vadd.f32 %v2178_v23, %v2128_v4 }
 0x18a   :  { %v2182_v27 = vpop.f32.mrf.mxu0 }
 0x18b   :  { %v2233_v28 = vpop.f32.mrf.mxu1  ;;  %v2230_v29 = vadd.f32 %v2229_v24, %v2179_v26  ;;  %v2183_v30 = vadd.f32 %v2182_v27, %v2132_v62 }
 0x18c   :  { %v2184_v31 = vpop.f32.mrf.mxu0 }
 0x18d   :  { %v2235_v32 = vpop.f32.mrf.mxu1  ;;  %v2185_v33 = vadd.f32 %v2184_v31, %v2134_v11  ;;  %v2234_v34 = vadd.f32 %v2233_v28, %v2183_v30 }
 0x18e   :  { %v2186_v35 = vpop.f32.mrf.mxu0 }
 0x18f   :  { %v2237_v36 = vpop.f32.mrf.mxu1  ;;  %v2236_v37 = vadd.f32 %v2235_v32, %v2185_v33 }
 0x190   :  { %v2187_v38 = vpop.f32.mrf.mxu0 }
 0x191   :  { %v2238_v39 = vpop.f32.mrf.mxu1 }
 0x1c2   :  { %v2274_v40 = vpop.f32.mrf.mxu0 }
 0x1c3   :  { %v2325_v41 = vpop.f32.mrf.mxu1  ;;  %v2275_v57 = vadd.f32 %v2274_v40, %v2224_v17 }
 0x1c4   :  { %v2276_v42 = vpop.f32.mrf.mxu0 }
 0x1c5   :  { %v2327_v43 = vpop.f32.mrf.mxu1  ;;  %v2277_v59 = vadd.f32 %v2276_v42, %v2226_v21  ;;  %v2326_v63 = vadd.f32 %v2325_v41, %v2275_v57 }
 0x1c6   :  { %v2278_v44 = vpop.f32.mrf.mxu0 }
 0x1c7   :  { %v2329_v45 = vpop.f32.mrf.mxu1  ;;  %v2279_v61 = vadd.f32 %v2278_v44, %v2228_v25  ;;  %v2328_v1 = vadd.f32 %v2327_v43, %v2277_v59 }
 0x1c8   :  { %v2280_v46 = vpop.f32.mrf.mxu0 }
 0x1c9   :  { %v2331_v47 = vpop.f32.mrf.mxu1  ;;  %v2281_v55 = vadd.f32 %v2280_v46, %v2230_v29  ;;  %v2330_v62 = vadd.f32 %v2329_v45, %v2279_v61 }
 0x1ca   :  { %v2284_v48 = vpop.f32.mrf.mxu0 }
 0x1cb   :  { %v2335_v49 = vpop.f32.mrf.mxu1  ;;  %v2285_v58 = vadd.f32 %v2284_v48, %v2234_v34  ;;  %v2332_v16 = vadd.f32 %v2331_v47, %v2281_v55 }
 0x1cc   :  { %v2286_v50 = vpop.f32.mrf.mxu0 }
 0x1cd   :  { %v2337_v51 = vpop.f32.mrf.mxu1  ;;  %v2287_v60 = vadd.f32 %v2286_v50, %v2236_v37  ;;  %v2336_v0 = vadd.f32 %v2335_v49, %v2285_v58 }
 0x1ce   :  { %v2288_v52 = vpop.f32.mrf.mxu0 }
 0x1cf   :  { %v2339_v53 = vpop.f32.mrf.mxu1  ;;  %v2338_v5 = vadd.f32 %v2337_v51, %v2287_v60 }
 0x1d0   :  { %v2289_v54 = vpop.f32.mrf.mxu0 }
 0x1d1   :  { %v2340_v56 = vpop.f32.mrf.mxu1 }
 0x202   :  { %v2376_v2 = vpop.f32.mrf.mxu0 }
 0x203   :  { %v2386_v4 = vpop.f32.mrf.mxu1  ;;  %v2377_v6 = vadd.f32 %v2376_v2, %v2326_v63 }
 0x204   :  { %v2387_v7 = vadd.f32 %v2386_v4, %v2336_v0  ;;  %v2378_v9 = vpop.f32.mrf.mxu0 }
 0x205   :  { %v2388_v10 = vpop.f32.mrf.mxu1  ;;  %v2393_v11 = vmax.f32 %v2377_v6, 0.0  ;;  %v2379_v3 = vadd.f32 %v2378_v9, %v2328_v1 }
 0x206   :  { %v2397_v12 = vmax.f32 %v2387_v7, 0.0  ;;  %v2389_v13 = vadd.f32 %v2388_v10, %v2338_v5  ;;  %v2380_v14 = vpop.f32.mrf.mxu0 }
 0x207   :  { %v2390_v15 = vpop.f32.mrf.mxu1  ;;  %2399 = vst [vmem:[%s4265_s3] sm:$0xff] %v2393_v11  ;;  %v2394_v8 = vmax.f32 %v2379_v3, 0.0  ;;  %v2381_v18 = vadd.f32 %v2380_v14, %v2330_v62 }
 0x208   :  { %2403 = vst [vmem:[%s4265_s3 + $0x20] sm:$0xff] %v2397_v12  ;;  %v2398_v17 = vmax.f32 %v2389_v13, 0.0  ;;  %v2382_v19 = vpop.f32.mrf.mxu0 }
 0x209   :  { %v2391_v20 = vpop.f32.mrf.mxu1  ;;  %2400 = vst [vmem:[%s4265_s3 + $0x8] sm:$0xff] %v2394_v8  ;;  %v2395_v21 = vmax.f32 %v2381_v18, 0.0  ;;  %v2383_v22 = vadd.f32 %v2382_v19, %v2332_v16 }
 0x20a   :  { %2404 = vst [vmem:[%s4265_s3 + $0x28] sm:$0xff] %v2398_v17 }
 0x20b   :  { %2401 = vst [vmem:[%s4265_s3 + $0x10] sm:$0xff] %v2395_v21  ;;  %v2396_v23 = vmax.f32 %v2383_v22, 0.0 }
 0x20d   :  { %2402 = vst [vmem:[%s4265_s3 + $0x18] sm:$0xff] %v2396_v23 }

// kernel: featurenet_forward.15
= control target key start
LH: loop header
LB: loop body
LE: loop exit
PB: predicated region body
PF: predicated region fallthrough
CT: control target
= control target key end

     0   :  { %6 = vsyncpa [#allocation3], 0  ;;  %s440_s0 = inlined_call_operand.vmem [shape: f32[2,3,3,256], index: 0, kind: input, shape index: {}]   ;;  %s441_s1 = inlined_call_operand.hbm [shape: f32[2,1,1,256], index: 1, kind: output, shape index: {}]  }
   0x1   :  { %8 = vsyncpa [#allocation3 + $0x1], 0  ;;  %s353_s6 = smov 0   ;;  %s355_s7 = smov 0  }
   0x2   :  { %s357_s8 = smov 0   ;;  %s359_s9 = smov 0  }
   0x3 LB: > { %s374_s10 = sadd.s32 4294967295, %s339_s9   ;;  %s224_s11 = sadd.s32 4294967294, %s339_s9   ;;  %s339_s9 = sphi %s359_s9, %s447_s9   ;;  %s335_s8 = sphi %s357_s8, %s446_s8   ;;  %s331_s7 = sphi %s355_s7, %s445_s7   ;;  %s327_s6 = sphi %s353_s6, %s444_s6  }
   0x4   : > { %s378_s12 = sadd.s32 1, %s339_s9   ;;  %s47_s13 = sadd.s32 1, %s335_s8 }
   0x5   : > { %s44_s14 = ssub.s32 %s339_s9, %s378_s12  ;;  %p57_p0 = scmp.ne.s32.totalorder %s335_s8, %s331_s7 }
   0x6   : > { %p45_p1 = scmp.eq.s32.totalorder %s44_s14, 0  ;;  %p58_p2 = scmp.eq.s32.totalorder %s374_s10, 1 }
   0x7   : > { %p63_p3 = scmp.ne.s32.totalorder %s331_s7, %s327_s6  ;;  %p64_p4 = scmp.eq.s32.totalorder %s224_s11, 1 }
   0x8   : > { %s389_s15 = scalar_select %p45_p1, %s335_s8, %s47_s13  }
   0x9   : > { %p391_p5 = por %p58_p2, %p57_p0  ;;  %p395_p6 = por %p64_p4, %p63_p3 }
   0xa   : > { %p227_p7 = scmp.ge.s32.totalorder %s339_s9, 1  ;;  %p90_p8 = scmp.lt.s32.totalorder %s339_s9, 3 }
   0xc   : > { %p91_p9 = pnand %p227_p7, %p90_p8 }
   0xd   : > { %p110_p10 = scmp.lt.s32.totalorder (!%p91_p9), %s374_s10, 1  ;;  %s107_s23 = sand.u32 (!%p91_p9), 1, %s331_s7  }
   0xe   : > { %94 = sbr.rel (%p91_p9) target bundleno = 52 (0x34), region = 24  ;;  %s228_s24 = sshll.u32 (!%p91_p9), %s107_s23, 1 }
   0xf   : > { %s109_s25 = scalar_lea.vmem (!%p91_p9), [#allocation2], %s228_s24  ;;  %s237_s27 = sshll.u32 (!%p91_p9), %s374_s10, 5 }
  0x10   : > { %s165_s26 = sshll.u32 (!%p91_p9), %s109_s25, 4  ;;  %s163_s30 = scalar_lea.hbm (!%p91_p9), %s441_s1, %s237_s27  ;;  %s166_s26 = int_to_ptr.vmem [resolvable:$true] %s165_s26 }
  0x11   : > { %s151_s2 = scalar_lea.sflag (!%p91_p9), [#allocation3], %s107_s23  ;;  %s279_s3 = scalar_lea.vmem (!%p91_p9), %s166_s26, 32 }
  0x12   : > { %p280_p11 = scmp.ne.s32.totalorder (!%p91_p9), %s166_s26, %s279_s3  ;;  %s342_s4 = smov (!%p91_p9), [#allocation2]  }
  0x13   : > { %s111_s18 = scalar_select %p110_p10, %s374_s10, 1  ;;  %v341_v0 = vmov 1966171168   ;;  %v133_v2 = vlaneseq }
  0x14   : > { %v131_v1 = vunpack.c.l.s4 %v341_v0  ;;  %p281_p12 = pnand %p280_p11, %p391_p5  ;;  %s283_s5 = sshll.u32 %s342_s4, 4  ;;  %s284_s5 = int_to_ptr.vmem [resolvable:$false] %s283_s5 }
  0x15   : > { %s238_s19 = smul.u32 24, %s111_s18  ;;  %v134_v9 = vshrl.u32 %v133_v2, 7  ;;  %vm147_vm0 = vcmp.lt.s32.totalorder %v133_v2, 256  ;;  %s285_s11 = scalar_lea.vmem %s284_s5, 64 }
  0x16   : > { %v132_v8 = vunpack.c.0.s8 %v131_v1  ;;  %p282_p13 = pneg %p281_p12  ;;  %p286_p0 = scmp.lt.s32.totalorder %s166_s26, %s284_s5 }
  0x17   : > { %s114_s22 = scalar_lea.vmem %s440_s0, %s238_s19  ;;  %p287_p1 = scmp.lt.s32.totalorder %s285_s11, %s279_s3 }
  0x18   : > { %v115_v3 = vld [vmem:[%s114_s22] sm:$0x77]  ;;  %v116_v4 = vld [vmem:[%s114_s22 + $0x8] sm:$0x77]  ;;  %v117_v5 = vld [vmem:[%s114_s22 + $0x10] sm:$0x77]  ;;  %v135_v13 = vsub.s32 %v132_v8, %v134_v9 }
  0x19   : > { %v118_v6 = vmax.f32 %v115_v3, %v116_v4  ;;  %p288_p2 = por %p287_p1, %p286_p0 }
  0x1b   : > { %v119_v7 = vmax.f32 %v118_v6, %v117_v5  ;;  %p289_p3 = pnand %p288_p2, %p282_p13 }
  0x1d   : > { %v230_v10 = vrot.slane %v119_v7, 9  ;;  %v231_v11 = vrot.slane %v119_v7, 10 }
  0x1f   : > { %v124_v12 = vmax.f32 %v119_v7, %v230_v10 }
  0x21   : > { %v128_v14 = vmax.f32 %v124_v12, %v231_v11 }
  0x23   : > { %v136_v15 = vrot.slane %v128_v14, %v135_v13 }
  0x25   : > { %v143_v16 = vrot.slane %v136_v15, %v135_v13 }
  0x27   : > { %149 = vst.msk [vmem:[%s109_s25] sm:$0x3] %vm147_vm0, %v143_v16 }
  0x28   : > { %292 = shalt.err (!%p289_p3)
}
  0x29   : > { %s293_s10 = scalar_lea.hbm %s163_s30, 32  ;;  %s297_s18 = scalar_lea.hbm %s441_s1, 64 }
  0x2a   : > { %p294_p4 = scmp.ne.s32.totalorder %s163_s30, %s293_s10  ;;  %p298_p9 = scmp.lt.s32.totalorder %s163_s30, %s441_s1 }
  0x2b   : > { %p299_p10 = scmp.lt.s32.totalorder %s297_s18, %s293_s10 }
  0x2c   : > { %p295_p7 = pnand %p294_p4, %p391_p5 }
  0x2d   : > { %p300_p11 = por %p299_p10, %p298_p9 }
  0x2e   : > { %p296_p8 = pneg %p295_p7 }
  0x30   : > { %p301_p12 = pnand %p300_p11, %p296_p8 }
  0x32   : > { %304 = shalt.err (!%p301_p12)
}
  0x33   : > { %239 = dma.vmem_to_hbm [thread:$0]  (%p391_p5), %s166_s26, 32, %s163_s30, %s151_s2  }
  0x34 PF: > { %p245_p13 = scmp.ge.s32.totalorder %s339_s9, 2  ;;  %s177_s21 = sand.u32 1, %s327_s6  }
  0x35   : > { %s178_s22 = scalar_lea.sflag [#allocation3], %s177_s21 }
  0x36   : > { %p242_p0 = pnand %p245_p13, %p395_p6 }
  0x38   : > { %p243_p1 = pneg %p242_p0 }
  0x3a   : > { %322 = dma.done.wait (%p243_p1), %s178_s22, 32  }
  0x3b   : > { %324 = vsyncadd (%p243_p1), %s178_s22, 4294967264  ;;  %p11_p2 = scmp.ge.s32.totalorder %s378_s12, 4   ;;  %s444_s6 = smov %s331_s7 }
  0x3c   : > { %s445_s7 = smov %s335_s8  ;;  %s446_s8 = smov %s389_s15 }
  0x3d   : > { %s447_s9 = smov %s378_s12  ;;  %13 = sbr.rel (!%p11_p2) target bundleno = 3 (0x3), region = 59 }
  0x42   :  { %183 = vsyncpa [#allocation3], 1 }
  0x43   :  { %185 = vsyncpa [#allocation3 + $0x1], 1 }

</bundles_post_ra>
